<compile_context>
chip_gen: v7x
topology: tpu7x:2x2x1
jax: 0.10.0
libtpu: 0.0.40
codegen_flags: <defaults>
</compile_context>

<pallas_src>
import functools

import jax
import jax.numpy as jnp
from jax import lax
from jax.experimental import pallas as pl
from jax.experimental.pallas import tpu as pltpu


B_TILE = 128  # images per grid step (lane width). Sweep to 256+ on v5e/v6e; keep 128 on v7x.


def _hicplus_kernel(x_ref, w1_ref, b1_ref, w2_ref, b2_ref, w3_ref, b3_ref,
                    o_ref, xsh_ref, y1_ref, y2sh_ref, *, bt):
    """One grid step: bt images.

    x_ref   : (40, 40, bt) VMEM        input images, batch in lanes
    w*_ref  : flat f32 arrays in SMEM  (648,), (8,), (64,), (8,), (200,), (1,)
    o_ref   : (28, 28, bt) VMEM        output images
    xsh_ref : (9, 40, 32, bt) VMEM     width-shifted input copies, xsh[dj,i,j,b] = x[i, j+dj, b]
    y1_ref  : (8, 32, 32, bt) VMEM     conv1 activations
    y2sh_ref: (5, 8, 32, 28, bt) VMEM  width-shifted conv2 activations
    """

    # ---- stage 0: width-shifted copies of the input (does the sublane relayout ONCE) ----
    def shift_body(r, carry):
        rows = pl.ds(r * 8, 8)
        blk = x_ref[rows]                                   # (8, 40, bt) aligned load
        for dj in range(9):                                 # static unroll
            xsh_ref[dj, rows] = blk[:, dj:dj + 32, :]       # (8, 32, bt)
        return carry

    lax.fori_loop(0, 5, shift_body, 0)

    # ---- conv1: 1 -> 8 channels, 9x9 valid, output (8, 32, 32, bt) ----
    def c1_channel(c, carry):
        bias = b1_ref[c]

        def c1_rowblock(rb, carry2):
            r0 = rb * 8

            def c1_di(di, acc):
                rows = pl.ds(r0 + di, 8)
                for dj in range(9):                         # static unroll
                    w = w1_ref[c * 81 + di * 9 + dj]        # scalar from SMEM
                    acc = acc + w * xsh_ref[dj, rows]       # (8, 32, bt)
                return acc

            acc = lax.fori_loop(0, 9, c1_di,
                                jnp.zeros((8, 32, bt), jnp.float32))
            y1_ref[c, pl.ds(r0, 8)] = jnp.maximum(acc + bias, 0.0)
            return carry2

        lax.fori_loop(0, 4, c1_rowblock, 0)
        return carry

    lax.fori_loop(0, 8, c1_channel, 0)

    # ---- conv2: 8 -> 8 channels, 1x1, fused with the width-shift needed by conv3 ----
    def c2_channel(o, carry):
        bias = b2_ref[o]

        def c2_rowblock(rb, carry2):
            rows = pl.ds(rb * 8, 8)
            acc = jnp.zeros((8, 32, bt), jnp.float32)
            for c in range(8):                              # static unroll
                acc = acc + w2_ref[o * 8 + c] * y1_ref[c, rows]
            res = jnp.maximum(acc + bias, 0.0)              # (8, 32, bt)
            for dj in range(5):                             # static unroll
                y2sh_ref[dj, o, rows] = res[:, dj:dj + 28, :]
            return carry2

        lax.fori_loop(0, 4, c2_rowblock, 0)
        return carry

    lax.fori_loop(0, 8, c2_channel, 0)

    # ---- conv3: 8 -> 1 channel, 5x5 valid, output (28, 28, bt) ----
    b3v = b3_ref[0]

    def c3_rowblock(rb, carry):
        r0 = rb * 7

        def c3_channel(c, acc):
            def c3_di(di, a):
                rows = pl.ds(r0 + di, 7)
                for dj in range(5):                         # static unroll
                    w = w3_ref[c * 25 + di * 5 + dj]
                    a = a + w * y2sh_ref[dj, c, rows]       # (7, 28, bt), aligned load
                return a

            return lax.fori_loop(0, 5, c3_di, acc)

        acc = lax.fori_loop(0, 8, c3_channel,
                            jnp.zeros((7, 28, bt), jnp.float32))
        o_ref[pl.ds(r0, 7)] = jnp.maximum(acc + b3v, 0.0)
        return carry

    lax.fori_loop(0, 4, c3_rowblock, 0)


@functools.partial(jax.jit, static_argnames=("b_tile",))
def hicplus_forward(x, params, b_tile=B_TILE):
    """x: (B, 1, 40, 40) float32 -> (B, 1, 28, 28) float32."""
    assert b_tile % 128 == 0
    assert x.shape[1:] == (1, 40, 40), x.shape
    w1, b1, w2, b2, w3, b3 = params
    B = x.shape[0]

    n_blocks = max(1, (B + b_tile - 1) // b_tile)
    # NOTE(v7x): if n_blocks == 1 only one of the two TensorCores gets work; for large B this
    # is naturally >= 2. For tiny demo batches it does not matter.
    Bp = n_blocks * b_tile

    # Layout plumbing (plain JAX): batch into lanes, pad to a multiple of b_tile.
    xt = jnp.transpose(x[:, 0, :, :], (1, 2, 0))            # (40, 40, B)
    if Bp != B:
        xt = jnp.pad(xt, ((0, 0), (0, 0), (0, Bp - B)))

    # Flat f32 parameter vectors for SMEM.
    w1f = w1.reshape(-1).astype(jnp.float32)                # (648,)  index c*81 + di*9 + dj
    b1f = b1.reshape(-1).astype(jnp.float32)                # (8,)
    w2f = w2.reshape(-1).astype(jnp.float32)                # (64,)   index o*8 + c
    b2f = b2.reshape(-1).astype(jnp.float32)                # (8,)
    w3f = w3.reshape(-1).astype(jnp.float32)                # (200,)  index c*25 + di*5 + dj
    b3f = b3.reshape(-1).astype(jnp.float32)                # (1,)

    # VMEM budget (bytes): scratch + double-buffered in/out blocks + headroom.
    scratch_bytes = 4 * b_tile * (9 * 40 * 32 + 8 * 32 * 32 + 5 * 8 * 32 * 32)
    io_bytes = 4 * b_tile * (40 * 40 + 28 * 32) * 2
    vmem_limit = min(scratch_bytes + io_bytes + (12 << 20), 110 << 20)

    flops = 2 * Bp * (8 * 81 * 32 * 32 + 8 * 8 * 32 * 32 + 8 * 25 * 28 * 28)
    bytes_accessed = Bp * (40 * 40 + 28 * 28) * 4 + (648 + 64 + 200 + 17) * 4

    smem_spec = pl.BlockSpec(memory_space=pltpu.MemorySpace.SMEM)

    out = pl.pallas_call(
        functools.partial(_hicplus_kernel, bt=b_tile),
        out_shape=jax.ShapeDtypeStruct((28, 28, Bp), jnp.float32),
        grid=(n_blocks,),
        in_specs=[
            pl.BlockSpec((40, 40, b_tile), lambda g: (0, 0, g)),  # x  (lane-dense)
            smem_spec,                                            # w1
            smem_spec,                                            # b1
            smem_spec,                                            # w2
            smem_spec,                                            # b2
            smem_spec,                                            # w3
            smem_spec,                                            # b3
        ],
        out_specs=pl.BlockSpec((28, 28, b_tile), lambda g: (0, 0, g)),
        scratch_shapes=[
            pltpu.VMEM((9, 40, 32, b_tile), jnp.float32),         # xsh
            pltpu.VMEM((8, 32, 32, b_tile), jnp.float32),         # y1
            pltpu.VMEM((5, 8, 32, 28, b_tile), jnp.float32),      # y2sh
        ],
        compiler_params=pltpu.CompilerParams(
            dimension_semantics=("parallel",),
            vmem_limit_bytes=vmem_limit,
        ),
        cost_estimate=pl.CostEstimate(
            flops=flops, transcendentals=0, bytes_accessed=bytes_accessed),
    )(xt, w1f, b1f, w2f, b2f, w3f, b3f)

    out = out[:, :, :B]                                     # drop batch padding
    return jnp.transpose(out, (2, 0, 1))[:, None, :, :]     # (B, 1, 28, 28)


def init_params(key):
    """Deterministic init mimicking PyTorch Conv2d default (uniform +-1/sqrt(fan_in))."""
    ks = jax.random.split(key, 6)

    def uinit(k, shape, fan_in):
        bound = 1.0 / jnp.sqrt(float(fan_in))
        return jax.random.uniform(k, shape, jnp.float32, -bound, bound)

    w1 = uinit(ks[0], (8, 1, 9, 9), 1 * 9 * 9)
    b1 = uinit(ks[1], (8,), 1 * 9 * 9)
    w2 = uinit(ks[2], (8, 8, 1, 1), 8 * 1 * 1)
    b2 = uinit(ks[3], (8,), 8 * 1 * 1)
    w3 = uinit(ks[4], (1, 8, 5, 5), 8 * 5 * 5)
    b3 = uinit(ks[5], (1,), 8 * 5 * 5)
    return (w1, b1, w2, b2, w3, b3)


def reference_forward(x, params):
    """Plain-JAX reference (lax convs) for validation."""
    w1, b1, w2, b2, w3, b3 = params
    dn = jax.lax.conv_dimension_numbers(x.shape, w1.shape, ("NCHW", "OIHW", "NCHW"))

    def conv(h, w, b):
        y = jax.lax.conv_general_dilated(h, w, (1, 1), "VALID", dimension_numbers=dn)
        return jax.nn.relu(y + b[None, :, None, None])

    h = conv(x, w1, b1)
    h = conv(h, w2, b2)
    return conv(h, w3, b3)


if __name__ == "__main__":
    key = jax.random.PRNGKey(0)
    kx, kp = jax.random.split(key)

    B = 2
    x = jax.random.normal(kx, (B, 1, 40, 40), jnp.float32)
    params = init_params(kp)

    out = jax.block_until_ready(hicplus_forward(x, params))
    assert out.shape == (B, 1, 28, 28), out.shape

    ref = jax.block_until_ready(reference_forward(x, params))
    if not jnp.allclose(out, ref, atol=1e-4, rtol=1e-4):
        err = float(jnp.max(jnp.abs(out - ref)))
        raise AssertionError(f"Pallas HiCPlus output mismatch vs reference (max abs err {err})")

    print("KERNEL_OK")
</pallas_src>

<mosaic_0001>
module attributes {stable_mosaic.version = 11 : i64} {
  func.func @_hicplus_kernel(%arg0: i32, %arg1: memref<40x40x128xf32, #tpu.memory_space<vmem>>, %arg2: memref<648xf32, #tpu.memory_space<smem>>, %arg3: memref<8xf32, #tpu.memory_space<smem>>, %arg4: memref<64xf32, #tpu.memory_space<smem>>, %arg5: memref<8xf32, #tpu.memory_space<smem>>, %arg6: memref<200xf32, #tpu.memory_space<smem>>, %arg7: memref<1xf32, #tpu.memory_space<smem>>, %arg8: memref<28x28x128xf32, #tpu.memory_space<vmem>>, %arg9: memref<9x40x32x128xf32, #tpu.memory_space<vmem>>, %arg10: memref<8x32x32x128xf32, #tpu.memory_space<vmem>>, %arg11: memref<5x8x32x28x128xf32, #tpu.memory_space<vmem>>) attributes {dimension_semantics = [#tpu.dimension_semantics<parallel>], iteration_bounds = array<i64: 1>, scalar_prefetch = 0 : i64, scratch_operands = 3 : i64, tpu.core_type = #tpu.core_type<tc>, window_params = [{transform_indices = @transform_0, window_bounds = array<i64: 40, 40, 128>}, {transform_indices = @transform_1, window_bounds = array<i64: 648>}, {transform_indices = @transform_2, window_bounds = array<i64: 8>}, {transform_indices = @transform_3, window_bounds = array<i64: 64>}, {transform_indices = @transform_4, window_bounds = array<i64: 8>}, {transform_indices = @transform_5, window_bounds = array<i64: 200>}, {transform_indices = @transform_6, window_bounds = array<i64: 1>}, {transform_indices = @transform_7, window_bounds = array<i64: 28, 28, 128>}]} {
    %c0_i32 = arith.constant 0 : i32
    %c5_i32 = arith.constant 5 : i32
    %0 = arith.addi %c0_i32, %c5_i32 : i32
    %c1_i32 = arith.constant 1 : i32
    scf.for %arg12 = %c0_i32 to %0 step %c1_i32  : i32 {
      %c8_i32_11 = arith.constant 8 : i32
      %5 = arith.muli %arg12, %c8_i32_11 : i32
      %6 = arith.index_cast %5 : i32 to index
      %c0_12 = arith.constant 0 : index
      %c0_13 = arith.constant 0 : index
      %7 = vector.load %arg1[%6, %c0_12, %c0_13] : memref<40x40x128xf32, #tpu.memory_space<vmem>>, vector<8x40x128xf32>
      %8 = vector.extract_strided_slice %7 {offsets = [0, 0, 0], sizes = [8, 32, 128], strides = [1, 1, 1]} : vector<8x40x128xf32> to vector<8x32x128xf32>
      %c0_14 = arith.constant 0 : index
      %9 = arith.index_cast %5 : i32 to index
      %c0_15 = arith.constant 0 : index
      %c0_16 = arith.constant 0 : index
      %10 = vector.load %arg9[%c0_14, %9, %c0_15, %c0_16] : memref<9x40x32x128xf32, #tpu.memory_space<vmem>>, vector<1x8x32x128xf32>
      %11 = vector.shape_cast %10 : vector<1x8x32x128xf32> to vector<8x32x128xf32>
      %12 = vector.shape_cast %8 : vector<8x32x128xf32> to vector<1x8x32x128xf32>
      tpu.vector_store %arg9[%c0_14, %9, %c0_15, %c0_16], %12 {strides = array<i32>} : memref<9x40x32x128xf32, #tpu.memory_space<vmem>>, vector<1x8x32x128xf32>,
      %13 = vector.extract_strided_slice %7 {offsets = [0, 1, 0], sizes = [8, 32, 128], strides = [1, 1, 1]} : vector<8x40x128xf32> to vector<8x32x128xf32>
      %c1 = arith.constant 1 : index
      %14 = arith.index_cast %5 : i32 to index
      %c0_17 = arith.constant 0 : index
      %c0_18 = arith.constant 0 : index
      %15 = vector.load %arg9[%c1, %14, %c0_17, %c0_18] : memref<9x40x32x128xf32, #tpu.memory_space<vmem>>, vector<1x8x32x128xf32>
      %16 = vector.shape_cast %15 : vector<1x8x32x128xf32> to vector<8x32x128xf32>
      %17 = vector.shape_cast %13 : vector<8x32x128xf32> to vector<1x8x32x128xf32>
      tpu.vector_store %arg9[%c1, %14, %c0_17, %c0_18], %17 {strides = array<i32>} : memref<9x40x32x128xf32, #tpu.memory_space<vmem>>, vector<1x8x32x128xf32>,
      %18 = vector.extract_strided_slice %7 {offsets = [0, 2, 0], sizes = [8, 32, 128], strides = [1, 1, 1]} : vector<8x40x128xf32> to vector<8x32x128xf32>
      %c2 = arith.constant 2 : index
      %19 = arith.index_cast %5 : i32 to index
      %c0_19 = arith.constant 0 : index
      %c0_20 = arith.constant 0 : index
      %20 = vector.load %arg9[%c2, %19, %c0_19, %c0_20] : memref<9x40x32x128xf32, #tpu.memory_space<vmem>>, vector<1x8x32x128xf32>
      %21 = vector.shape_cast %20 : vector<1x8x32x128xf32> to vector<8x32x128xf32>
      %22 = vector.shape_cast %18 : vector<8x32x128xf32> to vector<1x8x32x128xf32>
      tpu.vector_store %arg9[%c2, %19, %c0_19, %c0_20], %22 {strides = array<i32>} : memref<9x40x32x128xf32, #tpu.memory_space<vmem>>, vector<1x8x32x128xf32>,
      %23 = vector.extract_strided_slice %7 {offsets = [0, 3, 0], sizes = [8, 32, 128], strides = [1, 1, 1]} : vector<8x40x128xf32> to vector<8x32x128xf32>
      %c3 = arith.constant 3 : index
      %24 = arith.index_cast %5 : i32 to index
      %c0_21 = arith.constant 0 : index
      %c0_22 = arith.constant 0 : index
      %25 = vector.load %arg9[%c3, %24, %c0_21, %c0_22] : memref<9x40x32x128xf32, #tpu.memory_space<vmem>>, vector<1x8x32x128xf32>
      %26 = vector.shape_cast %25 : vector<1x8x32x128xf32> to vector<8x32x128xf32>
      %27 = vector.shape_cast %23 : vector<8x32x128xf32> to vector<1x8x32x128xf32>
      tpu.vector_store %arg9[%c3, %24, %c0_21, %c0_22], %27 {strides = array<i32>} : memref<9x40x32x128xf32, #tpu.memory_space<vmem>>, vector<1x8x32x128xf32>,
      %28 = vector.extract_strided_slice %7 {offsets = [0, 4, 0], sizes = [8, 32, 128], strides = [1, 1, 1]} : vector<8x40x128xf32> to vector<8x32x128xf32>
      %c4 = arith.constant 4 : index
      %29 = arith.index_cast %5 : i32 to index
      %c0_23 = arith.constant 0 : index
      %c0_24 = arith.constant 0 : index
      %30 = vector.load %arg9[%c4, %29, %c0_23, %c0_24] : memref<9x40x32x128xf32, #tpu.memory_space<vmem>>, vector<1x8x32x128xf32>
      %31 = vector.shape_cast %30 : vector<1x8x32x128xf32> to vector<8x32x128xf32>
      %32 = vector.shape_cast %28 : vector<8x32x128xf32> to vector<1x8x32x128xf32>
      tpu.vector_store %arg9[%c4, %29, %c0_23, %c0_24], %32 {strides = array<i32>} : memref<9x40x32x128xf32, #tpu.memory_space<vmem>>, vector<1x8x32x128xf32>,
      %33 = vector.extract_strided_slice %7 {offsets = [0, 5, 0], sizes = [8, 32, 128], strides = [1, 1, 1]} : vector<8x40x128xf32> to vector<8x32x128xf32>
      %c5 = arith.constant 5 : index
      %34 = arith.index_cast %5 : i32 to index
      %c0_25 = arith.constant 0 : index
      %c0_26 = arith.constant 0 : index
      %35 = vector.load %arg9[%c5, %34, %c0_25, %c0_26] : memref<9x40x32x128xf32, #tpu.memory_space<vmem>>, vector<1x8x32x128xf32>
      %36 = vector.shape_cast %35 : vector<1x8x32x128xf32> to vector<8x32x128xf32>
      %37 = vector.shape_cast %33 : vector<8x32x128xf32> to vector<1x8x32x128xf32>
      tpu.vector_store %arg9[%c5, %34, %c0_25, %c0_26], %37 {strides = array<i32>} : memref<9x40x32x128xf32, #tpu.memory_space<vmem>>, vector<1x8x32x128xf32>,
      %38 = vector.extract_strided_slice %7 {offsets = [0, 6, 0], sizes = [8, 32, 128], strides = [1, 1, 1]} : vector<8x40x128xf32> to vector<8x32x128xf32>
      %c6 = arith.constant 6 : index
      %39 = arith.index_cast %5 : i32 to index
      %c0_27 = arith.constant 0 : index
      %c0_28 = arith.constant 0 : index
      %40 = vector.load %arg9[%c6, %39, %c0_27, %c0_28] : memref<9x40x32x128xf32, #tpu.memory_space<vmem>>, vector<1x8x32x128xf32>
      %41 = vector.shape_cast %40 : vector<1x8x32x128xf32> to vector<8x32x128xf32>
      %42 = vector.shape_cast %38 : vector<8x32x128xf32> to vector<1x8x32x128xf32>
      tpu.vector_store %arg9[%c6, %39, %c0_27, %c0_28], %42 {strides = array<i32>} : memref<9x40x32x128xf32, #tpu.memory_space<vmem>>, vector<1x8x32x128xf32>,
      %43 = vector.extract_strided_slice %7 {offsets = [0, 7, 0], sizes = [8, 32, 128], strides = [1, 1, 1]} : vector<8x40x128xf32> to vector<8x32x128xf32>
      %c7 = arith.constant 7 : index
      %44 = arith.index_cast %5 : i32 to index
      %c0_29 = arith.constant 0 : index
      %c0_30 = arith.constant 0 : index
      %45 = vector.load %arg9[%c7, %44, %c0_29, %c0_30] : memref<9x40x32x128xf32, #tpu.memory_space<vmem>>, vector<1x8x32x128xf32>
      %46 = vector.shape_cast %45 : vector<1x8x32x128xf32> to vector<8x32x128xf32>
      %47 = vector.shape_cast %43 : vector<8x32x128xf32> to vector<1x8x32x128xf32>
      tpu.vector_store %arg9[%c7, %44, %c0_29, %c0_30], %47 {strides = array<i32>} : memref<9x40x32x128xf32, #tpu.memory_space<vmem>>, vector<1x8x32x128xf32>,
      %48 = vector.extract_strided_slice %7 {offsets = [0, 8, 0], sizes = [8, 32, 128], strides = [1, 1, 1]} : vector<8x40x128xf32> to vector<8x32x128xf32>
      %c8 = arith.constant 8 : index
      %49 = arith.index_cast %5 : i32 to index
      %c0_31 = arith.constant 0 : index
      %c0_32 = arith.constant 0 : index
      %50 = vector.load %arg9[%c8, %49, %c0_31, %c0_32] : memref<9x40x32x128xf32, #tpu.memory_space<vmem>>, vector<1x8x32x128xf32>
      %51 = vector.shape_cast %50 : vector<1x8x32x128xf32> to vector<8x32x128xf32>
      %52 = vector.shape_cast %48 : vector<8x32x128xf32> to vector<1x8x32x128xf32>
      tpu.vector_store %arg9[%c8, %49, %c0_31, %c0_32], %52 {strides = array<i32>} : memref<9x40x32x128xf32, #tpu.memory_space<vmem>>, vector<1x8x32x128xf32>,
    }
    %c5_i32_0 = arith.constant 5 : i32
    %c0_i32_1 = arith.constant 0 : i32
    %c8_i32 = arith.constant 8 : i32
    %1 = arith.addi %c0_i32_1, %c8_i32 : i32
    %c1_i32_2 = arith.constant 1 : i32
    scf.for %arg12 = %c0_i32_1 to %1 step %c1_i32_2  : i32 {
      %5 = arith.index_cast %arg12 : i32 to index
      %6 = memref.load %arg3[%5] : memref<8xf32, #tpu.memory_space<smem>>
      %c0_i32_11 = arith.constant 0 : i32
      %c4_i32_12 = arith.constant 4 : i32
      %7 = arith.addi %c0_i32_11, %c4_i32_12 : i32
      %c1_i32_13 = arith.constant 1 : i32
      scf.for %arg13 = %c0_i32_11 to %7 step %c1_i32_13  : i32 {
        %c8_i32_15 = arith.constant 8 : i32
        %8 = arith.muli %arg13, %c8_i32_15 : i32
        %cst = arith.constant 0.000000e+00 : f32
        %9 = vector.broadcast %cst : f32 to vector<8x32x128xf32>
        %c0_i32_16 = arith.constant 0 : i32
        %c9_i32 = arith.constant 9 : i32
        %10 = arith.addi %c0_i32_16, %c9_i32 : i32
        %c1_i32_17 = arith.constant 1 : i32
        %11 = scf.for %arg14 = %c0_i32_16 to %10 step %c1_i32_17 iter_args(%arg15 = %9) -> (vector<8x32x128xf32>)  : i32 {
          %21 = arith.addi %8, %arg14 : i32
          %c81_i32 = arith.constant 81 : i32
          %22 = arith.muli %arg12, %c81_i32 : i32
          %c9_i32_22 = arith.constant 9 : i32
          %23 = arith.muli %arg14, %c9_i32_22 : i32
          %24 = arith.addi %22, %23 : i32
          %c0_i32_23 = arith.constant 0 : i32
          %25 = arith.addi %24, %c0_i32_23 : i32
          %26 = arith.index_cast %25 : i32 to index
          %27 = memref.load %arg2[%26] : memref<648xf32, #tpu.memory_space<smem>>
          %c0_24 = arith.constant 0 : index
          %28 = arith.index_cast %21 : i32 to index
          %c0_25 = arith.constant 0 : index
          %c0_26 = arith.constant 0 : index
          %29 = vector.load %arg9[%c0_24, %28, %c0_25, %c0_26] : memref<9x40x32x128xf32, #tpu.memory_space<vmem>>, vector<1x8x32x128xf32>
          %30 = vector.shape_cast %29 : vector<1x8x32x128xf32> to vector<8x32x128xf32>
          %31 = vector.broadcast %27 : f32 to vector<8x32x128xf32>
          %32 = arith.mulf %31, %30 : vector<8x32x128xf32>
          %33 = arith.addf %arg15, %32 : vector<8x32x128xf32>
          %c81_i32_27 = arith.constant 81 : i32
          %34 = arith.muli %arg12, %c81_i32_27 : i32
          %c9_i32_28 = arith.constant 9 : i32
          %35 = arith.muli %arg14, %c9_i32_28 : i32
          %36 = arith.addi %34, %35 : i32
          %c1_i32_29 = arith.constant 1 : i32
          %37 = arith.addi %36, %c1_i32_29 : i32
          %38 = arith.index_cast %37 : i32 to index
          %39 = memref.load %arg2[%38] : memref<648xf32, #tpu.memory_space<smem>>
          %c1 = arith.constant 1 : index
          %40 = arith.index_cast %21 : i32 to index
          %c0_30 = arith.constant 0 : index
          %c0_31 = arith.constant 0 : index
          %41 = vector.load %arg9[%c1, %40, %c0_30, %c0_31] : memref<9x40x32x128xf32, #tpu.memory_space<vmem>>, vector<1x8x32x128xf32>
          %42 = vector.shape_cast %41 : vector<1x8x32x128xf32> to vector<8x32x128xf32>
          %43 = vector.broadcast %39 : f32 to vector<8x32x128xf32>
          %44 = arith.mulf %43, %42 : vector<8x32x128xf32>
          %45 = arith.addf %33, %44 : vector<8x32x128xf32>
          %c81_i32_32 = arith.constant 81 : i32
          %46 = arith.muli %arg12, %c81_i32_32 : i32
          %c9_i32_33 = arith.constant 9 : i32
          %47 = arith.muli %arg14, %c9_i32_33 : i32
          %48 = arith.addi %46, %47 : i32
          %c2_i32 = arith.constant 2 : i32
          %49 = arith.addi %48, %c2_i32 : i32
          %50 = arith.index_cast %49 : i32 to index
          %51 = memref.load %arg2[%50] : memref<648xf32, #tpu.memory_space<smem>>
          %c2 = arith.constant 2 : index
          %52 = arith.index_cast %21 : i32 to index
          %c0_34 = arith.constant 0 : index
          %c0_35 = arith.constant 0 : index
          %53 = vector.load %arg9[%c2, %52, %c0_34, %c0_35] : memref<9x40x32x128xf32, #tpu.memory_space<vmem>>, vector<1x8x32x128xf32>
          %54 = vector.shape_cast %53 : vector<1x8x32x128xf32> to vector<8x32x128xf32>
          %55 = vector.broadcast %51 : f32 to vector<8x32x128xf32>
          %56 = arith.mulf %55, %54 : vector<8x32x128xf32>
          %57 = arith.addf %45, %56 : vector<8x32x128xf32>
          %c81_i32_36 = arith.constant 81 : i32
          %58 = arith.muli %arg12, %c81_i32_36 : i32
          %c9_i32_37 = arith.constant 9 : i32
          %59 = arith.muli %arg14, %c9_i32_37 : i32
          %60 = arith.addi %58, %59 : i32
          %c3_i32 = arith.constant 3 : i32
          %61 = arith.addi %60, %c3_i32 : i32
          %62 = arith.index_cast %61 : i32 to index
          %63 = memref.load %arg2[%62] : memref<648xf32, #tpu.memory_space<smem>>
          %c3 = arith.constant 3 : index
          %64 = arith.index_cast %21 : i32 to index
          %c0_38 = arith.constant 0 : index
          %c0_39 = arith.constant 0 : index
          %65 = vector.load %arg9[%c3, %64, %c0_38, %c0_39] : memref<9x40x32x128xf32, #tpu.memory_space<vmem>>, vector<1x8x32x128xf32>
          %66 = vector.shape_cast %65 : vector<1x8x32x128xf32> to vector<8x32x128xf32>
          %67 = vector.broadcast %63 : f32 to vector<8x32x128xf32>
          %68 = arith.mulf %67, %66 : vector<8x32x128xf32>
          %69 = arith.addf %57, %68 : vector<8x32x128xf32>
          %c81_i32_40 = arith.constant 81 : i32
          %70 = arith.muli %arg12, %c81_i32_40 : i32
          %c9_i32_41 = arith.constant 9 : i32
          %71 = arith.muli %arg14, %c9_i32_41 : i32
          %72 = arith.addi %70, %71 : i32
          %c4_i32_42 = arith.constant 4 : i32
          %73 = arith.addi %72, %c4_i32_42 : i32
          %74 = arith.index_cast %73 : i32 to index
          %75 = memref.load %arg2[%74] : memref<648xf32, #tpu.memory_space<smem>>
          %c4 = arith.constant 4 : index
          %76 = arith.index_cast %21 : i32 to index
          %c0_43 = arith.constant 0 : index
          %c0_44 = arith.constant 0 : index
          %77 = vector.load %arg9[%c4, %76, %c0_43, %c0_44] : memref<9x40x32x128xf32, #tpu.memory_space<vmem>>, vector<1x8x32x128xf32>
          %78 = vector.shape_cast %77 : vector<1x8x32x128xf32> to vector<8x32x128xf32>
          %79 = vector.broadcast %75 : f32 to vector<8x32x128xf32>
          %80 = arith.mulf %79, %78 : vector<8x32x128xf32>
          %81 = arith.addf %69, %80 : vector<8x32x128xf32>
          %c81_i32_45 = arith.constant 81 : i32
          %82 = arith.muli %arg12, %c81_i32_45 : i32
          %c9_i32_46 = arith.constant 9 : i32
          %83 = arith.muli %arg14, %c9_i32_46 : i32
          %84 = arith.addi %82, %83 : i32
          %c5_i32_47 = arith.constant 5 : i32
          %85 = arith.addi %84, %c5_i32_47 : i32
          %86 = arith.index_cast %85 : i32 to index
          %87 = memref.load %arg2[%86] : memref<648xf32, #tpu.memory_space<smem>>
          %c5 = arith.constant 5 : index
          %88 = arith.index_cast %21 : i32 to index
          %c0_48 = arith.constant 0 : index
          %c0_49 = arith.constant 0 : index
          %89 = vector.load %arg9[%c5, %88, %c0_48, %c0_49] : memref<9x40x32x128xf32, #tpu.memory_space<vmem>>, vector<1x8x32x128xf32>
          %90 = vector.shape_cast %89 : vector<1x8x32x128xf32> to vector<8x32x128xf32>
          %91 = vector.broadcast %87 : f32 to vector<8x32x128xf32>
          %92 = arith.mulf %91, %90 : vector<8x32x128xf32>
          %93 = arith.addf %81, %92 : vector<8x32x128xf32>
          %c81_i32_50 = arith.constant 81 : i32
          %94 = arith.muli %arg12, %c81_i32_50 : i32
          %c9_i32_51 = arith.constant 9 : i32
          %95 = arith.muli %arg14, %c9_i32_51 : i32
          %96 = arith.addi %94, %95 : i32
          %c6_i32 = arith.constant 6 : i32
          %97 = arith.addi %96, %c6_i32 : i32
          %98 = arith.index_cast %97 : i32 to index
          %99 = memref.load %arg2[%98] : memref<648xf32, #tpu.memory_space<smem>>
          %c6 = arith.constant 6 : index
          %100 = arith.index_cast %21 : i32 to index
          %c0_52 = arith.constant 0 : index
          %c0_53 = arith.constant 0 : index
          %101 = vector.load %arg9[%c6, %100, %c0_52, %c0_53] : memref<9x40x32x128xf32, #tpu.memory_space<vmem>>, vector<1x8x32x128xf32>
          %102 = vector.shape_cast %101 : vector<1x8x32x128xf32> to vector<8x32x128xf32>
          %103 = vector.broadcast %99 : f32 to vector<8x32x128xf32>
          %104 = arith.mulf %103, %102 : vector<8x32x128xf32>
          %105 = arith.addf %93, %104 : vector<8x32x128xf32>
          %c81_i32_54 = arith.constant 81 : i32
          %106 = arith.muli %arg12, %c81_i32_54 : i32
          %c9_i32_55 = arith.constant 9 : i32
          %107 = arith.muli %arg14, %c9_i32_55 : i32
          %108 = arith.addi %106, %107 : i32
          %c7_i32 = arith.constant 7 : i32
          %109 = arith.addi %108, %c7_i32 : i32
          %110 = arith.index_cast %109 : i32 to index
          %111 = memref.load %arg2[%110] : memref<648xf32, #tpu.memory_space<smem>>
          %c7 = arith.constant 7 : index
          %112 = arith.index_cast %21 : i32 to index
          %c0_56 = arith.constant 0 : index
          %c0_57 = arith.constant 0 : index
          %113 = vector.load %arg9[%c7, %112, %c0_56, %c0_57] : memref<9x40x32x128xf32, #tpu.memory_space<vmem>>, vector<1x8x32x128xf32>
          %114 = vector.shape_cast %113 : vector<1x8x32x128xf32> to vector<8x32x128xf32>
          %115 = vector.broadcast %111 : f32 to vector<8x32x128xf32>
          %116 = arith.mulf %115, %114 : vector<8x32x128xf32>
          %117 = arith.addf %105, %116 : vector<8x32x128xf32>
          %c81_i32_58 = arith.constant 81 : i32
          %118 = arith.muli %arg12, %c81_i32_58 : i32
          %c9_i32_59 = arith.constant 9 : i32
          %119 = arith.muli %arg14, %c9_i32_59 : i32
          %120 = arith.addi %118, %119 : i32
          %c8_i32_60 = arith.constant 8 : i32
          %121 = arith.addi %120, %c8_i32_60 : i32
          %122 = arith.index_cast %121 : i32 to index
          %123 = memref.load %arg2[%122] : memref<648xf32, #tpu.memory_space<smem>>
          %c8 = arith.constant 8 : index
          %124 = arith.index_cast %21 : i32 to index
          %c0_61 = arith.constant 0 : index
          %c0_62 = arith.constant 0 : index
          %125 = vector.load %arg9[%c8, %124, %c0_61, %c0_62] : memref<9x40x32x128xf32, #tpu.memory_space<vmem>>, vector<1x8x32x128xf32>
          %126 = vector.shape_cast %125 : vector<1x8x32x128xf32> to vector<8x32x128xf32>
          %127 = vector.broadcast %123 : f32 to vector<8x32x128xf32>
          %128 = arith.mulf %127, %126 : vector<8x32x128xf32>
          %129 = arith.addf %117, %128 : vector<8x32x128xf32>
          scf.yield %129 : vector<8x32x128xf32>
        }
        %c9_i32_18 = arith.constant 9 : i32
        %12 = vector.broadcast %6 : f32 to vector<8x32x128xf32>
        %13 = arith.addf %11, %12 : vector<8x32x128xf32>
        %cst_19 = arith.constant 0.000000e+00 : f32
        %14 = vector.broadcast %cst_19 : f32 to vector<8x32x128xf32>
        %15 = arith.maximumf %13, %14 : vector<8x32x128xf32>
        %16 = arith.index_cast %arg12 : i32 to index
        %17 = arith.index_cast %8 : i32 to index
        %c0_20 = arith.constant 0 : index
        %c0_21 = arith.constant 0 : index
        %18 = vector.load %arg10[%16, %17, %c0_20, %c0_21] : memref<8x32x32x128xf32, #tpu.memory_space<vmem>>, vector<1x8x32x128xf32>
        %19 = vector.shape_cast %18 : vector<1x8x32x128xf32> to vector<8x32x128xf32>
        %20 = vector.shape_cast %15 : vector<8x32x128xf32> to vector<1x8x32x128xf32>
        tpu.vector_store %arg10[%16, %17, %c0_20, %c0_21], %20 {strides = array<i32>} : memref<8x32x32x128xf32, #tpu.memory_space<vmem>>, vector<1x8x32x128xf32>,
      }
      %c4_i32_14 = arith.constant 4 : i32
    }
    %c8_i32_3 = arith.constant 8 : i32
    %c0_i32_4 = arith.constant 0 : i32
    %c8_i32_5 = arith.constant 8 : i32
    %2 = arith.addi %c0_i32_4, %c8_i32_5 : i32
    %c1_i32_6 = arith.constant 1 : i32
    scf.for %arg12 = %c0_i32_4 to %2 step %c1_i32_6  : i32 {
      %5 = arith.index_cast %arg12 : i32 to index
      %6 = memref.load %arg5[%5] : memref<8xf32, #tpu.memory_space<smem>>
      %c0_i32_11 = arith.constant 0 : i32
      %c4_i32_12 = arith.constant 4 : i32
      %7 = arith.addi %c0_i32_11, %c4_i32_12 : i32
      %c1_i32_13 = arith.constant 1 : i32
      scf.for %arg13 = %c0_i32_11 to %7 step %c1_i32_13  : i32 {
        %c8_i32_15 = arith.constant 8 : i32
        %8 = arith.muli %arg13, %c8_i32_15 : i32
        %cst = arith.constant 0.000000e+00 : f32
        %9 = vector.broadcast %cst : f32 to vector<8x32x128xf32>
        %c8_i32_16 = arith.constant 8 : i32
        %10 = arith.muli %arg12, %c8_i32_16 : i32
        %c0_i32_17 = arith.constant 0 : i32
        %11 = arith.addi %10, %c0_i32_17 : i32
        %12 = arith.index_cast %11 : i32 to index
        %13 = memref.load %arg4[%12] : memref<64xf32, #tpu.memory_space<smem>>
        %c0_18 = arith.constant 0 : index
        %14 = arith.index_cast %8 : i32 to index
        %c0_19 = arith.constant 0 : index
        %c0_20 = arith.constant 0 : index
        %15 = vector.load %arg10[%c0_18, %14, %c0_19, %c0_20] : memref<8x32x32x128xf32, #tpu.memory_space<vmem>>, vector<1x8x32x128xf32>
        %16 = vector.shape_cast %15 : vector<1x8x32x128xf32> to vector<8x32x128xf32>
        %17 = vector.broadcast %13 : f32 to vector<8x32x128xf32>
        %18 = arith.mulf %17, %16 : vector<8x32x128xf32>
        %19 = arith.addf %9, %18 : vector<8x32x128xf32>
        %c8_i32_21 = arith.constant 8 : i32
        %20 = arith.muli %arg12, %c8_i32_21 : i32
        %c1_i32_22 = arith.constant 1 : i32
        %21 = arith.addi %20, %c1_i32_22 : i32
        %22 = arith.index_cast %21 : i32 to index
        %23 = memref.load %arg4[%22] : memref<64xf32, #tpu.memory_space<smem>>
        %c1 = arith.constant 1 : index
        %24 = arith.index_cast %8 : i32 to index
        %c0_23 = arith.constant 0 : index
        %c0_24 = arith.constant 0 : index
        %25 = vector.load %arg10[%c1, %24, %c0_23, %c0_24] : memref<8x32x32x128xf32, #tpu.memory_space<vmem>>, vector<1x8x32x128xf32>
        %26 = vector.shape_cast %25 : vector<1x8x32x128xf32> to vector<8x32x128xf32>
        %27 = vector.broadcast %23 : f32 to vector<8x32x128xf32>
        %28 = arith.mulf %27, %26 : vector<8x32x128xf32>
        %29 = arith.addf %19, %28 : vector<8x32x128xf32>
        %c8_i32_25 = arith.constant 8 : i32
        %30 = arith.muli %arg12, %c8_i32_25 : i32
        %c2_i32 = arith.constant 2 : i32
        %31 = arith.addi %30, %c2_i32 : i32
        %32 = arith.index_cast %31 : i32 to index
        %33 = memref.load %arg4[%32] : memref<64xf32, #tpu.memory_space<smem>>
        %c2 = arith.constant 2 : index
        %34 = arith.index_cast %8 : i32 to index
        %c0_26 = arith.constant 0 : index
        %c0_27 = arith.constant 0 : index
        %35 = vector.load %arg10[%c2, %34, %c0_26, %c0_27] : memref<8x32x32x128xf32, #tpu.memory_space<vmem>>, vector<1x8x32x128xf32>
        %36 = vector.shape_cast %35 : vector<1x8x32x128xf32> to vector<8x32x128xf32>
        %37 = vector.broadcast %33 : f32 to vector<8x32x128xf32>
        %38 = arith.mulf %37, %36 : vector<8x32x128xf32>
        %39 = arith.addf %29, %38 : vector<8x32x128xf32>
        %c8_i32_28 = arith.constant 8 : i32
        %40 = arith.muli %arg12, %c8_i32_28 : i32
        %c3_i32 = arith.constant 3 : i32
        %41 = arith.addi %40, %c3_i32 : i32
        %42 = arith.index_cast %41 : i32 to index
        %43 = memref.load %arg4[%42] : memref<64xf32, #tpu.memory_space<smem>>
        %c3 = arith.constant 3 : index
        %44 = arith.index_cast %8 : i32 to index
        %c0_29 = arith.constant 0 : index
        %c0_30 = arith.constant 0 : index
        %45 = vector.load %arg10[%c3, %44, %c0_29, %c0_30] : memref<8x32x32x128xf32, #tpu.memory_space<vmem>>, vector<1x8x32x128xf32>
        %46 = vector.shape_cast %45 : vector<1x8x32x128xf32> to vector<8x32x128xf32>
        %47 = vector.broadcast %43 : f32 to vector<8x32x128xf32>
        %48 = arith.mulf %47, %46 : vector<8x32x128xf32>
        %49 = arith.addf %39, %48 : vector<8x32x128xf32>
        %c8_i32_31 = arith.constant 8 : i32
        %50 = arith.muli %arg12, %c8_i32_31 : i32
        %c4_i32_32 = arith.constant 4 : i32
        %51 = arith.addi %50, %c4_i32_32 : i32
        %52 = arith.index_cast %51 : i32 to index
        %53 = memref.load %arg4[%52] : memref<64xf32, #tpu.memory_space<smem>>
        %c4 = arith.constant 4 : index
        %54 = arith.index_cast %8 : i32 to index
        %c0_33 = arith.constant 0 : index
        %c0_34 = arith.constant 0 : index
        %55 = vector.load %arg10[%c4, %54, %c0_33, %c0_34] : memref<8x32x32x128xf32, #tpu.memory_space<vmem>>, vector<1x8x32x128xf32>
        %56 = vector.shape_cast %55 : vector<1x8x32x128xf32> to vector<8x32x128xf32>
        %57 = vector.broadcast %53 : f32 to vector<8x32x128xf32>
        %58 = arith.mulf %57, %56 : vector<8x32x128xf32>
        %59 = arith.addf %49, %58 : vector<8x32x128xf32>
        %c8_i32_35 = arith.constant 8 : i32
        %60 = arith.muli %arg12, %c8_i32_35 : i32
        %c5_i32_36 = arith.constant 5 : i32
        %61 = arith.addi %60, %c5_i32_36 : i32
        %62 = arith.index_cast %61 : i32 to index
        %63 = memref.load %arg4[%62] : memref<64xf32, #tpu.memory_space<smem>>
        %c5 = arith.constant 5 : index
        %64 = arith.index_cast %8 : i32 to index
        %c0_37 = arith.constant 0 : index
        %c0_38 = arith.constant 0 : index
        %65 = vector.load %arg10[%c5, %64, %c0_37, %c0_38] : memref<8x32x32x128xf32, #tpu.memory_space<vmem>>, vector<1x8x32x128xf32>
        %66 = vector.shape_cast %65 : vector<1x8x32x128xf32> to vector<8x32x128xf32>
        %67 = vector.broadcast %63 : f32 to vector<8x32x128xf32>
        %68 = arith.mulf %67, %66 : vector<8x32x128xf32>
        %69 = arith.addf %59, %68 : vector<8x32x128xf32>
        %c8_i32_39 = arith.constant 8 : i32
        %70 = arith.muli %arg12, %c8_i32_39 : i32
        %c6_i32 = arith.constant 6 : i32
        %71 = arith.addi %70, %c6_i32 : i32
        %72 = arith.index_cast %71 : i32 to index
        %73 = memref.load %arg4[%72] : memref<64xf32, #tpu.memory_space<smem>>
        %c6 = arith.constant 6 : index
        %74 = arith.index_cast %8 : i32 to index
        %c0_40 = arith.constant 0 : index
        %c0_41 = arith.constant 0 : index
        %75 = vector.load %arg10[%c6, %74, %c0_40, %c0_41] : memref<8x32x32x128xf32, #tpu.memory_space<vmem>>, vector<1x8x32x128xf32>
        %76 = vector.shape_cast %75 : vector<1x8x32x128xf32> to vector<8x32x128xf32>
        %77 = vector.broadcast %73 : f32 to vector<8x32x128xf32>
        %78 = arith.mulf %77, %76 : vector<8x32x128xf32>
        %79 = arith.addf %69, %78 : vector<8x32x128xf32>
        %c8_i32_42 = arith.constant 8 : i32
        %80 = arith.muli %arg12, %c8_i32_42 : i32
        %c7_i32 = arith.constant 7 : i32
        %81 = arith.addi %80, %c7_i32 : i32
        %82 = arith.index_cast %81 : i32 to index
        %83 = memref.load %arg4[%82] : memref<64xf32, #tpu.memory_space<smem>>
        %c7 = arith.constant 7 : index
        %84 = arith.index_cast %8 : i32 to index
        %c0_43 = arith.constant 0 : index
        %c0_44 = arith.constant 0 : index
        %85 = vector.load %arg10[%c7, %84, %c0_43, %c0_44] : memref<8x32x32x128xf32, #tpu.memory_space<vmem>>, vector<1x8x32x128xf32>
        %86 = vector.shape_cast %85 : vector<1x8x32x128xf32> to vector<8x32x128xf32>
        %87 = vector.broadcast %83 : f32 to vector<8x32x128xf32>
        %88 = arith.mulf %87, %86 : vector<8x32x128xf32>
        %89 = arith.addf %79, %88 : vector<8x32x128xf32>
        %90 = vector.broadcast %6 : f32 to vector<8x32x128xf32>
        %91 = arith.addf %89, %90 : vector<8x32x128xf32>
        %cst_45 = arith.constant 0.000000e+00 : f32
        %92 = vector.broadcast %cst_45 : f32 to vector<8x32x128xf32>
        %93 = arith.maximumf %91, %92 : vector<8x32x128xf32>
        %94 = vector.extract_strided_slice %93 {offsets = [0, 0, 0], sizes = [8, 28, 128], strides = [1, 1, 1]} : vector<8x32x128xf32> to vector<8x28x128xf32>
        %c0_46 = arith.constant 0 : index
        %95 = arith.index_cast %arg12 : i32 to index
        %96 = arith.index_cast %8 : i32 to index
        %c0_47 = arith.constant 0 : index
        %c0_48 = arith.constant 0 : index
        %97 = vector.load %arg11[%c0_46, %95, %96, %c0_47, %c0_48] : memref<5x8x32x28x128xf32, #tpu.memory_space<vmem>>, vector<1x1x8x28x128xf32>
        %98 = vector.shape_cast %97 : vector<1x1x8x28x128xf32> to vector<8x28x128xf32>
        %99 = vector.shape_cast %94 : vector<8x28x128xf32> to vector<1x1x8x28x128xf32>
        tpu.vector_store %arg11[%c0_46, %95, %96, %c0_47, %c0_48], %99 {strides = array<i32>} : memref<5x8x32x28x128xf32, #tpu.memory_space<vmem>>, vector<1x1x8x28x128xf32>,
        %100 = vector.extract_strided_slice %93 {offsets = [0, 1, 0], sizes = [8, 28, 128], strides = [1, 1, 1]} : vector<8x32x128xf32> to vector<8x28x128xf32>
        %c1_49 = arith.constant 1 : index
        %101 = arith.index_cast %arg12 : i32 to index
        %102 = arith.index_cast %8 : i32 to index
        %c0_50 = arith.constant 0 : index
        %c0_51 = arith.constant 0 : index
        %103 = vector.load %arg11[%c1_49, %101, %102, %c0_50, %c0_51] : memref<5x8x32x28x128xf32, #tpu.memory_space<vmem>>, vector<1x1x8x28x128xf32>
        %104 = vector.shape_cast %103 : vector<1x1x8x28x128xf32> to vector<8x28x128xf32>
        %105 = vector.shape_cast %100 : vector<8x28x128xf32> to vector<1x1x8x28x128xf32>
        tpu.vector_store %arg11[%c1_49, %101, %102, %c0_50, %c0_51], %105 {strides = array<i32>} : memref<5x8x32x28x128xf32, #tpu.memory_space<vmem>>, vector<1x1x8x28x128xf32>,
        %106 = vector.extract_strided_slice %93 {offsets = [0, 2, 0], sizes = [8, 28, 128], strides = [1, 1, 1]} : vector<8x32x128xf32> to vector<8x28x128xf32>
        %c2_52 = arith.constant 2 : index
        %107 = arith.index_cast %arg12 : i32 to index
        %108 = arith.index_cast %8 : i32 to index
        %c0_53 = arith.constant 0 : index
        %c0_54 = arith.constant 0 : index
        %109 = vector.load %arg11[%c2_52, %107, %108, %c0_53, %c0_54] : memref<5x8x32x28x128xf32, #tpu.memory_space<vmem>>, vector<1x1x8x28x128xf32>
        %110 = vector.shape_cast %109 : vector<1x1x8x28x128xf32> to vector<8x28x128xf32>
        %111 = vector.shape_cast %106 : vector<8x28x128xf32> to vector<1x1x8x28x128xf32>
        tpu.vector_store %arg11[%c2_52, %107, %108, %c0_53, %c0_54], %111 {strides = array<i32>} : memref<5x8x32x28x128xf32, #tpu.memory_space<vmem>>, vector<1x1x8x28x128xf32>,
        %112 = vector.extract_strided_slice %93 {offsets = [0, 3, 0], sizes = [8, 28, 128], strides = [1, 1, 1]} : vector<8x32x128xf32> to vector<8x28x128xf32>
        %c3_55 = arith.constant 3 : index
        %113 = arith.index_cast %arg12 : i32 to index
        %114 = arith.index_cast %8 : i32 to index
        %c0_56 = arith.constant 0 : index
        %c0_57 = arith.constant 0 : index
        %115 = vector.load %arg11[%c3_55, %113, %114, %c0_56, %c0_57] : memref<5x8x32x28x128xf32, #tpu.memory_space<vmem>>, vector<1x1x8x28x128xf32>
        %116 = vector.shape_cast %115 : vector<1x1x8x28x128xf32> to vector<8x28x128xf32>
        %117 = vector.shape_cast %112 : vector<8x28x128xf32> to vector<1x1x8x28x128xf32>
        tpu.vector_store %arg11[%c3_55, %113, %114, %c0_56, %c0_57], %117 {strides = array<i32>} : memref<5x8x32x28x128xf32, #tpu.memory_space<vmem>>, vector<1x1x8x28x128xf32>,
        %118 = vector.extract_strided_slice %93 {offsets = [0, 4, 0], sizes = [8, 28, 128], strides = [1, 1, 1]} : vector<8x32x128xf32> to vector<8x28x128xf32>
        %c4_58 = arith.constant 4 : index
        %119 = arith.index_cast %arg12 : i32 to index
        %120 = arith.index_cast %8 : i32 to index
        %c0_59 = arith.constant 0 : index
        %c0_60 = arith.constant 0 : index
        %121 = vector.load %arg11[%c4_58, %119, %120, %c0_59, %c0_60] : memref<5x8x32x28x128xf32, #tpu.memory_space<vmem>>, vector<1x1x8x28x128xf32>
        %122 = vector.shape_cast %121 : vector<1x1x8x28x128xf32> to vector<8x28x128xf32>
        %123 = vector.shape_cast %118 : vector<8x28x128xf32> to vector<1x1x8x28x128xf32>
        tpu.vector_store %arg11[%c4_58, %119, %120, %c0_59, %c0_60], %123 {strides = array<i32>} : memref<5x8x32x28x128xf32, #tpu.memory_space<vmem>>, vector<1x1x8x28x128xf32>,
      }
      %c4_i32_14 = arith.constant 4 : i32
    }
    %c8_i32_7 = arith.constant 8 : i32
    %c0 = arith.constant 0 : index
    %3 = memref.load %arg7[%c0] : memref<1xf32, #tpu.memory_space<smem>>
    %c0_i32_8 = arith.constant 0 : i32
    %c4_i32 = arith.constant 4 : i32
    %4 = arith.addi %c0_i32_8, %c4_i32 : i32
    %c1_i32_9 = arith.constant 1 : i32
    scf.for %arg12 = %c0_i32_8 to %4 step %c1_i32_9  : i32 {
      %c7_i32 = arith.constant 7 : i32
      %5 = arith.muli %arg12, %c7_i32 : i32
      %cst = arith.constant 0.000000e+00 : f32
      %6 = vector.broadcast %cst : f32 to vector<7x28x128xf32>
      %c0_i32_11 = arith.constant 0 : i32
      %c8_i32_12 = arith.constant 8 : i32
      %7 = arith.addi %c0_i32_11, %c8_i32_12 : i32
      %c1_i32_13 = arith.constant 1 : i32
      %8 = scf.for %arg13 = %c0_i32_11 to %7 step %c1_i32_13 iter_args(%arg14 = %6) -> (vector<7x28x128xf32>)  : i32 {
        %c0_i32_18 = arith.constant 0 : i32
        %c5_i32_19 = arith.constant 5 : i32
        %15 = arith.addi %c0_i32_18, %c5_i32_19 : i32
        %c1_i32_20 = arith.constant 1 : i32
        %16 = scf.for %arg15 = %c0_i32_18 to %15 step %c1_i32_20 iter_args(%arg16 = %arg14) -> (vector<7x28x128xf32>)  : i32 {
          %17 = arith.addi %5, %arg15 : i32
          %c25_i32 = arith.constant 25 : i32
          %18 = arith.muli %arg13, %c25_i32 : i32
          %c5_i32_22 = arith.constant 5 : i32
          %19 = arith.muli %arg15, %c5_i32_22 : i32
          %20 = arith.addi %18, %19 : i32
          %c0_i32_23 = arith.constant 0 : i32
          %21 = arith.addi %20, %c0_i32_23 : i32
          %22 = arith.index_cast %21 : i32 to index
          %23 = memref.load %arg6[%22] : memref<200xf32, #tpu.memory_space<smem>>
          %c0_24 = arith.constant 0 : index
          %24 = arith.index_cast %arg13 : i32 to index
          %25 = arith.index_cast %17 : i32 to index
          %c0_25 = arith.constant 0 : index
          %c0_26 = arith.constant 0 : index
          %26 = vector.load %arg11[%c0_24, %24, %25, %c0_25, %c0_26] : memref<5x8x32x28x128xf32, #tpu.memory_space<vmem>>, vector<1x1x7x28x128xf32>
          %27 = vector.shape_cast %26 : vector<1x1x7x28x128xf32> to vector<7x28x128xf32>
          %28 = vector.broadcast %23 : f32 to vector<7x28x128xf32>
          %29 = arith.mulf %28, %27 : vector<7x28x128xf32>
          %30 = arith.addf %arg16, %29 : vector<7x28x128xf32>
          %c25_i32_27 = arith.constant 25 : i32
          %31 = arith.muli %arg13, %c25_i32_27 : i32
          %c5_i32_28 = arith.constant 5 : i32
          %32 = arith.muli %arg15, %c5_i32_28 : i32
          %33 = arith.addi %31, %32 : i32
          %c1_i32_29 = arith.constant 1 : i32
          %34 = arith.addi %33, %c1_i32_29 : i32
          %35 = arith.index_cast %34 : i32 to index
          %36 = memref.load %arg6[%35] : memref<200xf32, #tpu.memory_space<smem>>
          %c1 = arith.constant 1 : index
          %37 = arith.index_cast %arg13 : i32 to index
          %38 = arith.index_cast %17 : i32 to index
          %c0_30 = arith.constant 0 : index
          %c0_31 = arith.constant 0 : index
          %39 = vector.load %arg11[%c1, %37, %38, %c0_30, %c0_31] : memref<5x8x32x28x128xf32, #tpu.memory_space<vmem>>, vector<1x1x7x28x128xf32>
          %40 = vector.shape_cast %39 : vector<1x1x7x28x128xf32> to vector<7x28x128xf32>
          %41 = vector.broadcast %36 : f32 to vector<7x28x128xf32>
          %42 = arith.mulf %41, %40 : vector<7x28x128xf32>
          %43 = arith.addf %30, %42 : vector<7x28x128xf32>
          %c25_i32_32 = arith.constant 25 : i32
          %44 = arith.muli %arg13, %c25_i32_32 : i32
          %c5_i32_33 = arith.constant 5 : i32
          %45 = arith.muli %arg15, %c5_i32_33 : i32
          %46 = arith.addi %44, %45 : i32
          %c2_i32 = arith.constant 2 : i32
          %47 = arith.addi %46, %c2_i32 : i32
          %48 = arith.index_cast %47 : i32 to index
          %49 = memref.load %arg6[%48] : memref<200xf32, #tpu.memory_space<smem>>
          %c2 = arith.constant 2 : index
          %50 = arith.index_cast %arg13 : i32 to index
          %51 = arith.index_cast %17 : i32 to index
          %c0_34 = arith.constant 0 : index
          %c0_35 = arith.constant 0 : index
          %52 = vector.load %arg11[%c2, %50, %51, %c0_34, %c0_35] : memref<5x8x32x28x128xf32, #tpu.memory_space<vmem>>, vector<1x1x7x28x128xf32>
          %53 = vector.shape_cast %52 : vector<1x1x7x28x128xf32> to vector<7x28x128xf32>
          %54 = vector.broadcast %49 : f32 to vector<7x28x128xf32>
          %55 = arith.mulf %54, %53 : vector<7x28x128xf32>
          %56 = arith.addf %43, %55 : vector<7x28x128xf32>
          %c25_i32_36 = arith.constant 25 : i32
          %57 = arith.muli %arg13, %c25_i32_36 : i32
          %c5_i32_37 = arith.constant 5 : i32
          %58 = arith.muli %arg15, %c5_i32_37 : i32
          %59 = arith.addi %57, %58 : i32
          %c3_i32 = arith.constant 3 : i32
          %60 = arith.addi %59, %c3_i32 : i32
          %61 = arith.index_cast %60 : i32 to index
          %62 = memref.load %arg6[%61] : memref<200xf32, #tpu.memory_space<smem>>
          %c3 = arith.constant 3 : index
          %63 = arith.index_cast %arg13 : i32 to index
          %64 = arith.index_cast %17 : i32 to index
          %c0_38 = arith.constant 0 : index
          %c0_39 = arith.constant 0 : index
          %65 = vector.load %arg11[%c3, %63, %64, %c0_38, %c0_39] : memref<5x8x32x28x128xf32, #tpu.memory_space<vmem>>, vector<1x1x7x28x128xf32>
          %66 = vector.shape_cast %65 : vector<1x1x7x28x128xf32> to vector<7x28x128xf32>
          %67 = vector.broadcast %62 : f32 to vector<7x28x128xf32>
          %68 = arith.mulf %67, %66 : vector<7x28x128xf32>
          %69 = arith.addf %56, %68 : vector<7x28x128xf32>
          %c25_i32_40 = arith.constant 25 : i32
          %70 = arith.muli %arg13, %c25_i32_40 : i32
          %c5_i32_41 = arith.constant 5 : i32
          %71 = arith.muli %arg15, %c5_i32_41 : i32
          %72 = arith.addi %70, %71 : i32
          %c4_i32_42 = arith.constant 4 : i32
          %73 = arith.addi %72, %c4_i32_42 : i32
          %74 = arith.index_cast %73 : i32 to index
          %75 = memref.load %arg6[%74] : memref<200xf32, #tpu.memory_space<smem>>
          %c4 = arith.constant 4 : index
          %76 = arith.index_cast %arg13 : i32 to index
          %77 = arith.index_cast %17 : i32 to index
          %c0_43 = arith.constant 0 : index
          %c0_44 = arith.constant 0 : index
          %78 = vector.load %arg11[%c4, %76, %77, %c0_43, %c0_44] : memref<5x8x32x28x128xf32, #tpu.memory_space<vmem>>, vector<1x1x7x28x128xf32>
          %79 = vector.shape_cast %78 : vector<1x1x7x28x128xf32> to vector<7x28x128xf32>
          %80 = vector.broadcast %75 : f32 to vector<7x28x128xf32>
          %81 = arith.mulf %80, %79 : vector<7x28x128xf32>
          %82 = arith.addf %69, %81 : vector<7x28x128xf32>
          scf.yield %82 : vector<7x28x128xf32>
        }
        %c5_i32_21 = arith.constant 5 : i32
        scf.yield %16 : vector<7x28x128xf32>
      }
      %c8_i32_14 = arith.constant 8 : i32
      %9 = vector.broadcast %3 : f32 to vector<7x28x128xf32>
      %10 = arith.addf %8, %9 : vector<7x28x128xf32>
      %cst_15 = arith.constant 0.000000e+00 : f32
      %11 = vector.broadcast %cst_15 : f32 to vector<7x28x128xf32>
      %12 = arith.maximumf %10, %11 : vector<7x28x128xf32>
      %13 = arith.index_cast %5 : i32 to index
      %c0_16 = arith.constant 0 : index
      %c0_17 = arith.constant 0 : index
      %14 = vector.load %arg8[%13, %c0_16, %c0_17] : memref<28x28x128xf32, #tpu.memory_space<vmem>>, vector<7x28x128xf32>
      tpu.vector_store %arg8[%13, %c0_16, %c0_17], %12 {strides = array<i32>} : memref<28x28x128xf32, #tpu.memory_space<vmem>>, vector<7x28x128xf32>,
    }
    %c4_i32_10 = arith.constant 4 : i32
    return
  }
  func.func @transform_0(%arg0: i32) -> (i32, i32, i32) {
    %c0_i32 = arith.constant 0 : i32
    %c0_i32_0 = arith.constant 0 : i32
    %c0_i32_1 = arith.constant 0 : i32
    return %c0_i32, %c0_i32_0, %arg0 : i32, i32, i32
  }
  func.func @transform_1(%arg0: i32) -> i32 {
    %c0_i32 = arith.constant 0 : i32
    %c0_i32_0 = arith.constant 0 : i32
    return %c0_i32 : i32
  }
  func.func @transform_2(%arg0: i32) -> i32 {
    %c0_i32 = arith.constant 0 : i32
    %c0_i32_0 = arith.constant 0 : i32
    return %c0_i32 : i32
  }
  func.func @transform_3(%arg0: i32) -> i32 {
    %c0_i32 = arith.constant 0 : i32
    %c0_i32_0 = arith.constant 0 : i32
    return %c0_i32 : i32
  }
  func.func @transform_4(%arg0: i32) -> i32 {
    %c0_i32 = arith.constant 0 : i32
    %c0_i32_0 = arith.constant 0 : i32
    return %c0_i32 : i32
  }
  func.func @transform_5(%arg0: i32) -> i32 {
    %c0_i32 = arith.constant 0 : i32
    %c0_i32_0 = arith.constant 0 : i32
    return %c0_i32 : i32
  }
  func.func @transform_6(%arg0: i32) -> i32 {
    %c0_i32 = arith.constant 0 : i32
    %c0_i32_0 = arith.constant 0 : i32
    return %c0_i32 : i32
  }
  func.func @transform_7(%arg0: i32) -> (i32, i32, i32) {
    %c0_i32 = arith.constant 0 : i32
    %c0_i32_0 = arith.constant 0 : i32
    %c0_i32_1 = arith.constant 0 : i32
    return %c0_i32, %c0_i32_0, %arg0 : i32, i32, i32
  }
}

</mosaic_0001>

<bundles_post_ra>
// kernel: hicplus_forward.1
= control target key start
LH: loop header
LB: loop body
LE: loop exit
PB: predicated region body
PF: predicated region fallthrough
CT: control target
= control target key end

     0   :  { %s10515_s0 = inlined_call_operand.vmem [shape: f32[40,40,128], index: 0, kind: input, shape index: {}]   ;;  %s10516_s1 = inlined_call_operand.vmem [shape: f32[648], index: 1, kind: input, shape index: {}]   ;;  %s10517_s2 = inlined_call_operand.vmem [shape: f32[8], index: 2, kind: input, shape index: {}]   ;;  %s10518_s3 = inlined_call_operand.vmem [shape: f32[64], index: 3, kind: input, shape index: {}]   ;;  %s10519_s4 = inlined_call_operand.vmem [shape: f32[8], index: 4, kind: input, shape index: {}]   ;;  %s10520_s5 = inlined_call_operand.vmem [shape: f32[200], index: 5, kind: input, shape index: {}]   ;;  %s10521_s6 = inlined_call_operand.<no memory space> [shape: f32[1], index: 6, kind: input, shape index: {}]   ;;  %s10522_s7 = inlined_call_operand.vmem [shape: f32[28,28,128], index: 7, kind: output, shape index: {}]  }
   0x1   :  { %12 = sst [smem:[#allocation5]] %s10521_s6 }
   0x2   :  { %13 = vsyncpa [#allocation7], 0 }
   0x3   :  { %14 = vsyncpa [#allocation9], 0  ;;  %s34_s28 = sshll.u32 %s10517_s2, 4  ;;  %s35_s28 = int_to_ptr.vmem [resolvable:$true] %s34_s28 }
   0x4   :  { %15 = vsyncpa [#allocation12], 0  ;;  %s54_s8 = sshll.u32 %s10519_s4, 4  ;;  %s5585_s9 = scalar_lea.vmem %s35_s28, 16  ;;  %s55_s8 = int_to_ptr.vmem [resolvable:$true] %s54_s8 }
   0x5   :  { %p5586_p0 = scmp.ne.s32.totalorder %s35_s28, %s5585_s9  ;;  %p5590_p1 = scmp.lt.s32.totalorder %s35_s28, %s35_s28 }
   0x6   :  { %p5591_p2 = scmp.lt.s32.totalorder %s5585_s9, %s5585_s9 }
   0x8   :  { %p5592_p3 = por %p5591_p2, %p5590_p1 }
   0xa   :  { %p5593_p4 = pnand %p5592_p3, %p5586_p0 }
   0xc   :  { %5596 = shalt.err (!%p5593_p4)
}
   0xd   :  { %s6427_s6 = smov [#allocation8]   ;;  %s5597_s10 = scalar_lea.vmem %s55_s8, 16 }
   0xe   :  { %37 = dma.vmem_to_smem %s35_s28, 16, %s6427_s6, [#allocation9]  }
   0xf   :  { %p5598_p5 = scmp.ne.s32.totalorder %s55_s8, %s5597_s10  ;;  %p5602_p6 = scmp.lt.s32.totalorder %s55_s8, %s55_s8 }
  0x10   :  { %p5603_p7 = scmp.lt.s32.totalorder %s5597_s10, %s5597_s10 }
  0x12   :  { %p5604_p8 = por %p5603_p7, %p5602_p6 }
  0x14   :  { %p5605_p9 = pnand %p5604_p8, %p5598_p5 }
  0x16   :  { %5608 = shalt.err (!%p5605_p9)
}
  0x17   :  { %s6428_s2 = smov [#allocation11]   ;;  %s24_s12 = sshll.u32 %s10516_s1, 4  ;;  %s25_s12 = int_to_ptr.vmem [resolvable:$true] %s24_s12 }
  0x18   :  { %57 = dma.vmem_to_smem %s55_s8, 16, %s6428_s2, [#allocation12]  }
  0x19   :  { %s44_s15 = sshll.u32 %s10518_s3, 4  ;;  %s5609_s16 = scalar_lea.vmem %s25_s12, 96  ;;  %s45_s15 = int_to_ptr.vmem [resolvable:$true] %s44_s15 }
  0x1a   :  { %p5610_p10 = scmp.ne.s32.totalorder %s25_s12, %s5609_s16  ;;  %s5613_s17 = scalar_lea.vmem %s25_s12, 128 }
  0x1b   :  { %p5614_p11 = scmp.lt.s32.totalorder %s25_s12, %s25_s12  ;;  %p5615_p12 = scmp.lt.s32.totalorder %s5613_s17, %s5609_s16 }
  0x1d   :  { %p5616_p13 = por %p5615_p12, %p5614_p11 }
  0x1f   :  { %p5617_p0 = pnand %p5616_p13, %p5610_p10 }
  0x21   :  { %5620 = shalt.err (!%p5617_p0)
}
  0x22   :  { %s6429_s18 = smov [#allocation6]   ;;  %s5621_s19 = scalar_lea.vmem %s45_s15, 16 }
  0x23   :  { %27 = dma.vmem_to_smem %s25_s12, 96, %s6429_s18, [#allocation7]  }
  0x24   :  { %p5622_p1 = scmp.ne.s32.totalorder %s45_s15, %s5621_s19  ;;  %p5626_p2 = scmp.lt.s32.totalorder %s45_s15, %s45_s15 }
  0x25   :  { %p5627_p3 = scmp.lt.s32.totalorder %s5621_s19, %s5621_s19 }
  0x27   :  { %p5628_p4 = por %p5627_p3, %p5626_p2 }
  0x29   :  { %p5629_p5 = pnand %p5628_p4, %p5622_p1 }
  0x2b   :  { %5632 = shalt.err (!%p5629_p5)
}
  0x2c   :  { %s6430_s1 = smov [#allocation10]   ;;  %s64_s21 = sshll.u32 %s10520_s5, 4  ;;  %s65_s21 = int_to_ptr.vmem [resolvable:$true] %s64_s21 }
  0x2d   :  { %47 = dma.vmem_to_smem %s45_s15, 16, %s6430_s1, [#allocation9]  }
  0x2e   :  { %s5633_s22 = scalar_lea.vmem %s65_s21, 32  ;;  %p5638_p7 = scmp.lt.s32.totalorder %s65_s21, %s65_s21 }
  0x2f   :  { %p5634_p6 = scmp.ne.s32.totalorder %s65_s21, %s5633_s22  ;;  %p5639_p8 = scmp.lt.s32.totalorder %s5633_s22, %s5633_s22 }
  0x31   :  { %p5640_p9 = por %p5639_p8, %p5638_p7 }
  0x33   :  { %p5641_p10 = pnand %p5640_p9, %p5634_p6 }
  0x35   :  { %5644 = shalt.err (!%p5641_p10)
}
  0x36   :  { %s6431_s23 = smov [#allocation13]  }
  0x37   :  { %67 = dma.vmem_to_smem %s65_s21, 32, %s6431_s23, [#allocation12]  }
  0x38   :  { %6033 = dma.done.wait [#allocation7], 96  }
  0x39   :  { %6034 = vsyncadd [#allocation7], 4294967200 }
  0x3a   :  { %6035 = dma.done.wait [#allocation9], 32  }
  0x3b   :  { %6036 = vsyncadd [#allocation9], 4294967264 }
  0x3c   :  { %6037 = dma.done.wait [#allocation12], 48  }
  0x3d   :  { %6038 = vsyncadd [#allocation12], 4294967248 }
  0x3e   :  { %85 = sfence }
  0x3f   :  { %s6490_s24 = smov 0  }
  0x40 LB: > { %s3709_s5 = smul.u32 320, %s6041_s24  ;;  %s4801_s25 = sshll.u32 %s6041_s24, 8  ;;  %s6041_s24 = sphi %s6490_s24, %s91_s24  }
  0x41   : > { %s6505_s29 = scalar_lea.vmem [#allocation2], %s4801_s25  ;;  %s91_s24 = sadd.s32 1, %s6041_s24  }
  0x42   : > { %s6500_s28 = scalar_lea.vmem %s10515_s0, %s3709_s5  ;;  %p88_p11 = scmp.ge.s32.totalorder %s91_s24, 5  }
  0x43   : > { %v95_v0 = vld [vmem:[%s6500_s28] sm:$0xff]  ;;  %v96_v1 = vld [vmem:[%s6500_s28 + $0x8] sm:$0xff]  ;;  %v97_v2 = vld [vmem:[%s6500_s28 + $0x10] sm:$0xff]  ;;  %s6891_s30 = smov (%p88_p11), 0  }
  0x44   : > { %137 = vst [vmem:[%s6505_s29] sm:$0xff] %v95_v0  ;;  %3712 = vst [vmem:[%s6505_s29 + $0x4ff] sm:$0xfe] %v95_v0  ;;  %v98_v3 = vld [vmem:[%s6500_s28 + $0x18] sm:$0xff]  ;;  %v100_v4 = vld [vmem:[%s6500_s28 + $0x28] sm:$0xff] }
  0x45   : > { %3753 = vst [vmem:[%s6505_s29 + $0x9fe] sm:$0xfc] %v95_v0  ;;  %3794 = vst [vmem:[%s6505_s29 + $0xefd] sm:$0xf8] %v95_v0  ;;  %v101_v5 = vld [vmem:[%s6500_s28 + $0x30] sm:$0xff]  ;;  %v102_v6 = vld [vmem:[%s6500_s28 + $0x38] sm:$0xff] }
  0x46   : > { %3835 = vst [vmem:[%s6505_s29 + $0x13fc] sm:$0xf0] %v95_v0  ;;  %3876 = vst [vmem:[%s6505_s29 + $0x18fb] sm:$0xe0] %v95_v0  ;;  %v103_v7 = vld [vmem:[%s6500_s28 + $0x40] sm:$0xff]  ;;  %v105_v8 = vld [vmem:[%s6500_s28 + $0x50] sm:$0xff] }
  0x47   : > { %3917 = vst [vmem:[%s6505_s29 + $0x1dfa] sm:$0xc0] %v95_v0  ;;  %3958 = vst [vmem:[%s6505_s29 + $0x22f9] sm:$0x80] %v95_v0  ;;  %v106_v9 = vld [vmem:[%s6500_s28 + $0x58] sm:$0xff]  ;;  %v107_v10 = vld [vmem:[%s6500_s28 + $0x60] sm:$0xff] }
  0x48   : > { %138 = vst [vmem:[%s6505_s29 + $0x8] sm:$0xff] %v96_v1  ;;  %3713 = vst [vmem:[%s6505_s29 + $0x507] sm:$0xff] %v96_v1  ;;  %v108_v11 = vld [vmem:[%s6500_s28 + $0x68] sm:$0xff]  ;;  %v110_v12 = vld [vmem:[%s6500_s28 + $0x78] sm:$0xff] }
  0x49   : > { %3754 = vst [vmem:[%s6505_s29 + $0xa06] sm:$0xff] %v96_v1  ;;  %3795 = vst [vmem:[%s6505_s29 + $0xf05] sm:$0xff] %v96_v1  ;;  %v111_v13 = vld [vmem:[%s6500_s28 + $0x80] sm:$0xff]  ;;  %v112_v14 = vld [vmem:[%s6500_s28 + $0x88] sm:$0xff] }
  0x4a   : > { %3836 = vst [vmem:[%s6505_s29 + $0x1404] sm:$0xff] %v96_v1  ;;  %3877 = vst [vmem:[%s6505_s29 + $0x1903] sm:$0xff] %v96_v1  ;;  %v113_v15 = vld [vmem:[%s6500_s28 + $0x90] sm:$0xff]  ;;  %v115_v16 = vld [vmem:[%s6500_s28 + $0xa0] sm:$0xff] }
  0x4b   : > { %3918 = vst [vmem:[%s6505_s29 + $0x1e02] sm:$0xff] %v96_v1  ;;  %3959 = vst [vmem:[%s6505_s29 + $0x2301] sm:$0xff] %v96_v1  ;;  %v116_v17 = vld [vmem:[%s6500_s28 + $0xa8] sm:$0xff]  ;;  %v117_v18 = vld [vmem:[%s6500_s28 + $0xb0] sm:$0xff] }
  0x4c   : > { %3999 = vst [vmem:[%s6505_s29 + $0x2800] sm:$0xff] %v96_v1  ;;  %139 = vst [vmem:[%s6505_s29 + $0x10] sm:$0xff] %v97_v2  ;;  %v118_v19 = vld [vmem:[%s6500_s28 + $0xb8] sm:$0xff]  ;;  %v120_v20 = vld [vmem:[%s6500_s28 + $0xc8] sm:$0xff] }
  0x4d   : > { %3714 = vst [vmem:[%s6505_s29 + $0x50f] sm:$0xff] %v97_v2  ;;  %3755 = vst [vmem:[%s6505_s29 + $0xa0e] sm:$0xff] %v97_v2  ;;  %v121_v21 = vld [vmem:[%s6500_s28 + $0xd0] sm:$0xff]  ;;  %v122_v22 = vld [vmem:[%s6500_s28 + $0xd8] sm:$0xff] }
  0x4e   : > { %3796 = vst [vmem:[%s6505_s29 + $0xf0d] sm:$0xff] %v97_v2  ;;  %3837 = vst [vmem:[%s6505_s29 + $0x140c] sm:$0xff] %v97_v2  ;;  %v123_v23 = vld [vmem:[%s6500_s28 + $0xe0] sm:$0xff]  ;;  %v125_v24 = vld [vmem:[%s6500_s28 + $0xf0] sm:$0xff] }
  0x4f   : > { %3878 = vst [vmem:[%s6505_s29 + $0x190b] sm:$0xff] %v97_v2  ;;  %3919 = vst [vmem:[%s6505_s29 + $0x1e0a] sm:$0xff] %v97_v2  ;;  %v126_v25 = vld [vmem:[%s6500_s28 + $0xf8] sm:$0xff]  ;;  %v127_v26 = vld [vmem:[%s6500_s28 + $0x100] sm:$0xff] }
  0x50   : > { %3960 = vst [vmem:[%s6505_s29 + $0x2309] sm:$0xff] %v97_v2  ;;  %4000 = vst [vmem:[%s6505_s29 + $0x2808] sm:$0xff] %v97_v2  ;;  %v128_v27 = vld [vmem:[%s6500_s28 + $0x108] sm:$0xff]  ;;  %v130_v28 = vld [vmem:[%s6500_s28 + $0x118] sm:$0xff] }
  0x51   : > { %140 = vst [vmem:[%s6505_s29 + $0x18] sm:$0xff] %v98_v3  ;;  %3715 = vst [vmem:[%s6505_s29 + $0x517] sm:$0xff] %v98_v3  ;;  %v131_v29 = vld [vmem:[%s6500_s28 + $0x120] sm:$0xff]  ;;  %v132_v30 = vld [vmem:[%s6500_s28 + $0x128] sm:$0xff] }
  0x52   : > { %3756 = vst [vmem:[%s6505_s29 + $0xa16] sm:$0xff] %v98_v3  ;;  %3797 = vst [vmem:[%s6505_s29 + $0xf15] sm:$0xff] %v98_v3  ;;  %v133_v31 = vld [vmem:[%s6500_s28 + $0x130] sm:$0xff]  ;;  %v99_v32 = vld [vmem:[%s6500_s28 + $0x20] sm:$0xff] }
  0x53   : > { %3838 = vst [vmem:[%s6505_s29 + $0x1414] sm:$0xff] %v98_v3  ;;  %3879 = vst [vmem:[%s6505_s29 + $0x1913] sm:$0xff] %v98_v3  ;;  %v104_v33 = vld [vmem:[%s6500_s28 + $0x48] sm:$0xff]  ;;  %v109_v34 = vld [vmem:[%s6500_s28 + $0x70] sm:$0xff] }
  0x54   : > { %3920 = vst [vmem:[%s6505_s29 + $0x1e12] sm:$0xff] %v98_v3  ;;  %3961 = vst [vmem:[%s6505_s29 + $0x2311] sm:$0xff] %v98_v3  ;;  %v114_v35 = vld [vmem:[%s6500_s28 + $0x98] sm:$0xff]  ;;  %v119_v36 = vld [vmem:[%s6500_s28 + $0xc0] sm:$0xff] }
  0x55   : > { %4001 = vst [vmem:[%s6505_s29 + $0x2810] sm:$0xff] %v98_v3  ;;  %141 = vst [vmem:[%s6505_s29 + $0x20] sm:$0xff] %v100_v4  ;;  %v124_v37 = vld [vmem:[%s6500_s28 + $0xe8] sm:$0xff]  ;;  %v129_v38 = vld [vmem:[%s6500_s28 + $0x110] sm:$0xff] }
  0x56   : > { %3717 = vst [vmem:[%s6505_s29 + $0x51f] sm:$0xfe] %v100_v4  ;;  %3758 = vst [vmem:[%s6505_s29 + $0xa1e] sm:$0xfc] %v100_v4  ;;  %v134_v39 = vld [vmem:[%s6500_s28 + $0x138] sm:$0xff] }
  0x57   : > { %3799 = vst [vmem:[%s6505_s29 + $0xf1d] sm:$0xf8] %v100_v4  ;;  %3840 = vst [vmem:[%s6505_s29 + $0x141c] sm:$0xf0] %v100_v4 }
  0x58   : > { %3881 = vst [vmem:[%s6505_s29 + $0x191b] sm:$0xe0] %v100_v4  ;;  %3922 = vst [vmem:[%s6505_s29 + $0x1e1a] sm:$0xc0] %v100_v4 }
  0x59   : > { %3963 = vst [vmem:[%s6505_s29 + $0x2319] sm:$0x80] %v100_v4  ;;  %142 = vst [vmem:[%s6505_s29 + $0x28] sm:$0xff] %v101_v5 }
  0x5a   : > { %3718 = vst [vmem:[%s6505_s29 + $0x527] sm:$0xff] %v101_v5  ;;  %3759 = vst [vmem:[%s6505_s29 + $0xa26] sm:$0xff] %v101_v5 }
  0x5b   : > { %3800 = vst [vmem:[%s6505_s29 + $0xf25] sm:$0xff] %v101_v5  ;;  %3841 = vst [vmem:[%s6505_s29 + $0x1424] sm:$0xff] %v101_v5 }
  0x5c   : > { %3882 = vst [vmem:[%s6505_s29 + $0x1923] sm:$0xff] %v101_v5  ;;  %3923 = vst [vmem:[%s6505_s29 + $0x1e22] sm:$0xff] %v101_v5 }
  0x5d   : > { %3964 = vst [vmem:[%s6505_s29 + $0x2321] sm:$0xff] %v101_v5  ;;  %4003 = vst [vmem:[%s6505_s29 + $0x2820] sm:$0xff] %v101_v5 }
  0x5e   : > { %143 = vst [vmem:[%s6505_s29 + $0x30] sm:$0xff] %v102_v6  ;;  %3719 = vst [vmem:[%s6505_s29 + $0x52f] sm:$0xff] %v102_v6 }
  0x5f   : > { %3760 = vst [vmem:[%s6505_s29 + $0xa2e] sm:$0xff] %v102_v6  ;;  %3801 = vst [vmem:[%s6505_s29 + $0xf2d] sm:$0xff] %v102_v6 }
  0x60   : > { %3842 = vst [vmem:[%s6505_s29 + $0x142c] sm:$0xff] %v102_v6  ;;  %3883 = vst [vmem:[%s6505_s29 + $0x192b] sm:$0xff] %v102_v6 }
  0x61   : > { %3924 = vst [vmem:[%s6505_s29 + $0x1e2a] sm:$0xff] %v102_v6  ;;  %3965 = vst [vmem:[%s6505_s29 + $0x2329] sm:$0xff] %v102_v6 }
  0x62   : > { %4004 = vst [vmem:[%s6505_s29 + $0x2828] sm:$0xff] %v102_v6  ;;  %144 = vst [vmem:[%s6505_s29 + $0x38] sm:$0xff] %v103_v7 }
  0x63   : > { %3720 = vst [vmem:[%s6505_s29 + $0x537] sm:$0xff] %v103_v7  ;;  %3761 = vst [vmem:[%s6505_s29 + $0xa36] sm:$0xff] %v103_v7 }
  0x64   : > { %3802 = vst [vmem:[%s6505_s29 + $0xf35] sm:$0xff] %v103_v7  ;;  %3843 = vst [vmem:[%s6505_s29 + $0x1434] sm:$0xff] %v103_v7 }
  0x65   : > { %3884 = vst [vmem:[%s6505_s29 + $0x1933] sm:$0xff] %v103_v7  ;;  %3925 = vst [vmem:[%s6505_s29 + $0x1e32] sm:$0xff] %v103_v7 }
  0x66   : > { %3966 = vst [vmem:[%s6505_s29 + $0x2331] sm:$0xff] %v103_v7  ;;  %4005 = vst [vmem:[%s6505_s29 + $0x2830] sm:$0xff] %v103_v7 }
  0x67   : > { %145 = vst [vmem:[%s6505_s29 + $0x40] sm:$0xff] %v105_v8  ;;  %3722 = vst [vmem:[%s6505_s29 + $0x53f] sm:$0xfe] %v105_v8 }
  0x68   : > { %3763 = vst [vmem:[%s6505_s29 + $0xa3e] sm:$0xfc] %v105_v8  ;;  %3804 = vst [vmem:[%s6505_s29 + $0xf3d] sm:$0xf8] %v105_v8 }
  0x69   : > { %3845 = vst [vmem:[%s6505_s29 + $0x143c] sm:$0xf0] %v105_v8  ;;  %3886 = vst [vmem:[%s6505_s29 + $0x193b] sm:$0xe0] %v105_v8 }
  0x6a   : > { %3927 = vst [vmem:[%s6505_s29 + $0x1e3a] sm:$0xc0] %v105_v8  ;;  %3968 = vst [vmem:[%s6505_s29 + $0x2339] sm:$0x80] %v105_v8 }
  0x6b   : > { %146 = vst [vmem:[%s6505_s29 + $0x48] sm:$0xff] %v106_v9  ;;  %3723 = vst [vmem:[%s6505_s29 + $0x547] sm:$0xff] %v106_v9 }
  0x6c   : > { %3764 = vst [vmem:[%s6505_s29 + $0xa46] sm:$0xff] %v106_v9  ;;  %3805 = vst [vmem:[%s6505_s29 + $0xf45] sm:$0xff] %v106_v9 }
  0x6d   : > { %3846 = vst [vmem:[%s6505_s29 + $0x1444] sm:$0xff] %v106_v9  ;;  %3887 = vst [vmem:[%s6505_s29 + $0x1943] sm:$0xff] %v106_v9 }
  0x6e   : > { %3928 = vst [vmem:[%s6505_s29 + $0x1e42] sm:$0xff] %v106_v9  ;;  %3969 = vst [vmem:[%s6505_s29 + $0x2341] sm:$0xff] %v106_v9 }
  0x6f   : > { %4007 = vst [vmem:[%s6505_s29 + $0x2840] sm:$0xff] %v106_v9  ;;  %147 = vst [vmem:[%s6505_s29 + $0x50] sm:$0xff] %v107_v10 }
  0x70   : > { %3724 = vst [vmem:[%s6505_s29 + $0x54f] sm:$0xff] %v107_v10  ;;  %3765 = vst [vmem:[%s6505_s29 + $0xa4e] sm:$0xff] %v107_v10 }
  0x71   : > { %3806 = vst [vmem:[%s6505_s29 + $0xf4d] sm:$0xff] %v107_v10  ;;  %3847 = vst [vmem:[%s6505_s29 + $0x144c] sm:$0xff] %v107_v10 }
  0x72   : > { %3888 = vst [vmem:[%s6505_s29 + $0x194b] sm:$0xff] %v107_v10  ;;  %3929 = vst [vmem:[%s6505_s29 + $0x1e4a] sm:$0xff] %v107_v10 }
  0x73   : > { %3970 = vst [vmem:[%s6505_s29 + $0x2349] sm:$0xff] %v107_v10  ;;  %4008 = vst [vmem:[%s6505_s29 + $0x2848] sm:$0xff] %v107_v10 }
  0x74   : > { %148 = vst [vmem:[%s6505_s29 + $0x58] sm:$0xff] %v108_v11  ;;  %3725 = vst [vmem:[%s6505_s29 + $0x557] sm:$0xff] %v108_v11 }
  0x75   : > { %3766 = vst [vmem:[%s6505_s29 + $0xa56] sm:$0xff] %v108_v11  ;;  %3807 = vst [vmem:[%s6505_s29 + $0xf55] sm:$0xff] %v108_v11 }
  0x76   : > { %3848 = vst [vmem:[%s6505_s29 + $0x1454] sm:$0xff] %v108_v11  ;;  %3889 = vst [vmem:[%s6505_s29 + $0x1953] sm:$0xff] %v108_v11 }
  0x77   : > { %3930 = vst [vmem:[%s6505_s29 + $0x1e52] sm:$0xff] %v108_v11  ;;  %3971 = vst [vmem:[%s6505_s29 + $0x2351] sm:$0xff] %v108_v11 }
  0x78   : > { %4009 = vst [vmem:[%s6505_s29 + $0x2850] sm:$0xff] %v108_v11  ;;  %149 = vst [vmem:[%s6505_s29 + $0x60] sm:$0xff] %v110_v12 }
  0x79   : > { %3727 = vst [vmem:[%s6505_s29 + $0x55f] sm:$0xfe] %v110_v12  ;;  %3768 = vst [vmem:[%s6505_s29 + $0xa5e] sm:$0xfc] %v110_v12 }
  0x7a   : > { %3809 = vst [vmem:[%s6505_s29 + $0xf5d] sm:$0xf8] %v110_v12  ;;  %3850 = vst [vmem:[%s6505_s29 + $0x145c] sm:$0xf0] %v110_v12 }
  0x7b   : > { %3891 = vst [vmem:[%s6505_s29 + $0x195b] sm:$0xe0] %v110_v12  ;;  %3932 = vst [vmem:[%s6505_s29 + $0x1e5a] sm:$0xc0] %v110_v12 }
  0x7c   : > { %3973 = vst [vmem:[%s6505_s29 + $0x2359] sm:$0x80] %v110_v12  ;;  %150 = vst [vmem:[%s6505_s29 + $0x68] sm:$0xff] %v111_v13 }
  0x7d   : > { %3728 = vst [vmem:[%s6505_s29 + $0x567] sm:$0xff] %v111_v13  ;;  %3769 = vst [vmem:[%s6505_s29 + $0xa66] sm:$0xff] %v111_v13 }
  0x7e   : > { %3810 = vst [vmem:[%s6505_s29 + $0xf65] sm:$0xff] %v111_v13  ;;  %3851 = vst [vmem:[%s6505_s29 + $0x1464] sm:$0xff] %v111_v13 }
  0x7f   : > { %3892 = vst [vmem:[%s6505_s29 + $0x1963] sm:$0xff] %v111_v13  ;;  %3933 = vst [vmem:[%s6505_s29 + $0x1e62] sm:$0xff] %v111_v13 }
  0x80   : > { %3974 = vst [vmem:[%s6505_s29 + $0x2361] sm:$0xff] %v111_v13  ;;  %4011 = vst [vmem:[%s6505_s29 + $0x2860] sm:$0xff] %v111_v13 }
  0x81   : > { %151 = vst [vmem:[%s6505_s29 + $0x70] sm:$0xff] %v112_v14  ;;  %3729 = vst [vmem:[%s6505_s29 + $0x56f] sm:$0xff] %v112_v14 }
  0x82   : > { %3770 = vst [vmem:[%s6505_s29 + $0xa6e] sm:$0xff] %v112_v14  ;;  %3811 = vst [vmem:[%s6505_s29 + $0xf6d] sm:$0xff] %v112_v14 }
  0x83   : > { %3852 = vst [vmem:[%s6505_s29 + $0x146c] sm:$0xff] %v112_v14  ;;  %3893 = vst [vmem:[%s6505_s29 + $0x196b] sm:$0xff] %v112_v14 }
  0x84   : > { %3934 = vst [vmem:[%s6505_s29 + $0x1e6a] sm:$0xff] %v112_v14  ;;  %3975 = vst [vmem:[%s6505_s29 + $0x2369] sm:$0xff] %v112_v14 }
  0x85   : > { %4012 = vst [vmem:[%s6505_s29 + $0x2868] sm:$0xff] %v112_v14  ;;  %152 = vst [vmem:[%s6505_s29 + $0x78] sm:$0xff] %v113_v15 }
  0x86   : > { %3730 = vst [vmem:[%s6505_s29 + $0x577] sm:$0xff] %v113_v15  ;;  %3771 = vst [vmem:[%s6505_s29 + $0xa76] sm:$0xff] %v113_v15 }
  0x87   : > { %3812 = vst [vmem:[%s6505_s29 + $0xf75] sm:$0xff] %v113_v15  ;;  %3853 = vst [vmem:[%s6505_s29 + $0x1474] sm:$0xff] %v113_v15 }
  0x88   : > { %3894 = vst [vmem:[%s6505_s29 + $0x1973] sm:$0xff] %v113_v15  ;;  %3935 = vst [vmem:[%s6505_s29 + $0x1e72] sm:$0xff] %v113_v15 }
  0x89   : > { %3976 = vst [vmem:[%s6505_s29 + $0x2371] sm:$0xff] %v113_v15  ;;  %4013 = vst [vmem:[%s6505_s29 + $0x2870] sm:$0xff] %v113_v15 }
  0x8a   : > { %153 = vst [vmem:[%s6505_s29 + $0x80] sm:$0xff] %v115_v16  ;;  %3732 = vst [vmem:[%s6505_s29 + $0x57f] sm:$0xfe] %v115_v16 }
  0x8b   : > { %3773 = vst [vmem:[%s6505_s29 + $0xa7e] sm:$0xfc] %v115_v16  ;;  %3814 = vst [vmem:[%s6505_s29 + $0xf7d] sm:$0xf8] %v115_v16 }
  0x8c   : > { %3855 = vst [vmem:[%s6505_s29 + $0x147c] sm:$0xf0] %v115_v16  ;;  %3896 = vst [vmem:[%s6505_s29 + $0x197b] sm:$0xe0] %v115_v16 }
  0x8d   : > { %3937 = vst [vmem:[%s6505_s29 + $0x1e7a] sm:$0xc0] %v115_v16  ;;  %3978 = vst [vmem:[%s6505_s29 + $0x2379] sm:$0x80] %v115_v16 }
  0x8e   : > { %154 = vst [vmem:[%s6505_s29 + $0x88] sm:$0xff] %v116_v17  ;;  %3733 = vst [vmem:[%s6505_s29 + $0x587] sm:$0xff] %v116_v17 }
  0x8f   : > { %3774 = vst [vmem:[%s6505_s29 + $0xa86] sm:$0xff] %v116_v17  ;;  %3815 = vst [vmem:[%s6505_s29 + $0xf85] sm:$0xff] %v116_v17 }
  0x90   : > { %3856 = vst [vmem:[%s6505_s29 + $0x1484] sm:$0xff] %v116_v17  ;;  %3897 = vst [vmem:[%s6505_s29 + $0x1983] sm:$0xff] %v116_v17 }
  0x91   : > { %3938 = vst [vmem:[%s6505_s29 + $0x1e82] sm:$0xff] %v116_v17  ;;  %3979 = vst [vmem:[%s6505_s29 + $0x2381] sm:$0xff] %v116_v17 }
  0x92   : > { %4015 = vst [vmem:[%s6505_s29 + $0x2880] sm:$0xff] %v116_v17  ;;  %155 = vst [vmem:[%s6505_s29 + $0x90] sm:$0xff] %v117_v18 }
  0x93   : > { %3734 = vst [vmem:[%s6505_s29 + $0x58f] sm:$0xff] %v117_v18  ;;  %3775 = vst [vmem:[%s6505_s29 + $0xa8e] sm:$0xff] %v117_v18 }
  0x94   : > { %3816 = vst [vmem:[%s6505_s29 + $0xf8d] sm:$0xff] %v117_v18  ;;  %3857 = vst [vmem:[%s6505_s29 + $0x148c] sm:$0xff] %v117_v18 }
  0x95   : > { %3898 = vst [vmem:[%s6505_s29 + $0x198b] sm:$0xff] %v117_v18  ;;  %3939 = vst [vmem:[%s6505_s29 + $0x1e8a] sm:$0xff] %v117_v18 }
  0x96   : > { %3980 = vst [vmem:[%s6505_s29 + $0x2389] sm:$0xff] %v117_v18  ;;  %4016 = vst [vmem:[%s6505_s29 + $0x2888] sm:$0xff] %v117_v18 }
  0x97   : > { %156 = vst [vmem:[%s6505_s29 + $0x98] sm:$0xff] %v118_v19  ;;  %3735 = vst [vmem:[%s6505_s29 + $0x597] sm:$0xff] %v118_v19 }
  0x98   : > { %3776 = vst [vmem:[%s6505_s29 + $0xa96] sm:$0xff] %v118_v19  ;;  %3817 = vst [vmem:[%s6505_s29 + $0xf95] sm:$0xff] %v118_v19 }
  0x99   : > { %3858 = vst [vmem:[%s6505_s29 + $0x1494] sm:$0xff] %v118_v19  ;;  %3899 = vst [vmem:[%s6505_s29 + $0x1993] sm:$0xff] %v118_v19 }
  0x9a   : > { %3940 = vst [vmem:[%s6505_s29 + $0x1e92] sm:$0xff] %v118_v19  ;;  %3981 = vst [vmem:[%s6505_s29 + $0x2391] sm:$0xff] %v118_v19 }
  0x9b   : > { %4017 = vst [vmem:[%s6505_s29 + $0x2890] sm:$0xff] %v118_v19  ;;  %157 = vst [vmem:[%s6505_s29 + $0xa0] sm:$0xff] %v120_v20 }
  0x9c   : > { %3737 = vst [vmem:[%s6505_s29 + $0x59f] sm:$0xfe] %v120_v20  ;;  %3778 = vst [vmem:[%s6505_s29 + $0xa9e] sm:$0xfc] %v120_v20 }
  0x9d   : > { %3819 = vst [vmem:[%s6505_s29 + $0xf9d] sm:$0xf8] %v120_v20  ;;  %3860 = vst [vmem:[%s6505_s29 + $0x149c] sm:$0xf0] %v120_v20 }
  0x9e   : > { %3901 = vst [vmem:[%s6505_s29 + $0x199b] sm:$0xe0] %v120_v20  ;;  %3942 = vst [vmem:[%s6505_s29 + $0x1e9a] sm:$0xc0] %v120_v20 }
  0x9f   : > { %3983 = vst [vmem:[%s6505_s29 + $0x2399] sm:$0x80] %v120_v20  ;;  %158 = vst [vmem:[%s6505_s29 + $0xa8] sm:$0xff] %v121_v21 }
  0xa0   : > { %3738 = vst [vmem:[%s6505_s29 + $0x5a7] sm:$0xff] %v121_v21  ;;  %3779 = vst [vmem:[%s6505_s29 + $0xaa6] sm:$0xff] %v121_v21 }
  0xa1   : > { %3820 = vst [vmem:[%s6505_s29 + $0xfa5] sm:$0xff] %v121_v21  ;;  %3861 = vst [vmem:[%s6505_s29 + $0x14a4] sm:$0xff] %v121_v21 }
  0xa2   : > { %3902 = vst [vmem:[%s6505_s29 + $0x19a3] sm:$0xff] %v121_v21  ;;  %3943 = vst [vmem:[%s6505_s29 + $0x1ea2] sm:$0xff] %v121_v21 }
  0xa3   : > { %3984 = vst [vmem:[%s6505_s29 + $0x23a1] sm:$0xff] %v121_v21  ;;  %4019 = vst [vmem:[%s6505_s29 + $0x28a0] sm:$0xff] %v121_v21 }
  0xa4   : > { %159 = vst [vmem:[%s6505_s29 + $0xb0] sm:$0xff] %v122_v22  ;;  %3739 = vst [vmem:[%s6505_s29 + $0x5af] sm:$0xff] %v122_v22 }
  0xa5   : > { %3780 = vst [vmem:[%s6505_s29 + $0xaae] sm:$0xff] %v122_v22  ;;  %3821 = vst [vmem:[%s6505_s29 + $0xfad] sm:$0xff] %v122_v22 }
  0xa6   : > { %3862 = vst [vmem:[%s6505_s29 + $0x14ac] sm:$0xff] %v122_v22  ;;  %3903 = vst [vmem:[%s6505_s29 + $0x19ab] sm:$0xff] %v122_v22 }
  0xa7   : > { %3944 = vst [vmem:[%s6505_s29 + $0x1eaa] sm:$0xff] %v122_v22  ;;  %3985 = vst [vmem:[%s6505_s29 + $0x23a9] sm:$0xff] %v122_v22 }
  0xa8   : > { %4020 = vst [vmem:[%s6505_s29 + $0x28a8] sm:$0xff] %v122_v22  ;;  %160 = vst [vmem:[%s6505_s29 + $0xb8] sm:$0xff] %v123_v23 }
  0xa9   : > { %3740 = vst [vmem:[%s6505_s29 + $0x5b7] sm:$0xff] %v123_v23  ;;  %3781 = vst [vmem:[%s6505_s29 + $0xab6] sm:$0xff] %v123_v23 }
  0xaa   : > { %3822 = vst [vmem:[%s6505_s29 + $0xfb5] sm:$0xff] %v123_v23  ;;  %3863 = vst [vmem:[%s6505_s29 + $0x14b4] sm:$0xff] %v123_v23 }
  0xab   : > { %3904 = vst [vmem:[%s6505_s29 + $0x19b3] sm:$0xff] %v123_v23  ;;  %3945 = vst [vmem:[%s6505_s29 + $0x1eb2] sm:$0xff] %v123_v23 }
  0xac   : > { %3986 = vst [vmem:[%s6505_s29 + $0x23b1] sm:$0xff] %v123_v23  ;;  %4021 = vst [vmem:[%s6505_s29 + $0x28b0] sm:$0xff] %v123_v23 }
  0xad   : > { %161 = vst [vmem:[%s6505_s29 + $0xc0] sm:$0xff] %v125_v24  ;;  %3742 = vst [vmem:[%s6505_s29 + $0x5bf] sm:$0xfe] %v125_v24 }
  0xae   : > { %3783 = vst [vmem:[%s6505_s29 + $0xabe] sm:$0xfc] %v125_v24  ;;  %3824 = vst [vmem:[%s6505_s29 + $0xfbd] sm:$0xf8] %v125_v24 }
  0xaf   : > { %3865 = vst [vmem:[%s6505_s29 + $0x14bc] sm:$0xf0] %v125_v24  ;;  %3906 = vst [vmem:[%s6505_s29 + $0x19bb] sm:$0xe0] %v125_v24 }
  0xb0   : > { %3947 = vst [vmem:[%s6505_s29 + $0x1eba] sm:$0xc0] %v125_v24  ;;  %3988 = vst [vmem:[%s6505_s29 + $0x23b9] sm:$0x80] %v125_v24 }
  0xb1   : > { %162 = vst [vmem:[%s6505_s29 + $0xc8] sm:$0xff] %v126_v25  ;;  %3743 = vst [vmem:[%s6505_s29 + $0x5c7] sm:$0xff] %v126_v25 }
  0xb2   : > { %3784 = vst [vmem:[%s6505_s29 + $0xac6] sm:$0xff] %v126_v25  ;;  %3825 = vst [vmem:[%s6505_s29 + $0xfc5] sm:$0xff] %v126_v25 }
  0xb3   : > { %3866 = vst [vmem:[%s6505_s29 + $0x14c4] sm:$0xff] %v126_v25  ;;  %3907 = vst [vmem:[%s6505_s29 + $0x19c3] sm:$0xff] %v126_v25 }
  0xb4   : > { %3948 = vst [vmem:[%s6505_s29 + $0x1ec2] sm:$0xff] %v126_v25  ;;  %3989 = vst [vmem:[%s6505_s29 + $0x23c1] sm:$0xff] %v126_v25 }
  0xb5   : > { %4023 = vst [vmem:[%s6505_s29 + $0x28c0] sm:$0xff] %v126_v25  ;;  %163 = vst [vmem:[%s6505_s29 + $0xd0] sm:$0xff] %v127_v26 }
  0xb6   : > { %3744 = vst [vmem:[%s6505_s29 + $0x5cf] sm:$0xff] %v127_v26  ;;  %3785 = vst [vmem:[%s6505_s29 + $0xace] sm:$0xff] %v127_v26 }
  0xb7   : > { %3826 = vst [vmem:[%s6505_s29 + $0xfcd] sm:$0xff] %v127_v26  ;;  %3867 = vst [vmem:[%s6505_s29 + $0x14cc] sm:$0xff] %v127_v26 }
  0xb8   : > { %3908 = vst [vmem:[%s6505_s29 + $0x19cb] sm:$0xff] %v127_v26  ;;  %3949 = vst [vmem:[%s6505_s29 + $0x1eca] sm:$0xff] %v127_v26 }
  0xb9   : > { %3990 = vst [vmem:[%s6505_s29 + $0x23c9] sm:$0xff] %v127_v26  ;;  %4024 = vst [vmem:[%s6505_s29 + $0x28c8] sm:$0xff] %v127_v26 }
  0xba   : > { %164 = vst [vmem:[%s6505_s29 + $0xd8] sm:$0xff] %v128_v27  ;;  %3745 = vst [vmem:[%s6505_s29 + $0x5d7] sm:$0xff] %v128_v27 }
  0xbb   : > { %3786 = vst [vmem:[%s6505_s29 + $0xad6] sm:$0xff] %v128_v27  ;;  %3827 = vst [vmem:[%s6505_s29 + $0xfd5] sm:$0xff] %v128_v27 }
  0xbc   : > { %3868 = vst [vmem:[%s6505_s29 + $0x14d4] sm:$0xff] %v128_v27  ;;  %3909 = vst [vmem:[%s6505_s29 + $0x19d3] sm:$0xff] %v128_v27 }
  0xbd   : > { %3950 = vst [vmem:[%s6505_s29 + $0x1ed2] sm:$0xff] %v128_v27  ;;  %3991 = vst [vmem:[%s6505_s29 + $0x23d1] sm:$0xff] %v128_v27 }
  0xbe   : > { %4025 = vst [vmem:[%s6505_s29 + $0x28d0] sm:$0xff] %v128_v27  ;;  %165 = vst [vmem:[%s6505_s29 + $0xe0] sm:$0xff] %v130_v28 }
  0xbf   : > { %3747 = vst [vmem:[%s6505_s29 + $0x5df] sm:$0xfe] %v130_v28  ;;  %3788 = vst [vmem:[%s6505_s29 + $0xade] sm:$0xfc] %v130_v28 }
  0xc0   : > { %3829 = vst [vmem:[%s6505_s29 + $0xfdd] sm:$0xf8] %v130_v28  ;;  %3870 = vst [vmem:[%s6505_s29 + $0x14dc] sm:$0xf0] %v130_v28 }
  0xc1   : > { %3911 = vst [vmem:[%s6505_s29 + $0x19db] sm:$0xe0] %v130_v28  ;;  %3952 = vst [vmem:[%s6505_s29 + $0x1eda] sm:$0xc0] %v130_v28 }
  0xc2   : > { %3993 = vst [vmem:[%s6505_s29 + $0x23d9] sm:$0x80] %v130_v28  ;;  %166 = vst [vmem:[%s6505_s29 + $0xe8] sm:$0xff] %v131_v29 }
  0xc3   : > { %3748 = vst [vmem:[%s6505_s29 + $0x5e7] sm:$0xff] %v131_v29  ;;  %3789 = vst [vmem:[%s6505_s29 + $0xae6] sm:$0xff] %v131_v29 }
  0xc4   : > { %3830 = vst [vmem:[%s6505_s29 + $0xfe5] sm:$0xff] %v131_v29  ;;  %3871 = vst [vmem:[%s6505_s29 + $0x14e4] sm:$0xff] %v131_v29 }
  0xc5   : > { %3912 = vst [vmem:[%s6505_s29 + $0x19e3] sm:$0xff] %v131_v29  ;;  %3953 = vst [vmem:[%s6505_s29 + $0x1ee2] sm:$0xff] %v131_v29 }
  0xc6   : > { %3994 = vst [vmem:[%s6505_s29 + $0x23e1] sm:$0xff] %v131_v29  ;;  %4027 = vst [vmem:[%s6505_s29 + $0x28e0] sm:$0xff] %v131_v29 }
  0xc7   : > { %167 = vst [vmem:[%s6505_s29 + $0xf0] sm:$0xff] %v132_v30  ;;  %3749 = vst [vmem:[%s6505_s29 + $0x5ef] sm:$0xff] %v132_v30 }
  0xc8   : > { %3790 = vst [vmem:[%s6505_s29 + $0xaee] sm:$0xff] %v132_v30  ;;  %3831 = vst [vmem:[%s6505_s29 + $0xfed] sm:$0xff] %v132_v30 }
  0xc9   : > { %3872 = vst [vmem:[%s6505_s29 + $0x14ec] sm:$0xff] %v132_v30  ;;  %3913 = vst [vmem:[%s6505_s29 + $0x19eb] sm:$0xff] %v132_v30 }
  0xca   : > { %3954 = vst [vmem:[%s6505_s29 + $0x1eea] sm:$0xff] %v132_v30  ;;  %3995 = vst [vmem:[%s6505_s29 + $0x23e9] sm:$0xff] %v132_v30 }
  0xcb   : > { %4028 = vst [vmem:[%s6505_s29 + $0x28e8] sm:$0xff] %v132_v30  ;;  %168 = vst [vmem:[%s6505_s29 + $0xf8] sm:$0xff] %v133_v31 }
  0xcc   : > { %3750 = vst [vmem:[%s6505_s29 + $0x5f7] sm:$0xff] %v133_v31  ;;  %3791 = vst [vmem:[%s6505_s29 + $0xaf6] sm:$0xff] %v133_v31 }
  0xcd   : > { %3832 = vst [vmem:[%s6505_s29 + $0xff5] sm:$0xff] %v133_v31  ;;  %3873 = vst [vmem:[%s6505_s29 + $0x14f4] sm:$0xff] %v133_v31 }
  0xce   : > { %3914 = vst [vmem:[%s6505_s29 + $0x19f3] sm:$0xff] %v133_v31  ;;  %3955 = vst [vmem:[%s6505_s29 + $0x1ef2] sm:$0xff] %v133_v31 }
  0xcf   : > { %3996 = vst [vmem:[%s6505_s29 + $0x23f1] sm:$0xff] %v133_v31  ;;  %4029 = vst [vmem:[%s6505_s29 + $0x28f0] sm:$0xff] %v133_v31 }
  0xd0   : > { %3716 = vst [vmem:[%s6505_s29 + $0x51f] sm:$0x1] %v99_v32  ;;  %3757 = vst [vmem:[%s6505_s29 + $0xa1e] sm:$0x3] %v99_v32 }
  0xd1   : > { %3798 = vst [vmem:[%s6505_s29 + $0xf1d] sm:$0x7] %v99_v32  ;;  %3839 = vst [vmem:[%s6505_s29 + $0x141c] sm:$0xf] %v99_v32 }
  0xd2   : > { %3880 = vst [vmem:[%s6505_s29 + $0x191b] sm:$0x1f] %v99_v32  ;;  %3921 = vst [vmem:[%s6505_s29 + $0x1e1a] sm:$0x3f] %v99_v32 }
  0xd3   : > { %3962 = vst [vmem:[%s6505_s29 + $0x2319] sm:$0x7f] %v99_v32  ;;  %4002 = vst [vmem:[%s6505_s29 + $0x2818] sm:$0xff] %v99_v32 }
  0xd4   : > { %3721 = vst [vmem:[%s6505_s29 + $0x53f] sm:$0x1] %v104_v33  ;;  %3762 = vst [vmem:[%s6505_s29 + $0xa3e] sm:$0x3] %v104_v33 }
  0xd5   : > { %3803 = vst [vmem:[%s6505_s29 + $0xf3d] sm:$0x7] %v104_v33  ;;  %3844 = vst [vmem:[%s6505_s29 + $0x143c] sm:$0xf] %v104_v33 }
  0xd6   : > { %3885 = vst [vmem:[%s6505_s29 + $0x193b] sm:$0x1f] %v104_v33  ;;  %3926 = vst [vmem:[%s6505_s29 + $0x1e3a] sm:$0x3f] %v104_v33 }
  0xd7   : > { %3967 = vst [vmem:[%s6505_s29 + $0x2339] sm:$0x7f] %v104_v33  ;;  %4006 = vst [vmem:[%s6505_s29 + $0x2838] sm:$0xff] %v104_v33 }
  0xd8   : > { %3726 = vst [vmem:[%s6505_s29 + $0x55f] sm:$0x1] %v109_v34  ;;  %3767 = vst [vmem:[%s6505_s29 + $0xa5e] sm:$0x3] %v109_v34 }
  0xd9   : > { %3808 = vst [vmem:[%s6505_s29 + $0xf5d] sm:$0x7] %v109_v34  ;;  %3849 = vst [vmem:[%s6505_s29 + $0x145c] sm:$0xf] %v109_v34 }
  0xda   : > { %3890 = vst [vmem:[%s6505_s29 + $0x195b] sm:$0x1f] %v109_v34  ;;  %3931 = vst [vmem:[%s6505_s29 + $0x1e5a] sm:$0x3f] %v109_v34 }
  0xdb   : > { %3972 = vst [vmem:[%s6505_s29 + $0x2359] sm:$0x7f] %v109_v34  ;;  %4010 = vst [vmem:[%s6505_s29 + $0x2858] sm:$0xff] %v109_v34 }
  0xdc   : > { %3731 = vst [vmem:[%s6505_s29 + $0x57f] sm:$0x1] %v114_v35  ;;  %3772 = vst [vmem:[%s6505_s29 + $0xa7e] sm:$0x3] %v114_v35 }
  0xdd   : > { %3813 = vst [vmem:[%s6505_s29 + $0xf7d] sm:$0x7] %v114_v35  ;;  %3854 = vst [vmem:[%s6505_s29 + $0x147c] sm:$0xf] %v114_v35 }
  0xde   : > { %3895 = vst [vmem:[%s6505_s29 + $0x197b] sm:$0x1f] %v114_v35  ;;  %3936 = vst [vmem:[%s6505_s29 + $0x1e7a] sm:$0x3f] %v114_v35 }
  0xdf   : > { %3977 = vst [vmem:[%s6505_s29 + $0x2379] sm:$0x7f] %v114_v35  ;;  %4014 = vst [vmem:[%s6505_s29 + $0x2878] sm:$0xff] %v114_v35 }
  0xe0   : > { %3736 = vst [vmem:[%s6505_s29 + $0x59f] sm:$0x1] %v119_v36  ;;  %3777 = vst [vmem:[%s6505_s29 + $0xa9e] sm:$0x3] %v119_v36 }
  0xe1   : > { %3818 = vst [vmem:[%s6505_s29 + $0xf9d] sm:$0x7] %v119_v36  ;;  %3859 = vst [vmem:[%s6505_s29 + $0x149c] sm:$0xf] %v119_v36 }
  0xe2   : > { %3900 = vst [vmem:[%s6505_s29 + $0x199b] sm:$0x1f] %v119_v36  ;;  %3941 = vst [vmem:[%s6505_s29 + $0x1e9a] sm:$0x3f] %v119_v36 }
  0xe3   : > { %3982 = vst [vmem:[%s6505_s29 + $0x2399] sm:$0x7f] %v119_v36  ;;  %4018 = vst [vmem:[%s6505_s29 + $0x2898] sm:$0xff] %v119_v36 }
  0xe4   : > { %3741 = vst [vmem:[%s6505_s29 + $0x5bf] sm:$0x1] %v124_v37  ;;  %3782 = vst [vmem:[%s6505_s29 + $0xabe] sm:$0x3] %v124_v37 }
  0xe5   : > { %3823 = vst [vmem:[%s6505_s29 + $0xfbd] sm:$0x7] %v124_v37  ;;  %3864 = vst [vmem:[%s6505_s29 + $0x14bc] sm:$0xf] %v124_v37 }
  0xe6   : > { %3905 = vst [vmem:[%s6505_s29 + $0x19bb] sm:$0x1f] %v124_v37  ;;  %3946 = vst [vmem:[%s6505_s29 + $0x1eba] sm:$0x3f] %v124_v37 }
  0xe7   : > { %3987 = vst [vmem:[%s6505_s29 + $0x23b9] sm:$0x7f] %v124_v37  ;;  %4022 = vst [vmem:[%s6505_s29 + $0x28b8] sm:$0xff] %v124_v37 }
  0xe8   : > { %3746 = vst [vmem:[%s6505_s29 + $0x5df] sm:$0x1] %v129_v38  ;;  %3787 = vst [vmem:[%s6505_s29 + $0xade] sm:$0x3] %v129_v38 }
  0xe9   : > { %3828 = vst [vmem:[%s6505_s29 + $0xfdd] sm:$0x7] %v129_v38  ;;  %3869 = vst [vmem:[%s6505_s29 + $0x14dc] sm:$0xf] %v129_v38  ;;  %90 = sbr.rel (!%p88_p11) target bundleno = 64 (0x40), region = 170 }
  0xea   : > { %3910 = vst [vmem:[%s6505_s29 + $0x19db] sm:$0x1f] %v129_v38  ;;  %3951 = vst [vmem:[%s6505_s29 + $0x1eda] sm:$0x3f] %v129_v38 }
  0xeb   : > { %3992 = vst [vmem:[%s6505_s29 + $0x23d9] sm:$0x7f] %v129_v38  ;;  %4026 = vst [vmem:[%s6505_s29 + $0x28d8] sm:$0xff] %v129_v38 }
  0xec   : > { %3751 = vst [vmem:[%s6505_s29 + $0x5ff] sm:$0x1] %v134_v39  ;;  %3792 = vst [vmem:[%s6505_s29 + $0xafe] sm:$0x3] %v134_v39 }
  0xed   : > { %3833 = vst [vmem:[%s6505_s29 + $0xffd] sm:$0x7] %v134_v39  ;;  %3874 = vst [vmem:[%s6505_s29 + $0x14fc] sm:$0xf] %v134_v39 }
  0xee   : > { %3915 = vst [vmem:[%s6505_s29 + $0x19fb] sm:$0x1f] %v134_v39  ;;  %3956 = vst [vmem:[%s6505_s29 + $0x1efa] sm:$0x3f] %v134_v39 }
  0xef   : > { %3997 = vst [vmem:[%s6505_s29 + $0x23f9] sm:$0x7f] %v134_v39  ;;  %4030 = vst [vmem:[%s6505_s29 + $0x28f8] sm:$0xff] %v134_v39 }
  0xf0 LB: > { %s6897_s8 = sld [smem:[#allocation8 + %s6045_s30]]  ;;  %s6899_s9 = smov 0   ;;  %s6045_s30 = sphi %s6891_s30, %s502_s30  }
  0xf1 LB: >> { %s4031_s6 = sshll.u32 %s6049_s9, 3  ;;  %v6905_v40 = vmov 0.0   ;;  %v6907_v41 = vmov 0.0   ;;  %v6909_v42 = vmov 0.0   ;;  %v6911_v43 = vmov 0.0   ;;  %s6969_s0 = smov 0   ;;  %s6049_s9 = sphi %s6899_s9, %s509_s9  }
  0xf2   : >> { %v6913_v44 = vmov 0.0   ;;  %v6915_v45 = vmov 0.0   ;;  %v6917_v46 = vmov 0.0   ;;  %v6919_v47 = vmov 0.0  }
  0xf3   : >> { %v6921_v48 = vmov 0.0   ;;  %v6923_v49 = vmov 0.0   ;;  %v6925_v50 = vmov 0.0   ;;  %v6927_v51 = vmov 0.0  }
  0xf4   : >> { %v6929_v52 = vmov 0.0   ;;  %v6931_v53 = vmov 0.0   ;;  %v6933_v54 = vmov 0.0   ;;  %v6935_v55 = vmov 0.0  }
  0xf5   : >> { %v6937_v56 = vmov 0.0   ;;  %v6939_v57 = vmov 0.0   ;;  %v6941_v58 = vmov 0.0   ;;  %v6943_v59 = vmov 0.0  }
  0xf6   : >> { %v6945_v60 = vmov 0.0   ;;  %v6947_v61 = vmov 0.0   ;;  %v6949_v62 = vmov 0.0   ;;  %v6951_v63 = vmov 0.0  }
  0xf7   : >> { %v6953_v0 = vmov 0.0   ;;  %v6955_v1 = vmov 0.0   ;;  %v6957_v2 = vmov 0.0   ;;  %v6959_v3 = vmov 0.0  }
  0xf8   : >> { %v6961_v4 = vmov 0.0   ;;  %v6963_v5 = vmov 0.0   ;;  %v6965_v6 = vmov 0.0   ;;  %v6967_v7 = vmov 0.0  }
  0xf9 LB: >>> { %10532 = vst [vmem:[#allocation17_spill] sm:$0xff] %v6053_v40  ;;  %10533 = vst [vmem:[#allocation18_spill] sm:$0xff] %v6057_v41  ;;  %s550_s10 = smul.u32 81, %s6045_s30  ;;  %s549_s4 = sadd.s32 %s6181_s0, %s4031_s6  ;;  %s6181_s0 = sphi %s6969_s0, %s10871_s0   ;;  %v6177_v7 = vphi %v6967_v7, %v10870_v7   ;;  %v6173_v6 = vphi %v6965_v6, %v10869_v6   ;;  %v6169_v5 = vphi %v6963_v5, %v10868_v5   ;;  %v6165_v4 = vphi %v6961_v4, %v10867_v4   ;;  %v6161_v3 = vphi %v6959_v3, %v10866_v3   ;;  %v6157_v2 = vphi %v6957_v2, %v10865_v2   ;;  %v6153_v1 = vphi %v6955_v1, %v10864_v1   ;;  %v6149_v0 = vphi %v6953_v0, %v10863_v0   ;;  %v6145_v63 = vphi %v6951_v63, %v10862_v63   ;;  %v6141_v62 = vphi %v6949_v62, %v10861_v62   ;;  %v6137_v61 = vphi %v6947_v61, %v10860_v61   ;;  %v6133_v60 = vphi %v6945_v60, %v10859_v60   ;;  %v6129_v59 = vphi %v6943_v59, %v10858_v59   ;;  %v6125_v58 = vphi %v6941_v58, %v10857_v58   ;;  %v6121_v57 = vphi %v6939_v57, %v10856_v57   ;;  %v6117_v56 = vphi %v6937_v56, %v10855_v56   ;;  %v6113_v55 = vphi %v6935_v55, %v10854_v55   ;;  %v6109_v54 = vphi %v6933_v54, %v10853_v54   ;;  %v6105_v53 = vphi %v6931_v53, %v10852_v53   ;;  %v6101_v52 = vphi %v6929_v52, %v10851_v52   ;;  %v6097_v51 = vphi %v6927_v51, %v10850_v51   ;;  %v6093_v50 = vphi %v6925_v50, %v10849_v50   ;;  %v6089_v49 = vphi %v6923_v49, %v10848_v49   ;;  %v6085_v48 = vphi %v6921_v48, %v10847_v48   ;;  %v6081_v47 = vphi %v6919_v47, %v10846_v47   ;;  %v6077_v46 = vphi %v6917_v46, %v10845_v46   ;;  %v6073_v45 = vphi %v6915_v45, %v10844_v45   ;;  %v6069_v44 = vphi %v6913_v44, %v10843_v44   ;;  %v6065_v43 = vphi %v6911_v43, %v10842_v43   ;;  %v6061_v42 = vphi %v6909_v42, %v10841_v42   ;;  %v6057_v41 = vphi %v6907_v41, %v10840_v41   ;;  %v6053_v40 = vphi %v6905_v40, %v10839_v40  }
  0xfa   : >>> { %10534 = vst [vmem:[#allocation19_spill] sm:$0xff] %v6061_v42  ;;  %10535 = vst [vmem:[#allocation20_spill] sm:$0xff] %v6065_v43  ;;  %s551_s2 = smul.u32 9, %s6181_s0  ;;  %s4032_s13 = sshll.u32 %s549_s4, 5 }
  0xfb   : >>> { %10536 = vst [vmem:[#allocation21_spill] sm:$0xff] %v6069_v44  ;;  %10537 = vst [vmem:[#allocation22_spill] sm:$0xff] %v6073_v45  ;;  %s7078_s14 = scalar_lea.vmem [#allocation2], %s4032_s13  ;;  %s516_s28 = sadd.s32 1, %s6181_s0  }
  0xfc   : >>> { %10538 = vst [vmem:[#allocation23_spill] sm:$0xff] %v6077_v46  ;;  %10539 = vst [vmem:[#allocation24_spill] sm:$0xff] %v6081_v47  ;;  %s7075_s11 = sadd.s32 %s551_s2, %s550_s10  ;;  %v556_v8 = vld [vmem:[%s7078_s14] sm:$0xff]  ;;  %v557_v9 = vld [vmem:[%s7078_s14 + $0x8] sm:$0xff]  ;;  %p8403_p12 = scmp.ge.s32.totalorder %s516_s28, 9  }
  0xfd   : >>> { %10540 = vst [vmem:[#allocation25_spill] sm:$0xff] %v6085_v48  ;;  %10541 = vst [vmem:[#allocation26_spill] sm:$0xff] %v6089_v49  ;;  %s553_s12 = sld [smem:[#allocation6 + %s7075_s11]]  ;;  %v558_v10 = vld [vmem:[%s7078_s14 + $0x10] sm:$0xff]  ;;  %v559_v11 = vld [vmem:[%s7078_s14 + $0x18] sm:$0xff]  ;;  %s653_s15 = sadd.s32 1, %s7075_s11 }
  0xfe   : >>> { %10542 = vst [vmem:[#allocation27_spill] sm:$0xff] %v6093_v50  ;;  %10543 = vst [vmem:[#allocation28_spill] sm:$0xff] %v6097_v51  ;;  %v560_v12 = vld [vmem:[%s7078_s14 + $0x20] sm:$0xff]  ;;  %v561_v13 = vld [vmem:[%s7078_s14 + $0x28] sm:$0xff]  ;;  %s7113_s16 = sld [smem:[#allocation6 + %s653_s15]]  ;;  %s754_s17 = sadd.s32 2, %s7075_s11 }
  0xff   : >>> { %10544 = vst [vmem:[#allocation29_spill] sm:$0xff] %v6101_v52  ;;  %10545 = vst [vmem:[#allocation30_spill] sm:$0xff] %v6105_v53  ;;  %v562_v14 = vld [vmem:[%s7078_s14 + $0x30] sm:$0xff]  ;;  %v563_v15 = vld [vmem:[%s7078_s14 + $0x38] sm:$0xff]  ;;  %s855_s18 = sadd.s32 3, %s7075_s11  ;;  %s7246_s19 = sld [smem:[#allocation6 + %s754_s17]] }
 0x100   : >>> { %10546 = vst [vmem:[#allocation31_spill] sm:$0xff] %v6109_v54  ;;  %10547 = vst [vmem:[#allocation32_spill] sm:$0xff] %v6113_v55  ;;  %v564_v16 = vld [vmem:[%s7078_s14 + $0x40] sm:$0xff]  ;;  %v565_v17 = vld [vmem:[%s7078_s14 + $0x48] sm:$0xff]  ;;  %s7257_s1 = sld [smem:[#allocation6 + %s855_s18]]  ;;  %s956_s3 = sadd.s32 4, %s7075_s11 }
 0x101   : >>> { %10548 = vst [vmem:[#allocation33_spill] sm:$0xff] %v6117_v56  ;;  %10549 = vst [vmem:[#allocation34_spill] sm:$0xff] %v6121_v57  ;;  %v566_v18 = vld [vmem:[%s7078_s14 + $0x50] sm:$0xff]  ;;  %v567_v20 = vld [vmem:[%s7078_s14 + $0x58] sm:$0xff]  ;;  %s1057_s20 = sadd.s32 5, %s7075_s11  ;;  %s1158_s21 = sadd.s32 6, %s7075_s11 }
 0x102   : >>> { %v568_v21 = vld [vmem:[%s7078_s14 + $0x60] sm:$0xff]  ;;  %v569_v22 = vld [vmem:[%s7078_s14 + $0x68] sm:$0xff]  ;;  %v570_v23 = vld [vmem:[%s7078_s14 + $0x70] sm:$0xff]  ;;  %s7548_s22 = sld [smem:[#allocation6 + %s956_s3]]  ;;  %s1259_s5 = sadd.s32 7, %s7075_s11 }
 0x103   : >>> { %v588_v19 = vstv %s553_s12  ;;  %v571_v24 = vld [vmem:[%s7078_s14 + $0x78] sm:$0xff]  ;;  %v572_v25 = vld [vmem:[%s7078_s14 + $0x80] sm:$0xff]  ;;  %v573_v26 = vld [vmem:[%s7078_s14 + $0x88] sm:$0xff]  ;;  %s7562_s23 = sld [smem:[#allocation6 + %s1057_s20]]  ;;  %s1360_s25 = sadd.s32 8, %s7075_s11 }
 0x104   : >>> { %v574_v27 = vld [vmem:[%s7078_s14 + $0x90] sm:$0xff]  ;;  %v575_v28 = vld [vmem:[%s7078_s14 + $0x98] sm:$0xff]  ;;  %v589_v29 = vmul.f32 %v588_v19, %v556_v8  ;;  %v590_v30 = vmul.f32 %v588_v19, %v557_v9  ;;  %v591_v31 = vmul.f32 %v588_v19, %v558_v10  ;;  %v592_v32 = vmul.f32 %v588_v19, %v559_v11  ;;  %v576_v33 = vld [vmem:[%s7078_s14 + $0xa0] sm:$0xff]  ;;  %s7564_s24 = sld [smem:[#allocation6 + %s1158_s21]]  ;;  %s10871_s0 = smov %s516_s28 }
 0x105   : >>> { %v577_v34 = vld [vmem:[%s7078_s14 + $0xa8] sm:$0xff]  ;;  %v578_v35 = vld [vmem:[%s7078_s14 + $0xb0] sm:$0xff]  ;;  %v593_v36 = vmul.f32 %v588_v19, %v560_v12  ;;  %v594_v37 = vmul.f32 %v588_v19, %v561_v13  ;;  %v595_v38 = vmul.f32 %v588_v19, %v562_v14  ;;  %v596_v39 = vmul.f32 %v588_v19, %v563_v15  ;;  %v579_v40 = vld [vmem:[%s7078_s14 + $0xb8] sm:$0xff]  ;;  %s8014_s26 = sld [smem:[#allocation6 + %s1259_s5]]  ;;  %s4802_s10 = sshll.u32 (%p8403_p12), %s6049_s9, 8 }
 0x106   : >>> { %v580_v41 = vld [vmem:[%s7078_s14 + $0xc0] sm:$0xff]  ;;  %v581_v8 = vld [vmem:[%s7078_s14 + $0xc8] sm:$0xff]  ;;  %v597_v9 = vmul.f32 %v588_v19, %v564_v16  ;;  %v598_v10 = vmul.f32 %v588_v19, %v565_v17  ;;  %v599_v42 = vmul.f32 %v588_v19, %v566_v18  ;;  %v600_v11 = vmul.f32 %v588_v19, %v567_v20  ;;  %v582_v43 = vld [vmem:[%s7078_s14 + $0xd0] sm:$0xff]  ;;  %s8016_s27 = sld [smem:[#allocation6 + %s1360_s25]]  ;;  %s4306_s2 = sshll.u32 (%p8403_p12), %s6045_s30, 10 }
 0x107   : >>> { %v583_v44 = vld [vmem:[%s7078_s14 + $0xd8] sm:$0xff]  ;;  %v584_v45 = vld [vmem:[%s7078_s14 + $0xe0] sm:$0xff]  ;;  %v601_v46 = vmul.f32 %v588_v19, %v568_v21  ;;  %v602_v47 = vmul.f32 %v588_v19, %v569_v22  ;;  %v603_v12 = vmul.f32 %v588_v19, %v570_v23  ;;  %v604_v13 = vmul.f32 %v588_v19, %v571_v24  ;;  %v585_v14 = vld [vmem:[%s7078_s14 + $0xe8] sm:$0xff]  ;;  %s1528_s4 = sadd.s32 (%p8403_p12), %s4802_s10, %s4306_s2  ;;  %s509_s9 = sadd.s32 (%p8403_p12), 1, %s6049_s9  }
 0x108   : >>> { %v586_v15 = vld [vmem:[%s7078_s14 + $0xf0] sm:$0xff]  ;;  %v587_v48 = vld [vmem:[%s7078_s14 + $0xf8] sm:$0xff]  ;;  %v605_v49 = vmul.f32 %v588_v19, %v572_v25  ;;  %v606_v50 = vmul.f32 %v588_v19, %v573_v26  ;;  %v607_v51 = vmul.f32 %v588_v19, %v574_v27  ;;  %v608_v52 = vmul.f32 %v588_v19, %v575_v28  ;;  %s8530_s6 = scalar_lea.vmem (%p8403_p12), [#allocation3], %s1528_s4  ;;  %p506_p13 = scmp.ge.s32.totalorder (%p8403_p12), %s509_s9, 4  }
 0x109   : >>> { %v609_v53 = vmul.f32 %v588_v19, %v576_v33  ;;  %v610_v16 = vmul.f32 %v588_v19, %v577_v34  ;;  %v611_v17 = vmul.f32 %v588_v19, %v578_v35  ;;  %v612_v18 = vmul.f32 %v588_v19, %v579_v40  ;;  %v10559_v27 = vld [vmem:[#allocation29_spill] sm:$0xff]  ;;  %v10561_v33 = vld [vmem:[#allocation28_spill] sm:$0xff]  ;;  %v10563_v34 = vld [vmem:[#allocation27_spill] sm:$0xff] }
 0x10a   : >>> { %v613_v20 = vmul.f32 %v588_v19, %v580_v41  ;;  %v614_v54 = vmul.f32 %v588_v19, %v581_v8  ;;  %v615_v55 = vmul.f32 %v588_v19, %v582_v43  ;;  %v616_v56 = vmul.f32 %v588_v19, %v583_v44  ;;  %v10565_v35 = vld [vmem:[#allocation26_spill] sm:$0xff]  ;;  %v10569_v8 = vld [vmem:[#allocation24_spill] sm:$0xff] }
 0x10b   : >>> { %v617_v21 = vmul.f32 %v588_v19, %v584_v45  ;;  %v618_v22 = vmul.f32 %v588_v19, %v585_v14  ;;  %v619_v23 = vmul.f32 %v588_v19, %v586_v15  ;;  %v620_v24 = vmul.f32 %v588_v19, %v587_v48  ;;  %v4035_v19 = vld [vmem:[%s7078_s14 + $0x500] sm:$0xff]  ;;  %v4046_v14 = vld [vmem:[%s7078_s14 + $0x558] sm:$0xff] }
 0x10c   : >>> { %v7116_v57 = vadd.f32 %v6177_v7, %v589_v29  ;;  %v7119_v25 = vadd.f32 %v6173_v6, %v590_v30  ;;  %v7122_v40 = vadd.f32 %v6169_v5, %v591_v31  ;;  %v7125_v41 = vadd.f32 %v6165_v4, %v592_v32  ;;  %v10551_v7 = vld [vmem:[#allocation33_spill] sm:$0xff]  ;;  %v4038_v29 = vld [vmem:[%s7078_s14 + $0x518] sm:$0xff]  ;;  %v4039_v30 = vld [vmem:[%s7078_s14 + $0x520] sm:$0xff] }
 0x10d   : >>> { %v7128_v43 = vadd.f32 %v6161_v3, %v593_v36  ;;  %v7131_v44 = vadd.f32 %v6157_v2, %v594_v37  ;;  %v7134_v45 = vadd.f32 %v6153_v1, %v595_v38  ;;  %v7137_v48 = vadd.f32 %v6149_v0, %v596_v39  ;;  %v4040_v31 = vld [vmem:[%s7078_s14 + $0x528] sm:$0xff]  ;;  %v4041_v32 = vld [vmem:[%s7078_s14 + $0x530] sm:$0xff]  ;;  %v4042_v37 = vld [vmem:[%s7078_s14 + $0x538] sm:$0xff] }
 0x10e   : >>> { %v7140_v5 = vadd.f32 %v6145_v63, %v597_v9  ;;  %v7143_v4 = vadd.f32 %v6141_v62, %v598_v10  ;;  %v7146_v3 = vadd.f32 %v6137_v61, %v599_v42  ;;  %v7149_v2 = vadd.f32 %v6133_v60, %v600_v11  ;;  %v10550_v63 = vld [vmem:[#allocation34_spill] sm:$0xff]  ;;  %v4036_v42 = vld [vmem:[%s7078_s14 + $0x508] sm:$0xff]  ;;  %v4037_v61 = vld [vmem:[%s7078_s14 + $0x510] sm:$0xff] }
 0x10f   : >>> { %v7152_v1 = vadd.f32 %v6129_v59, %v601_v46  ;;  %v7155_v0 = vadd.f32 %v6125_v58, %v602_v47  ;;  %v7158_v6 = vadd.f32 %v10550_v63, %v603_v12  ;;  %v7161_v62 = vadd.f32 %v10551_v7, %v604_v13  ;;  %v10553_v60 = vld [vmem:[#allocation32_spill] sm:$0xff]  ;;  %v10555_v46 = vld [vmem:[#allocation31_spill] sm:$0xff]  ;;  %v10557_v47 = vld [vmem:[#allocation30_spill] sm:$0xff] }
 0x110   : >>> { %v7167_v26 = vadd.f32 %v10553_v60, %v605_v49  ;;  %v7170_v59 = vadd.f32 %v10555_v46, %v606_v50  ;;  %v7173_v58 = vadd.f32 %v10557_v47, %v607_v51  ;;  %v7176_v28 = vadd.f32 %v10559_v27, %v608_v52  ;;  %v10567_v36 = vld [vmem:[#allocation25_spill] sm:$0xff]  ;;  %v4043_v38 = vld [vmem:[%s7078_s14 + $0x540] sm:$0xff]  ;;  %v4044_v39 = vld [vmem:[%s7078_s14 + $0x548] sm:$0xff] }
 0x111   : >>> { %10552 = vst [vmem:[#allocation34_spill] sm:$0xff] %v7161_v62  ;;  %v7183_v49 = vadd.f32 %v10561_v33, %v609_v53  ;;  %v7186_v50 = vadd.f32 %v10563_v34, %v610_v16  ;;  %v7189_v51 = vadd.f32 %v10565_v35, %v611_v17  ;;  %v7192_v52 = vadd.f32 %v10567_v36, %v612_v18  ;;  %v10571_v53 = vld [vmem:[#allocation23_spill] sm:$0xff]  ;;  %v10573_v11 = vld [vmem:[#allocation22_spill] sm:$0xff]  ;;  %v4045_v13 = vld [vmem:[%s7078_s14 + $0x550] sm:$0xff] }
 0x112   : >>> { %10554 = vst [vmem:[#allocation33_spill] sm:$0xff] %v7167_v26  ;;  %10556 = vst [vmem:[#allocation32_spill] sm:$0xff] %v7170_v59  ;;  %v7198_v9 = vadd.f32 %v10569_v8, %v613_v20  ;;  %v7201_v10 = vadd.f32 %v10571_v53, %v614_v54  ;;  %v7204_v12 = vadd.f32 %v10573_v11, %v615_v55  ;;  %v4047_v15 = vld [vmem:[%s7078_s14 + $0x560] sm:$0xff]  ;;  %v689_v16 = vstv %s7113_s16  ;;  %v10575_v17 = vld [vmem:[#allocation21_spill] sm:$0xff] }
 0x113   : >>> { %10558 = vst [vmem:[#allocation31_spill] sm:$0xff] %v7173_v58  ;;  %10560 = vst [vmem:[#allocation30_spill] sm:$0xff] %v7176_v28  ;;  %v7211_v18 = vadd.f32 %v10575_v17, %v616_v56  ;;  %v10577_v63 = vld [vmem:[#allocation20_spill] sm:$0xff]  ;;  %v10579_v7 = vld [vmem:[#allocation19_spill] sm:$0xff]  ;;  %v691_v8 = vmul.f32 %v4036_v42, %v689_v16  ;;  %v693_v17 = vmul.f32 %v4038_v29, %v689_v16 }
 0x114   : >>> { %10562 = vst [vmem:[#allocation29_spill] sm:$0xff] %v7183_v49  ;;  %10564 = vst [vmem:[#allocation28_spill] sm:$0xff] %v7186_v50  ;;  %v7214_v20 = vadd.f32 %v10577_v63, %v617_v21  ;;  %v7217_v54 = vadd.f32 %v10579_v7, %v618_v22  ;;  %v10581_v60 = vld [vmem:[#allocation18_spill] sm:$0xff]  ;;  %v4048_v55 = vld [vmem:[%s7078_s14 + $0x568] sm:$0xff]  ;;  %v690_v21 = vmul.f32 %v4035_v19, %v689_v16 }
 0x115   : >>> { %10566 = vst [vmem:[#allocation27_spill] sm:$0xff] %v7189_v51  ;;  %10568 = vst [vmem:[#allocation26_spill] sm:$0xff] %v7192_v52  ;;  %v7220_v46 = vadd.f32 %v10581_v60, %v619_v23  ;;  %v4049_v47 = vld [vmem:[%s7078_s14 + $0x570] sm:$0xff]  ;;  %v4050_v27 = vld [vmem:[%s7078_s14 + $0x578] sm:$0xff]  ;;  %v692_v22 = vmul.f32 %v4037_v61, %v689_v16  ;;  %v694_v63 = vmul.f32 %v4039_v30, %v689_v16 }
 0x116   : >>> { %10570 = vst [vmem:[#allocation25_spill] sm:$0xff] %v7198_v9  ;;  %10572 = vst [vmem:[#allocation24_spill] sm:$0xff] %v7201_v10  ;;  %v10583_v33 = vld [vmem:[#allocation17_spill] sm:$0xff]  ;;  %v4051_v56 = vld [vmem:[%s7078_s14 + $0x580] sm:$0xff]  ;;  %v695_v7 = vmul.f32 %v4040_v31, %v689_v16  ;;  %v696_v60 = vmul.f32 %v4041_v32, %v689_v16  ;;  %v698_v19 = vmul.f32 %v4043_v38, %v689_v16 }
 0x117   : >>> { %10574 = vst [vmem:[#allocation23_spill] sm:$0xff] %v7204_v12  ;;  %10576 = vst [vmem:[#allocation22_spill] sm:$0xff] %v7211_v18  ;;  %v7226_v34 = vadd.f32 %v10583_v33, %v620_v24  ;;  %v4052_v35 = vld [vmem:[%s7078_s14 + $0x588] sm:$0xff]  ;;  %v4053_v36 = vld [vmem:[%s7078_s14 + $0x590] sm:$0xff]  ;;  %v699_v42 = vmul.f32 %v4044_v39, %v689_v16  ;;  %v700_v61 = vmul.f32 %v4045_v13, %v689_v16 }
 0x118   : >>> { %10578 = vst [vmem:[#allocation21_spill] sm:$0xff] %v7214_v20  ;;  %10580 = vst [vmem:[#allocation20_spill] sm:$0xff] %v7217_v54  ;;  %v4054_v53 = vld [vmem:[%s7078_s14 + $0x598] sm:$0xff]  ;;  %v4055_v23 = vld [vmem:[%s7078_s14 + $0x5a0] sm:$0xff]  ;;  %v701_v12 = vmul.f32 %v4046_v14, %v689_v16  ;;  %v702_v29 = vmul.f32 %v4047_v15, %v689_v16  ;;  %v703_v30 = vmul.f32 %v4048_v55, %v689_v16 }
 0x119   : >>> { %10582 = vst [vmem:[#allocation19_spill] sm:$0xff] %v7220_v46  ;;  %10584 = vst [vmem:[#allocation18_spill] sm:$0xff] %v7226_v34  ;;  %v4056_v11 = vld [vmem:[%s7078_s14 + $0x5a8] sm:$0xff]  ;;  %v4057_v24 = vld [vmem:[%s7078_s14 + $0x5b0] sm:$0xff]  ;;  %v697_v46 = vmul.f32 %v4042_v37, %v689_v16  ;;  %v704_v31 = vmul.f32 %v4049_v47, %v689_v16  ;;  %v705_v52 = vmul.f32 %v4050_v27, %v689_v16 }
 0x11a   : >>> { %v4058_v33 = vld [vmem:[%s7078_s14 + $0x5b8] sm:$0xff]  ;;  %v4059_v34 = vld [vmem:[%s7078_s14 + $0x5c0] sm:$0xff]  ;;  %v4060_v54 = vld [vmem:[%s7078_s14 + $0x5c8] sm:$0xff]  ;;  %v706_v51 = vmul.f32 %v4051_v56, %v689_v16  ;;  %v707_v50 = vmul.f32 %v4052_v35, %v689_v16  ;;  %v708_v37 = vmul.f32 %v4053_v36, %v689_v16  ;;  %v709_v39 = vmul.f32 %v4054_v53, %v689_v16 }
 0x11b   : >>> { %v4061_v20 = vld [vmem:[%s7078_s14 + $0x5d0] sm:$0xff]  ;;  %v4062_v18 = vld [vmem:[%s7078_s14 + $0x5d8] sm:$0xff]  ;;  %v4063_v32 = vld [vmem:[%s7078_s14 + $0x5e0] sm:$0xff]  ;;  %v710_v13 = vmul.f32 %v4055_v23, %v689_v16  ;;  %v711_v49 = vmul.f32 %v4056_v11, %v689_v16  ;;  %v712_v28 = vmul.f32 %v4057_v24, %v689_v16  ;;  %v713_v58 = vmul.f32 %v4058_v33, %v689_v16 }
 0x11c   : >>> { %v4064_v10 = vld [vmem:[%s7078_s14 + $0x5e8] sm:$0xff]  ;;  %v4065_v9 = vld [vmem:[%s7078_s14 + $0x5f0] sm:$0xff]  ;;  %v4066_v38 = vld [vmem:[%s7078_s14 + $0x5f8] sm:$0xff]  ;;  %v714_v14 = vmul.f32 %v4059_v34, %v689_v16  ;;  %v715_v15 = vmul.f32 %v4060_v54, %v689_v16  ;;  %v716_v59 = vmul.f32 %v4061_v20, %v689_v16  ;;  %v717_v55 = vmul.f32 %v4062_v18, %v689_v16 }
 0x11d   : >>> { %v718_v47 = vmul.f32 %v4063_v32, %v689_v16  ;;  %v719_v26 = vmul.f32 %v4064_v10, %v689_v16  ;;  %v720_v62 = vmul.f32 %v4065_v9, %v689_v16  ;;  %v721_v27 = vmul.f32 %v4066_v38, %v689_v16  ;;  %v10586_v16 = vld [vmem:[#allocation34_spill] sm:$0xff]  ;;  %v4071_v34 = vld [vmem:[%s7078_s14 + $0xa10] sm:$0xff]  ;;  %v10600_v23 = vld [vmem:[#allocation27_spill] sm:$0xff] }
 0x11e   : >>> { %v7249_v56 = vadd.f32 %v690_v21, %v7116_v57  ;;  %v7252_v35 = vadd.f32 %v691_v8, %v7119_v25  ;;  %v7255_v36 = vadd.f32 %v692_v22, %v7122_v40  ;;  %v7260_v18 = vadd.f32 %v693_v17, %v7125_v41  ;;  %v4073_v21 = vld [vmem:[%s7078_s14 + $0xa20] sm:$0xff]  ;;  %v10594_v8 = vld [vmem:[#allocation30_spill] sm:$0xff]  ;;  %v4074_v17 = vld [vmem:[%s7078_s14 + $0xa28] sm:$0xff] }
 0x11f   : >>> { %v7263_v9 = vadd.f32 %v694_v63, %v7128_v43  ;;  %v7266_v10 = vadd.f32 %v695_v7, %v7131_v44  ;;  %v7269_v57 = vadd.f32 %v696_v60, %v7134_v45  ;;  %v7272_v25 = vadd.f32 %v697_v46, %v7137_v48  ;;  %v4075_v63 = vld [vmem:[%s7078_s14 + $0xa30] sm:$0xff]  ;;  %v4076_v7 = vld [vmem:[%s7078_s14 + $0xa38] sm:$0xff] }
 0x120   : >>> { %v7275_v40 = vadd.f32 %v698_v19, %v7140_v5  ;;  %v7278_v41 = vadd.f32 %v699_v42, %v7143_v4  ;;  %v7281_v43 = vadd.f32 %v700_v61, %v7146_v3  ;;  %v7284_v44 = vadd.f32 %v701_v12, %v7149_v2  ;;  %v4069_v4 = vld [vmem:[%s7078_s14 + $0xa00] sm:$0xff]  ;;  %v10588_v3 = vld [vmem:[#allocation33_spill] sm:$0xff]  ;;  %v10590_v2 = vld [vmem:[#allocation32_spill] sm:$0xff] }
 0x121   : >>> { %v7287_v45 = vadd.f32 %v702_v29, %v7152_v1  ;;  %v7290_v48 = vadd.f32 %v703_v30, %v7155_v0  ;;  %v7293_v5 = vadd.f32 %v704_v31, %v7158_v6  ;;  %v7297_v20 = vadd.f32 %v705_v52, %v10586_v16  ;;  %v10592_v1 = vld [vmem:[#allocation31_spill] sm:$0xff]  ;;  %v4070_v0 = vld [vmem:[%s7078_s14 + $0xa08] sm:$0xff]  ;;  %v4072_v6 = vld [vmem:[%s7078_s14 + $0xa18] sm:$0xff] }
 0x122   : >>> { %v7300_v54 = vadd.f32 %v706_v51, %v10588_v3  ;;  %v7303_v12 = vadd.f32 %v707_v50, %v10590_v2  ;;  %v7306_v46 = vadd.f32 %v708_v37, %v10592_v1  ;;  %v7313_v22 = vadd.f32 %v709_v39, %v10594_v8  ;;  %v10596_v52 = vld [vmem:[#allocation29_spill] sm:$0xff]  ;;  %v10598_v51 = vld [vmem:[#allocation28_spill] sm:$0xff]  ;;  %v10602_v60 = vld [vmem:[#allocation26_spill] sm:$0xff] }
 0x123   : >>> { %10585 = vst [vmem:[#allocation17_spill] sm:$0xff] %v7293_v5  ;;  %10587 = vst [vmem:[#allocation34_spill] sm:$0xff] %v7297_v20  ;;  %v7316_v53 = vadd.f32 %v710_v13, %v10596_v52  ;;  %v7319_v50 = vadd.f32 %v711_v49, %v10598_v51  ;;  %v7322_v11 = vadd.f32 %v712_v28, %v10600_v23  ;;  %v10604_v33 = vld [vmem:[#allocation25_spill] sm:$0xff]  ;;  %v10606_v42 = vld [vmem:[#allocation24_spill] sm:$0xff]  ;;  %v790_v16 = vstv %s7246_s19 }
 0x124   : >>> { %10589 = vst [vmem:[#allocation33_spill] sm:$0xff] %v7300_v54  ;;  %10591 = vst [vmem:[#allocation32_spill] sm:$0xff] %v7303_v12  ;;  %v7328_v24 = vadd.f32 %v713_v58, %v10602_v60  ;;  %v7331_v19 = vadd.f32 %v714_v14, %v10604_v33  ;;  %v7334_v49 = vadd.f32 %v715_v15, %v10606_v42  ;;  %v10608_v61 = vld [vmem:[#allocation23_spill] sm:$0xff]  ;;  %v4078_v30 = vld [vmem:[%s7078_s14 + $0xa48] sm:$0xff] }
 0x125   : >>> { %10593 = vst [vmem:[#allocation31_spill] sm:$0xff] %v7306_v46  ;;  %10595 = vst [vmem:[#allocation30_spill] sm:$0xff] %v7313_v22  ;;  %v7337_v28 = vadd.f32 %v716_v59, %v10608_v61  ;;  %v4077_v29 = vld [vmem:[%s7078_s14 + $0xa40] sm:$0xff]  ;;  %v4079_v31 = vld [vmem:[%s7078_s14 + $0xa50] sm:$0xff]  ;;  %v791_v51 = vmul.f32 %v4069_v4, %v790_v16  ;;  %v792_v42 = vmul.f32 %v4070_v0, %v790_v16 }
 0x126   : >>> { %10597 = vst [vmem:[#allocation29_spill] sm:$0xff] %v7316_v53  ;;  %10599 = vst [vmem:[#allocation28_spill] sm:$0xff] %v7319_v50  ;;  %v10610_v32 = vld [vmem:[#allocation22_spill] sm:$0xff]  ;;  %v10612_v37 = vld [vmem:[#allocation21_spill] sm:$0xff]  ;;  %v793_v61 = vmul.f32 %v4071_v34, %v790_v16  ;;  %v797_v4 = vmul.f32 %v4075_v63, %v790_v16  ;;  %v800_v0 = vmul.f32 %v4078_v30, %v790_v16 }
 0x127   : >>> { %10601 = vst [vmem:[#allocation27_spill] sm:$0xff] %v7322_v11  ;;  %10603 = vst [vmem:[#allocation26_spill] sm:$0xff] %v7328_v24  ;;  %v7343_v58 = vadd.f32 %v717_v55, %v10610_v32  ;;  %v7346_v38 = vadd.f32 %v718_v47, %v10612_v37  ;;  %v10614_v39 = vld [vmem:[#allocation20_spill] sm:$0xff]  ;;  %v4080_v14 = vld [vmem:[%s7078_s14 + $0xa58] sm:$0xff]  ;;  %v795_v32 = vmul.f32 %v4073_v21, %v790_v16 }
 0x128   : >>> { %10605 = vst [vmem:[#allocation25_spill] sm:$0xff] %v7331_v19  ;;  %10607 = vst [vmem:[#allocation24_spill] sm:$0xff] %v7334_v49  ;;  %v7349_v13 = vadd.f32 %v719_v26, %v10614_v39  ;;  %v4081_v15 = vld [vmem:[%s7078_s14 + $0xa60] sm:$0xff]  ;;  %v4082_v59 = vld [vmem:[%s7078_s14 + $0xa68] sm:$0xff]  ;;  %v7365_v26 = vstv %s7257_s1  ;;  %v801_v34 = vmul.f32 %v4079_v31, %v790_v16 }
 0x129   : >>> { %10609 = vst [vmem:[#allocation23_spill] sm:$0xff] %v7337_v28  ;;  %10611 = vst [vmem:[#allocation22_spill] sm:$0xff] %v7343_v58  ;;  %v10616_v3 = vld [vmem:[#allocation19_spill] sm:$0xff]  ;;  %v10618_v1 = vld [vmem:[#allocation18_spill] sm:$0xff]  ;;  %v804_v49 = vmul.f32 %v4082_v59, %v790_v16 }
 0x12a   : >>> { %10613 = vst [vmem:[#allocation21_spill] sm:$0xff] %v7346_v38  ;;  %10615 = vst [vmem:[#allocation20_spill] sm:$0xff] %v7349_v13  ;;  %v7356_v2 = vadd.f32 %v720_v62, %v10616_v3  ;;  %v7359_v55 = vadd.f32 %v721_v27, %v10618_v1  ;;  %v4083_v8 = vld [vmem:[%s7078_s14 + $0xa70] sm:$0xff]  ;;  %v4084_v52 = vld [vmem:[%s7078_s14 + $0xa78] sm:$0xff]  ;;  %v794_v62 = vmul.f32 %v4072_v6, %v790_v16 }
 0x12b   : >>> { %v4085_v47 = vld [vmem:[%s7078_s14 + $0xa80] sm:$0xff]  ;;  %10620 = vst [vmem:[#allocation35_spill] sm:$0xff] %v7365_v26  ;;  %v4086_v23 = vld [vmem:[%s7078_s14 + $0xa88] sm:$0xff]  ;;  %v4087_v60 = vld [vmem:[%s7078_s14 + $0xa90] sm:$0xff]  ;;  %v796_v3 = vmul.f32 %v4074_v17, %v790_v16  ;;  %v798_v1 = vmul.f32 %v4076_v7, %v790_v16  ;;  %v799_v26 = vmul.f32 %v4077_v29, %v790_v16  ;;  %v802_v6 = vmul.f32 %v4080_v14, %v790_v16 }
 0x12c   : >>> { %10617 = vst [vmem:[#allocation19_spill] sm:$0xff] %v7356_v2  ;;  %10619 = vst [vmem:[#allocation18_spill] sm:$0xff] %v7359_v55  ;;  %v4088_v33 = vld [vmem:[%s7078_s14 + $0xa98] sm:$0xff]  ;;  %v4089_v27 = vld [vmem:[%s7078_s14 + $0xaa0] sm:$0xff]  ;;  %v803_v38 = vmul.f32 %v4081_v15, %v790_v16  ;;  %v805_v19 = vmul.f32 %v4083_v8, %v790_v16  ;;  %v806_v24 = vmul.f32 %v4084_v52, %v790_v16 }
 0x12d   : >>> { %v4090_v37 = vld [vmem:[%s7078_s14 + $0xaa8] sm:$0xff]  ;;  %v4091_v39 = vld [vmem:[%s7078_s14 + $0xab0] sm:$0xff]  ;;  %v4092_v55 = vld [vmem:[%s7078_s14 + $0xab8] sm:$0xff]  ;;  %v807_v17 = vmul.f32 %v4085_v47, %v790_v16  ;;  %v808_v29 = vmul.f32 %v4086_v23, %v790_v16  ;;  %v809_v50 = vmul.f32 %v4087_v60, %v790_v16  ;;  %v810_v53 = vmul.f32 %v4088_v33, %v790_v16 }
 0x12e   : >>> { %v4093_v2 = vld [vmem:[%s7078_s14 + $0xac0] sm:$0xff]  ;;  %v4094_v13 = vld [vmem:[%s7078_s14 + $0xac8] sm:$0xff]  ;;  %v4095_v21 = vld [vmem:[%s7078_s14 + $0xad0] sm:$0xff]  ;;  %v811_v22 = vmul.f32 %v4089_v27, %v790_v16  ;;  %v812_v46 = vmul.f32 %v4090_v37, %v790_v16  ;;  %v813_v12 = vmul.f32 %v4091_v39, %v790_v16  ;;  %v814_v30 = vmul.f32 %v4092_v55, %v790_v16 }
 0x12f   : >>> { %v4096_v58 = vld [vmem:[%s7078_s14 + $0xad8] sm:$0xff]  ;;  %v4097_v28 = vld [vmem:[%s7078_s14 + $0xae0] sm:$0xff]  ;;  %v4098_v63 = vld [vmem:[%s7078_s14 + $0xae8] sm:$0xff]  ;;  %v815_v31 = vmul.f32 %v4093_v2, %v790_v16  ;;  %v816_v14 = vmul.f32 %v4094_v13, %v790_v16  ;;  %v817_v15 = vmul.f32 %v4095_v21, %v790_v16  ;;  %v7383_v52 = vadd.f32 %v791_v51, %v7249_v56 }
 0x130   : >>> { %v4099_v7 = vld [vmem:[%s7078_s14 + $0xaf0] sm:$0xff]  ;;  %v4100_v11 = vld [vmem:[%s7078_s14 + $0xaf8] sm:$0xff]  ;;  %v818_v54 = vmul.f32 %v4096_v58, %v790_v16  ;;  %v819_v20 = vmul.f32 %v4097_v28, %v790_v16  ;;  %v820_v5 = vmul.f32 %v4098_v63, %v790_v16  ;;  %v7386_v47 = vadd.f32 %v792_v42, %v7252_v35  ;;  %v10628_v27 = vld [vmem:[#allocation28_spill] sm:$0xff] }
 0x131   : >>> { %v821_v59 = vmul.f32 %v4099_v7, %v790_v16  ;;  %v822_v8 = vmul.f32 %v4100_v11, %v790_v16  ;;  %v7389_v23 = vadd.f32 %v793_v61, %v7255_v36  ;;  %v7392_v2 = vadd.f32 %v794_v62, %v7260_v18  ;;  %v4105_v51 = vld [vmem:[%s7078_s14 + $0xf10] sm:$0xff]  ;;  %v4108_v61 = vld [vmem:[%s7078_s14 + $0xf28] sm:$0xff]  ;;  %v10629_v39 = vld [vmem:[#allocation27_spill] sm:$0xff] }
 0x132   : >>> { %v7395_v28 = vadd.f32 %v795_v32, %v7263_v9  ;;  %v7398_v11 = vadd.f32 %v796_v3, %v7266_v10  ;;  %v7401_v56 = vadd.f32 %v797_v4, %v7269_v57  ;;  %v7404_v35 = vadd.f32 %v798_v1, %v7272_v25  ;;  %v4103_v25 = vld [vmem:[%s7078_s14 + $0xf00] sm:$0xff]  ;;  %v4109_v62 = vld [vmem:[%s7078_s14 + $0xf30] sm:$0xff]  ;;  %v4110_v32 = vld [vmem:[%s7078_s14 + $0xf38] sm:$0xff] }
 0x133   : >>> { %v7407_v36 = vadd.f32 %v799_v26, %v7275_v40  ;;  %v7410_v18 = vadd.f32 %v800_v0, %v7278_v41  ;;  %v7413_v9 = vadd.f32 %v801_v34, %v7281_v43  ;;  %v7416_v10 = vadd.f32 %v802_v6, %v7284_v44  ;;  %v10621_v40 = vld [vmem:[#allocation17_spill] sm:$0xff]  ;;  %v10622_v41 = vld [vmem:[#allocation34_spill] sm:$0xff]  ;;  %v4104_v44 = vld [vmem:[%s7078_s14 + $0xf08] sm:$0xff] }
 0x134   : >>> { %v7419_v57 = vadd.f32 %v803_v38, %v7287_v45  ;;  %v7423_v58 = vadd.f32 %v804_v49, %v7290_v48  ;;  %v7426_v13 = vadd.f32 %v805_v19, %v10621_v40  ;;  %v7429_v16 = vadd.f32 %v806_v24, %v10622_v41  ;;  %v10623_v43 = vld [vmem:[#allocation33_spill] sm:$0xff]  ;;  %v4106_v45 = vld [vmem:[%s7078_s14 + $0xf18] sm:$0xff]  ;;  %v4107_v38 = vld [vmem:[%s7078_s14 + $0xf20] sm:$0xff] }
 0x135   : >>> { %v7432_v55 = vadd.f32 %v807_v17, %v10623_v43  ;;  %v10624_v26 = vld [vmem:[#allocation32_spill] sm:$0xff]  ;;  %v10625_v48 = vld [vmem:[#allocation31_spill] sm:$0xff]  ;;  %v10626_v19 = vld [vmem:[#allocation30_spill] sm:$0xff]  ;;  %v7454_v37 = vadd.f32 %v812_v46, %v10628_v27  ;;  %v7457_v3 = vadd.f32 %v813_v12, %v10629_v39 }
 0x136   : >>> { %v7439_v60 = vadd.f32 %v808_v29, %v10624_v26  ;;  %v7442_v49 = vadd.f32 %v809_v50, %v10625_v48  ;;  %v7445_v33 = vadd.f32 %v810_v53, %v10626_v19  ;;  %v10627_v24 = vld [vmem:[#allocation29_spill] sm:$0xff]  ;;  %v10631_v50 = vld [vmem:[#allocation26_spill] sm:$0xff]  ;;  %v4112_v0 = vld [vmem:[%s7078_s14 + $0xf48] sm:$0xff] }
 0x137   : >>> { %v7448_v42 = vadd.f32 %v811_v22, %v10627_v24  ;;  %10630 = vst [vmem:[#allocation17_spill] sm:$0xff] %v7457_v3  ;;  %v7460_v4 = vadd.f32 %v814_v30, %v10631_v50  ;;  %v10633_v53 = vld [vmem:[#allocation25_spill] sm:$0xff]  ;;  %v4111_v22 = vld [vmem:[%s7078_s14 + $0xf40] sm:$0xff]  ;;  %v10635_v6 = vld [vmem:[#allocation24_spill] sm:$0xff] }
 0x138   : >>> { %v7463_v1 = vadd.f32 %v815_v31, %v10633_v53  ;;  %v4113_v34 = vld [vmem:[%s7078_s14 + $0xf50] sm:$0xff]  ;;  %v7469_v46 = vadd.f32 %v816_v14, %v10635_v6  ;;  %v10637_v21 = vld [vmem:[#allocation23_spill] sm:$0xff]  ;;  %v10639_v17 = vld [vmem:[#allocation22_spill] sm:$0xff] }
 0x139   : >>> { %10632 = vst [vmem:[#allocation34_spill] sm:$0xff] %v7460_v4  ;;  %v7472_v12 = vadd.f32 %v817_v15, %v10637_v21  ;;  %v7475_v63 = vadd.f32 %v818_v54, %v10639_v17  ;;  %v10641_v7 = vld [vmem:[#allocation21_spill] sm:$0xff]  ;;  %v4114_v30 = vld [vmem:[%s7078_s14 + $0xf58] sm:$0xff]  ;;  %v4115_v31 = vld [vmem:[%s7078_s14 + $0xf60] sm:$0xff] }
 0x13a   : >>> { %10634 = vst [vmem:[#allocation33_spill] sm:$0xff] %v7463_v1  ;;  %10636 = vst [vmem:[#allocation32_spill] sm:$0xff] %v7469_v46  ;;  %v7478_v29 = vadd.f32 %v819_v20, %v10641_v7  ;;  %v4116_v40 = vld [vmem:[%s7078_s14 + $0xf68] sm:$0xff]  ;;  %v10645_v14 = vld [vmem:[#allocation19_spill] sm:$0xff] }
 0x13b   : >>> { %10638 = vst [vmem:[#allocation31_spill] sm:$0xff] %v7472_v12  ;;  %10640 = vst [vmem:[#allocation30_spill] sm:$0xff] %v7475_v63  ;;  %v10643_v41 = vld [vmem:[#allocation20_spill] sm:$0xff]  ;;  %v7487_v26 = vadd.f32 %v821_v59, %v10645_v14  ;;  %v10647_v15 = vld [vmem:[#allocation18_spill] sm:$0xff] }
 0x13c   : >>> { %10642 = vst [vmem:[#allocation29_spill] sm:$0xff] %v7478_v29  ;;  %v7484_v43 = vadd.f32 %v820_v5, %v10643_v41  ;;  %v7490_v48 = vadd.f32 %v822_v8, %v10647_v15  ;;  %v4117_v54 = vld [vmem:[%s7078_s14 + $0xf70] sm:$0xff]  ;;  %v4118_v19 = vld [vmem:[%s7078_s14 + $0xf78] sm:$0xff]  ;;  %v4119_v24 = vld [vmem:[%s7078_s14 + $0xf80] sm:$0xff] }
 0x13d   : >>> { %10646 = vst [vmem:[#allocation27_spill] sm:$0xff] %v7487_v26  ;;  %v10649_v20 = vld [vmem:[#allocation35_spill] sm:$0xff]  ;;  %v4120_v39 = vld [vmem:[%s7078_s14 + $0xf88] sm:$0xff]  ;;  %v4121_v50 = vld [vmem:[%s7078_s14 + $0xf90] sm:$0xff] }
 0x13e   : >>> { %10644 = vst [vmem:[#allocation28_spill] sm:$0xff] %v7484_v43  ;;  %10648 = vst [vmem:[#allocation26_spill] sm:$0xff] %v7490_v48  ;;  %v892_v27 = vmul.f32 %v4103_v25, %v10649_v20  ;;  %v4122_v53 = vld [vmem:[%s7078_s14 + $0xf98] sm:$0xff]  ;;  %v893_v5 = vmul.f32 %v4104_v44, %v10649_v20  ;;  %v894_v6 = vmul.f32 %v4105_v51, %v10649_v20  ;;  %v4123_v21 = vld [vmem:[%s7078_s14 + $0xfa0] sm:$0xff] }
 0x13f   : >>> { %v895_v59 = vmul.f32 %v4106_v45, %v10649_v20  ;;  %v896_v8 = vmul.f32 %v4107_v38, %v10649_v20  ;;  %v4124_v17 = vld [vmem:[%s7078_s14 + $0xfa8] sm:$0xff]  ;;  %v4125_v7 = vld [vmem:[%s7078_s14 + $0xfb0] sm:$0xff]  ;;  %v897_v25 = vmul.f32 %v4108_v61, %v10649_v20  ;;  %v898_v41 = vmul.f32 %v4109_v62, %v10649_v20  ;;  %v4126_v51 = vld [vmem:[%s7078_s14 + $0xfb8] sm:$0xff] }
 0x140   : >>> { %v899_v14 = vmul.f32 %v4110_v32, %v10649_v20  ;;  %v900_v44 = vmul.f32 %v4111_v22, %v10649_v20  ;;  %v4127_v45 = vld [vmem:[%s7078_s14 + $0xfc0] sm:$0xff]  ;;  %v4128_v15 = vld [vmem:[%s7078_s14 + $0xfc8] sm:$0xff]  ;;  %v901_v38 = vmul.f32 %v4112_v0, %v10649_v20  ;;  %v902_v48 = vmul.f32 %v4113_v34, %v10649_v20  ;;  %v4129_v62 = vld [vmem:[%s7078_s14 + $0xfd0] sm:$0xff] }
 0x141   : >>> { %v903_v26 = vmul.f32 %v4114_v30, %v10649_v20  ;;  %v904_v61 = vmul.f32 %v4115_v31, %v10649_v20  ;;  %v4130_v43 = vld [vmem:[%s7078_s14 + $0xfd8] sm:$0xff]  ;;  %v4131_v32 = vld [vmem:[%s7078_s14 + $0xfe0] sm:$0xff]  ;;  %v905_v29 = vmul.f32 %v4116_v40, %v10649_v20  ;;  %v906_v22 = vmul.f32 %v4117_v54, %v10649_v20  ;;  %v4132_v12 = vld [vmem:[%s7078_s14 + $0xfe8] sm:$0xff] }
 0x142   : >>> { %v907_v63 = vmul.f32 %v4118_v19, %v10649_v20  ;;  %v908_v0 = vmul.f32 %v4119_v24, %v10649_v20  ;;  %v4133_v34 = vld [vmem:[%s7078_s14 + $0xff0] sm:$0xff]  ;;  %v4134_v46 = vld [vmem:[%s7078_s14 + $0xff8] sm:$0xff]  ;;  %v909_v30 = vmul.f32 %v4120_v39, %v10649_v20  ;;  %v910_v31 = vmul.f32 %v4121_v50, %v10649_v20 }
 0x143   : >>> { %v911_v1 = vmul.f32 %v4122_v53, %v10649_v20  ;;  %v912_v4 = vmul.f32 %v4123_v21, %v10649_v20  ;;  %v913_v40 = vmul.f32 %v4124_v17, %v10649_v20  ;;  %v914_v54 = vmul.f32 %v4125_v7, %v10649_v20 }
 0x144   : >>> { %v915_v19 = vmul.f32 %v4126_v51, %v10649_v20  ;;  %v916_v24 = vmul.f32 %v4127_v45, %v10649_v20  ;;  %v917_v3 = vmul.f32 %v4128_v15, %v10649_v20  ;;  %v918_v39 = vmul.f32 %v4129_v62, %v10649_v20  ;;  %v4147_v62 = vld [vmem:[%s7078_s14 + $0x1450] sm:$0xff] }
 0x145   : >>> { %v919_v50 = vmul.f32 %v4130_v43, %v10649_v20  ;;  %v920_v53 = vmul.f32 %v4131_v32, %v10649_v20  ;;  %v921_v21 = vmul.f32 %v4132_v12, %v10649_v20  ;;  %v922_v17 = vmul.f32 %v4133_v34, %v10649_v20  ;;  %v4148_v32 = vld [vmem:[%s7078_s14 + $0x1458] sm:$0xff]  ;;  %v10674_v34 = vld [vmem:[#allocation27_spill] sm:$0xff] }
 0x146   : >>> { %v923_v7 = vmul.f32 %v4134_v46, %v10649_v20  ;;  %v7546_v51 = vadd.f32 %v892_v27, %v7383_v52  ;;  %v7551_v45 = vadd.f32 %v893_v5, %v7386_v47  ;;  %v7554_v15 = vadd.f32 %v894_v6, %v7389_v23  ;;  %v4145_v6 = vld [vmem:[%s7078_s14 + $0x1440] sm:$0xff] }
 0x147   : >>> { %v7557_v43 = vadd.f32 %v895_v59, %v7392_v2  ;;  %v7560_v12 = vadd.f32 %v896_v8, %v7395_v28  ;;  %v7567_v52 = vadd.f32 %v897_v25, %v7398_v11  ;;  %v7570_v47 = vadd.f32 %v898_v41, %v7401_v56  ;;  %v4146_v59 = vld [vmem:[%s7078_s14 + $0x1448] sm:$0xff]  ;;  %v10666_v25 = vld [vmem:[#allocation31_spill] sm:$0xff] }
 0x148   : >>> { %v7573_v23 = vadd.f32 %v899_v14, %v7404_v35  ;;  %v7576_v2 = vadd.f32 %v900_v44, %v7407_v36  ;;  %v7579_v28 = vadd.f32 %v901_v38, %v7410_v18  ;;  %v7582_v46 = vadd.f32 %v902_v48, %v7413_v9  ;;  %v4137_v48 = vld [vmem:[%s7078_s14 + $0x1400] sm:$0xff]  ;;  %v10668_v14 = vld [vmem:[#allocation30_spill] sm:$0xff]  ;;  %v10670_v38 = vld [vmem:[#allocation29_spill] sm:$0xff] }
 0x149   : >>> { %v7585_v11 = vadd.f32 %v903_v26, %v7416_v10  ;;  %v7588_v56 = vadd.f32 %v904_v61, %v7419_v57  ;;  %v7591_v35 = vadd.f32 %v905_v29, %v7423_v58  ;;  %v7594_v36 = vadd.f32 %v906_v22, %v7426_v13  ;;  %v4138_v10 = vld [vmem:[%s7078_s14 + $0x1408] sm:$0xff]  ;;  %v4141_v29 = vld [vmem:[%s7078_s14 + $0x1420] sm:$0xff] }
 0x14a   : >>> { %v7597_v18 = vadd.f32 %v907_v63, %v7429_v16  ;;  %v7600_v9 = vadd.f32 %v908_v0, %v7432_v55  ;;  %v7605_v57 = vadd.f32 %v909_v30, %v7439_v60  ;;  %v7608_v58 = vadd.f32 %v910_v31, %v7442_v49  ;;  %v4139_v63 = vld [vmem:[%s7078_s14 + $0x1410] sm:$0xff]  ;;  %v4140_v55 = vld [vmem:[%s7078_s14 + $0x1418] sm:$0xff]  ;;  %v4142_v26 = vld [vmem:[%s7078_s14 + $0x1428] sm:$0xff] }
 0x14b   : >>> { %10650 = vst [vmem:[#allocation25_spill] sm:$0xff] %v7594_v36  ;;  %v7611_v13 = vadd.f32 %v911_v1, %v7445_v33  ;;  %v7614_v16 = vadd.f32 %v912_v4, %v7448_v42  ;;  %v7621_v20 = vadd.f32 %v913_v40, %v7454_v37  ;;  %v10658_v60 = vld [vmem:[#allocation17_spill] sm:$0xff]  ;;  %v10660_v49 = vld [vmem:[#allocation34_spill] sm:$0xff]  ;;  %v10664_v37 = vld [vmem:[#allocation32_spill] sm:$0xff]  ;;  %v7640_v41 = vadd.f32 %v918_v39, %v10666_v25 }
 0x14c   : >>> { %10651 = vst [vmem:[#allocation24_spill] sm:$0xff] %v7597_v18  ;;  %10652 = vst [vmem:[#allocation23_spill] sm:$0xff] %v7600_v9  ;;  %v7624_v27 = vadd.f32 %v914_v54, %v10658_v60  ;;  %v7627_v5 = vadd.f32 %v915_v19, %v10660_v49  ;;  %v10662_v33 = vld [vmem:[#allocation33_spill] sm:$0xff]  ;;  %v4144_v1 = vld [vmem:[%s7078_s14 + $0x1438] sm:$0xff]  ;;  %v7637_v8 = vadd.f32 %v917_v3, %v10664_v37  ;;  %v992_v39 = vstv %s7548_s22 }
 0x14d   : >>> { %10653 = vst [vmem:[#allocation22_spill] sm:$0xff] %v7605_v57  ;;  %10654 = vst [vmem:[#allocation21_spill] sm:$0xff] %v7608_v58  ;;  %v7630_v42 = vadd.f32 %v916_v24, %v10662_v33  ;;  %v4143_v4 = vld [vmem:[%s7078_s14 + $0x1430] sm:$0xff]  ;;  %v7643_v44 = vadd.f32 %v919_v50, %v10668_v14  ;;  %v7646_v61 = vadd.f32 %v920_v53, %v10670_v38  ;;  %v4149_v22 = vld [vmem:[%s7078_s14 + $0x1460] sm:$0xff]  ;;  %v7667_v33 = vstv %s7562_s23 }
 0x14e   : >>> { %10655 = vst [vmem:[#allocation20_spill] sm:$0xff] %v7611_v13  ;;  %10656 = vst [vmem:[#allocation19_spill] sm:$0xff] %v7614_v16  ;;  %v10672_v0 = vld [vmem:[#allocation28_spill] sm:$0xff]  ;;  %v7655_v30 = vadd.f32 %v922_v17, %v10674_v34  ;;  %v10676_v31 = vld [vmem:[#allocation26_spill] sm:$0xff]  ;;  %v993_v60 = vmul.f32 %v4137_v48, %v992_v39  ;;  %v994_v49 = vmul.f32 %v4138_v10, %v992_v39 }
 0x14f   : >>> { %10657 = vst [vmem:[#allocation18_spill] sm:$0xff] %v7621_v20  ;;  %10659 = vst [vmem:[#allocation35_spill] sm:$0xff] %v7624_v27  ;;  %v7652_v3 = vadd.f32 %v921_v21, %v10672_v0  ;;  %v7658_v40 = vadd.f32 %v923_v7, %v10676_v31  ;;  %v4150_v54 = vld [vmem:[%s7078_s14 + $0x1468] sm:$0xff]  ;;  %v4151_v19 = vld [vmem:[%s7078_s14 + $0x1470] sm:$0xff]  ;;  %v7670_v21 = vstv %s7564_s24  ;;  %v995_v25 = vmul.f32 %v4139_v63, %v992_v39 }
 0x150   : >>> { %10661 = vst [vmem:[#allocation17_spill] sm:$0xff] %v7627_v5  ;;  %10663 = vst [vmem:[#allocation34_spill] sm:$0xff] %v7630_v42  ;;  %v4152_v24 = vld [vmem:[%s7078_s14 + $0x1478] sm:$0xff]  ;;  %v4153_v50 = vld [vmem:[%s7078_s14 + $0x1480] sm:$0xff]  ;;  %v996_v14 = vmul.f32 %v4140_v55, %v992_v39  ;;  %v997_v38 = vmul.f32 %v4141_v29, %v992_v39  ;;  %v998_v0 = vmul.f32 %v4142_v26, %v992_v39 }
 0x151   : >>> { %10665 = vst [vmem:[#allocation33_spill] sm:$0xff] %v7637_v8  ;;  %10667 = vst [vmem:[#allocation32_spill] sm:$0xff] %v7640_v41  ;;  %v4154_v53 = vld [vmem:[%s7078_s14 + $0x1488] sm:$0xff]  ;;  %v4155_v17 = vld [vmem:[%s7078_s14 + $0x1490] sm:$0xff]  ;;  %v999_v31 = vmul.f32 %v4143_v4, %v992_v39  ;;  %v1004_v63 = vmul.f32 %v4148_v32, %v992_v39  ;;  %v1005_v55 = vmul.f32 %v4149_v22, %v992_v39 }
 0x152   : >>> { %10669 = vst [vmem:[#allocation31_spill] sm:$0xff] %v7643_v44  ;;  %10671 = vst [vmem:[#allocation30_spill] sm:$0xff] %v7646_v61  ;;  %v4156_v7 = vld [vmem:[%s7078_s14 + $0x1498] sm:$0xff]  ;;  %v4157_v37 = vld [vmem:[%s7078_s14 + $0x14a0] sm:$0xff]  ;;  %v1003_v44 = vmul.f32 %v4147_v62, %v992_v39  ;;  %v1006_v29 = vmul.f32 %v4150_v54, %v992_v39  ;;  %v1007_v42 = vmul.f32 %v4151_v19, %v992_v39 }
 0x153   : >>> { %10673 = vst [vmem:[#allocation29_spill] sm:$0xff] %v7652_v3  ;;  %10675 = vst [vmem:[#allocation28_spill] sm:$0xff] %v7655_v30  ;;  %v4158_v34 = vld [vmem:[%s7078_s14 + $0x14a8] sm:$0xff]  ;;  %v4159_v48 = vld [vmem:[%s7078_s14 + $0x14b0] sm:$0xff]  ;;  %v1008_v5 = vmul.f32 %v4152_v24, %v992_v39  ;;  %v1009_v27 = vmul.f32 %v4153_v50, %v992_v39  ;;  %v1010_v20 = vmul.f32 %v4154_v53, %v992_v39 }
 0x154   : >>> { %10677 = vst [vmem:[#allocation27_spill] sm:$0xff] %v7658_v40  ;;  %10678 = vst [vmem:[#allocation26_spill] sm:$0xff] %v7667_v33  ;;  %v4160_v10 = vld [vmem:[%s7078_s14 + $0x14b8] sm:$0xff]  ;;  %v1000_v33 = vmul.f32 %v4144_v1, %v992_v39  ;;  %v1001_v40 = vmul.f32 %v4145_v6, %v992_v39  ;;  %v4161_v30 = vld [vmem:[%s7078_s14 + $0x14c0] sm:$0xff]  ;;  %v1011_v6 = vmul.f32 %v4155_v17, %v992_v39 }
 0x155   : >>> { %10679 = vst [vmem:[#allocation36_spill] sm:$0xff] %v7670_v21  ;;  %v1002_v21 = vmul.f32 %v4146_v59, %v992_v39  ;;  %v4162_v3 = vld [vmem:[%s7078_s14 + $0x14c8] sm:$0xff]  ;;  %v4163_v61 = vld [vmem:[%s7078_s14 + $0x14d0] sm:$0xff]  ;;  %v4164_v41 = vld [vmem:[%s7078_s14 + $0x14d8] sm:$0xff]  ;;  %v1012_v16 = vmul.f32 %v4156_v7, %v992_v39  ;;  %v1013_v59 = vmul.f32 %v4157_v37, %v992_v39  ;;  %v1014_v13 = vmul.f32 %v4158_v34, %v992_v39 }
 0x156   : >>> { %v4165_v26 = vld [vmem:[%s7078_s14 + $0x14e0] sm:$0xff]  ;;  %v4166_v8 = vld [vmem:[%s7078_s14 + $0x14e8] sm:$0xff]  ;;  %v4167_v4 = vld [vmem:[%s7078_s14 + $0x14f0] sm:$0xff]  ;;  %v1015_v58 = vmul.f32 %v4159_v48, %v992_v39  ;;  %v1016_v57 = vmul.f32 %v4160_v10, %v992_v39  ;;  %v1017_v9 = vmul.f32 %v4161_v30, %v992_v39  ;;  %v1018_v62 = vmul.f32 %v4162_v3, %v992_v39 }
 0x157   : >>> { %v4168_v1 = vld [vmem:[%s7078_s14 + $0x14f8] sm:$0xff]  ;;  %v1019_v32 = vmul.f32 %v4163_v61, %v992_v39  ;;  %v1020_v22 = vmul.f32 %v4164_v41, %v992_v39  ;;  %v1021_v54 = vmul.f32 %v4165_v26, %v992_v39  ;;  %v1022_v18 = vmul.f32 %v4166_v8, %v992_v39  ;;  %v4171_v61 = vld [vmem:[%s7078_s14 + $0x1900] sm:$0xff]  ;;  %v10680_v3 = vld [vmem:[#allocation25_spill] sm:$0xff] }
 0x158   : >>> { %v1023_v36 = vmul.f32 %v4167_v4, %v992_v39  ;;  %v1024_v19 = vmul.f32 %v4168_v1, %v992_v39  ;;  %v7687_v24 = vadd.f32 %v993_v60, %v7546_v51  ;;  %v7690_v50 = vadd.f32 %v994_v49, %v7551_v45  ;;  %v10683_v39 = vld [vmem:[#allocation22_spill] sm:$0xff]  ;;  %v4173_v60 = vld [vmem:[%s7078_s14 + $0x1910] sm:$0xff]  ;;  %v4175_v49 = vld [vmem:[%s7078_s14 + $0x1920] sm:$0xff] }
 0x159   : >>> { %v7693_v53 = vadd.f32 %v995_v25, %v7554_v15  ;;  %v7696_v30 = vadd.f32 %v996_v14, %v7557_v43  ;;  %v7699_v41 = vadd.f32 %v997_v38, %v7560_v12  ;;  %v7702_v8 = vadd.f32 %v998_v0, %v7567_v52  ;;  %v4177_v25 = vld [vmem:[%s7078_s14 + $0x1930] sm:$0xff]  ;;  %v4178_v14 = vld [vmem:[%s7078_s14 + $0x1938] sm:$0xff]  ;;  %v4179_v38 = vld [vmem:[%s7078_s14 + $0x1940] sm:$0xff] }
 0x15a   : >>> { %v7705_v51 = vadd.f32 %v999_v31, %v7570_v47  ;;  %v7708_v45 = vadd.f32 %v1000_v33, %v7573_v23  ;;  %v7711_v15 = vadd.f32 %v1001_v40, %v7576_v2  ;;  %v7714_v43 = vadd.f32 %v1002_v21, %v7579_v28  ;;  %v4172_v2 = vld [vmem:[%s7078_s14 + $0x1908] sm:$0xff]  ;;  %v10684_v21 = vld [vmem:[#allocation21_spill] sm:$0xff]  ;;  %v10689_v0 = vld [vmem:[#allocation35_spill] sm:$0xff] }
 0x15b   : >>> { %v7717_v12 = vadd.f32 %v1003_v44, %v7582_v46  ;;  %v7720_v52 = vadd.f32 %v1004_v63, %v7585_v11  ;;  %v7723_v47 = vadd.f32 %v1005_v55, %v7588_v56  ;;  %v7726_v23 = vadd.f32 %v1006_v29, %v7591_v35  ;;  %v10681_v40 = vld [vmem:[#allocation24_spill] sm:$0xff]  ;;  %v10682_v44 = vld [vmem:[#allocation23_spill] sm:$0xff]  ;;  %v4174_v35 = vld [vmem:[%s7078_s14 + $0x1918] sm:$0xff] }
 0x15c   : >>> { %v7731_v28 = vadd.f32 %v1007_v42, %v10680_v3  ;;  %v7734_v46 = vadd.f32 %v1008_v5, %v10681_v40  ;;  %v7737_v11 = vadd.f32 %v1009_v27, %v10682_v44  ;;  %v7740_v56 = vadd.f32 %v1010_v20, %v10683_v39  ;;  %v4176_v33 = vld [vmem:[%s7078_s14 + $0x1928] sm:$0xff]  ;;  %v10686_v5 = vld [vmem:[#allocation19_spill] sm:$0xff]  ;;  %v10687_v27 = vld [vmem:[#allocation18_spill] sm:$0xff] }
 0x15d   : >>> { %v7747_v17 = vadd.f32 %v1011_v6, %v10684_v21  ;;  %v10685_v42 = vld [vmem:[#allocation20_spill] sm:$0xff]  ;;  %v7753_v37 = vadd.f32 %v1013_v59, %v10686_v5  ;;  %v7756_v20 = vadd.f32 %v1014_v13, %v10687_v27  ;;  %v7762_v34 = vadd.f32 %v1015_v58, %v10689_v0  ;;  %v10691_v48 = vld [vmem:[#allocation17_spill] sm:$0xff]  ;;  %v4182_v26 = vld [vmem:[%s7078_s14 + $0x1958] sm:$0xff] }
 0x15e   : >>> { %v7750_v7 = vadd.f32 %v1012_v16, %v10685_v42  ;;  %v7765_v10 = vadd.f32 %v1016_v57, %v10691_v48  ;;  %v10693_v16 = vld [vmem:[#allocation34_spill] sm:$0xff]  ;;  %v10695_v63 = vld [vmem:[#allocation33_spill] sm:$0xff]  ;;  %v4180_v55 = vld [vmem:[%s7078_s14 + $0x1948] sm:$0xff] }
 0x15f   : >>> { %10688 = vst [vmem:[#allocation25_spill] sm:$0xff] %v7756_v20  ;;  %10690 = vst [vmem:[#allocation24_spill] sm:$0xff] %v7762_v34  ;;  %v7768_v31 = vadd.f32 %v1017_v9, %v10693_v16  ;;  %v7771_v13 = vadd.f32 %v1018_v62, %v10695_v63  ;;  %v4181_v29 = vld [vmem:[%s7078_s14 + $0x1950] sm:$0xff]  ;;  %v10697_v4 = vld [vmem:[#allocation32_spill] sm:$0xff] }
 0x160   : >>> { %10692 = vst [vmem:[#allocation23_spill] sm:$0xff] %v7765_v10  ;;  %v7777_v58 = vadd.f32 %v1019_v32, %v10697_v4  ;;  %v10699_v1 = vld [vmem:[#allocation31_spill] sm:$0xff]  ;;  %v10701_v6 = vld [vmem:[#allocation30_spill] sm:$0xff]  ;;  %v10703_v9 = vld [vmem:[#allocation29_spill] sm:$0xff] }
 0x161   : >>> { %10694 = vst [vmem:[#allocation22_spill] sm:$0xff] %v7768_v31  ;;  %10696 = vst [vmem:[#allocation21_spill] sm:$0xff] %v7771_v13  ;;  %v7780_v57 = vadd.f32 %v1020_v22, %v10699_v1  ;;  %v7783_v59 = vadd.f32 %v1021_v54, %v10701_v6  ;;  %v7786_v3 = vadd.f32 %v1022_v18, %v10703_v9  ;;  %v4183_v62 = vld [vmem:[%s7078_s14 + $0x1960] sm:$0xff]  ;;  %v4184_v40 = vld [vmem:[%s7078_s14 + $0x1968] sm:$0xff] }
 0x162   : >>> { %10698 = vst [vmem:[#allocation20_spill] sm:$0xff] %v7777_v58  ;;  %v4185_v44 = vld [vmem:[%s7078_s14 + $0x1970] sm:$0xff]  ;;  %v10705_v39 = vld [vmem:[#allocation28_spill] sm:$0xff]  ;;  %v10707_v32 = vld [vmem:[#allocation27_spill] sm:$0xff] }
 0x163   : >>> { %10700 = vst [vmem:[#allocation19_spill] sm:$0xff] %v7780_v57  ;;  %10702 = vst [vmem:[#allocation18_spill] sm:$0xff] %v7783_v59  ;;  %v7792_v21 = vadd.f32 %v1023_v36, %v10705_v39  ;;  %v7795_v42 = vadd.f32 %v1024_v19, %v10707_v32  ;;  %v4186_v22 = vld [vmem:[%s7078_s14 + $0x1978] sm:$0xff]  ;;  %v4187_v5 = vld [vmem:[%s7078_s14 + $0x1980] sm:$0xff] }
 0x164   : >>> { %10704 = vst [vmem:[#allocation35_spill] sm:$0xff] %v7786_v3  ;;  %v4188_v27 = vld [vmem:[%s7078_s14 + $0x1988] sm:$0xff]  ;;  %v10709_v54 = vld [vmem:[#allocation26_spill] sm:$0xff]  ;;  %v4189_v48 = vld [vmem:[%s7078_s14 + $0x1990] sm:$0xff] }
 0x165   : >>> { %10706 = vst [vmem:[#allocation17_spill] sm:$0xff] %v7792_v21  ;;  %10708 = vst [vmem:[#allocation34_spill] sm:$0xff] %v7795_v42  ;;  %v1094_v0 = vmul.f32 %v4171_v61, %v10709_v54  ;;  %v1095_v18 = vmul.f32 %v4172_v2, %v10709_v54  ;;  %v4190_v16 = vld [vmem:[%s7078_s14 + $0x1998] sm:$0xff]  ;;  %v4191_v63 = vld [vmem:[%s7078_s14 + $0x19a0] sm:$0xff]  ;;  %v1096_v36 = vmul.f32 %v4173_v60, %v10709_v54 }
 0x166   : >>> { %v1097_v4 = vmul.f32 %v4174_v35, %v10709_v54  ;;  %v1098_v19 = vmul.f32 %v4175_v49, %v10709_v54  ;;  %v1099_v1 = vmul.f32 %v4176_v33, %v10709_v54  ;;  %v4192_v6 = vld [vmem:[%s7078_s14 + $0x19a8] sm:$0xff]  ;;  %v4193_v61 = vld [vmem:[%s7078_s14 + $0x19b0] sm:$0xff]  ;;  %v4194_v9 = vld [vmem:[%s7078_s14 + $0x19b8] sm:$0xff]  ;;  %v1100_v2 = vmul.f32 %v4177_v25, %v10709_v54 }
 0x167   : >>> { %v1101_v39 = vmul.f32 %v4178_v14, %v10709_v54  ;;  %v1102_v32 = vmul.f32 %v4179_v38, %v10709_v54  ;;  %v1103_v60 = vmul.f32 %v4180_v55, %v10709_v54  ;;  %v4195_v35 = vld [vmem:[%s7078_s14 + $0x19c0] sm:$0xff]  ;;  %v4196_v49 = vld [vmem:[%s7078_s14 + $0x19c8] sm:$0xff]  ;;  %v4197_v42 = vld [vmem:[%s7078_s14 + $0x19d0] sm:$0xff]  ;;  %v1104_v33 = vmul.f32 %v4181_v29, %v10709_v54 }
 0x168   : >>> { %v1105_v21 = vmul.f32 %v4182_v26, %v10709_v54  ;;  %v1106_v3 = vmul.f32 %v4183_v62, %v10709_v54  ;;  %v1107_v59 = vmul.f32 %v4184_v40, %v10709_v54  ;;  %v4198_v25 = vld [vmem:[%s7078_s14 + $0x19d8] sm:$0xff]  ;;  %v4199_v57 = vld [vmem:[%s7078_s14 + $0x19e0] sm:$0xff]  ;;  %v4200_v14 = vld [vmem:[%s7078_s14 + $0x19e8] sm:$0xff]  ;;  %v1108_v38 = vmul.f32 %v4185_v44, %v10709_v54 }
 0x169   : >>> { %v1109_v58 = vmul.f32 %v4186_v22, %v10709_v54  ;;  %v1110_v55 = vmul.f32 %v4187_v5, %v10709_v54  ;;  %v1111_v13 = vmul.f32 %v4188_v27, %v10709_v54  ;;  %v4201_v31 = vld [vmem:[%s7078_s14 + $0x19f0] sm:$0xff]  ;;  %v4202_v10 = vld [vmem:[%s7078_s14 + $0x19f8] sm:$0xff]  ;;  %v1112_v29 = vmul.f32 %v4189_v48, %v10709_v54 }
 0x16a   : >>> { %v1113_v26 = vmul.f32 %v4190_v16, %v10709_v54  ;;  %v1114_v62 = vmul.f32 %v4191_v63, %v10709_v54  ;;  %v1115_v40 = vmul.f32 %v4192_v6, %v10709_v54  ;;  %v1116_v34 = vmul.f32 %v4193_v61, %v10709_v54 }
 0x16b   : >>> { %v1117_v44 = vmul.f32 %v4194_v9, %v10709_v54  ;;  %v1118_v22 = vmul.f32 %v4195_v35, %v10709_v54  ;;  %v1119_v5 = vmul.f32 %v4196_v49, %v10709_v54  ;;  %v1120_v27 = vmul.f32 %v4197_v42, %v10709_v54  ;;  %v10722_v49 = vld [vmem:[#allocation19_spill] sm:$0xff] }
 0x16c   : >>> { %v1121_v20 = vmul.f32 %v4198_v25, %v10709_v54  ;;  %v1122_v48 = vmul.f32 %v4199_v57, %v10709_v54  ;;  %v1123_v16 = vmul.f32 %v4200_v14, %v10709_v54  ;;  %v1124_v63 = vmul.f32 %v4201_v31, %v10709_v54  ;;  %v10724_v25 = vld [vmem:[#allocation18_spill] sm:$0xff] }
 0x16d   : >>> { %v1125_v6 = vmul.f32 %v4202_v10, %v10709_v54  ;;  %v7847_v61 = vadd.f32 %v1094_v0, %v7687_v24  ;;  %v7850_v9 = vadd.f32 %v1095_v18, %v7690_v50  ;;  %v7853_v42 = vadd.f32 %v1096_v36, %v7693_v53  ;;  %v4205_v10 = vld [vmem:[%s7078_s14 + $0x1e00] sm:$0xff]  ;;  %v10712_v18 = vld [vmem:[#allocation24_spill] sm:$0xff] }
 0x16e   : >>> { %v7856_v35 = vadd.f32 %v1097_v4, %v7696_v30  ;;  %v7859_v57 = vadd.f32 %v1098_v19, %v7699_v41  ;;  %v7862_v31 = vadd.f32 %v1099_v1, %v7702_v8  ;;  %v7865_v24 = vadd.f32 %v1100_v2, %v7705_v51  ;;  %v4213_v0 = vld [vmem:[%s7078_s14 + $0x1e40] sm:$0xff]  ;;  %v10718_v19 = vld [vmem:[#allocation21_spill] sm:$0xff]  ;;  %v4214_v2 = vld [vmem:[%s7078_s14 + $0x1e48] sm:$0xff] }
 0x16f   : >>> { %v7868_v50 = vadd.f32 %v1101_v39, %v7708_v45  ;;  %v7871_v53 = vadd.f32 %v1102_v32, %v7711_v15  ;;  %v7874_v30 = vadd.f32 %v1103_v60, %v7714_v43  ;;  %v7877_v41 = vadd.f32 %v1104_v33, %v7717_v12  ;;  %v4206_v15 = vld [vmem:[%s7078_s14 + $0x1e08] sm:$0xff]  ;;  %v4215_v39 = vld [vmem:[%s7078_s14 + $0x1e50] sm:$0xff]  ;;  %v4216_v32 = vld [vmem:[%s7078_s14 + $0x1e58] sm:$0xff] }
 0x170   : >>> { %v7880_v8 = vadd.f32 %v1105_v21, %v7720_v52  ;;  %v7883_v51 = vadd.f32 %v1106_v3, %v7723_v47  ;;  %v7886_v45 = vadd.f32 %v1107_v59, %v7726_v23  ;;  %v7891_v43 = vadd.f32 %v1108_v38, %v7731_v28  ;;  %v4207_v3 = vld [vmem:[%s7078_s14 + $0x1e10] sm:$0xff]  ;;  %v4208_v23 = vld [vmem:[%s7078_s14 + $0x1e18] sm:$0xff]  ;;  %v4209_v59 = vld [vmem:[%s7078_s14 + $0x1e20] sm:$0xff] }
 0x171   : >>> { %v7894_v12 = vadd.f32 %v1109_v58, %v7734_v46  ;;  %v7897_v52 = vadd.f32 %v1110_v55, %v7737_v11  ;;  %v7900_v47 = vadd.f32 %v1111_v13, %v7740_v56  ;;  %v4210_v21 = vld [vmem:[%s7078_s14 + $0x1e28] sm:$0xff]  ;;  %v7907_v54 = vadd.f32 %v1112_v29, %v7747_v17  ;;  %v10710_v11 = vld [vmem:[#allocation25_spill] sm:$0xff]  ;;  %v4212_v58 = vld [vmem:[%s7078_s14 + $0x1e38] sm:$0xff] }
 0x172   : >>> { %v7910_v28 = vadd.f32 %v1113_v26, %v7750_v7  ;;  %v7913_v46 = vadd.f32 %v1114_v62, %v7753_v37  ;;  %v7916_v56 = vadd.f32 %v1115_v40, %v10710_v11  ;;  %v4211_v13 = vld [vmem:[%s7078_s14 + $0x1e30] sm:$0xff]  ;;  %v7922_v36 = vadd.f32 %v1116_v34, %v10712_v18  ;;  %v10714_v17 = vld [vmem:[#allocation23_spill] sm:$0xff]  ;;  %v10716_v7 = vld [vmem:[#allocation22_spill] sm:$0xff] }
 0x173   : >>> { %v7925_v4 = vadd.f32 %v1117_v44, %v10714_v17  ;;  %v7928_v37 = vadd.f32 %v1118_v22, %v10716_v7  ;;  %v7931_v1 = vadd.f32 %v1119_v5, %v10718_v19  ;;  %v10720_v60 = vld [vmem:[#allocation20_spill] sm:$0xff]  ;;  %v7940_v33 = vadd.f32 %v1121_v20, %v10722_v49  ;;  %v10726_v38 = vld [vmem:[#allocation35_spill] sm:$0xff]  ;;  %v4219_v62 = vld [vmem:[%s7078_s14 + $0x1e70] sm:$0xff] }
 0x174   : >>> { %10711 = vst [vmem:[#allocation33_spill] sm:$0xff] %v7916_v56  ;;  %10713 = vst [vmem:[#allocation32_spill] sm:$0xff] %v7922_v36  ;;  %v7937_v34 = vadd.f32 %v1120_v27, %v10720_v60  ;;  %v7943_v14 = vadd.f32 %v1122_v48, %v10724_v25  ;;  %v7946_v55 = vadd.f32 %v1123_v16, %v10726_v38  ;;  %v4217_v29 = vld [vmem:[%s7078_s14 + $0x1e60] sm:$0xff]  ;;  %v4218_v26 = vld [vmem:[%s7078_s14 + $0x1e68] sm:$0xff] }
 0x175   : >>> { %10715 = vst [vmem:[#allocation31_spill] sm:$0xff] %v7925_v4  ;;  %10717 = vst [vmem:[#allocation30_spill] sm:$0xff] %v7928_v37  ;;  %v10728_v40 = vld [vmem:[#allocation17_spill] sm:$0xff]  ;;  %v10730_v22 = vld [vmem:[#allocation34_spill] sm:$0xff] }
 0x176   : >>> { %10719 = vst [vmem:[#allocation29_spill] sm:$0xff] %v7931_v1  ;;  %10721 = vst [vmem:[#allocation28_spill] sm:$0xff] %v7937_v34  ;;  %v7952_v44 = vadd.f32 %v1124_v63, %v10728_v40  ;;  %v7955_v5 = vadd.f32 %v1125_v6, %v10730_v22  ;;  %v4220_v20 = vld [vmem:[%s7078_s14 + $0x1e78] sm:$0xff]  ;;  %v4221_v27 = vld [vmem:[%s7078_s14 + $0x1e80] sm:$0xff] }
 0x177   : >>> { %10723 = vst [vmem:[#allocation27_spill] sm:$0xff] %v7940_v33  ;;  %10725 = vst [vmem:[#allocation26_spill] sm:$0xff] %v7943_v14  ;;  %v4222_v11 = vld [vmem:[%s7078_s14 + $0x1e88] sm:$0xff]  ;;  %v4223_v17 = vld [vmem:[%s7078_s14 + $0x1e90] sm:$0xff] }
 0x178   : >>> { %10727 = vst [vmem:[#allocation25_spill] sm:$0xff] %v7946_v55  ;;  %10729 = vst [vmem:[#allocation24_spill] sm:$0xff] %v7952_v44  ;;  %v10732_v48 = vld [vmem:[#allocation36_spill] sm:$0xff]  ;;  %v4224_v7 = vld [vmem:[%s7078_s14 + $0x1e98] sm:$0xff] }
 0x179   : >>> { %10731 = vst [vmem:[#allocation23_spill] sm:$0xff] %v7955_v5  ;;  %v1195_v18 = vmul.f32 %v4205_v10, %v10732_v48  ;;  %v1196_v16 = vmul.f32 %v4206_v15, %v10732_v48  ;;  %v4225_v19 = vld [vmem:[%s7078_s14 + $0x1ea0] sm:$0xff]  ;;  %v1197_v63 = vmul.f32 %v4207_v3, %v10732_v48  ;;  %v1198_v60 = vmul.f32 %v4208_v23, %v10732_v48  ;;  %v4226_v25 = vld [vmem:[%s7078_s14 + $0x1ea8] sm:$0xff]  ;;  %v4227_v10 = vld [vmem:[%s7078_s14 + $0x1eb0] sm:$0xff] }
 0x17a   : >>> { %v1199_v6 = vmul.f32 %v4209_v59, %v10732_v48  ;;  %v1200_v49 = vmul.f32 %v4210_v21, %v10732_v48  ;;  %v4228_v38 = vld [vmem:[%s7078_s14 + $0x1eb8] sm:$0xff]  ;;  %v1201_v15 = vmul.f32 %v4211_v13, %v10732_v48  ;;  %v1202_v40 = vmul.f32 %v4212_v58, %v10732_v48  ;;  %v4229_v23 = vld [vmem:[%s7078_s14 + $0x1ec0] sm:$0xff]  ;;  %v4230_v59 = vld [vmem:[%s7078_s14 + $0x1ec8] sm:$0xff] }
 0x17b   : >>> { %v1203_v22 = vmul.f32 %v4213_v0, %v10732_v48  ;;  %v1204_v3 = vmul.f32 %v4214_v2, %v10732_v48  ;;  %v4231_v5 = vld [vmem:[%s7078_s14 + $0x1ed0] sm:$0xff]  ;;  %v1205_v21 = vmul.f32 %v4215_v39, %v10732_v48  ;;  %v1206_v44 = vmul.f32 %v4216_v32, %v10732_v48  ;;  %v4232_v58 = vld [vmem:[%s7078_s14 + $0x1ed8] sm:$0xff]  ;;  %v4233_v14 = vld [vmem:[%s7078_s14 + $0x1ee0] sm:$0xff] }
 0x17c   : >>> { %v1207_v55 = vmul.f32 %v4217_v29, %v10732_v48  ;;  %v1208_v13 = vmul.f32 %v4218_v26, %v10732_v48  ;;  %v4234_v0 = vld [vmem:[%s7078_s14 + $0x1ee8] sm:$0xff]  ;;  %v1209_v33 = vmul.f32 %v4219_v62, %v10732_v48  ;;  %v1210_v2 = vmul.f32 %v4220_v20, %v10732_v48  ;;  %v4235_v39 = vld [vmem:[%s7078_s14 + $0x1ef0] sm:$0xff]  ;;  %v4236_v37 = vld [vmem:[%s7078_s14 + $0x1ef8] sm:$0xff] }
 0x17d   : >>> { %v1211_v34 = vmul.f32 %v4221_v27, %v10732_v48  ;;  %v1212_v1 = vmul.f32 %v4222_v11, %v10732_v48  ;;  %v1213_v32 = vmul.f32 %v4223_v17, %v10732_v48  ;;  %v1214_v29 = vmul.f32 %v4224_v7, %v10732_v48 }
 0x17e   : >>> { %v1215_v4 = vmul.f32 %v4225_v19, %v10732_v48  ;;  %v1216_v26 = vmul.f32 %v4226_v25, %v10732_v48  ;;  %v1217_v62 = vmul.f32 %v4227_v10, %v10732_v48  ;;  %v1218_v20 = vmul.f32 %v4228_v38, %v10732_v48 }
 0x17f   : >>> { %v1219_v27 = vmul.f32 %v4229_v23, %v10732_v48  ;;  %v1220_v11 = vmul.f32 %v4230_v59, %v10732_v48  ;;  %v1221_v36 = vmul.f32 %v4231_v5, %v10732_v48  ;;  %v1222_v17 = vmul.f32 %v4232_v58, %v10732_v48  ;;  %v10750_v23 = vld [vmem:[#allocation28_spill] sm:$0xff]  ;;  %v10754_v58 = vld [vmem:[#allocation26_spill] sm:$0xff] }
 0x180   : >>> { %v1223_v7 = vmul.f32 %v4233_v14, %v10732_v48  ;;  %v1224_v19 = vmul.f32 %v4234_v0, %v10732_v48  ;;  %v1225_v25 = vmul.f32 %v4235_v39, %v10732_v48  ;;  %v1226_v56 = vmul.f32 %v4236_v37, %v10732_v48 }
 0x181   : >>> { %v8009_v10 = vadd.f32 %v1195_v18, %v7847_v61  ;;  %v8012_v38 = vadd.f32 %v1196_v16, %v7850_v9  ;;  %v8019_v5 = vadd.f32 %v1197_v63, %v7853_v42  ;;  %v8022_v14 = vadd.f32 %v1198_v60, %v7856_v35  ;;  %v4245_v18 = vld [vmem:[%s7078_s14 + $0x2330] sm:$0xff]  ;;  %v4246_v16 = vld [vmem:[%s7078_s14 + $0x2338] sm:$0xff]  ;;  %v10742_v63 = vld [vmem:[#allocation32_spill] sm:$0xff] }
 0x182   : >>> { %v8025_v37 = vadd.f32 %v1199_v6, %v7859_v57  ;;  %v8028_v61 = vadd.f32 %v1200_v49, %v7862_v31  ;;  %v8031_v9 = vadd.f32 %v1201_v15, %v7865_v24  ;;  %v8034_v48 = vadd.f32 %v1202_v40, %v7868_v50  ;;  %v4247_v15 = vld [vmem:[%s7078_s14 + $0x2340] sm:$0xff]  ;;  %v4248_v40 = vld [vmem:[%s7078_s14 + $0x2348] sm:$0xff] }
 0x183   : >>> { %v8037_v42 = vadd.f32 %v1203_v22, %v7871_v53  ;;  %v8040_v35 = vadd.f32 %v1204_v3, %v7874_v30  ;;  %v8043_v57 = vadd.f32 %v1205_v21, %v7877_v41  ;;  %v8046_v31 = vadd.f32 %v1206_v44, %v7880_v8  ;;  %v4239_v44 = vld [vmem:[%s7078_s14 + $0x2300] sm:$0xff]  ;;  %v4249_v22 = vld [vmem:[%s7078_s14 + $0x2350] sm:$0xff]  ;;  %v4250_v3 = vld [vmem:[%s7078_s14 + $0x2358] sm:$0xff] }
 0x184   : >>> { %v8049_v24 = vadd.f32 %v1207_v55, %v7883_v51  ;;  %v8052_v50 = vadd.f32 %v1208_v13, %v7886_v45  ;;  %v8055_v53 = vadd.f32 %v1209_v33, %v7891_v43  ;;  %v8058_v30 = vadd.f32 %v1210_v2, %v7894_v12  ;;  %v4240_v51 = vld [vmem:[%s7078_s14 + $0x2308] sm:$0xff]  ;;  %v4241_v55 = vld [vmem:[%s7078_s14 + $0x2310] sm:$0xff]  ;;  %v4242_v45 = vld [vmem:[%s7078_s14 + $0x2318] sm:$0xff] }
 0x185   : >>> { %v8061_v41 = vadd.f32 %v1211_v34, %v7897_v52  ;;  %v8064_v8 = vadd.f32 %v1212_v1, %v7900_v47  ;;  %v8071_v43 = vadd.f32 %v1213_v32, %v7907_v54  ;;  %v8074_v12 = vadd.f32 %v1214_v29, %v7910_v28  ;;  %v10740_v34 = vld [vmem:[#allocation33_spill] sm:$0xff]  ;;  %v4243_v1 = vld [vmem:[%s7078_s14 + $0x2320] sm:$0xff]  ;;  %v4244_v33 = vld [vmem:[%s7078_s14 + $0x2328] sm:$0xff] }
 0x186   : >>> { %10733 = vst [vmem:[#allocation22_spill] sm:$0xff] %v8055_v53  ;;  %10734 = vst [vmem:[#allocation21_spill] sm:$0xff] %v8058_v30  ;;  %v8077_v52 = vadd.f32 %v1215_v4, %v7913_v46  ;;  %v8080_v47 = vadd.f32 %v1216_v26, %v10740_v34  ;;  %v8087_v60 = vadd.f32 %v1217_v62, %v10742_v63  ;;  %v10744_v54 = vld [vmem:[#allocation31_spill] sm:$0xff]  ;;  %v10746_v28 = vld [vmem:[#allocation30_spill] sm:$0xff]  ;;  %v1295_v34 = vstv %s8014_s26 }
 0x187   : >>> { %10735 = vst [vmem:[#allocation20_spill] sm:$0xff] %v8061_v41  ;;  %10736 = vst [vmem:[#allocation19_spill] sm:$0xff] %v8064_v8  ;;  %v8090_v6 = vadd.f32 %v1218_v20, %v10744_v54  ;;  %v8093_v46 = vadd.f32 %v1219_v27, %v10746_v28  ;;  %v10748_v4 = vld [vmem:[#allocation29_spill] sm:$0xff]  ;;  %v8103_v59 = vadd.f32 %v1221_v36, %v10750_v23  ;;  %v10752_v21 = vld [vmem:[#allocation27_spill] sm:$0xff] }
 0x188   : >>> { %10737 = vst [vmem:[#allocation18_spill] sm:$0xff] %v8071_v43  ;;  %10738 = vst [vmem:[#allocation35_spill] sm:$0xff] %v8074_v12  ;;  %v8096_v49 = vadd.f32 %v1220_v11, %v10748_v4  ;;  %v8106_v13 = vadd.f32 %v1222_v17, %v10752_v21  ;;  %v8109_v0 = vadd.f32 %v1223_v7, %v10754_v58  ;;  %v10756_v2 = vld [vmem:[#allocation25_spill] sm:$0xff]  ;;  %v4251_v32 = vld [vmem:[%s7078_s14 + $0x2360] sm:$0xff]  ;;  %v8127_v7 = vstv %s8016_s27 }
 0x189   : >>> { %10739 = vst [vmem:[#allocation17_spill] sm:$0xff] %v8077_v52  ;;  %10741 = vst [vmem:[#allocation34_spill] sm:$0xff] %v8080_v47  ;;  %v8112_v39 = vadd.f32 %v1224_v19, %v10756_v2  ;;  %v4252_v29 = vld [vmem:[%s7078_s14 + $0x2368] sm:$0xff]  ;;  %v4253_v26 = vld [vmem:[%s7078_s14 + $0x2370] sm:$0xff]  ;;  %v1296_v28 = vmul.f32 %v4239_v44, %v1295_v34  ;;  %v1297_v4 = vmul.f32 %v4240_v51, %v1295_v34 }
 0x18a   : >>> { %10743 = vst [vmem:[#allocation36_spill] sm:$0xff] %v8087_v60  ;;  %10745 = vst [vmem:[#allocation33_spill] sm:$0xff] %v8090_v6  ;;  %v10758_v62 = vld [vmem:[#allocation24_spill] sm:$0xff]  ;;  %v10760_v36 = vld [vmem:[#allocation23_spill] sm:$0xff]  ;;  %v1298_v23 = vmul.f32 %v4241_v55, %v1295_v34  ;;  %v1300_v2 = vmul.f32 %v4243_v1, %v1295_v34  ;;  %v1304_v44 = vmul.f32 %v4247_v15, %v1295_v34 }
 0x18b   : >>> { %10747 = vst [vmem:[#allocation32_spill] sm:$0xff] %v8093_v46  ;;  %10749 = vst [vmem:[#allocation31_spill] sm:$0xff] %v8096_v49  ;;  %v8118_v20 = vadd.f32 %v1225_v25, %v10758_v62  ;;  %v8121_v27 = vadd.f32 %v1226_v56, %v10760_v36  ;;  %v4254_v11 = vld [vmem:[%s7078_s14 + $0x2378] sm:$0xff]  ;;  %v4255_v17 = vld [vmem:[%s7078_s14 + $0x2380] sm:$0xff]  ;;  %v1299_v25 = vmul.f32 %v4242_v45, %v1295_v34 }
 0x18c   : >>> { %10751 = vst [vmem:[#allocation30_spill] sm:$0xff] %v8103_v59  ;;  %10753 = vst [vmem:[#allocation29_spill] sm:$0xff] %v8106_v13  ;;  %v4256_v19 = vld [vmem:[%s7078_s14 + $0x2388] sm:$0xff]  ;;  %v4257_v63 = vld [vmem:[%s7078_s14 + $0x2390] sm:$0xff]  ;;  %v1301_v62 = vmul.f32 %v4244_v33, %v1295_v34  ;;  %v1302_v36 = vmul.f32 %v4245_v18, %v1295_v34  ;;  %v1305_v51 = vmul.f32 %v4248_v40, %v1295_v34 }
 0x18d   : >>> { %10755 = vst [vmem:[#allocation28_spill] sm:$0xff] %v8109_v0  ;;  %10757 = vst [vmem:[#allocation27_spill] sm:$0xff] %v8112_v39  ;;  %v4258_v54 = vld [vmem:[%s7078_s14 + $0x2398] sm:$0xff]  ;;  %v4259_v21 = vld [vmem:[%s7078_s14 + $0x23a0] sm:$0xff]  ;;  %v1306_v55 = vmul.f32 %v4249_v22, %v1295_v34  ;;  %v1307_v0 = vmul.f32 %v4250_v3, %v1295_v34  ;;  %v1308_v49 = vmul.f32 %v4251_v32, %v1295_v34 }
 0x18e   : >>> { %10759 = vst [vmem:[#allocation26_spill] sm:$0xff] %v8118_v20  ;;  %10761 = vst [vmem:[#allocation25_spill] sm:$0xff] %v8121_v27  ;;  %v4260_v56 = vld [vmem:[%s7078_s14 + $0x23a8] sm:$0xff]  ;;  %v4261_v58 = vld [vmem:[%s7078_s14 + $0x23b0] sm:$0xff]  ;;  %v1309_v46 = vmul.f32 %v4252_v29, %v1295_v34  ;;  %v1310_v6 = vmul.f32 %v4253_v26, %v1295_v34  ;;  %v1311_v1 = vmul.f32 %v4254_v11, %v1295_v34 }
 0x18f   : >>> { %10762 = vst [vmem:[#allocation24_spill] sm:$0xff] %v8127_v7  ;;  %v1303_v7 = vmul.f32 %v4246_v16, %v1295_v34  ;;  %v4262_v27 = vld [vmem:[%s7078_s14 + $0x23b8] sm:$0xff]  ;;  %v4263_v20 = vld [vmem:[%s7078_s14 + $0x23c0] sm:$0xff]  ;;  %v4264_v39 = vld [vmem:[%s7078_s14 + $0x23c8] sm:$0xff]  ;;  %v1312_v16 = vmul.f32 %v4255_v17, %v1295_v34  ;;  %v1313_v47 = vmul.f32 %v4256_v19, %v1295_v34  ;;  %v1314_v52 = vmul.f32 %v4257_v63, %v1295_v34 }
 0x190   : >>> { %v4265_v45 = vld [vmem:[%s7078_s14 + $0x23d0] sm:$0xff]  ;;  %v4266_v13 = vld [vmem:[%s7078_s14 + $0x23d8] sm:$0xff]  ;;  %v4267_v59 = vld [vmem:[%s7078_s14 + $0x23e0] sm:$0xff]  ;;  %v1315_v12 = vmul.f32 %v4258_v54, %v1295_v34  ;;  %v1316_v43 = vmul.f32 %v4259_v21, %v1295_v34  ;;  %v1317_v8 = vmul.f32 %v4260_v56, %v1295_v34  ;;  %v1318_v15 = vmul.f32 %v4261_v58, %v1295_v34 }
 0x191   : >>> { %v4268_v33 = vld [vmem:[%s7078_s14 + $0x23e8] sm:$0xff]  ;;  %v4269_v18 = vld [vmem:[%s7078_s14 + $0x23f0] sm:$0xff]  ;;  %v4270_v60 = vld [vmem:[%s7078_s14 + $0x23f8] sm:$0xff]  ;;  %v1319_v40 = vmul.f32 %v4262_v27, %v1295_v34  ;;  %v1320_v22 = vmul.f32 %v4263_v20, %v1295_v34  ;;  %v1321_v3 = vmul.f32 %v4264_v39, %v1295_v34  ;;  %v1322_v41 = vmul.f32 %v4265_v45, %v1295_v34 }
 0x192   : >>> { %v1323_v30 = vmul.f32 %v4266_v13, %v1295_v34  ;;  %v1324_v53 = vmul.f32 %v4267_v59, %v1295_v34  ;;  %v1325_v32 = vmul.f32 %v4268_v33, %v1295_v34  ;;  %v1326_v29 = vmul.f32 %v4269_v18, %v1295_v34  ;;  %v4273_v27 = vld [vmem:[%s7078_s14 + $0x2800] sm:$0xff]  ;;  %v10772_v56 = vld [vmem:[#allocation34_spill] sm:$0xff] }
 0x193   : >>> { %v1327_v26 = vmul.f32 %v4270_v60, %v1295_v34  ;;  %v8145_v11 = vadd.f32 %v1296_v28, %v8009_v10  ;;  %v8148_v17 = vadd.f32 %v1297_v4, %v8012_v38  ;;  %v8151_v19 = vadd.f32 %v1298_v23, %v8019_v5  ;;  %v4275_v34 = vld [vmem:[%s7078_s14 + $0x2810] sm:$0xff]  ;;  %v4277_v54 = vld [vmem:[%s7078_s14 + $0x2820] sm:$0xff]  ;;  %v4278_v28 = vld [vmem:[%s7078_s14 + $0x2828] sm:$0xff] }
 0x194   : >>> { %v8154_v39 = vadd.f32 %v1299_v25, %v8022_v14  ;;  %v8157_v59 = vadd.f32 %v1300_v2, %v8025_v37  ;;  %v8160_v60 = vadd.f32 %v1301_v62, %v8028_v61  ;;  %v8163_v10 = vadd.f32 %v1302_v36, %v8031_v9  ;;  %v4279_v4 = vld [vmem:[%s7078_s14 + $0x2830] sm:$0xff]  ;;  %v4280_v23 = vld [vmem:[%s7078_s14 + $0x2838] sm:$0xff]  ;;  %v4281_v62 = vld [vmem:[%s7078_s14 + $0x2840] sm:$0xff] }
 0x195   : >>> { %v8166_v38 = vadd.f32 %v1303_v7, %v8034_v48  ;;  %v8169_v5 = vadd.f32 %v1304_v44, %v8037_v42  ;;  %v8172_v14 = vadd.f32 %v1305_v51, %v8040_v35  ;;  %v8175_v37 = vadd.f32 %v1306_v55, %v8043_v57  ;;  %v10763_v42 = vld [vmem:[#allocation22_spill] sm:$0xff]  ;;  %v10764_v35 = vld [vmem:[#allocation21_spill] sm:$0xff]  ;;  %v4274_v57 = vld [vmem:[%s7078_s14 + $0x2808] sm:$0xff] }
 0x196   : >>> { %v8178_v61 = vadd.f32 %v1307_v0, %v8046_v31  ;;  %v8181_v9 = vadd.f32 %v1308_v49, %v8049_v24  ;;  %v8184_v48 = vadd.f32 %v1309_v46, %v8052_v50  ;;  %v8187_v13 = vadd.f32 %v1310_v6, %v10763_v42  ;;  %v4276_v31 = vld [vmem:[%s7078_s14 + $0x2818] sm:$0xff]  ;;  %v10766_v0 = vld [vmem:[#allocation20_spill] sm:$0xff]  ;;  %v10767_v24 = vld [vmem:[#allocation19_spill] sm:$0xff] }
 0x197   : >>> { %v8190_v20 = vadd.f32 %v1311_v1, %v10764_v35  ;;  %v8197_v7 = vadd.f32 %v1312_v16, %v10766_v0  ;;  %v8200_v49 = vadd.f32 %v1313_v47, %v10767_v24  ;;  %v10768_v50 = vld [vmem:[#allocation18_spill] sm:$0xff]  ;;  %v10769_v6 = vld [vmem:[#allocation35_spill] sm:$0xff]  ;;  %v10770_v25 = vld [vmem:[#allocation17_spill] sm:$0xff]  ;;  %v8216_v58 = vadd.f32 %v1317_v8, %v10772_v56 }
 0x198   : >>> { %v8203_v46 = vadd.f32 %v1314_v52, %v10768_v50  ;;  %v8206_v63 = vadd.f32 %v1315_v12, %v10769_v6  ;;  %v8213_v21 = vadd.f32 %v1316_v43, %v10770_v25  ;;  %v10774_v47 = vld [vmem:[#allocation36_spill] sm:$0xff]  ;;  %v10776_v52 = vld [vmem:[#allocation33_spill] sm:$0xff]  ;;  %v10780_v55 = vld [vmem:[#allocation31_spill] sm:$0xff] }
 0x199   : >>> { %10765 = vst [vmem:[#allocation23_spill] sm:$0xff] %v8190_v20  ;;  %10773 = vst [vmem:[#allocation21_spill] sm:$0xff] %v8216_v58  ;;  %v8219_v2 = vadd.f32 %v1318_v15, %v10774_v47  ;;  %v8222_v12 = vadd.f32 %v1319_v40, %v10776_v52  ;;  %v4282_v36 = vld [vmem:[%s7078_s14 + $0x2848] sm:$0xff]  ;;  %v4283_v44 = vld [vmem:[%s7078_s14 + $0x2850] sm:$0xff]  ;;  %v8231_v8 = vadd.f32 %v1321_v3, %v10780_v55 }
 0x19a   : >>> { %10771 = vst [vmem:[#allocation22_spill] sm:$0xff] %v8213_v21  ;;  %v10778_v51 = vld [vmem:[#allocation32_spill] sm:$0xff]  ;;  %v10782_v45 = vld [vmem:[#allocation30_spill] sm:$0xff]  ;;  %v10784_v33 = vld [vmem:[#allocation29_spill] sm:$0xff] }
 0x19b   : >>> { %10775 = vst [vmem:[#allocation20_spill] sm:$0xff] %v8219_v2  ;;  %10777 = vst [vmem:[#allocation19_spill] sm:$0xff] %v8222_v12  ;;  %v8228_v43 = vadd.f32 %v1320_v22, %v10778_v51  ;;  %v8234_v1 = vadd.f32 %v1322_v41, %v10782_v45  ;;  %v8237_v18 = vadd.f32 %v1323_v30, %v10784_v33  ;;  %v4284_v16 = vld [vmem:[%s7078_s14 + $0x2858] sm:$0xff]  ;;  %v4285_v15 = vld [vmem:[%s7078_s14 + $0x2860] sm:$0xff] }
 0x19c   : >>> { %10781 = vst [vmem:[#allocation35_spill] sm:$0xff] %v8231_v8  ;;  %v4286_v40 = vld [vmem:[%s7078_s14 + $0x2868] sm:$0xff]  ;;  %v10788_v22 = vld [vmem:[#allocation27_spill] sm:$0xff]  ;;  %v10790_v3 = vld [vmem:[#allocation26_spill] sm:$0xff] }
 0x19d   : >>> { %10779 = vst [vmem:[#allocation18_spill] sm:$0xff] %v8228_v43  ;;  %10783 = vst [vmem:[#allocation17_spill] sm:$0xff] %v8234_v1  ;;  %v10786_v42 = vld [vmem:[#allocation28_spill] sm:$0xff]  ;;  %v8246_v0 = vadd.f32 %v1325_v32, %v10788_v22  ;;  %v8249_v24 = vadd.f32 %v1326_v29, %v10790_v3  ;;  %v10792_v41 = vld [vmem:[#allocation25_spill] sm:$0xff] }
 0x19e   : >>> { %10785 = vst [vmem:[#allocation34_spill] sm:$0xff] %v8237_v18  ;;  %v8243_v35 = vadd.f32 %v1324_v53, %v10786_v42  ;;  %v8252_v50 = vadd.f32 %v1327_v26, %v10792_v41  ;;  %v4287_v30 = vld [vmem:[%s7078_s14 + $0x2870] sm:$0xff]  ;;  %v4288_v6 = vld [vmem:[%s7078_s14 + $0x2878] sm:$0xff]  ;;  %v4289_v25 = vld [vmem:[%s7078_s14 + $0x2880] sm:$0xff] }
 0x19f   : >>> { %10789 = vst [vmem:[#allocation33_spill] sm:$0xff] %v8246_v0  ;;  %10791 = vst [vmem:[#allocation32_spill] sm:$0xff] %v8249_v24  ;;  %v4290_v56 = vld [vmem:[%s7078_s14 + $0x2888] sm:$0xff]  ;;  %v4291_v47 = vld [vmem:[%s7078_s14 + $0x2890] sm:$0xff] }
 0x1a0   : >>> { %10787 = vst [vmem:[#allocation36_spill] sm:$0xff] %v8243_v35  ;;  %10793 = vst [vmem:[#allocation31_spill] sm:$0xff] %v8252_v50  ;;  %v4292_v53 = vld [vmem:[%s7078_s14 + $0x2898] sm:$0xff]  ;;  %v10794_v52 = vld [vmem:[#allocation24_spill] sm:$0xff] }
 0x1a1   : >>> { %v1397_v51 = vmul.f32 %v4273_v27, %v10794_v52  ;;  %v1398_v32 = vmul.f32 %v4274_v57, %v10794_v52  ;;  %v1399_v55 = vmul.f32 %v4275_v34, %v10794_v52  ;;  %v1400_v29 = vmul.f32 %v4276_v31, %v10794_v52  ;;  %v4293_v26 = vld [vmem:[%s7078_s14 + $0x28a0] sm:$0xff]  ;;  %v4294_v45 = vld [vmem:[%s7078_s14 + $0x28a8] sm:$0xff]  ;;  %v4295_v33 = vld [vmem:[%s7078_s14 + $0x28b0] sm:$0xff] }
 0x1a2   : >>> { %v1401_v42 = vmul.f32 %v4277_v54, %v10794_v52  ;;  %v1402_v22 = vmul.f32 %v4278_v28, %v10794_v52  ;;  %v1403_v3 = vmul.f32 %v4279_v4, %v10794_v52  ;;  %v1404_v27 = vmul.f32 %v4280_v23, %v10794_v52  ;;  %v4296_v57 = vld [vmem:[%s7078_s14 + $0x28b8] sm:$0xff]  ;;  %v4297_v34 = vld [vmem:[%s7078_s14 + $0x28c0] sm:$0xff]  ;;  %v4298_v41 = vld [vmem:[%s7078_s14 + $0x28c8] sm:$0xff] }
 0x1a3   : >>> { %v1405_v31 = vmul.f32 %v4281_v62, %v10794_v52  ;;  %v1406_v50 = vmul.f32 %v4282_v36, %v10794_v52  ;;  %v1407_v24 = vmul.f32 %v4283_v44, %v10794_v52  ;;  %v1408_v54 = vmul.f32 %v4284_v16, %v10794_v52  ;;  %v4299_v0 = vld [vmem:[%s7078_s14 + $0x28d0] sm:$0xff]  ;;  %v4300_v28 = vld [vmem:[%s7078_s14 + $0x28d8] sm:$0xff]  ;;  %v4301_v35 = vld [vmem:[%s7078_s14 + $0x28e0] sm:$0xff] }
 0x1a4   : >>> { %v1409_v4 = vmul.f32 %v4285_v15, %v10794_v52  ;;  %v1410_v23 = vmul.f32 %v4286_v40, %v10794_v52  ;;  %v1411_v18 = vmul.f32 %v4287_v30, %v10794_v52  ;;  %v1412_v1 = vmul.f32 %v4288_v6, %v10794_v52  ;;  %v4302_v8 = vld [vmem:[%s7078_s14 + $0x28e8] sm:$0xff]  ;;  %v4303_v43 = vld [vmem:[%s7078_s14 + $0x28f0] sm:$0xff]  ;;  %v4304_v62 = vld [vmem:[%s7078_s14 + $0x28f8] sm:$0xff] }
 0x1a5   : >>> { %v1413_v36 = vmul.f32 %v4289_v25, %v10794_v52  ;;  %v1414_v44 = vmul.f32 %v4290_v56, %v10794_v52  ;;  %v1415_v16 = vmul.f32 %v4291_v47, %v10794_v52  ;;  %v1416_v12 = vmul.f32 %v4292_v53, %v10794_v52 }
 0x1a6   : >>> { %v1417_v2 = vmul.f32 %v4293_v26, %v10794_v52  ;;  %v1418_v15 = vmul.f32 %v4294_v45, %v10794_v52  ;;  %v1419_v40 = vmul.f32 %v4295_v33, %v10794_v52  ;;  %v1420_v30 = vmul.f32 %v4296_v57, %v10794_v52 }
 0x1a7   : >>> { %v1421_v6 = vmul.f32 %v4297_v34, %v10794_v52  ;;  %v1422_v58 = vmul.f32 %v4298_v41, %v10794_v52  ;;  %v1423_v25 = vmul.f32 %v4299_v0, %v10794_v52  ;;  %v1424_v56 = vmul.f32 %v4300_v28, %v10794_v52 }
 0x1a8   : >>> { %v1425_v47 = vmul.f32 %v4301_v35, %v10794_v52  ;;  %v1426_v53 = vmul.f32 %v4302_v8, %v10794_v52  ;;  %v1427_v26 = vmul.f32 %v4303_v43, %v10794_v52  ;;  %v1428_v45 = vmul.f32 %v4304_v62, %v10794_v52 }
 0x1a9   : >>> { %v8305_v33 = vadd.f32 %v1397_v51, %v8145_v11   ;;  %v8308_v57 = vadd.f32 %v1398_v32, %v8148_v17   ;;  %v8311_v41 = vadd.f32 %v1399_v55, %v8151_v19   ;;  %v8314_v0 = vadd.f32 %v1400_v29, %v8154_v39  }
 0x1aa   : >>> { %v8317_v35 = vadd.f32 %v1401_v42, %v8157_v59   ;;  %v8320_v8 = vadd.f32 %v1402_v22, %v8160_v60   ;;  %v8323_v43 = vadd.f32 %v1403_v3, %v8163_v10   ;;  %v8329_v17 = vadd.f32 %v1405_v31, %v8169_v5   ;;  %v10805_v5 = vld [vmem:[#allocation23_spill] sm:$0xff] }
 0x1ab   : >>> { %10795 = vst [vmem:[#allocation37_spill] sm:$0xff] %v8305_v33  ;;  %10796 = vst [vmem:[#allocation38_spill] sm:$0xff] %v8308_v57  ;;  %v10797_v21 = vmov %v8311_v41  ;;  %v10798_v28 = vmov %v8314_v0  ;;  %v8326_v0 = vadd.f32 %v1404_v27, %v8166_v38   ;;  %v8332_v62 = vadd.f32 %v1406_v50, %v8172_v14   ;;  %v10835_v3 = vld [vmem:[#allocation31_spill] sm:$0xff] }
 0x1ac   : >>> { %v10799_v20 = vmov %v8323_v43  ;;  %v8335_v39 = vadd.f32 %v1407_v24, %v8175_v37   ;;  %v8338_v60 = vadd.f32 %v1408_v54, %v8178_v61   ;;  %v8341_v59 = vadd.f32 %v1409_v4, %v8181_v9   ;;  %v10813_v61 = vld [vmem:[#allocation21_spill] sm:$0xff] }
 0x1ad   : >>> { %v10800_v11 = vmov %v8326_v0  ;;  %v10801_v19 = vmov %v8332_v62  ;;  %v8344_v10 = vadd.f32 %v1410_v23, %v8184_v48   ;;  %v8347_v57 = vadd.f32 %v1411_v18, %v8187_v13   ;;  %v10815_v48 = vld [vmem:[#allocation20_spill] sm:$0xff] }
 0x1ae   : >>> { %v10802_v32 = vmov %v8338_v60  ;;  %v10803_v29 = vmov %v8341_v59  ;;  %v8350_v52 = vadd.f32 %v1412_v1, %v10805_v5   ;;  %v8353_v55 = vadd.f32 %v1413_v36, %v8197_v7   ;;  %v10811_v59 = vld [vmem:[#allocation22_spill] sm:$0xff]  ;;  %v10817_v7 = vld [vmem:[#allocation19_spill] sm:$0xff] }
 0x1af   : >>> { %v10804_v38 = vmov %v8347_v57  ;;  %v8356_v54 = vadd.f32 %v1414_v44, %v8200_v49   ;;  %v8359_v60 = vadd.f32 %v1415_v16, %v8203_v46   ;;  %v8365_v51 = vadd.f32 %v1417_v2, %v10811_v59   ;;  %v10819_v1 = vld [vmem:[#allocation18_spill] sm:$0xff]  ;;  %v10821_v46 = vld [vmem:[#allocation35_spill] sm:$0xff] }
 0x1b0   : >>> { %v10806_v22 = vmov %v8350_v52  ;;  %v10807_v14 = vmov %v8353_v55  ;;  %v8362_v52 = vadd.f32 %v1416_v12, %v8206_v63   ;;  %v8368_v50 = vadd.f32 %v1418_v15, %v10813_v61   ;;  %v10823_v63 = vld [vmem:[#allocation17_spill] sm:$0xff]  ;;  %v10824_v2 = vld [vmem:[#allocation34_spill] sm:$0xff] }
 0x1b1   : >>> { %v10808_v37 = vmov %v8356_v54  ;;  %v10809_v24 = vmov %v8359_v60  ;;  %v10812_v27 = vmov %v8365_v51  ;;  %v8371_v49 = vadd.f32 %v1419_v40, %v10815_v48   ;;  %v10826_v51 = vld [vmem:[#allocation36_spill] sm:$0xff] }
 0x1b2   : >>> { %v10810_v9 = vmov %v8362_v52  ;;  %v10814_v13 = vmov %v8368_v50  ;;  %v8374_v48 = vadd.f32 %v1420_v30, %v10817_v7   ;;  %v8377_v55 = vadd.f32 %v1421_v6, %v10819_v1   ;;  %v10829_v50 = vld [vmem:[#allocation33_spill] sm:$0xff]  ;;  %v10869_v6 = vld [vmem:[#allocation38_spill] sm:$0xff]  ;;  %v10870_v7 = vld [vmem:[#allocation37_spill] sm:$0xff] }
 0x1b3   : >>> { %v10816_v18 = vmov %v8371_v49  ;;  %v8380_v46 = vadd.f32 %v1422_v58, %v10821_v46   ;;  %v8383_v12 = vadd.f32 %v1423_v25, %v10823_v63   ;;  %v8386_v44 = vadd.f32 %v1424_v56, %v10824_v2   ;;  %v10832_v49 = vld [vmem:[#allocation32_spill] sm:$0xff] }
 0x1b4   : >>> { %v10818_v31 = vmov %v8374_v48  ;;  %v10820_v23 = vmov %v8377_v55  ;;  %v8389_v43 = vadd.f32 %v1425_v47, %v10826_v51   ;;  %v8392_v42 = vadd.f32 %v1426_v53, %v10829_v50  }
 0x1b5   : >>> { %v10822_v36 = vmov %v8380_v46  ;;  %v10825_v16 = vmov %v8386_v44  ;;  %v8395_v41 = vadd.f32 %v1427_v26, %v10832_v49   ;;  %v8398_v40 = vadd.f32 %v1428_v45, %v10835_v3   ;;  %v10872_v26 = vld [vmem:[#allocation37_spill] sm:$0xff] (%p8403_p12) }
 0x1b6   : >>> { %10827 = vst [vmem:[#allocation39_spill] sm:$0xff] %v8389_v43  ;;  %v10828_v15 = vmov %v8389_v43  ;;  %10830 = vst [vmem:[#allocation40_spill] sm:$0xff] %v8392_v42  ;;  %v10831_v33 = vmov %v8392_v42  ;;  %v10843_v44 = vmov %v10825_v16  ;;  %v10844_v45 = vmov %v8383_v12 }
 0x1b7   : >>> { %10833 = vst [vmem:[#allocation41_spill] sm:$0xff] %v8395_v41  ;;  %v10834_v30 = vmov %v8395_v41  ;;  %10836 = vst [vmem:[#allocation42_spill] sm:$0xff] %v8398_v40  ;;  %v10837_v34 = vmov %v8398_v40  ;;  %v10841_v42 = vmov %v10831_v33  ;;  %v10842_v43 = vmov %v10828_v15 }
 0x1b8   : >>> { %v10839_v40 = vmov %v10837_v34  ;;  %v10840_v41 = vmov %v10834_v30  ;;  %v10845_v46 = vmov %v10822_v36  ;;  %v10846_v47 = vmov %v10820_v23  ;;  %515 = sbr.rel (!%p8403_p12) target bundleno = 249 (0xf9), region = 181  ;;  %v10873_v30 = vld [vmem:[#allocation38_spill] sm:$0xff] (%p8403_p12) }
 0x1b9   : >>> { %v10847_v48 = vmov %v10818_v31  ;;  %v10848_v49 = vmov %v10816_v18  ;;  %v10849_v50 = vmov %v10814_v13  ;;  %v10850_v51 = vmov %v10812_v27 }
 0x1ba   : >>> { %v10851_v52 = vmov %v10810_v9  ;;  %v10852_v53 = vmov %v10809_v24  ;;  %v10853_v54 = vmov %v10808_v37  ;;  %v10854_v55 = vmov %v10807_v14 }
 0x1bb   : >>> { %v10855_v56 = vmov %v10806_v22  ;;  %v10856_v57 = vmov %v10804_v38  ;;  %v10857_v58 = vmov %v8344_v10  ;;  %v10858_v59 = vmov %v10803_v29 }
 0x1bc   : >>> { %v10859_v60 = vmov %v10802_v32  ;;  %v10860_v61 = vmov %v8335_v39  ;;  %v10861_v62 = vmov %v10801_v19  ;;  %v10862_v63 = vmov %v8329_v17 }
 0x1bd   : >>> { %v10863_v0 = vmov %v10800_v11  ;;  %v10864_v1 = vmov %v10799_v20  ;;  %v10865_v2 = vmov %v8320_v8  ;;  %v10866_v3 = vmov %v8317_v35  ;;  %v10874_v46 = vld [vmem:[#allocation39_spill] sm:$0xff] (%p8403_p12)  ;;  %v10875_v63 = vld [vmem:[#allocation40_spill] sm:$0xff] (%p8403_p12) }
 0x1be   : >>> { %v10867_v4 = vmov %v10798_v28  ;;  %v10868_v5 = vmov %v10797_v21  ;;  %v8510_v25 = vstv (%p8403_p12), %s6897_s8  ;;  %v10876_v2 = vld [vmem:[#allocation41_spill] sm:$0xff] (%p8403_p12) }
 0x1bf   : >> { %v1462_v34 = vadd.f32 %v8510_v25, %v10872_v26  ;;  %v1463_v33 = vadd.f32 %v8510_v25, %v10873_v30  ;;  %v1464_v7 = vadd.f32 %v8510_v25, %v10797_v21  ;;  %v1465_v15 = vadd.f32 %v8510_v25, %v10798_v28  ;;  %s502_s30 = sadd.s32 (%p506_p13), 1, %s6045_s30  }
 0x1c0   : >> { %v1466_v58 = vadd.f32 %v8510_v25, %v8317_v35  ;;  %v1467_v42 = vadd.f32 %v8510_v25, %v8320_v8  ;;  %v1468_v54 = vadd.f32 %v8510_v25, %v10799_v20  ;;  %v1469_v4 = vadd.f32 %v8510_v25, %v10800_v11  ;;  %p499_p0 = scmp.ge.s32.totalorder (%p506_p13), %s502_s30, 8  }
 0x1c1   : >> { %v1494_v62 = vmax.f32 %v1462_v34, 0.0  ;;  %v1495_v44 = vmax.f32 %v1463_v33, 0.0  ;;  %v1496_v40 = vmax.f32 %v1464_v7, 0.0  ;;  %v1497_v6 = vmax.f32 %v1465_v15, 0.0 }
 0x1c2   : >> { %v1498_v21 = vmax.f32 %v1466_v58, 0.0  ;;  %v1499_v56 = vmax.f32 %v1467_v42, 0.0  ;;  %v1500_v47 = vmax.f32 %v1468_v54, 0.0  ;;  %v1501_v53 = vmax.f32 %v1469_v4, 0.0 }
 0x1c3   : >> { %1530 = vst [vmem:[%s8530_s6] sm:$0xff] %v1494_v62  ;;  %1531 = vst [vmem:[%s8530_s6 + $0x8] sm:$0xff] %v1495_v44  ;;  %v1470_v20 = vadd.f32 %v8510_v25, %v8329_v17  ;;  %v1471_v45 = vadd.f32 %v8510_v25, %v10801_v19  ;;  %v1472_v33 = vadd.f32 %v8510_v25, %v8335_v39 }
 0x1c4   : >> { %1532 = vst [vmem:[%s8530_s6 + $0x10] sm:$0xff] %v1496_v40  ;;  %1533 = vst [vmem:[%s8530_s6 + $0x18] sm:$0xff] %v1497_v6  ;;  %v1473_v57 = vadd.f32 %v8510_v25, %v10802_v32  ;;  %v1474_v34 = vadd.f32 %v8510_v25, %v10803_v29  ;;  %v1475_v41 = vadd.f32 %v8510_v25, %v8344_v10 }
 0x1c5   : >> { %1534 = vst [vmem:[%s8530_s6 + $0x20] sm:$0xff] %v1498_v21  ;;  %1535 = vst [vmem:[%s8530_s6 + $0x28] sm:$0xff] %v1499_v56  ;;  %v1476_v0 = vadd.f32 %v8510_v25, %v10804_v38  ;;  %v1477_v28 = vadd.f32 %v8510_v25, %v10806_v22  ;;  %v1502_v35 = vmax.f32 %v1470_v20, 0.0  ;;  %v1503_v8 = vmax.f32 %v1471_v45, 0.0 }
 0x1c6   : >> { %1536 = vst [vmem:[%s8530_s6 + $0x30] sm:$0xff] %v1500_v47  ;;  %1537 = vst [vmem:[%s8530_s6 + $0x38] sm:$0xff] %v1501_v53  ;;  %v1504_v43 = vmax.f32 %v1472_v33, 0.0  ;;  %v1505_v11 = vmax.f32 %v1473_v57, 0.0  ;;  %v1506_v17 = vmax.f32 %v1474_v34, 0.0  ;;  %v1507_v19 = vmax.f32 %v1475_v41, 0.0 }
 0x1c7   : >> { %v1508_v39 = vmax.f32 %v1476_v0, 0.0  ;;  %v1509_v32 = vmax.f32 %v1477_v28, 0.0  ;;  %1538 = vst [vmem:[%s8530_s6 + $0x40] sm:$0xff] %v1502_v35  ;;  %1539 = vst [vmem:[%s8530_s6 + $0x48] sm:$0xff] %v1503_v8  ;;  %v1478_v29 = vadd.f32 %v8510_v25, %v10807_v14  ;;  %v1479_v10 = vadd.f32 %v8510_v25, %v10808_v37 }
 0x1c8   : >> { %1540 = vst [vmem:[%s8530_s6 + $0x50] sm:$0xff] %v1504_v43  ;;  %1541 = vst [vmem:[%s8530_s6 + $0x58] sm:$0xff] %v1505_v11  ;;  %v1480_v38 = vadd.f32 %v8510_v25, %v10809_v24  ;;  %v1481_v5 = vadd.f32 %v8510_v25, %v10810_v9  ;;  %v1482_v52 = vadd.f32 %v8510_v25, %v10812_v27 }
 0x1c9   : >> { %1542 = vst [vmem:[%s8530_s6 + $0x60] sm:$0xff] %v1506_v17  ;;  %1543 = vst [vmem:[%s8530_s6 + $0x68] sm:$0xff] %v1507_v19  ;;  %v1483_v22 = vadd.f32 %v8510_v25, %v10814_v13  ;;  %v1484_v14 = vadd.f32 %v8510_v25, %v10816_v18  ;;  %v1485_v37 = vadd.f32 %v8510_v25, %v10818_v31  ;;  %v1510_v60 = vmax.f32 %v1478_v29, 0.0 }
 0x1ca   : >> { %1544 = vst [vmem:[%s8530_s6 + $0x70] sm:$0xff] %v1508_v39  ;;  %1545 = vst [vmem:[%s8530_s6 + $0x78] sm:$0xff] %v1509_v32  ;;  %v1511_v24 = vmax.f32 %v1479_v10, 0.0  ;;  %v1512_v9 = vmax.f32 %v1480_v38, 0.0  ;;  %v1513_v59 = vmax.f32 %v1481_v5, 0.0  ;;  %v1514_v61 = vmax.f32 %v1482_v52, 0.0 }
 0x1cb   : >> { %v1515_v48 = vmax.f32 %v1483_v22, 0.0  ;;  %v1516_v27 = vmax.f32 %v1484_v14, 0.0  ;;  %v1517_v1 = vmax.f32 %v1485_v37, 0.0  ;;  %1546 = vst [vmem:[%s8530_s6 + $0x80] sm:$0xff] %v1510_v60  ;;  %v1486_v13 = vadd.f32 %v8510_v25, %v10820_v23 }
 0x1cc   : >> { %1547 = vst [vmem:[%s8530_s6 + $0x88] sm:$0xff] %v1511_v24  ;;  %1548 = vst [vmem:[%s8530_s6 + $0x90] sm:$0xff] %v1512_v9  ;;  %v1487_v18 = vadd.f32 %v8510_v25, %v10822_v36  ;;  %v1488_v31 = vadd.f32 %v8510_v25, %v8383_v12  ;;  %v1489_v55 = vadd.f32 %v8510_v25, %v10825_v16  ;;  %v10877_v16 = vld [vmem:[#allocation42_spill] sm:$0xff] }
 0x1cd   : >> { %1549 = vst [vmem:[%s8530_s6 + $0x98] sm:$0xff] %v1513_v59  ;;  %1550 = vst [vmem:[%s8530_s6 + $0xa0] sm:$0xff] %v1514_v61  ;;  %v1490_v23 = vadd.f32 %v8510_v25, %v10874_v46  ;;  %v1491_v36 = vadd.f32 %v8510_v25, %v10875_v63  ;;  %v1492_v12 = vadd.f32 %v8510_v25, %v10876_v2  ;;  %v1518_v15 = vmax.f32 %v1486_v13, 0.0  ;;  %508 = sbr.rel (!%p506_p13) target bundleno = 241 (0xf1), region = 192 }
 0x1ce   : >> { %1551 = vst [vmem:[%s8530_s6 + $0xa8] sm:$0xff] %v1515_v48  ;;  %1552 = vst [vmem:[%s8530_s6 + $0xb0] sm:$0xff] %v1516_v27  ;;  %v1493_v51 = vadd.f32 %v8510_v25, %v10877_v16  ;;  %v1519_v50 = vmax.f32 %v1487_v18, 0.0  ;;  %v1520_v49 = vmax.f32 %v1488_v31, 0.0  ;;  %v1521_v30 = vmax.f32 %v1489_v55, 0.0 }
 0x1cf   : >> { %1553 = vst [vmem:[%s8530_s6 + $0xb8] sm:$0xff] %v1517_v1  ;;  %v1522_v3 = vmax.f32 %v1490_v23, 0.0  ;;  %v1523_v26 = vmax.f32 %v1491_v36, 0.0  ;;  %v1524_v7 = vmax.f32 %v1492_v12, 0.0  ;;  %1554 = vst [vmem:[%s8530_s6 + $0xc0] sm:$0xff] %v1518_v15 }
 0x1d0   : >> { %v1525_v58 = vmax.f32 %v1493_v51, 0.0  ;;  %1555 = vst [vmem:[%s8530_s6 + $0xc8] sm:$0xff] %v1519_v50  ;;  %1556 = vst [vmem:[%s8530_s6 + $0xd0] sm:$0xff] %v1520_v49 }
 0x1d1   : >> { %1557 = vst [vmem:[%s8530_s6 + $0xd8] sm:$0xff] %v1521_v30  ;;  %1558 = vst [vmem:[%s8530_s6 + $0xe0] sm:$0xff] %v1522_v3 }
 0x1d2   : >> { %1559 = vst [vmem:[%s8530_s6 + $0xe8] sm:$0xff] %v1523_v26  ;;  %1560 = vst [vmem:[%s8530_s6 + $0xf0] sm:$0xff] %v1524_v7 }
 0x1d3   : >> { %1561 = vst [vmem:[%s8530_s6 + $0xf8] sm:$0xff] %v1525_v58 }
 0x1d4   :  { %501 = sbr.rel (!%p499_p0) target bundleno = 240 (0xf0), region = 203  ;;  %s8618_s0 = smov (%p499_p0), 0  }
 0x1db LB: > { %s8624_s11 = sld [smem:[#allocation11 + %s6185_s0]]  ;;  %s8626_s12 = smov 0   ;;  %s6185_s0 = sphi %s8618_s0, %s1567_s0  }
 0x1dc LB: >> { %s4308_s30 = sshll.u32 %s6185_s0, 3  ;;  %s4803_s9 = sshll.u32 %s6189_s12, 8  ;;  %s6189_s12 = sphi %s8626_s12, %s1574_s12  }
 0x1dd   : >> { %s1577_s8 = sld [smem:[#allocation10 + %s4308_s30]]  ;;  %s1677_s13 = sadd.s32 1, %s4308_s30 }
 0x1de   : >> { %s1678_s14 = sld [smem:[#allocation10 + %s1677_s13]]  ;;  %s1778_s15 = sadd.s32 2, %s4308_s30 }
 0x1df   : >> { %s1879_s16 = sadd.s32 3, %s4308_s30  ;;  %s8635_s17 = scalar_lea.vmem [#allocation3], %s4803_s9 }
 0x1e0   : >> { %v1580_v25 = vld [vmem:[%s8635_s17] sm:$0xff]  ;;  %s1779_s18 = sld [smem:[#allocation10 + %s1778_s15]]  ;;  %s1980_s1 = sadd.s32 4, %s4308_s30  ;;  %v1581_v42 = vld [vmem:[%s8635_s17 + $0x8] sm:$0xff]  ;;  %v1582_v47 = vld [vmem:[%s8635_s17 + $0x10] sm:$0xff] }
 0x1e1   : >> { %s1880_s19 = sld [smem:[#allocation10 + %s1879_s16]]  ;;  %s2081_s3 = sadd.s32 5, %s4308_s30  ;;  %v4311_v4 = vld [vmem:[%s8635_s17 + $0x400] sm:$0xff]  ;;  %v4312_v62 = vld [vmem:[%s8635_s17 + $0x408] sm:$0xff]  ;;  %v4313_v53 = vld [vmem:[%s8635_s17 + $0x410] sm:$0xff]  ;;  %v8686_v18 = vstv %s8624_s11 }
 0x1e2   : >> { %s1981_s20 = sld [smem:[#allocation10 + %s1980_s1]]  ;;  %v4344_v40 = vld [vmem:[%s8635_s17 + $0x800] sm:$0xff]  ;;  %s2182_s22 = sadd.s32 6, %s4308_s30  ;;  %v4345_v33 = vld [vmem:[%s8635_s17 + $0x808] sm:$0xff]  ;;  %v4346_v60 = vld [vmem:[%s8635_s17 + $0x810] sm:$0xff] }
 0x1e3   : >> { %v8639_v54 = vstv %s1577_s8  ;;  %s2082_s21 = sld [smem:[#allocation10 + %s2081_s3]]  ;;  %s2283_s23 = sadd.s32 7, %s4308_s30  ;;  %v4377_v56 = vld [vmem:[%s8635_s17 + $0xc00] sm:$0xff]  ;;  %v4378_v57 = vld [vmem:[%s8635_s17 + $0xc08] sm:$0xff]  ;;  %v4379_v27 = vld [vmem:[%s8635_s17 + $0xc10] sm:$0xff] }
 0x1e4   : >> { %v1613_v44 = vmul.f32 %v8639_v54, %v1580_v25  ;;  %v1614_v6 = vmul.f32 %v8639_v54, %v1581_v42  ;;  %v8646_v21 = vstv %s1678_s14  ;;  %s2183_s24 = sld [smem:[#allocation10 + %s2182_s22]]  ;;  %v4410_v0 = vld [vmem:[%s8635_s17 + $0x1000] sm:$0xff]  ;;  %v1615_v28 = vmul.f32 %v8639_v54, %v1582_v47  ;;  %v4411_v19 = vld [vmem:[%s8635_s17 + $0x1008] sm:$0xff]  ;;  %v4412_v46 = vld [vmem:[%s8635_s17 + $0x1010] sm:$0xff]  ;;  %s4541_s25 = sshll.u32 %s6185_s0, 10 }
 0x1e5   : >> { %s2284_s5 = sld [smem:[#allocation10 + %s2283_s23]]  ;;  %v1714_v20 = vmul.f32 %v4311_v4, %v8646_v21  ;;  %v1715_v45 = vmul.f32 %v4312_v62, %v8646_v21  ;;  %v1716_v35 = vmul.f32 %v4313_v53, %v8646_v21  ;;  %v4443_v32 = vld [vmem:[%s8635_s17 + $0x1400] sm:$0xff]  ;;  %v4444_v5 = vld [vmem:[%s8635_s17 + $0x1408] sm:$0xff]  ;;  %v1583_v12 = vld [vmem:[%s8635_s17 + $0x18] sm:$0xff]  ;;  %s8724_s26 = sadd.s32 %s4803_s9, %s4541_s25 }
 0x1e6   : >> { %v8655_v34 = vstv %s1779_s18  ;;  %v4476_v14 = vld [vmem:[%s8635_s17 + $0x1800] sm:$0xff]  ;;  %v4477_v48 = vld [vmem:[%s8635_s17 + $0x1808] sm:$0xff]  ;;  %v4314_v16 = vld [vmem:[%s8635_s17 + $0x418] sm:$0xff]  ;;  %s8750_s27 = scalar_lea.vmem [#allocation4], %s8724_s26  ;;  %s1574_s12 = sadd.s32 1, %s6189_s12  }
 0x1e7   : >> { %v8657_v41 = vstv %s1880_s19  ;;  %v1746_v8 = vadd.f32 %v1714_v20, %v1613_v44  ;;  %v1815_v43 = vmul.f32 %v4344_v40, %v8655_v34  ;;  %v1747_v17 = vadd.f32 %v1715_v45, %v1614_v6  ;;  %v4509_v37 = vld [vmem:[%s8635_s17 + $0x1c00] sm:$0xff]  ;;  %v4510_v55 = vld [vmem:[%s8635_s17 + $0x1c08] sm:$0xff]  ;;  %v4347_v51 = vld [vmem:[%s8635_s17 + $0x818] sm:$0xff]  ;;  %p1571_p1 = scmp.ge.s32.totalorder %s1574_s12, 4  }
 0x1e8   : >> { %v1916_v11 = vmul.f32 %v4377_v56, %v8657_v41  ;;  %v8665_v39 = vstv %s1981_s20  ;;  %v1816_v10 = vmul.f32 %v4345_v33, %v8655_v34  ;;  %v1917_v38 = vmul.f32 %v4378_v57, %v8657_v41  ;;  %v4445_v3 = vld [vmem:[%s8635_s17 + $0x1410] sm:$0xff]  ;;  %v4380_v62 = vld [vmem:[%s8635_s17 + $0xc18] sm:$0xff]  ;;  %v1584_v53 = vld [vmem:[%s8635_s17 + $0x20] sm:$0xff]  ;;  %s1567_s0 = sadd.s32 (%p1571_p1), 1, %s6185_s0  }
 0x1e9   : >> { %v8668_v29 = vstv %s2082_s21  ;;  %v1847_v52 = vadd.f32 %v1815_v43, %v1746_v8  ;;  %v2017_v22 = vmul.f32 %v4410_v0, %v8665_v39  ;;  %v2018_v61 = vmul.f32 %v4411_v19, %v8665_v39  ;;  %v4478_v26 = vld [vmem:[%s8635_s17 + $0x1810] sm:$0xff]  ;;  %v4413_v47 = vld [vmem:[%s8635_s17 + $0x1018] sm:$0xff]  ;;  %v4315_v0 = vld [vmem:[%s8635_s17 + $0x420] sm:$0xff]  ;;  %p1564_p2 = scmp.ge.s32.totalorder (%p1571_p1), %s1567_s0, 8  }
 0x1ea   : >> { %v8677_v24 = vstv %s2183_s24  ;;  %v1848_v59 = vadd.f32 %v1816_v10, %v1747_v17  ;;  %v2118_v13 = vmul.f32 %v4443_v32, %v8668_v29  ;;  %v2119_v31 = vmul.f32 %v4444_v5, %v8668_v29  ;;  %v4511_v4 = vld [vmem:[%s8635_s17 + $0x1c10] sm:$0xff]  ;;  %v4446_v17 = vld [vmem:[%s8635_s17 + $0x1418] sm:$0xff] }
 0x1eb   : >> { %v8679_v9 = vstv %s2284_s5  ;;  %v1948_v1 = vadd.f32 %v1916_v11, %v1847_v52  ;;  %v2219_v23 = vmul.f32 %v4476_v14, %v8677_v24  ;;  %v1748_v36 = vadd.f32 %v1716_v35, %v1615_v28  ;;  %v4348_v28 = vld [vmem:[%s8635_s17 + $0x820] sm:$0xff]  ;;  %v4479_v19 = vld [vmem:[%s8635_s17 + $0x1818] sm:$0xff] }
 0x1ec   : >> { %v1949_v63 = vadd.f32 %v1917_v38, %v1848_v59  ;;  %v1817_v2 = vmul.f32 %v4346_v60, %v8655_v34  ;;  %v2320_v50 = vmul.f32 %v4509_v37, %v8679_v9  ;;  %v2220_v49 = vmul.f32 %v4477_v48, %v8677_v24  ;;  %v4381_v52 = vld [vmem:[%s8635_s17 + $0xc20] sm:$0xff]  ;;  %v4512_v37 = vld [vmem:[%s8635_s17 + $0x1c18] sm:$0xff] }
 0x1ed   : >> { %v2049_v15 = vadd.f32 %v2017_v22, %v1948_v1  ;;  %v1918_v30 = vmul.f32 %v4379_v27, %v8657_v41  ;;  %v2321_v58 = vmul.f32 %v4510_v55, %v8679_v9  ;;  %v2019_v42 = vmul.f32 %v4412_v46, %v8665_v39 }
 0x1ee   : >> { %v2050_v7 = vadd.f32 %v2018_v61, %v1949_v63  ;;  %v1849_v25 = vadd.f32 %v1817_v2, %v1748_v36  ;;  %v1616_v40 = vmul.f32 %v8639_v54, %v1583_v12  ;;  %v1717_v6 = vmul.f32 %v4314_v16, %v8646_v21  ;;  %v4414_v61 = vld [vmem:[%s8635_s17 + $0x1020] sm:$0xff]  ;;  %v4316_v36 = vld [vmem:[%s8635_s17 + $0x428] sm:$0xff] }
 0x1ef   : >> { %v2150_v44 = vadd.f32 %v2118_v13, %v2049_v15  ;;  %v1818_v56 = vmul.f32 %v4347_v51, %v8655_v34  ;;  %v2120_v33 = vmul.f32 %v4445_v3, %v8668_v29  ;;  %v2221_v57 = vmul.f32 %v4478_v26, %v8677_v24  ;;  %v4349_v2 = vld [vmem:[%s8635_s17 + $0x828] sm:$0xff] }
 0x1f0   : >> { %v2151_v20 = vadd.f32 %v2119_v31, %v2050_v7  ;;  %v1950_v45 = vadd.f32 %v1918_v30, %v1849_v25  ;;  %v2322_v8 = vmul.f32 %v4511_v4, %v8679_v9  ;;  %v1749_v43 = vadd.f32 %v1717_v6, %v1616_v40  ;;  %v1585_v31 = vld [vmem:[%s8635_s17 + $0x28] sm:$0xff]  ;;  %v4513_v7 = vld [vmem:[%s8635_s17 + $0x1c20] sm:$0xff]  ;;  %v1586_v6 = vld [vmem:[%s8635_s17 + $0x30] sm:$0xff] }
 0x1f1   : >> { %v2251_v35 = vadd.f32 %v2219_v23, %v2150_v44  ;;  %v1919_v11 = vmul.f32 %v4380_v62, %v8657_v41  ;;  %v2020_v38 = vmul.f32 %v4413_v47, %v8665_v39  ;;  %v1617_v5 = vmul.f32 %v8639_v54, %v1584_v53  ;;  %v4382_v25 = vld [vmem:[%s8635_s17 + $0xc28] sm:$0xff] }
 0x1f2   : >> { %v2252_v32 = vadd.f32 %v2220_v49, %v2151_v20  ;;  %v2051_v10 = vadd.f32 %v2019_v42, %v1950_v45  ;;  %v1850_v14 = vadd.f32 %v1818_v56, %v1749_v43  ;;  %v1718_v60 = vmul.f32 %v4315_v0, %v8646_v21  ;;  %v4480_v49 = vld [vmem:[%s8635_s17 + $0x1820] sm:$0xff]  ;;  %v4415_v40 = vld [vmem:[%s8635_s17 + $0x1028] sm:$0xff]  ;;  %v4317_v45 = vld [vmem:[%s8635_s17 + $0x430] sm:$0xff] }
 0x1f3   : >> { %v2352_v22 = vadd.f32 %v2320_v50, %v2251_v35  ;;  %v1819_v59 = vmul.f32 %v4348_v28, %v8655_v34  ;;  %v2121_v1 = vmul.f32 %v4446_v17, %v8668_v29  ;;  %v2222_v13 = vmul.f32 %v4479_v19, %v8677_v24  ;;  %v4447_v50 = vld [vmem:[%s8635_s17 + $0x1420] sm:$0xff]  ;;  %v4481_v43 = vld [vmem:[%s8635_s17 + $0x1828] sm:$0xff] }
 0x1f4   : >> { %v2353_v48 = vadd.f32 %v2321_v58, %v2252_v32  ;;  %v2152_v27 = vadd.f32 %v2120_v33, %v2051_v10  ;;  %v1951_v46 = vadd.f32 %v1919_v11, %v1850_v14  ;;  %v1750_v23 = vadd.f32 %v1718_v60, %v1617_v5  ;;  %v4350_v33 = vld [vmem:[%s8635_s17 + $0x830] sm:$0xff]  ;;  %v4514_v32 = vld [vmem:[%s8635_s17 + $0x1c28] sm:$0xff]  ;;  %v1587_v60 = vld [vmem:[%s8635_s17 + $0x38] sm:$0xff] }
 0x1f5   : >> { %v2385_v55 = vadd.f32 %v8686_v18, %v2352_v22  ;;  %v1920_v63 = vmul.f32 %v4381_v52, %v8657_v41  ;;  %v2323_v51 = vmul.f32 %v4512_v37, %v8679_v9  ;;  %v2021_v15 = vmul.f32 %v4414_v61, %v8665_v39  ;;  %v4416_v37 = vld [vmem:[%s8635_s17 + $0x1030] sm:$0xff] }
 0x1f6   : >> { %v2386_v12 = vadd.f32 %v8686_v18, %v2353_v48  ;;  %v2253_v16 = vadd.f32 %v2221_v57, %v2152_v27  ;;  %v2052_v3 = vadd.f32 %v2020_v38, %v1951_v46  ;;  %v1851_v26 = vadd.f32 %v1819_v59, %v1750_v23  ;;  %v4383_v38 = vld [vmem:[%s8635_s17 + $0xc30] sm:$0xff] }
 0x1f7   : >> { %v2417_v30 = vmax.f32 %v2385_v55, 0.0  ;;  %v1618_v58 = vmul.f32 %v8639_v54, %v1585_v31  ;;  %v1719_v62 = vmul.f32 %v4316_v36, %v8646_v21  ;;  %v1820_v44 = vmul.f32 %v4349_v2, %v8655_v34  ;;  %v4482_v36 = vld [vmem:[%s8635_s17 + $0x1830] sm:$0xff] }
 0x1f8   : >> { %v2418_v42 = vmax.f32 %v2386_v12, 0.0  ;;  %v2354_v4 = vadd.f32 %v2322_v8, %v2253_v16  ;;  %v2153_v56 = vadd.f32 %v2121_v1, %v2052_v3  ;;  %v1952_v47 = vadd.f32 %v1920_v63, %v1851_v26  ;;  %v4448_v8 = vld [vmem:[%s8635_s17 + $0x1428] sm:$0xff]  ;;  %v4318_v1 = vld [vmem:[%s8635_s17 + $0x438] sm:$0xff]  ;;  %v4449_v63 = vld [vmem:[%s8635_s17 + $0x1430] sm:$0xff] }
 0x1f9   : >> { %2452 = vst [vmem:[%s8750_s27] sm:$0xff] %v2417_v30  ;;  %4544 = vst [vmem:[%s8750_s27 + $0x1fff] sm:$0xfe] %v2417_v30  ;;  %v2122_v53 = vmul.f32 %v4447_v50, %v8668_v29  ;;  %v2223_v20 = vmul.f32 %v4480_v49, %v8677_v24  ;;  %v2324_v0 = vmul.f32 %v4513_v7, %v8679_v9  ;;  %v4417_v7 = vld [vmem:[%s8635_s17 + $0x1038] sm:$0xff] }
 0x1fa   : >> { %4578 = vst [vmem:[%s8750_s27 + $0x3ffe] sm:$0xfc] %v2417_v30  ;;  %4612 = vst [vmem:[%s8750_s27 + $0x5ffd] sm:$0xf8] %v2417_v30  ;;  %v2387_v57 = vadd.f32 %v8686_v18, %v2354_v4  ;;  %v1751_v28 = vadd.f32 %v1719_v62, %v1618_v58  ;;  %v1921_v35 = vmul.f32 %v4382_v25, %v8657_v41  ;;  %v1588_v58 = vld [vmem:[%s8635_s17 + $0x40] sm:$0xff] }
 0x1fb   : >> { %4646 = vst [vmem:[%s8750_s27 + $0x7ffc] sm:$0xf0] %v2417_v30  ;;  %2453 = vst [vmem:[%s8750_s27 + $0x8] sm:$0xff] %v2418_v42  ;;  %v2254_v11 = vadd.f32 %v2222_v13, %v2153_v56  ;;  %v2053_v17 = vadd.f32 %v2021_v15, %v1952_v47  ;;  %v2022_v19 = vmul.f32 %v4415_v40, %v8665_v39  ;;  %v4351_v13 = vld [vmem:[%s8635_s17 + $0x838] sm:$0xff]  ;;  %v4515_v30 = vld [vmem:[%s8635_s17 + $0x1c30] sm:$0xff] }
 0x1fc   : >> { %4545 = vst [vmem:[%s8750_s27 + $0x2007] sm:$0xff] %v2418_v42  ;;  %4579 = vst [vmem:[%s8750_s27 + $0x4006] sm:$0xff] %v2418_v42  ;;  %v1619_v10 = vmul.f32 %v8639_v54, %v1586_v6  ;;  %v2419_v5 = vmax.f32 %v2387_v57, 0.0  ;;  %v1852_v52 = vadd.f32 %v1820_v44, %v1751_v28  ;;  %v1720_v22 = vmul.f32 %v4317_v45, %v8646_v21  ;;  %v4384_v15 = vld [vmem:[%s8635_s17 + $0xc38] sm:$0xff]  ;;  %v4319_v44 = vld [vmem:[%s8635_s17 + $0x440] sm:$0xff] }
 0x1fd   : >> { %4613 = vst [vmem:[%s8750_s27 + $0x6005] sm:$0xff] %v2418_v42  ;;  %4647 = vst [vmem:[%s8750_s27 + $0x8004] sm:$0xff] %v2418_v42  ;;  %v1821_v14 = vmul.f32 %v4350_v33, %v8655_v34  ;;  %v2355_v59 = vadd.f32 %v2323_v51, %v2254_v11  ;;  %v2154_v61 = vadd.f32 %v2122_v53, %v2053_v17  ;;  %v4450_v53 = vld [vmem:[%s8635_s17 + $0x1438] sm:$0xff]  ;;  %v4385_v45 = vld [vmem:[%s8635_s17 + $0xc40] sm:$0xff] }
 0x1fe   : >> { %v2123_v48 = vmul.f32 %v4448_v8, %v8668_v29  ;;  %v2224_v27 = vmul.f32 %v4481_v43, %v8677_v24  ;;  %2454 = vst [vmem:[%s8750_s27 + $0x10] sm:$0xff] %v2419_v5  ;;  %4546 = vst [vmem:[%s8750_s27 + $0x200f] sm:$0xff] %v2419_v5  ;;  %v1953_v31 = vadd.f32 %v1921_v35, %v1852_v52  ;;  %v4483_v28 = vld [vmem:[%s8635_s17 + $0x1838] sm:$0xff] }
 0x1ff   : >> { %4580 = vst [vmem:[%s8750_s27 + $0x400e] sm:$0xff] %v2419_v5  ;;  %4614 = vst [vmem:[%s8750_s27 + $0x600d] sm:$0xff] %v2419_v5  ;;  %v2325_v55 = vmul.f32 %v4514_v32, %v8679_v9  ;;  %v1752_v46 = vadd.f32 %v1720_v22, %v1619_v10  ;;  %v1922_v23 = vmul.f32 %v4383_v38, %v8657_v41  ;;  %v4516_v17 = vld [vmem:[%s8635_s17 + $0x1c38] sm:$0xff]  ;;  %v4418_v32 = vld [vmem:[%s8635_s17 + $0x1040] sm:$0xff] }
 0x200   : >> { %4648 = vst [vmem:[%s8750_s27 + $0x800c] sm:$0xff] %v2419_v5  ;;  %v2388_v2 = vadd.f32 %v8686_v18, %v2355_v59  ;;  %v2255_v12 = vadd.f32 %v2223_v20, %v2154_v61  ;;  %v2023_v16 = vmul.f32 %v4416_v37, %v8665_v39  ;;  %v1620_v51 = vmul.f32 %v8639_v54, %v1587_v60  ;;  %v4352_v20 = vld [vmem:[%s8635_s17 + $0x840] sm:$0xff]  ;;  %v1589_v10 = vld [vmem:[%s8635_s17 + $0x48] sm:$0xff] }
 0x201   : >> { %v2054_v50 = vadd.f32 %v2022_v19, %v1953_v31  ;;  %v1853_v49 = vadd.f32 %v1821_v14, %v1752_v46  ;;  %v1721_v3 = vmul.f32 %v4318_v1, %v8646_v21  ;;  %v1822_v26 = vmul.f32 %v4351_v13, %v8655_v34  ;;  %v4451_v14 = vld [vmem:[%s8635_s17 + $0x1440] sm:$0xff]  ;;  %v4353_v1 = vld [vmem:[%s8635_s17 + $0x848] sm:$0xff] }
 0x202   : >> { %v2420_v25 = vmax.f32 %v2388_v2, 0.0  ;;  %v2356_v42 = vadd.f32 %v2324_v0, %v2255_v12  ;;  %v2124_v4 = vmul.f32 %v4449_v63, %v8668_v29  ;;  %v2225_v62 = vmul.f32 %v4482_v36, %v8677_v24  ;;  %v4517_v12 = vld [vmem:[%s8635_s17 + $0x1c40] sm:$0xff] }
 0x203   : >> { %v2155_v40 = vadd.f32 %v2123_v48, %v2054_v50  ;;  %v1954_v6 = vadd.f32 %v1922_v23, %v1853_v49  ;;  %v1753_v56 = vadd.f32 %v1721_v3, %v1620_v51  ;;  %v1923_v47 = vmul.f32 %v4384_v15, %v8657_v41  ;;  %v4484_v48 = vld [vmem:[%s8635_s17 + $0x1840] sm:$0xff]  ;;  %v4419_v51 = vld [vmem:[%s8635_s17 + $0x1048] sm:$0xff]  ;;  %v1590_v3 = vld [vmem:[%s8635_s17 + $0x50] sm:$0xff] }
 0x204   : >> { %2455 = vst [vmem:[%s8750_s27 + $0x18] sm:$0xf] %v2420_v25  ;;  %4547 = vst [vmem:[%s8750_s27 + $0x2017] sm:$0x1f] %v2420_v25  ;;  %v2389_v33 = vadd.f32 %v8686_v18, %v2356_v42  ;;  %v2326_v57 = vmul.f32 %v4515_v30, %v8679_v9  ;;  %v2024_v0 = vmul.f32 %v4417_v7, %v8665_v39  ;;  %v4452_v42 = vld [vmem:[%s8635_s17 + $0x1448] sm:$0xff] }
 0x205   : >> { %4581 = vst [vmem:[%s8750_s27 + $0x4016] sm:$0x3f] %v2420_v25  ;;  %4615 = vst [vmem:[%s8750_s27 + $0x6015] sm:$0x7f] %v2420_v25  ;;  %v1621_v35 = vmul.f32 %v8639_v54, %v1588_v58  ;;  %v2256_v8 = vadd.f32 %v2224_v27, %v2155_v40  ;;  %v2055_v43 = vadd.f32 %v2023_v16, %v1954_v6  ;;  %v4320_v27 = vld [vmem:[%s8635_s17 + $0x448] sm:$0xff] }
 0x206   : >> { %4649 = vst [vmem:[%s8750_s27 + $0x8014] sm:$0xff] %v2420_v25  ;;  %v1854_v11 = vadd.f32 %v1822_v26, %v1753_v56  ;;  %v1722_v19 = vmul.f32 %v4319_v44, %v8646_v21  ;;  %v2421_v38 = vmax.f32 %v2389_v33, 0.0  ;;  %v2125_v5 = vmul.f32 %v4450_v53, %v8668_v29  ;;  %v4386_v16 = vld [vmem:[%s8635_s17 + $0xc48] sm:$0xff] }
 0x207   : >> { %v1823_v52 = vmul.f32 %v4352_v20, %v8655_v34  ;;  %v1924_v22 = vmul.f32 %v4385_v45, %v8657_v41  ;;  %v2357_v37 = vadd.f32 %v2325_v55, %v2256_v8  ;;  %v2156_v60 = vadd.f32 %v2124_v4, %v2055_v43  ;;  %v4321_v4 = vld [vmem:[%s8635_s17 + $0x450] sm:$0xff]  ;;  %v4518_v33 = vld [vmem:[%s8635_s17 + $0x1c48] sm:$0xff] }
 0x208   : >> { %v1955_v59 = vadd.f32 %v1923_v47, %v1854_v11  ;;  %v1754_v61 = vadd.f32 %v1722_v19, %v1621_v35  ;;  %2456 = vst [vmem:[%s8750_s27 + $0x20] sm:$0xff] %v2421_v38  ;;  %4548 = vst [vmem:[%s8750_s27 + $0x201f] sm:$0xfe] %v2421_v38  ;;  %v2226_v13 = vmul.f32 %v4483_v28, %v8677_v24  ;;  %v4485_v47 = vld [vmem:[%s8635_s17 + $0x1848] sm:$0xff]  ;;  %v4420_v11 = vld [vmem:[%s8635_s17 + $0x1050] sm:$0xff] }
 0x209   : >> { %4582 = vst [vmem:[%s8750_s27 + $0x401e] sm:$0xfc] %v2421_v38  ;;  %4616 = vst [vmem:[%s8750_s27 + $0x601d] sm:$0xf8] %v2421_v38  ;;  %v2327_v31 = vmul.f32 %v4516_v17, %v8679_v9  ;;  %v2025_v55 = vmul.f32 %v4418_v32, %v8665_v39  ;;  %v1622_v46 = vmul.f32 %v8639_v54, %v1589_v10  ;;  %v1591_v17 = vld [vmem:[%s8635_s17 + $0x58] sm:$0xff] }
 0x20a   : >> { %4650 = vst [vmem:[%s8750_s27 + $0x801c] sm:$0xf0] %v2421_v38  ;;  %v2390_v23 = vadd.f32 %v8686_v18, %v2357_v37  ;;  %v2257_v63 = vadd.f32 %v2225_v62, %v2156_v60  ;;  %v2056_v36 = vadd.f32 %v2024_v0, %v1955_v59  ;;  %v1855_v2 = vadd.f32 %v1823_v52, %v1754_v61  ;;  %v4354_v62 = vld [vmem:[%s8635_s17 + $0x850] sm:$0xff]  ;;  %v4355_v52 = vld [vmem:[%s8635_s17 + $0x858] sm:$0xff] }
 0x20b   : >> { %v2126_v15 = vmul.f32 %v4451_v14, %v8668_v29  ;;  %v2227_v50 = vmul.f32 %v4484_v48, %v8677_v24  ;;  %v1723_v49 = vmul.f32 %v4320_v27, %v8646_v21  ;;  %v1824_v30 = vmul.f32 %v4353_v1, %v8655_v34  ;;  %v4387_v0 = vld [vmem:[%s8635_s17 + $0xc50] sm:$0xff] }
 0x20c   : >> { %v2422_v26 = vmax.f32 %v2390_v23, 0.0  ;;  %v2358_v7 = vadd.f32 %v2326_v57, %v2257_v63  ;;  %v2157_v58 = vadd.f32 %v2125_v5, %v2056_v36  ;;  %v1956_v25 = vadd.f32 %v1924_v22, %v1855_v2  ;;  %v4322_v5 = vld [vmem:[%s8635_s17 + $0x458] sm:$0xff]  ;;  %v4453_v59 = vld [vmem:[%s8635_s17 + $0x1450] sm:$0xff] }
 0x20d   : >> { %v2328_v44 = vmul.f32 %v4517_v12, %v8679_v9  ;;  %v1755_v40 = vadd.f32 %v1723_v49, %v1622_v46  ;;  %v1925_v6 = vmul.f32 %v4386_v16, %v8657_v41  ;;  %v2026_v56 = vmul.f32 %v4419_v51, %v8665_v39  ;;  %v4486_v61 = vld [vmem:[%s8635_s17 + $0x1850] sm:$0xff]  ;;  %v4421_v2 = vld [vmem:[%s8635_s17 + $0x1058] sm:$0xff]  ;;  %v1592_v12 = vld [vmem:[%s8635_s17 + $0x60] sm:$0xff] }
 0x20e   : >> { %2457 = vst [vmem:[%s8750_s27 + $0x28] sm:$0xff] %v2422_v26  ;;  %4549 = vst [vmem:[%s8750_s27 + $0x2027] sm:$0xff] %v2422_v26  ;;  %v2391_v53 = vadd.f32 %v8686_v18, %v2358_v7  ;;  %v2258_v20 = vadd.f32 %v2226_v13, %v2157_v58  ;;  %v2057_v45 = vadd.f32 %v2025_v55, %v1956_v25  ;;  %v4519_v23 = vld [vmem:[%s8635_s17 + $0x1c50] sm:$0xff]  ;;  %v4323_v49 = vld [vmem:[%s8635_s17 + $0x460] sm:$0xff] }
 0x20f   : >> { %4583 = vst [vmem:[%s8750_s27 + $0x4026] sm:$0xff] %v2422_v26  ;;  %4617 = vst [vmem:[%s8750_s27 + $0x6025] sm:$0xff] %v2422_v26  ;;  %v1623_v57 = vmul.f32 %v8639_v54, %v1590_v3  ;;  %v1856_v28 = vadd.f32 %v1824_v30, %v1755_v40  ;;  %v2127_v35 = vmul.f32 %v4452_v42, %v8668_v29  ;;  %v4454_v58 = vld [vmem:[%s8635_s17 + $0x1458] sm:$0xff]  ;;  %v4356_v25 = vld [vmem:[%s8635_s17 + $0x860] sm:$0xff] }
 0x210   : >> { %4651 = vst [vmem:[%s8750_s27 + $0x8024] sm:$0xff] %v2422_v26  ;;  %v1724_v8 = vmul.f32 %v4321_v4, %v8646_v21  ;;  %v1825_v43 = vmul.f32 %v4354_v62, %v8655_v34  ;;  %v2423_v19 = vmax.f32 %v2391_v53, 0.0  ;;  %v2359_v32 = vadd.f32 %v2327_v31, %v2258_v20  ;;  %v4388_v31 = vld [vmem:[%s8635_s17 + $0xc58] sm:$0xff]  ;;  %v4389_v42 = vld [vmem:[%s8635_s17 + $0xc60] sm:$0xff] }
 0x211   : >> { %v2158_v10 = vadd.f32 %v2126_v15, %v2057_v45  ;;  %v2228_v38 = vmul.f32 %v4485_v47, %v8677_v24  ;;  %v1957_v22 = vadd.f32 %v1925_v6, %v1856_v28  ;;  %v2329_v14 = vmul.f32 %v4518_v33, %v8679_v9  ;;  %v4487_v40 = vld [vmem:[%s8635_s17 + $0x1858] sm:$0xff]  ;;  %v4422_v33 = vld [vmem:[%s8635_s17 + $0x1060] sm:$0xff] }
 0x212   : >> { %v1756_v37 = vadd.f32 %v1724_v8, %v1623_v57  ;;  %v1926_v60 = vmul.f32 %v4387_v0, %v8657_v41  ;;  %2458 = vst [vmem:[%s8750_s27 + $0x30] sm:$0xff] %v2423_v19  ;;  %4550 = vst [vmem:[%s8750_s27 + $0x202f] sm:$0xff] %v2423_v19  ;;  %v2392_v48 = vadd.f32 %v8686_v18, %v2359_v32  ;;  %v4520_v20 = vld [vmem:[%s8635_s17 + $0x1c58] sm:$0xff]  ;;  %v1593_v57 = vld [vmem:[%s8635_s17 + $0x68] sm:$0xff] }
 0x213   : >> { %4584 = vst [vmem:[%s8750_s27 + $0x402e] sm:$0xff] %v2423_v19  ;;  %4618 = vst [vmem:[%s8750_s27 + $0x602d] sm:$0xff] %v2423_v19  ;;  %v2259_v27 = vadd.f32 %v2227_v50, %v2158_v10  ;;  %v2027_v1 = vmul.f32 %v4420_v11, %v8665_v39  ;;  %v1624_v13 = vmul.f32 %v8639_v54, %v1591_v17  ;;  %v4488_v10 = vld [vmem:[%s8635_s17 + $0x1860] sm:$0xff] }
 0x214   : >> { %4652 = vst [vmem:[%s8750_s27 + $0x802c] sm:$0xff] %v2423_v19  ;;  %v2058_v55 = vadd.f32 %v2026_v56, %v1957_v22  ;;  %v1857_v46 = vadd.f32 %v1825_v43, %v1756_v37  ;;  %v1725_v63 = vmul.f32 %v4322_v5, %v8646_v21  ;;  %v1826_v36 = vmul.f32 %v4355_v52, %v8655_v34  ;;  %v4455_v43 = vld [vmem:[%s8635_s17 + $0x1460] sm:$0xff]  ;;  %v4357_v5 = vld [vmem:[%s8635_s17 + $0x868] sm:$0xff] }
 0x215   : >> { %v2424_v16 = vmax.f32 %v2392_v48, 0.0  ;;  %v2360_v51 = vadd.f32 %v2328_v44, %v2259_v27  ;;  %v2128_v15 = vmul.f32 %v4453_v59, %v8668_v29  ;;  %v2229_v50 = vmul.f32 %v4486_v61, %v8677_v24  ;;  %v4521_v27 = vld [vmem:[%s8635_s17 + $0x1c60] sm:$0xff] }
 0x216   : >> { %v2159_v30 = vadd.f32 %v2127_v35, %v2058_v55  ;;  %v1958_v3 = vadd.f32 %v1926_v60, %v1857_v46  ;;  %v1757_v26 = vadd.f32 %v1725_v63, %v1624_v13  ;;  %v1927_v7 = vmul.f32 %v4388_v31, %v8657_v41  ;;  %v4423_v13 = vld [vmem:[%s8635_s17 + $0x1068] sm:$0xff]  ;;  %v1594_v63 = vld [vmem:[%s8635_s17 + $0x70] sm:$0xff] }
 0x217   : >> { %2459 = vst [vmem:[%s8750_s27 + $0x38] sm:$0xf] %v2424_v16  ;;  %4551 = vst [vmem:[%s8750_s27 + $0x2037] sm:$0x1f] %v2424_v16  ;;  %v2393_v4 = vadd.f32 %v8686_v18, %v2360_v51  ;;  %v2330_v62 = vmul.f32 %v4519_v23, %v8679_v9  ;;  %v2028_v44 = vmul.f32 %v4421_v2, %v8665_v39  ;;  %v4456_v51 = vld [vmem:[%s8635_s17 + $0x1468] sm:$0xff] }
 0x218   : >> { %4585 = vst [vmem:[%s8750_s27 + $0x4036] sm:$0x3f] %v2424_v16  ;;  %4619 = vst [vmem:[%s8750_s27 + $0x6035] sm:$0x7f] %v2424_v16  ;;  %v1625_v6 = vmul.f32 %v8639_v54, %v1592_v12  ;;  %v2260_v56 = vadd.f32 %v2228_v38, %v2159_v30  ;;  %v2059_v47 = vadd.f32 %v2027_v1, %v1958_v3  ;;  %v4324_v38 = vld [vmem:[%s8635_s17 + $0x468] sm:$0xff] }
 0x219   : >> { %4653 = vst [vmem:[%s8750_s27 + $0x8034] sm:$0xff] %v2424_v16  ;;  %v1858_v53 = vadd.f32 %v1826_v36, %v1757_v26  ;;  %v1726_v45 = vmul.f32 %v4323_v49, %v8646_v21  ;;  %v2425_v0 = vmax.f32 %v2393_v4, 0.0  ;;  %v2129_v28 = vmul.f32 %v4454_v58, %v8668_v29  ;;  %v4390_v1 = vld [vmem:[%s8635_s17 + $0xc68] sm:$0xff] }
 0x21a   : >> { %v1827_v35 = vmul.f32 %v4356_v25, %v8655_v34  ;;  %v1928_v8 = vmul.f32 %v4389_v42, %v8657_v41  ;;  %v2361_v11 = vadd.f32 %v2329_v14, %v2260_v56  ;;  %v2160_v17 = vadd.f32 %v2128_v15, %v2059_v47  ;;  %v4325_v15 = vld [vmem:[%s8635_s17 + $0x470] sm:$0xff]  ;;  %v4522_v4 = vld [vmem:[%s8635_s17 + $0x1c68] sm:$0xff] }
 0x21b   : >> { %v1959_v19 = vadd.f32 %v1927_v7, %v1858_v53  ;;  %v1758_v32 = vadd.f32 %v1726_v45, %v1625_v6  ;;  %2460 = vst [vmem:[%s8750_s27 + $0x40] sm:$0xff] %v2425_v0  ;;  %4552 = vst [vmem:[%s8750_s27 + $0x203f] sm:$0xfe] %v2425_v0  ;;  %v2230_v52 = vmul.f32 %v4487_v40, %v8677_v24  ;;  %v4489_v7 = vld [vmem:[%s8635_s17 + $0x1868] sm:$0xff]  ;;  %v4424_v53 = vld [vmem:[%s8635_s17 + $0x1070] sm:$0xff] }
 0x21c   : >> { %4586 = vst [vmem:[%s8750_s27 + $0x403e] sm:$0xfc] %v2425_v0  ;;  %4620 = vst [vmem:[%s8750_s27 + $0x603d] sm:$0xf8] %v2425_v0  ;;  %v2331_v22 = vmul.f32 %v4520_v20, %v8679_v9  ;;  %v2029_v14 = vmul.f32 %v4422_v33, %v8665_v39  ;;  %v1626_v37 = vmul.f32 %v8639_v54, %v1593_v57  ;;  %v1595_v20 = vld [vmem:[%s8635_s17 + $0x78] sm:$0xff] }
 0x21d   : >> { %4654 = vst [vmem:[%s8750_s27 + $0x803c] sm:$0xf0] %v2425_v0  ;;  %v2394_v60 = vadd.f32 %v8686_v18, %v2361_v11  ;;  %v2261_v59 = vadd.f32 %v2229_v50, %v2160_v17  ;;  %v2060_v61 = vadd.f32 %v2028_v44, %v1959_v19  ;;  %v1859_v48 = vadd.f32 %v1827_v35, %v1758_v32  ;;  %v4358_v50 = vld [vmem:[%s8635_s17 + $0x870] sm:$0xff]  ;;  %v4359_v35 = vld [vmem:[%s8635_s17 + $0x878] sm:$0xff] }
 0x21e   : >> { %v2130_v31 = vmul.f32 %v4455_v43, %v8668_v29  ;;  %v2231_v55 = vmul.f32 %v4488_v10, %v8677_v24  ;;  %v1727_v46 = vmul.f32 %v4324_v38, %v8646_v21  ;;  %v1828_v23 = vmul.f32 %v4357_v5, %v8655_v34  ;;  %v4391_v44 = vld [vmem:[%s8635_s17 + $0xc70] sm:$0xff] }
 0x21f   : >> { %v2426_v36 = vmax.f32 %v2394_v60, 0.0  ;;  %v2362_v2 = vadd.f32 %v2330_v62, %v2261_v59  ;;  %v2161_v12 = vadd.f32 %v2129_v28, %v2060_v61  ;;  %v1960_v16 = vadd.f32 %v1928_v8, %v1859_v48  ;;  %v4326_v28 = vld [vmem:[%s8635_s17 + $0x478] sm:$0xff]  ;;  %v4457_v19 = vld [vmem:[%s8635_s17 + $0x1470] sm:$0xff] }
 0x220   : >> { %v2332_v49 = vmul.f32 %v4521_v27, %v8679_v9  ;;  %v1759_v30 = vadd.f32 %v1727_v46, %v1626_v37  ;;  %v1929_v3 = vmul.f32 %v4390_v1, %v8657_v41  ;;  %v2030_v26 = vmul.f32 %v4423_v13, %v8665_v39  ;;  %v4490_v32 = vld [vmem:[%s8635_s17 + $0x1870] sm:$0xff]  ;;  %v4425_v48 = vld [vmem:[%s8635_s17 + $0x1078] sm:$0xff]  ;;  %v1596_v27 = vld [vmem:[%s8635_s17 + $0x80] sm:$0xff] }
 0x221   : >> { %2461 = vst [vmem:[%s8750_s27 + $0x48] sm:$0xff] %v2426_v36  ;;  %4553 = vst [vmem:[%s8750_s27 + $0x2047] sm:$0xff] %v2426_v36  ;;  %v2395_v58 = vadd.f32 %v8686_v18, %v2362_v2  ;;  %v2262_v25 = vadd.f32 %v2230_v52, %v2161_v12  ;;  %v2061_v42 = vadd.f32 %v2029_v14, %v1960_v16  ;;  %v4523_v60 = vld [vmem:[%s8635_s17 + $0x1c70] sm:$0xff]  ;;  %v4327_v46 = vld [vmem:[%s8635_s17 + $0x480] sm:$0xff] }
 0x222   : >> { %4587 = vst [vmem:[%s8750_s27 + $0x4046] sm:$0xff] %v2426_v36  ;;  %4621 = vst [vmem:[%s8750_s27 + $0x6045] sm:$0xff] %v2426_v36  ;;  %v1627_v62 = vmul.f32 %v8639_v54, %v1594_v63  ;;  %v1860_v40 = vadd.f32 %v1828_v23, %v1759_v30  ;;  %v2131_v6 = vmul.f32 %v4456_v51, %v8668_v29  ;;  %v4458_v12 = vld [vmem:[%s8635_s17 + $0x1478] sm:$0xff]  ;;  %v4360_v16 = vld [vmem:[%s8635_s17 + $0x880] sm:$0xff] }
 0x223   : >> { %4655 = vst [vmem:[%s8750_s27 + $0x8044] sm:$0xff] %v2426_v36  ;;  %v1728_v56 = vmul.f32 %v4325_v15, %v8646_v21  ;;  %v1829_v47 = vmul.f32 %v4358_v50, %v8655_v34  ;;  %v2427_v45 = vmax.f32 %v2395_v58, 0.0  ;;  %v2363_v33 = vadd.f32 %v2331_v22, %v2262_v25  ;;  %v4392_v22 = vld [vmem:[%s8635_s17 + $0xc78] sm:$0xff]  ;;  %v4393_v51 = vld [vmem:[%s8635_s17 + $0xc80] sm:$0xff] }
 0x224   : >> { %v2162_v57 = vadd.f32 %v2130_v31, %v2061_v42  ;;  %v2232_v0 = vmul.f32 %v4489_v7, %v8677_v24  ;;  %v1961_v8 = vadd.f32 %v1929_v3, %v1860_v40  ;;  %v2333_v43 = vmul.f32 %v4522_v4, %v8679_v9  ;;  %v4491_v30 = vld [vmem:[%s8635_s17 + $0x1878] sm:$0xff]  ;;  %v4426_v4 = vld [vmem:[%s8635_s17 + $0x1080] sm:$0xff] }
 0x225   : >> { %v1760_v11 = vadd.f32 %v1728_v56, %v1627_v62  ;;  %v1930_v17 = vmul.f32 %v4391_v44, %v8657_v41  ;;  %2462 = vst [vmem:[%s8750_s27 + $0x50] sm:$0xff] %v2427_v45  ;;  %4554 = vst [vmem:[%s8750_s27 + $0x204f] sm:$0xff] %v2427_v45  ;;  %v2396_v10 = vadd.f32 %v8686_v18, %v2363_v33  ;;  %v4524_v25 = vld [vmem:[%s8635_s17 + $0x1c78] sm:$0xff]  ;;  %v1597_v62 = vld [vmem:[%s8635_s17 + $0x88] sm:$0xff] }
 0x226   : >> { %4588 = vst [vmem:[%s8750_s27 + $0x404e] sm:$0xff] %v2427_v45  ;;  %4622 = vst [vmem:[%s8750_s27 + $0x604d] sm:$0xff] %v2427_v45  ;;  %v2263_v38 = vadd.f32 %v2231_v55, %v2162_v57  ;;  %v2031_v5 = vmul.f32 %v4424_v53, %v8665_v39  ;;  %v1628_v52 = vmul.f32 %v8639_v54, %v1595_v20  ;;  %v4492_v57 = vld [vmem:[%s8635_s17 + $0x1880] sm:$0xff] }
 0x227   : >> { %4656 = vst [vmem:[%s8750_s27 + $0x804c] sm:$0xff] %v2427_v45  ;;  %v2062_v14 = vadd.f32 %v2030_v26, %v1961_v8  ;;  %v1861_v37 = vadd.f32 %v1829_v47, %v1760_v11  ;;  %v1729_v59 = vmul.f32 %v4326_v28, %v8646_v21  ;;  %v1830_v61 = vmul.f32 %v4359_v35, %v8655_v34  ;;  %v4459_v47 = vld [vmem:[%s8635_s17 + $0x1480] sm:$0xff]  ;;  %v4361_v28 = vld [vmem:[%s8635_s17 + $0x888] sm:$0xff] }
 0x228   : >> { %v2428_v1 = vmax.f32 %v2396_v10, 0.0  ;;  %v2364_v13 = vadd.f32 %v2332_v49, %v2263_v38  ;;  %v2132_v31 = vmul.f32 %v4457_v19, %v8668_v29  ;;  %v2233_v55 = vmul.f32 %v4490_v32, %v8677_v24  ;;  %v4525_v38 = vld [vmem:[%s8635_s17 + $0x1c80] sm:$0xff] }
 0x229   : >> { %v2163_v23 = vadd.f32 %v2131_v6, %v2062_v14  ;;  %v1962_v63 = vadd.f32 %v1930_v17, %v1861_v37  ;;  %v1761_v36 = vadd.f32 %v1729_v59, %v1628_v52  ;;  %v1931_v2 = vmul.f32 %v4392_v22, %v8657_v41  ;;  %v4427_v52 = vld [vmem:[%s8635_s17 + $0x1088] sm:$0xff]  ;;  %v1598_v59 = vld [vmem:[%s8635_s17 + $0x90] sm:$0xff] }
 0x22a   : >> { %2463 = vst [vmem:[%s8750_s27 + $0x58] sm:$0xf] %v2428_v1  ;;  %4555 = vst [vmem:[%s8750_s27 + $0x2057] sm:$0x1f] %v2428_v1  ;;  %v2397_v15 = vadd.f32 %v8686_v18, %v2364_v13  ;;  %v2334_v50 = vmul.f32 %v4523_v60, %v8679_v9  ;;  %v2032_v49 = vmul.f32 %v4425_v48, %v8665_v39  ;;  %v4460_v13 = vld [vmem:[%s8635_s17 + $0x1488] sm:$0xff] }
 0x22b   : >> { %4589 = vst [vmem:[%s8750_s27 + $0x4056] sm:$0x3f] %v2428_v1  ;;  %4623 = vst [vmem:[%s8750_s27 + $0x6055] sm:$0x7f] %v2428_v1  ;;  %v1629_v3 = vmul.f32 %v8639_v54, %v1596_v27  ;;  %v2264_v26 = vadd.f32 %v2232_v0, %v2163_v23  ;;  %v2063_v7 = vadd.f32 %v2031_v5, %v1962_v63  ;;  %v4328_v0 = vld [vmem:[%s8635_s17 + $0x488] sm:$0xff] }
 0x22c   : >> { %4657 = vst [vmem:[%s8750_s27 + $0x8054] sm:$0xff] %v2428_v1  ;;  %v1862_v58 = vadd.f32 %v1830_v61, %v1761_v36  ;;  %v1730_v42 = vmul.f32 %v4327_v46, %v8646_v21  ;;  %v2429_v44 = vmax.f32 %v2397_v15, 0.0  ;;  %v2133_v40 = vmul.f32 %v4458_v12, %v8668_v29  ;;  %v4394_v5 = vld [vmem:[%s8635_s17 + $0xc88] sm:$0xff] }
 0x22d   : >> { %v1831_v6 = vmul.f32 %v4360_v16, %v8655_v34  ;;  %v1932_v56 = vmul.f32 %v4393_v51, %v8657_v41  ;;  %v2365_v53 = vadd.f32 %v2333_v43, %v2264_v26  ;;  %v2164_v20 = vadd.f32 %v2132_v31, %v2063_v7  ;;  %v4329_v31 = vld [vmem:[%s8635_s17 + $0x490] sm:$0xff]  ;;  %v4526_v15 = vld [vmem:[%s8635_s17 + $0x1c88] sm:$0xff] }
 0x22e   : >> { %v1963_v45 = vadd.f32 %v1931_v2, %v1862_v58  ;;  %v1762_v33 = vadd.f32 %v1730_v42, %v1629_v3  ;;  %2464 = vst [vmem:[%s8750_s27 + $0x60] sm:$0xff] %v2429_v44  ;;  %4556 = vst [vmem:[%s8750_s27 + $0x205f] sm:$0xfe] %v2429_v44  ;;  %v2234_v35 = vmul.f32 %v4491_v30, %v8677_v24  ;;  %v4493_v2 = vld [vmem:[%s8635_s17 + $0x1888] sm:$0xff]  ;;  %v4428_v58 = vld [vmem:[%s8635_s17 + $0x1090] sm:$0xff] }
 0x22f   : >> { %4590 = vst [vmem:[%s8750_s27 + $0x405e] sm:$0xfc] %v2429_v44  ;;  %4624 = vst [vmem:[%s8750_s27 + $0x605d] sm:$0xf8] %v2429_v44  ;;  %v2335_v8 = vmul.f32 %v4524_v25, %v8679_v9  ;;  %v2033_v43 = vmul.f32 %v4426_v4, %v8665_v39  ;;  %v1630_v11 = vmul.f32 %v8639_v54, %v1597_v62  ;;  %v1599_v25 = vld [vmem:[%s8635_s17 + $0x98] sm:$0xff] }
 0x230   : >> { %4658 = vst [vmem:[%s8750_s27 + $0x805c] sm:$0xf0] %v2429_v44  ;;  %v2398_v17 = vadd.f32 %v8686_v18, %v2365_v53  ;;  %v2265_v19 = vadd.f32 %v2233_v55, %v2164_v20  ;;  %v2064_v32 = vadd.f32 %v2032_v49, %v1963_v45  ;;  %v1863_v10 = vadd.f32 %v1831_v6, %v1762_v33  ;;  %v4362_v55 = vld [vmem:[%s8635_s17 + $0x890] sm:$0xff]  ;;  %v4363_v6 = vld [vmem:[%s8635_s17 + $0x898] sm:$0xff] }
 0x231   : >> { %v2134_v22 = vmul.f32 %v4459_v47, %v8668_v29  ;;  %v2235_v14 = vmul.f32 %v4492_v57, %v8677_v24  ;;  %v1731_v37 = vmul.f32 %v4328_v0, %v8646_v21  ;;  %v1832_v60 = vmul.f32 %v4361_v28, %v8655_v34  ;;  %v4395_v49 = vld [vmem:[%s8635_s17 + $0xc90] sm:$0xff] }
 0x232   : >> { %v2430_v61 = vmax.f32 %v2398_v17, 0.0  ;;  %v2366_v48 = vadd.f32 %v2334_v50, %v2265_v19  ;;  %v2165_v27 = vadd.f32 %v2133_v40, %v2064_v32  ;;  %v1964_v1 = vadd.f32 %v1932_v56, %v1863_v10  ;;  %v4330_v40 = vld [vmem:[%s8635_s17 + $0x498] sm:$0xff]  ;;  %v4461_v45 = vld [vmem:[%s8635_s17 + $0x1490] sm:$0xff] }
 0x233   : >> { %v2336_v46 = vmul.f32 %v4525_v38, %v8679_v9  ;;  %v1763_v23 = vadd.f32 %v1731_v37, %v1630_v11  ;;  %v1933_v63 = vmul.f32 %v4394_v5, %v8657_v41  ;;  %v2034_v36 = vmul.f32 %v4427_v52, %v8665_v39  ;;  %v4494_v33 = vld [vmem:[%s8635_s17 + $0x1890] sm:$0xff]  ;;  %v4429_v10 = vld [vmem:[%s8635_s17 + $0x1098] sm:$0xff]  ;;  %v1600_v38 = vld [vmem:[%s8635_s17 + $0xa0] sm:$0xff] }
 0x234   : >> { %2465 = vst [vmem:[%s8750_s27 + $0x68] sm:$0xff] %v2430_v61  ;;  %4557 = vst [vmem:[%s8750_s27 + $0x2067] sm:$0xff] %v2430_v61  ;;  %v2399_v12 = vadd.f32 %v8686_v18, %v2366_v48  ;;  %v2266_v16 = vadd.f32 %v2234_v35, %v2165_v27  ;;  %v2065_v51 = vadd.f32 %v2033_v43, %v1964_v1  ;;  %v4527_v17 = vld [vmem:[%s8635_s17 + $0x1c90] sm:$0xff]  ;;  %v4331_v37 = vld [vmem:[%s8635_s17 + $0x4a0] sm:$0xff] }
 0x235   : >> { %4591 = vst [vmem:[%s8750_s27 + $0x4066] sm:$0xff] %v2430_v61  ;;  %4625 = vst [vmem:[%s8750_s27 + $0x6065] sm:$0xff] %v2430_v61  ;;  %v1631_v50 = vmul.f32 %v8639_v54, %v1598_v59  ;;  %v1864_v30 = vadd.f32 %v1832_v60, %v1763_v23  ;;  %v2135_v3 = vmul.f32 %v4460_v13, %v8668_v29  ;;  %v4462_v27 = vld [vmem:[%s8635_s17 + $0x1498] sm:$0xff]  ;;  %v4364_v1 = vld [vmem:[%s8635_s17 + $0x8a0] sm:$0xff] }
 0x236   : >> { %4659 = vst [vmem:[%s8750_s27 + $0x8064] sm:$0xff] %v2430_v61  ;;  %v1732_v26 = vmul.f32 %v4329_v31, %v8646_v21  ;;  %v1833_v7 = vmul.f32 %v4362_v55, %v8655_v34  ;;  %v2431_v42 = vmax.f32 %v2399_v12, 0.0  ;;  %v2367_v4 = vadd.f32 %v2335_v8, %v2266_v16  ;;  %v4396_v8 = vld [vmem:[%s8635_s17 + $0xc98] sm:$0xff]  ;;  %v4397_v13 = vld [vmem:[%s8635_s17 + $0xca0] sm:$0xff] }
 0x237   : >> { %v2166_v62 = vadd.f32 %v2134_v22, %v2065_v51  ;;  %v2236_v44 = vmul.f32 %v4493_v2, %v8677_v24  ;;  %v1965_v56 = vadd.f32 %v1933_v63, %v1864_v30  ;;  %v2337_v47 = vmul.f32 %v4526_v15, %v8679_v9  ;;  %v4495_v23 = vld [vmem:[%s8635_s17 + $0x1898] sm:$0xff]  ;;  %v4430_v15 = vld [vmem:[%s8635_s17 + $0x10a0] sm:$0xff] }
 0x238   : >> { %v1764_v53 = vadd.f32 %v1732_v26, %v1631_v50  ;;  %v1934_v20 = vmul.f32 %v4395_v49, %v8657_v41  ;;  %2466 = vst [vmem:[%s8750_s27 + $0x70] sm:$0xff] %v2431_v42  ;;  %4558 = vst [vmem:[%s8750_s27 + $0x206f] sm:$0xff] %v2431_v42  ;;  %v2400_v57 = vadd.f32 %v8686_v18, %v2367_v4  ;;  %v4528_v16 = vld [vmem:[%s8635_s17 + $0x1c98] sm:$0xff]  ;;  %v1601_v50 = vld [vmem:[%s8635_s17 + $0xa8] sm:$0xff] }
 0x239   : >> { %4592 = vst [vmem:[%s8750_s27 + $0x406e] sm:$0xff] %v2431_v42  ;;  %4626 = vst [vmem:[%s8750_s27 + $0x606d] sm:$0xff] %v2431_v42  ;;  %v2267_v0 = vadd.f32 %v2235_v14, %v2166_v62  ;;  %v2035_v28 = vmul.f32 %v4428_v58, %v8665_v39  ;;  %v1632_v35 = vmul.f32 %v8639_v54, %v1599_v25  ;;  %v4496_v62 = vld [vmem:[%s8635_s17 + $0x18a0] sm:$0xff] }
 0x23a   : >> { %4660 = vst [vmem:[%s8750_s27 + $0x806c] sm:$0xff] %v2431_v42  ;;  %v2066_v43 = vadd.f32 %v2034_v36, %v1965_v56  ;;  %v1865_v11 = vadd.f32 %v1833_v7, %v1764_v53  ;;  %v1733_v19 = vmul.f32 %v4330_v40, %v8646_v21  ;;  %v1834_v32 = vmul.f32 %v4363_v6, %v8655_v34  ;;  %v4463_v7 = vld [vmem:[%s8635_s17 + $0x14a0] sm:$0xff]  ;;  %v4365_v40 = vld [vmem:[%s8635_s17 + $0x8a8] sm:$0xff] }
 0x23b   : >> { %v2432_v5 = vmax.f32 %v2400_v57, 0.0  ;;  %v2368_v52 = vadd.f32 %v2336_v46, %v2267_v0  ;;  %v2136_v22 = vmul.f32 %v4461_v45, %v8668_v29  ;;  %v2237_v14 = vmul.f32 %v4494_v33, %v8677_v24  ;;  %v4529_v0 = vld [vmem:[%s8635_s17 + $0x1ca0] sm:$0xff] }
 0x23c   : >> { %v2167_v60 = vadd.f32 %v2135_v3, %v2066_v43  ;;  %v1966_v59 = vadd.f32 %v1934_v20, %v1865_v11  ;;  %v1765_v61 = vadd.f32 %v1733_v19, %v1632_v35  ;;  %v1935_v48 = vmul.f32 %v4396_v8, %v8657_v41  ;;  %v4431_v35 = vld [vmem:[%s8635_s17 + $0x10a8] sm:$0xff]  ;;  %v1602_v19 = vld [vmem:[%s8635_s17 + $0xb0] sm:$0xff] }
 0x23d   : >> { %2467 = vst [vmem:[%s8750_s27 + $0x78] sm:$0xf] %v2432_v5  ;;  %4559 = vst [vmem:[%s8750_s27 + $0x2077] sm:$0x1f] %v2432_v5  ;;  %v2401_v31 = vadd.f32 %v8686_v18, %v2368_v52  ;;  %v2338_v55 = vmul.f32 %v4527_v17, %v8679_v9  ;;  %v2036_v46 = vmul.f32 %v4429_v10, %v8665_v39  ;;  %v4464_v52 = vld [vmem:[%s8635_s17 + $0x14a8] sm:$0xff] }
 0x23e   : >> { %4593 = vst [vmem:[%s8750_s27 + $0x4076] sm:$0x3f] %v2432_v5  ;;  %4627 = vst [vmem:[%s8750_s27 + $0x6075] sm:$0x7f] %v2432_v5  ;;  %v1633_v63 = vmul.f32 %v8639_v54, %v1600_v38  ;;  %v2268_v36 = vadd.f32 %v2236_v44, %v2167_v60  ;;  %v2067_v2 = vadd.f32 %v2035_v28, %v1966_v59  ;;  %v4332_v44 = vld [vmem:[%s8635_s17 + $0x4a8] sm:$0xff] }
 0x23f   : >> { %4661 = vst [vmem:[%s8750_s27 + $0x8074] sm:$0xff] %v2432_v5  ;;  %v1866_v12 = vadd.f32 %v1834_v32, %v1765_v61  ;;  %v1734_v51 = vmul.f32 %v4331_v37, %v8646_v21  ;;  %v2433_v49 = vmax.f32 %v2401_v31, 0.0  ;;  %v2137_v30 = vmul.f32 %v4462_v27, %v8668_v29  ;;  %v4398_v28 = vld [vmem:[%s8635_s17 + $0xca8] sm:$0xff] }
 0x240   : >> { %v1835_v3 = vmul.f32 %v4364_v1, %v8655_v34  ;;  %v1936_v26 = vmul.f32 %v4397_v13, %v8657_v41  ;;  %v2369_v58 = vadd.f32 %v2337_v47, %v2268_v36  ;;  %v2168_v25 = vadd.f32 %v2136_v22, %v2067_v2  ;;  %v4333_v22 = vld [vmem:[%s8635_s17 + $0x4b0] sm:$0xff]  ;;  %v4530_v31 = vld [vmem:[%s8635_s17 + $0x1ca8] sm:$0xff] }
 0x241   : >> { %v1967_v42 = vadd.f32 %v1935_v48, %v1866_v12  ;;  %v1766_v4 = vadd.f32 %v1734_v51, %v1633_v63  ;;  %2468 = vst [vmem:[%s8750_s27 + $0x80] sm:$0xff] %v2433_v49  ;;  %4560 = vst [vmem:[%s8750_s27 + $0x207f] sm:$0xfe] %v2433_v49  ;;  %v2238_v6 = vmul.f32 %v4495_v23, %v8677_v24  ;;  %v4497_v48 = vld [vmem:[%s8635_s17 + $0x18a8] sm:$0xff]  ;;  %v4432_v12 = vld [vmem:[%s8635_s17 + $0x10b0] sm:$0xff] }
 0x242   : >> { %4594 = vst [vmem:[%s8750_s27 + $0x407e] sm:$0xfc] %v2433_v49  ;;  %4628 = vst [vmem:[%s8750_s27 + $0x607d] sm:$0xf8] %v2433_v49  ;;  %v2339_v56 = vmul.f32 %v4528_v16, %v8679_v9  ;;  %v2037_v47 = vmul.f32 %v4430_v15, %v8665_v39  ;;  %v1634_v53 = vmul.f32 %v8639_v54, %v1601_v50  ;;  %v1603_v16 = vld [vmem:[%s8635_s17 + $0xb8] sm:$0xff] }
 0x243   : >> { %4662 = vst [vmem:[%s8750_s27 + $0x807c] sm:$0xf0] %v2433_v49  ;;  %v2402_v20 = vadd.f32 %v8686_v18, %v2369_v58  ;;  %v2269_v45 = vadd.f32 %v2237_v14, %v2168_v25  ;;  %v2068_v33 = vadd.f32 %v2036_v46, %v1967_v42  ;;  %v1867_v57 = vadd.f32 %v1835_v3, %v1766_v4  ;;  %v4366_v14 = vld [vmem:[%s8635_s17 + $0x8b0] sm:$0xff]  ;;  %v4367_v3 = vld [vmem:[%s8635_s17 + $0x8b8] sm:$0xff] }
 0x244   : >> { %v2138_v8 = vmul.f32 %v4463_v7, %v8668_v29  ;;  %v2239_v43 = vmul.f32 %v4496_v62, %v8677_v24  ;;  %v1735_v11 = vmul.f32 %v4332_v44, %v8646_v21  ;;  %v1836_v17 = vmul.f32 %v4365_v40, %v8655_v34  ;;  %v4399_v46 = vld [vmem:[%s8635_s17 + $0xcb0] sm:$0xff] }
 0x245   : >> { %v2434_v32 = vmax.f32 %v2402_v20, 0.0  ;;  %v2370_v10 = vadd.f32 %v2338_v55, %v2269_v45  ;;  %v2169_v38 = vadd.f32 %v2137_v30, %v2068_v33  ;;  %v1968_v5 = vadd.f32 %v1936_v26, %v1867_v57  ;;  %v4334_v30 = vld [vmem:[%s8635_s17 + $0x4b8] sm:$0xff]  ;;  %v4465_v42 = vld [vmem:[%s8635_s17 + $0x14b0] sm:$0xff] }
 0x246   : >> { %v2340_v37 = vmul.f32 %v4529_v0, %v8679_v9  ;;  %v1767_v60 = vadd.f32 %v1735_v11, %v1634_v53  ;;  %v1937_v59 = vmul.f32 %v4398_v28, %v8657_v41  ;;  %v2038_v61 = vmul.f32 %v4431_v35, %v8665_v39  ;;  %v4498_v4 = vld [vmem:[%s8635_s17 + $0x18b0] sm:$0xff]  ;;  %v4433_v57 = vld [vmem:[%s8635_s17 + $0x10b8] sm:$0xff]  ;;  %v1604_v0 = vld [vmem:[%s8635_s17 + $0xc0] sm:$0xff] }
 0x247   : >> { %2469 = vst [vmem:[%s8750_s27 + $0x88] sm:$0xff] %v2434_v32  ;;  %4561 = vst [vmem:[%s8750_s27 + $0x2087] sm:$0xff] %v2434_v32  ;;  %v2403_v27 = vadd.f32 %v8686_v18, %v2370_v10  ;;  %v2270_v1 = vadd.f32 %v2238_v6, %v2169_v38  ;;  %v2069_v13 = vadd.f32 %v2037_v47, %v1968_v5  ;;  %v4531_v20 = vld [vmem:[%s8635_s17 + $0x1cb0] sm:$0xff]  ;;  %v4335_v11 = vld [vmem:[%s8635_s17 + $0x4c0] sm:$0xff] }
 0x248   : >> { %4595 = vst [vmem:[%s8750_s27 + $0x4086] sm:$0xff] %v2434_v32  ;;  %4629 = vst [vmem:[%s8750_s27 + $0x6085] sm:$0xff] %v2434_v32  ;;  %v1635_v55 = vmul.f32 %v8639_v54, %v1602_v19  ;;  %v1868_v23 = vadd.f32 %v1836_v17, %v1767_v60  ;;  %v2139_v63 = vmul.f32 %v4464_v52, %v8668_v29  ;;  %v4466_v38 = vld [vmem:[%s8635_s17 + $0x14b8] sm:$0xff]  ;;  %v4368_v5 = vld [vmem:[%s8635_s17 + $0x8c0] sm:$0xff] }
 0x249   : >> { %4663 = vst [vmem:[%s8750_s27 + $0x8084] sm:$0xff] %v2434_v32  ;;  %v1736_v36 = vmul.f32 %v4333_v22, %v8646_v21  ;;  %v1837_v2 = vmul.f32 %v4366_v14, %v8655_v34  ;;  %v2435_v51 = vmax.f32 %v2403_v27, 0.0  ;;  %v2371_v15 = vadd.f32 %v2339_v56, %v2270_v1  ;;  %v4400_v56 = vld [vmem:[%s8635_s17 + $0xcb8] sm:$0xff]  ;;  %v4401_v52 = vld [vmem:[%s8635_s17 + $0xcc0] sm:$0xff] }
 0x24a   : >> { %v2170_v50 = vadd.f32 %v2138_v8, %v2069_v13  ;;  %v2240_v49 = vmul.f32 %v4497_v48, %v8677_v24  ;;  %v1969_v26 = vadd.f32 %v1937_v59, %v1868_v23  ;;  %v2341_v7 = vmul.f32 %v4530_v31, %v8679_v9  ;;  %v4499_v60 = vld [vmem:[%s8635_s17 + $0x18b8] sm:$0xff]  ;;  %v4434_v31 = vld [vmem:[%s8635_s17 + $0x10c0] sm:$0xff] }
 0x24b   : >> { %v1768_v58 = vadd.f32 %v1736_v36, %v1635_v55  ;;  %v1938_v25 = vmul.f32 %v4399_v46, %v8657_v41  ;;  %2470 = vst [vmem:[%s8750_s27 + $0x90] sm:$0xff] %v2435_v51  ;;  %4562 = vst [vmem:[%s8750_s27 + $0x208f] sm:$0xff] %v2435_v51  ;;  %v2404_v62 = vadd.f32 %v8686_v18, %v2371_v15  ;;  %v4532_v1 = vld [vmem:[%s8635_s17 + $0x1cb8] sm:$0xff]  ;;  %v1605_v55 = vld [vmem:[%s8635_s17 + $0xc8] sm:$0xff] }
 0x24c   : >> { %4596 = vst [vmem:[%s8750_s27 + $0x408e] sm:$0xff] %v2435_v51  ;;  %4630 = vst [vmem:[%s8750_s27 + $0x608d] sm:$0xff] %v2435_v51  ;;  %v2271_v44 = vadd.f32 %v2239_v43, %v2170_v50  ;;  %v2039_v40 = vmul.f32 %v4432_v12, %v8665_v39  ;;  %v1636_v6 = vmul.f32 %v8639_v54, %v1603_v16  ;;  %v4500_v50 = vld [vmem:[%s8635_s17 + $0x18c0] sm:$0xff] }
 0x24d   : >> { %4664 = vst [vmem:[%s8750_s27 + $0x808c] sm:$0xff] %v2435_v51  ;;  %v2070_v47 = vadd.f32 %v2038_v61, %v1969_v26  ;;  %v1869_v53 = vadd.f32 %v1837_v2, %v1768_v58  ;;  %v1737_v45 = vmul.f32 %v4334_v30, %v8646_v21  ;;  %v1838_v33 = vmul.f32 %v4367_v3, %v8655_v34  ;;  %v4467_v2 = vld [vmem:[%s8635_s17 + $0x14c0] sm:$0xff]  ;;  %v4369_v30 = vld [vmem:[%s8635_s17 + $0x8c8] sm:$0xff] }
 0x24e   : >> { %v2436_v28 = vmax.f32 %v2404_v62, 0.0  ;;  %v2372_v35 = vadd.f32 %v2340_v37, %v2271_v44  ;;  %v2140_v8 = vmul.f32 %v4465_v42, %v8668_v29  ;;  %v2241_v43 = vmul.f32 %v4498_v4, %v8677_v24  ;;  %v4533_v44 = vld [vmem:[%s8635_s17 + $0x1cc0] sm:$0xff] }
 0x24f   : >> { %v2171_v17 = vadd.f32 %v2139_v63, %v2070_v47  ;;  %v1970_v19 = vadd.f32 %v1938_v25, %v1869_v53  ;;  %v1769_v32 = vadd.f32 %v1737_v45, %v1636_v6  ;;  %v1939_v10 = vmul.f32 %v4400_v56, %v8657_v41  ;;  %v4435_v6 = vld [vmem:[%s8635_s17 + $0x10c8] sm:$0xff]  ;;  %v1606_v45 = vld [vmem:[%s8635_s17 + $0xd0] sm:$0xff] }
 0x250   : >> { %2471 = vst [vmem:[%s8750_s27 + $0x98] sm:$0xf] %v2436_v28  ;;  %4563 = vst [vmem:[%s8750_s27 + $0x2097] sm:$0x1f] %v2436_v28  ;;  %v2405_v22 = vadd.f32 %v8686_v18, %v2372_v35  ;;  %v2342_v14 = vmul.f32 %v4531_v20, %v8679_v9  ;;  %v2040_v37 = vmul.f32 %v4433_v57, %v8665_v39  ;;  %v4468_v35 = vld [vmem:[%s8635_s17 + $0x14c8] sm:$0xff] }
 0x251   : >> { %4597 = vst [vmem:[%s8750_s27 + $0x4096] sm:$0x3f] %v2436_v28  ;;  %4631 = vst [vmem:[%s8750_s27 + $0x6095] sm:$0x7f] %v2436_v28  ;;  %v1637_v59 = vmul.f32 %v8639_v54, %v1604_v0  ;;  %v2272_v61 = vadd.f32 %v2240_v49, %v2171_v17  ;;  %v2071_v48 = vadd.f32 %v2039_v40, %v1970_v19  ;;  %v4336_v49 = vld [vmem:[%s8635_s17 + $0x4c8] sm:$0xff] }
 0x252   : >> { %4665 = vst [vmem:[%s8750_s27 + $0x8094] sm:$0xff] %v2436_v28  ;;  %v1870_v27 = vadd.f32 %v1838_v33, %v1769_v32  ;;  %v1738_v13 = vmul.f32 %v4335_v11, %v8646_v21  ;;  %v2437_v46 = vmax.f32 %v2405_v22, 0.0  ;;  %v2141_v23 = vmul.f32 %v4466_v38, %v8668_v29  ;;  %v4402_v40 = vld [vmem:[%s8635_s17 + $0xcc8] sm:$0xff] }
 0x253   : >> { %v1839_v63 = vmul.f32 %v4368_v5, %v8655_v34  ;;  %v1940_v36 = vmul.f32 %v4401_v52, %v8657_v41  ;;  %v2373_v12 = vadd.f32 %v2341_v7, %v2272_v61  ;;  %v2172_v16 = vadd.f32 %v2140_v8, %v2071_v48  ;;  %v4337_v8 = vld [vmem:[%s8635_s17 + $0x4d0] sm:$0xff]  ;;  %v4534_v22 = vld [vmem:[%s8635_s17 + $0x1cc8] sm:$0xff] }
 0x254   : >> { %v1971_v51 = vadd.f32 %v1939_v10, %v1870_v27  ;;  %v1770_v15 = vadd.f32 %v1738_v13, %v1637_v59  ;;  %2472 = vst [vmem:[%s8750_s27 + $0xa0] sm:$0xff] %v2437_v46  ;;  %4564 = vst [vmem:[%s8750_s27 + $0x209f] sm:$0xfe] %v2437_v46  ;;  %v2242_v3 = vmul.f32 %v4499_v60, %v8677_v24  ;;  %v4501_v10 = vld [vmem:[%s8635_s17 + $0x18c8] sm:$0xff]  ;;  %v4436_v27 = vld [vmem:[%s8635_s17 + $0x10d0] sm:$0xff] }
 0x255   : >> { %4598 = vst [vmem:[%s8750_s27 + $0x409e] sm:$0xfc] %v2437_v46  ;;  %4632 = vst [vmem:[%s8750_s27 + $0x609d] sm:$0xf8] %v2437_v46  ;;  %v2343_v26 = vmul.f32 %v4532_v1, %v8679_v9  ;;  %v2041_v7 = vmul.f32 %v4434_v31, %v8665_v39  ;;  %v1638_v58 = vmul.f32 %v8639_v54, %v1605_v55  ;;  %v1607_v1 = vld [vmem:[%s8635_s17 + $0xd8] sm:$0xff] }
 0x256   : >> { %4666 = vst [vmem:[%s8750_s27 + $0x809c] sm:$0xf0] %v2437_v46  ;;  %v2406_v25 = vadd.f32 %v8686_v18, %v2373_v12  ;;  %v2273_v42 = vadd.f32 %v2241_v43, %v2172_v16  ;;  %v2072_v4 = vadd.f32 %v2040_v37, %v1971_v51  ;;  %v1871_v62 = vadd.f32 %v1839_v63, %v1770_v15  ;;  %v4370_v43 = vld [vmem:[%s8635_s17 + $0x8d0] sm:$0xff]  ;;  %v4371_v63 = vld [vmem:[%s8635_s17 + $0x8d8] sm:$0xff] }
 0x257   : >> { %v2142_v56 = vmul.f32 %v4467_v2, %v8668_v29  ;;  %v2243_v47 = vmul.f32 %v4500_v50, %v8677_v24  ;;  %v1739_v53 = vmul.f32 %v4336_v49, %v8646_v21  ;;  %v1840_v20 = vmul.f32 %v4369_v30, %v8655_v34  ;;  %v4403_v37 = vld [vmem:[%s8635_s17 + $0xcd0] sm:$0xff] }
 0x258   : >> { %v2438_v33 = vmax.f32 %v2406_v25, 0.0  ;;  %v2374_v57 = vadd.f32 %v2342_v14, %v2273_v42  ;;  %v2173_v0 = vadd.f32 %v2141_v23, %v2072_v4  ;;  %v1972_v28 = vadd.f32 %v1940_v36, %v1871_v62  ;;  %v4338_v23 = vld [vmem:[%s8635_s17 + $0x4d8] sm:$0xff]  ;;  %v4469_v51 = vld [vmem:[%s8635_s17 + $0x14d0] sm:$0xff] }
 0x259   : >> { %v2344_v11 = vmul.f32 %v4533_v44, %v8679_v9  ;;  %v1771_v17 = vadd.f32 %v1739_v53, %v1638_v58  ;;  %v1941_v19 = vmul.f32 %v4402_v40, %v8657_v41  ;;  %v2042_v32 = vmul.f32 %v4435_v6, %v8665_v39  ;;  %v4502_v15 = vld [vmem:[%s8635_s17 + $0x18d0] sm:$0xff]  ;;  %v4437_v62 = vld [vmem:[%s8635_s17 + $0x10d8] sm:$0xff]  ;;  %v1608_v44 = vld [vmem:[%s8635_s17 + $0xe0] sm:$0xff] }
 0x25a   : >> { %2473 = vst [vmem:[%s8750_s27 + $0xa8] sm:$0xff] %v2438_v33  ;;  %4565 = vst [vmem:[%s8750_s27 + $0x20a7] sm:$0xff] %v2438_v33  ;;  %v2407_v38 = vadd.f32 %v8686_v18, %v2374_v57  ;;  %v2274_v5 = vadd.f32 %v2242_v3, %v2173_v0  ;;  %v2073_v52 = vadd.f32 %v2041_v7, %v1972_v28  ;;  %v4535_v25 = vld [vmem:[%s8635_s17 + $0x1cd0] sm:$0xff]  ;;  %v4339_v53 = vld [vmem:[%s8635_s17 + $0x4e0] sm:$0xff] }
 0x25b   : >> { %4599 = vst [vmem:[%s8750_s27 + $0x40a6] sm:$0xff] %v2438_v33  ;;  %4633 = vst [vmem:[%s8750_s27 + $0x60a5] sm:$0xff] %v2438_v33  ;;  %v1639_v14 = vmul.f32 %v8639_v54, %v1606_v45  ;;  %v1872_v60 = vadd.f32 %v1840_v20, %v1771_v17  ;;  %v2143_v59 = vmul.f32 %v4468_v35, %v8668_v29  ;;  %v4470_v0 = vld [vmem:[%s8635_s17 + $0x14d8] sm:$0xff]  ;;  %v4372_v28 = vld [vmem:[%s8635_s17 + $0x8e0] sm:$0xff] }
 0x25c   : >> { %4667 = vst [vmem:[%s8750_s27 + $0x80a4] sm:$0xff] %v2438_v33  ;;  %v1740_v61 = vmul.f32 %v4337_v8, %v8646_v21  ;;  %v1841_v48 = vmul.f32 %v4370_v43, %v8655_v34  ;;  %v2439_v13 = vmax.f32 %v2407_v38, 0.0  ;;  %v2375_v31 = vadd.f32 %v2343_v26, %v2274_v5  ;;  %v4404_v26 = vld [vmem:[%s8635_s17 + $0xcd8] sm:$0xff]  ;;  %v4405_v35 = vld [vmem:[%s8635_s17 + $0xce0] sm:$0xff] }
 0x25d   : >> { %v2174_v55 = vadd.f32 %v2142_v56, %v2073_v52  ;;  %v2244_v46 = vmul.f32 %v4501_v10, %v8677_v24  ;;  %v1973_v36 = vadd.f32 %v1941_v19, %v1872_v60  ;;  %v2345_v2 = vmul.f32 %v4534_v22, %v8679_v9  ;;  %v4503_v38 = vld [vmem:[%s8635_s17 + $0x18d8] sm:$0xff]  ;;  %v4438_v52 = vld [vmem:[%s8635_s17 + $0x10e0] sm:$0xff]  ;;  %v1609_v22 = vld [vmem:[%s8635_s17 + $0xe8] sm:$0xff] }
 0x25e   : >> { %v1772_v12 = vadd.f32 %v1740_v61, %v1639_v14  ;;  %v1942_v16 = vmul.f32 %v4403_v37, %v8657_v41  ;;  %2474 = vst [vmem:[%s8750_s27 + $0xb0] sm:$0xff] %v2439_v13  ;;  %4566 = vst [vmem:[%s8750_s27 + $0x20af] sm:$0xff] %v2439_v13  ;;  %v2408_v50 = vadd.f32 %v8686_v18, %v2375_v31  ;;  %v4536_v60 = vld [vmem:[%s8635_s17 + $0x1cd8] sm:$0xff]  ;;  %v4471_v31 = vld [vmem:[%s8635_s17 + $0x14e0] sm:$0xff] }
 0x25f   : >> { %4600 = vst [vmem:[%s8750_s27 + $0x40ae] sm:$0xff] %v2439_v13  ;;  %4634 = vst [vmem:[%s8750_s27 + $0x60ad] sm:$0xff] %v2439_v13  ;;  %v2275_v49 = vadd.f32 %v2243_v47, %v2174_v55  ;;  %v2043_v30 = vmul.f32 %v4436_v27, %v8665_v39  ;;  %v1640_v3 = vmul.f32 %v8639_v54, %v1607_v1  ;;  %v4340_v55 = vld [vmem:[%s8635_s17 + $0x4e8] sm:$0xff] }
 0x260   : >> { %4668 = vst [vmem:[%s8750_s27 + $0x80ac] sm:$0xff] %v2439_v13  ;;  %v2074_v7 = vadd.f32 %v2042_v32, %v1973_v36  ;;  %v1873_v58 = vadd.f32 %v1841_v48, %v1772_v12  ;;  %v1741_v42 = vmul.f32 %v4338_v23, %v8646_v21  ;;  %v1842_v4 = vmul.f32 %v4371_v63, %v8655_v34 }
 0x261   : >> { %v2440_v40 = vmax.f32 %v2408_v50, 0.0  ;;  %v2376_v6 = vadd.f32 %v2344_v11, %v2275_v49  ;;  %v2144_v56 = vmul.f32 %v4469_v51, %v8668_v29  ;;  %v2245_v47 = vmul.f32 %v4502_v15, %v8677_v24  ;;  %v4504_v15 = vld [vmem:[%s8635_s17 + $0x18e0] sm:$0xff]  ;;  %v4406_v49 = vld [vmem:[%s8635_s17 + $0xce8] sm:$0xff] }
 0x262   : >> { %v2175_v20 = vadd.f32 %v2143_v59, %v2074_v7  ;;  %v1974_v45 = vadd.f32 %v1942_v16, %v1873_v58  ;;  %v1773_v33 = vadd.f32 %v1741_v42, %v1640_v3  ;;  %v1943_v57 = vmul.f32 %v4404_v26, %v8657_v41  ;;  %v4537_v50 = vld [vmem:[%s8635_s17 + $0x1ce0] sm:$0xff]  ;;  %v1610_v58 = vld [vmem:[%s8635_s17 + $0xf0] sm:$0xff] }
 0x263   : >> { %2475 = vst [vmem:[%s8750_s27 + $0xb8] sm:$0xf] %v2440_v40  ;;  %4567 = vst [vmem:[%s8750_s27 + $0x20b7] sm:$0x1f] %v2440_v40  ;;  %v2409_v8 = vadd.f32 %v8686_v18, %v2376_v6  ;;  %v2346_v43 = vmul.f32 %v4535_v25, %v8679_v9  ;;  %v2044_v11 = vmul.f32 %v4437_v62, %v8665_v39  ;;  %v4374_v6 = vld [vmem:[%s8635_s17 + $0x8f0] sm:$0xff] }
 0x264   : >> { %4601 = vst [vmem:[%s8750_s27 + $0x40b6] sm:$0x3f] %v2440_v40  ;;  %4635 = vst [vmem:[%s8750_s27 + $0x60b5] sm:$0x7f] %v2440_v40  ;;  %v1641_v17 = vmul.f32 %v8639_v54, %v1608_v44  ;;  %v2276_v19 = vadd.f32 %v2244_v46, %v2175_v20  ;;  %v2075_v32 = vadd.f32 %v2043_v30, %v1974_v45  ;;  %v4373_v46 = vld [vmem:[%s8635_s17 + $0x8e8] sm:$0xff] }
 0x265   : >> { %4669 = vst [vmem:[%s8750_s27 + $0x80b4] sm:$0xff] %v2440_v40  ;;  %v1874_v10 = vadd.f32 %v1842_v4, %v1773_v33  ;;  %v1742_v5 = vmul.f32 %v4339_v53, %v8646_v21  ;;  %v2441_v14 = vmax.f32 %v2409_v8, 0.0  ;;  %v2145_v37 = vmul.f32 %v4470_v0, %v8668_v29  ;;  %v4439_v44 = vld [vmem:[%s8635_s17 + $0x10e8] sm:$0xff]  ;;  %v4341_v40 = vld [vmem:[%s8635_s17 + $0x4f0] sm:$0xff] }
 0x266   : >> { %v1843_v59 = vmul.f32 %v4372_v28, %v8655_v34  ;;  %v1944_v61 = vmul.f32 %v4405_v35, %v8657_v41  ;;  %v2377_v48 = vadd.f32 %v2345_v2, %v2276_v19  ;;  %v2176_v27 = vadd.f32 %v2144_v56, %v2075_v32  ;;  %v4472_v45 = vld [vmem:[%s8635_s17 + $0x14e8] sm:$0xff]  ;;  %v4407_v8 = vld [vmem:[%s8635_s17 + $0xcf0] sm:$0xff] }
 0x267   : >> { %v1975_v1 = vadd.f32 %v1943_v57, %v1874_v10  ;;  %v1774_v13 = vadd.f32 %v1742_v5, %v1641_v17  ;;  %2476 = vst [vmem:[%s8750_s27 + $0xc0] sm:$0xff] %v2441_v14  ;;  %4568 = vst [vmem:[%s8750_s27 + $0x20bf] sm:$0xfe] %v2441_v14  ;;  %v2246_v23 = vmul.f32 %v4503_v38, %v8677_v24  ;;  %v4505_v28 = vld [vmem:[%s8635_s17 + $0x18e8] sm:$0xff]  ;;  %v4440_v32 = vld [vmem:[%s8635_s17 + $0x10f0] sm:$0xff] }
 0x268   : >> { %4602 = vst [vmem:[%s8750_s27 + $0x40be] sm:$0xfc] %v2441_v14  ;;  %4636 = vst [vmem:[%s8750_s27 + $0x60bd] sm:$0xf8] %v2441_v14  ;;  %v2045_v63 = vmul.f32 %v4438_v52, %v8665_v39  ;;  %v1642_v36 = vmul.f32 %v8639_v54, %v1609_v22  ;;  %v2410_v2 = vadd.f32 %v8686_v18, %v2377_v48  ;;  %v1611_v10 = vld [vmem:[%s8635_s17 + $0xf8] sm:$0xff] }
 0x269   : >> { %4670 = vst [vmem:[%s8750_s27 + $0x80bc] sm:$0xf0] %v2441_v14  ;;  %v2277_v12 = vadd.f32 %v2245_v47, %v2176_v27  ;;  %v2076_v16 = vadd.f32 %v2044_v11, %v1975_v1  ;;  %v1875_v51 = vadd.f32 %v1843_v59, %v1774_v13  ;;  %v2347_v30 = vmul.f32 %v4536_v60, %v8679_v9  ;;  %v4342_v14 = vld [vmem:[%s8635_s17 + $0x4f8] sm:$0xff]  ;;  %v4473_v1 = vld [vmem:[%s8635_s17 + $0x14f0] sm:$0xff] }
 0x26a   : >> { %v2146_v3 = vmul.f32 %v4471_v31, %v8668_v29  ;;  %v1743_v26 = vmul.f32 %v4340_v55, %v8646_v21  ;;  %v1844_v7 = vmul.f32 %v4373_v46, %v8655_v34  ;;  %v2442_v25 = vmax.f32 %v2410_v2, 0.0  ;;  %v4506_v2 = vld [vmem:[%s8635_s17 + $0x18f0] sm:$0xff] }
 0x26b   : >> { %v2378_v42 = vadd.f32 %v2346_v43, %v2277_v12  ;;  %v2177_v4 = vadd.f32 %v2145_v37, %v2076_v16  ;;  %v1976_v62 = vadd.f32 %v1944_v61, %v1875_v51  ;;  %v2247_v56 = vmul.f32 %v4504_v15, %v8677_v24  ;;  %v4375_v37 = vld [vmem:[%s8635_s17 + $0x8f8] sm:$0xff]  ;;  %v4538_v61 = vld [vmem:[%s8635_s17 + $0x1ce8] sm:$0xff] }
 0x26c   : >> { %v2348_v47 = vmul.f32 %v4537_v50, %v8679_v9  ;;  %v1775_v53 = vadd.f32 %v1743_v26, %v1642_v36  ;;  %v1945_v20 = vmul.f32 %v4406_v49, %v8657_v41  ;;  %2477 = vst [vmem:[%s8750_s27 + $0xc8] sm:$0xff] %v2442_v25  ;;  %4569 = vst [vmem:[%s8750_s27 + $0x20c7] sm:$0xff] %v2442_v25  ;;  %v4441_v49 = vld [vmem:[%s8635_s17 + $0x10f8] sm:$0xff]  ;;  %v4539_v26 = vld [vmem:[%s8635_s17 + $0x1cf0] sm:$0xff] }
 0x26d   : >> { %4603 = vst [vmem:[%s8750_s27 + $0x40c6] sm:$0xff] %v2442_v25  ;;  %4637 = vst [vmem:[%s8750_s27 + $0x60c5] sm:$0xff] %v2442_v25  ;;  %v2411_v33 = vadd.f32 %v8686_v18, %v2378_v42  ;;  %v2278_v57 = vadd.f32 %v2246_v23, %v2177_v4  ;;  %v2077_v0 = vadd.f32 %v2045_v63, %v1976_v62  ;;  %v4408_v23 = vld [vmem:[%s8635_s17 + $0xcf8] sm:$0xff] }
 0x26e   : >> { %4671 = vst [vmem:[%s8750_s27 + $0x80c4] sm:$0xff] %v2442_v25  ;;  %v1643_v35 = vmul.f32 %v8639_v54, %v1610_v58  ;;  %v1876_v43 = vadd.f32 %v1844_v7, %v1775_v53  ;;  %v2046_v11 = vmul.f32 %v4439_v44, %v8665_v39  ;;  %v1744_v17 = vmul.f32 %v4341_v40, %v8646_v21  ;;  %v4474_v25 = vld [vmem:[%s8635_s17 + $0x14f8] sm:$0xff] }
 0x26f   : >> { %v1845_v19 = vmul.f32 %v4374_v6, %v8655_v34  ;;  %v2443_v38 = vmax.f32 %v2411_v33, 0.0  ;;  %v2379_v5 = vadd.f32 %v2347_v30, %v2278_v57  ;;  %v2178_v52 = vadd.f32 %v2146_v3, %v2077_v0  ;;  %v4507_v6 = vld [vmem:[%s8635_s17 + $0x18f8] sm:$0xff] }
 0x270   : >> { %v2147_v22 = vmul.f32 %v4472_v45, %v8668_v29  ;;  %v1977_v60 = vadd.f32 %v1945_v20, %v1876_v43  ;;  %v2248_v59 = vmul.f32 %v4505_v28, %v8677_v24  ;;  %v1776_v48 = vadd.f32 %v1744_v17, %v1643_v35 }
 0x271   : >> { %v1946_v27 = vmul.f32 %v4407_v8, %v8657_v41  ;;  %2478 = vst [vmem:[%s8750_s27 + $0xd0] sm:$0xff] %v2443_v38  ;;  %4570 = vst [vmem:[%s8750_s27 + $0x20cf] sm:$0xff] %v2443_v38  ;;  %v2412_v13 = vadd.f32 %v8686_v18, %v2379_v5  ;;  %v2279_v31 = vadd.f32 %v2247_v56, %v2178_v52 }
 0x272   : >> { %4604 = vst [vmem:[%s8750_s27 + $0x40ce] sm:$0xff] %v2443_v38  ;;  %4638 = vst [vmem:[%s8750_s27 + $0x60cd] sm:$0xff] %v2443_v38  ;;  %v2047_v55 = vmul.f32 %v4440_v32, %v8665_v39  ;;  %v1644_v46 = vmul.f32 %v8639_v54, %v1611_v10  ;;  %v2078_v63 = vadd.f32 %v2046_v11, %v1977_v60 }
 0x273   : >> { %4672 = vst [vmem:[%s8750_s27 + $0x80cc] sm:$0xff] %v2443_v38  ;;  %v1877_v36 = vadd.f32 %v1845_v19, %v1776_v48  ;;  %v1745_v12 = vmul.f32 %v4342_v14, %v8646_v21  ;;  %v1846_v16 = vmul.f32 %v4375_v37, %v8655_v34  ;;  %v2444_v51 = vmax.f32 %v2412_v13, 0.0 }
 0x274   : >> { %v2380_v15 = vadd.f32 %v2348_v47, %v2279_v31  ;;  %v2349_v50 = vmul.f32 %v4538_v61, %v8679_v9  ;;  %v2148_v54 = vmul.f32 %v4473_v1, %v8668_v29  ;;  %v2179_v30 = vadd.f32 %v2147_v22, %v2078_v63 }
 0x275   : >> { %v1978_v3 = vadd.f32 %v1946_v27, %v1877_v36  ;;  %v1777_v7 = vadd.f32 %v1745_v12, %v1644_v46  ;;  %v1947_v58 = vmul.f32 %v4408_v23, %v8657_v41  ;;  %2479 = vst [vmem:[%s8750_s27 + $0xd8] sm:$0xf] %v2444_v51  ;;  %4571 = vst [vmem:[%s8750_s27 + $0x20d7] sm:$0x1f] %v2444_v51 }
 0x276   : >> { %4605 = vst [vmem:[%s8750_s27 + $0x40d6] sm:$0x3f] %v2444_v51  ;;  %4639 = vst [vmem:[%s8750_s27 + $0x60d5] sm:$0x7f] %v2444_v51  ;;  %v2413_v21 = vadd.f32 %v8686_v18, %v2380_v15  ;;  %v2249_v34 = vmul.f32 %v4506_v2, %v8677_v24  ;;  %v2280_v42 = vadd.f32 %v2248_v59, %v2179_v30 }
 0x277   : >> { %4673 = vst [vmem:[%s8750_s27 + $0x80d4] sm:$0xff] %v2444_v51  ;;  %v2079_v4 = vadd.f32 %v2047_v55, %v1978_v3  ;;  %v1878_v62 = vadd.f32 %v1846_v16, %v1777_v7  ;;  %v2048_v41 = vmul.f32 %v4441_v49, %v8665_v39  ;;  %v2350_v40 = vmul.f32 %v4539_v26, %v8679_v9  ;;  %v4540_v39 = vld [vmem:[%s8635_s17 + $0x1cf8] sm:$0xff] }
 0x278   : >> { %v2445_v44 = vmax.f32 %v2413_v21, 0.0  ;;  %v2381_v56 = vadd.f32 %v2349_v50, %v2280_v42  ;;  %v2149_v20 = vmul.f32 %v4474_v25, %v8668_v29  ;;  %v2250_v0 = vmul.f32 %v4507_v6, %v8677_v24 }
 0x279   : >> { %v2180_v47 = vadd.f32 %v2148_v54, %v2079_v4  ;;  %v1979_v53 = vadd.f32 %v1947_v58, %v1878_v62  ;;  %v2351_v8 = vmul.f32 %v4540_v39, %v8679_v9 }
 0x27a   : >> { %2480 = vst [vmem:[%s8750_s27 + $0xe0] sm:$0xff] %v2445_v44  ;;  %4572 = vst [vmem:[%s8750_s27 + $0x20df] sm:$0xfe] %v2445_v44  ;;  %v2414_v45 = vadd.f32 %v8686_v18, %v2381_v56 }
 0x27b   : >> { %4606 = vst [vmem:[%s8750_s27 + $0x40de] sm:$0xfc] %v2445_v44  ;;  %4640 = vst [vmem:[%s8750_s27 + $0x60dd] sm:$0xf8] %v2445_v44  ;;  %v2281_v33 = vadd.f32 %v2249_v34, %v2180_v47  ;;  %v2080_v57 = vadd.f32 %v2048_v41, %v1979_v53 }
 0x27c   : >> { %4674 = vst [vmem:[%s8750_s27 + $0x80dc] sm:$0xf0] %v2445_v44  ;;  %v2446_v29 = vmax.f32 %v2414_v45, 0.0 }
 0x27d   : >> { %v2382_v28 = vadd.f32 %v2350_v40, %v2281_v33  ;;  %v2181_v35 = vadd.f32 %v2149_v20, %v2080_v57 }
 0x27e   : >> { %2481 = vst [vmem:[%s8750_s27 + $0xe8] sm:$0xff] %v2446_v29  ;;  %4573 = vst [vmem:[%s8750_s27 + $0x20e7] sm:$0xff] %v2446_v29 }
 0x27f   : >> { %4607 = vst [vmem:[%s8750_s27 + $0x40e6] sm:$0xff] %v2446_v29  ;;  %4641 = vst [vmem:[%s8750_s27 + $0x60e5] sm:$0xff] %v2446_v29  ;;  %v2415_v24 = vadd.f32 %v8686_v18, %v2382_v28  ;;  %v2282_v43 = vadd.f32 %v2250_v0, %v2181_v35 }
 0x280   : >> { %4675 = vst [vmem:[%s8750_s27 + $0x80e4] sm:$0xff] %v2446_v29 }
 0x281   : >> { %v2447_v11 = vmax.f32 %v2415_v24, 0.0  ;;  %v2383_v17 = vadd.f32 %v2351_v8, %v2282_v43 }
 0x283   : >> { %2482 = vst [vmem:[%s8750_s27 + $0xf0] sm:$0xff] %v2447_v11  ;;  %4574 = vst [vmem:[%s8750_s27 + $0x20ef] sm:$0xff] %v2447_v11  ;;  %v2416_v9 = vadd.f32 %v8686_v18, %v2383_v17  ;;  %1573 = sbr.rel (!%p1571_p1) target bundleno = 476 (0x1dc), region = 214 }
 0x284   : >> { %4608 = vst [vmem:[%s8750_s27 + $0x40ee] sm:$0xff] %v2447_v11  ;;  %4642 = vst [vmem:[%s8750_s27 + $0x60ed] sm:$0xff] %v2447_v11 }
 0x285   : >> { %4676 = vst [vmem:[%s8750_s27 + $0x80ec] sm:$0xff] %v2447_v11  ;;  %v2448_v19 = vmax.f32 %v2416_v9, 0.0 }
 0x287   : >> { %2483 = vst [vmem:[%s8750_s27 + $0xf8] sm:$0xf] %v2448_v19  ;;  %4575 = vst [vmem:[%s8750_s27 + $0x20f7] sm:$0x1f] %v2448_v19 }
 0x288   : >> { %4609 = vst [vmem:[%s8750_s27 + $0x40f6] sm:$0x3f] %v2448_v19  ;;  %4643 = vst [vmem:[%s8750_s27 + $0x60f5] sm:$0x7f] %v2448_v19 }
 0x289   : >> { %4677 = vst [vmem:[%s8750_s27 + $0x80f4] sm:$0xff] %v2448_v19 }
 0x28a   :  { %1566 = sbr.rel (!%p1564_p2) target bundleno = 475 (0x1db), region = 225  ;;  %s9374_s28 = sld [smem:[#allocation5]] (%p1564_p2) }
 0x28b   :  { %s9376_s29 = smov (%p1564_p2), 0  }
 0x291 LB: > { %s2627_s10 = smul.u32 7, %s6193_s29  ;;  %v9382_v18 = vmov 0.0   ;;  %v9384_v32 = vmov 0.0   ;;  %v9386_v10 = vmov 0.0   ;;  %v9388_v38 = vmov 0.0   ;;  %s9438_s2 = smov 0   ;;  %s6193_s29 = sphi %s9376_s29, %s2626_s29  }
 0x292   : > { %v9390_v5 = vmov 0.0   ;;  %v9392_v52 = vmov 0.0   ;;  %v9394_v22 = vmov 0.0   ;;  %v9396_v14 = vmov 0.0  }
 0x293   : > { %v9398_v37 = vmov 0.0   ;;  %v9400_v60 = vmov 0.0   ;;  %v9402_v59 = vmov 0.0   ;;  %v9404_v61 = vmov 0.0  }
 0x294   : > { %v9406_v48 = vmov 0.0   ;;  %v9408_v27 = vmov 0.0   ;;  %v9410_v1 = vmov 0.0   ;;  %v9412_v13 = vmov 0.0  }
 0x295   : > { %v9414_v31 = vmov 0.0   ;;  %v9416_v55 = vmov 0.0   ;;  %v9418_v46 = vmov 0.0   ;;  %v9420_v23 = vmov 0.0  }
 0x296   : > { %v9422_v63 = vmov 0.0   ;;  %v9424_v36 = vmov 0.0   ;;  %v9426_v2 = vmov 0.0   ;;  %v9428_v12 = vmov 0.0  }
 0x297   : > { %v9430_v16 = vmov 0.0   ;;  %v9432_v51 = vmov 0.0   ;;  %v9434_v15 = vmov 0.0   ;;  %v9436_v50 = vmov 0.0  }
 0x298 LB: >> { %s9527_s4 = smov 0   ;;  %s6309_s2 = sphi %s9438_s2, %s2633_s2   ;;  %v6305_v50 = vphi %v9436_v50, %v11043_v50   ;;  %v6301_v15 = vphi %v9434_v15, %v11042_v15   ;;  %v6297_v51 = vphi %v9432_v51, %v11041_v51   ;;  %v6293_v16 = vphi %v9430_v16, %v11040_v16   ;;  %v6289_v12 = vphi %v9428_v12, %v11039_v12   ;;  %v6285_v2 = vphi %v9426_v2, %v11038_v2   ;;  %v6281_v36 = vphi %v9424_v36, %v11037_v36   ;;  %v6277_v63 = vphi %v9422_v63, %v11036_v63   ;;  %v6273_v23 = vphi %v9420_v23, %v11035_v23   ;;  %v6269_v46 = vphi %v9418_v46, %v11034_v46   ;;  %v6265_v55 = vphi %v9416_v55, %v11033_v55   ;;  %v6261_v31 = vphi %v9414_v31, %v11032_v31   ;;  %v6257_v13 = vphi %v9412_v13, %v11031_v13   ;;  %v6253_v1 = vphi %v9410_v1, %v11030_v1   ;;  %v6249_v27 = vphi %v9408_v27, %v11029_v27   ;;  %v6245_v48 = vphi %v9406_v48, %v11028_v48   ;;  %v6241_v61 = vphi %v9404_v61, %v11027_v61   ;;  %v6237_v59 = vphi %v9402_v59, %v11026_v59   ;;  %v6233_v60 = vphi %v9400_v60, %v11025_v60   ;;  %v6229_v37 = vphi %v9398_v37, %v11024_v37   ;;  %v6225_v14 = vphi %v9396_v14, %v11023_v14   ;;  %v6221_v22 = vphi %v9394_v22, %v11022_v22   ;;  %v6217_v52 = vphi %v9392_v52, %v11021_v52   ;;  %v6213_v5 = vphi %v9390_v5, %v11020_v5   ;;  %v6209_v38 = vphi %v9388_v38, %v11019_v38   ;;  %v6205_v10 = vphi %v9386_v10, %v11018_v10   ;;  %v6201_v32 = vphi %v9384_v32, %v11017_v32   ;;  %v6197_v18 = vphi %v9382_v18, %v11016_v18  }
 0x299 LB: >>> { %10878 = vst [vmem:[#allocation43_spill] sm:$0xff] %v6313_v18  ;;  %10879 = vst [vmem:[#allocation44_spill] sm:$0xff] %v6317_v32  ;;  %s2697_s6 = smul.u32 25, %s6309_s2  ;;  %s2696_s0 = sadd.s32 %s6425_s4, %s2627_s10  ;;  %s6425_s4 = sphi %s9527_s4, %s2667_s4   ;;  %v6421_v50 = vphi %v6305_v50, %v11014_v50   ;;  %v6417_v15 = vphi %v6301_v15, %v11013_v15   ;;  %v6413_v51 = vphi %v6297_v51, %v11012_v51   ;;  %v6409_v16 = vphi %v6293_v16, %v11011_v16   ;;  %v6405_v12 = vphi %v6289_v12, %v11010_v12   ;;  %v6401_v2 = vphi %v6285_v2, %v11009_v2   ;;  %v6397_v36 = vphi %v6281_v36, %v11008_v36   ;;  %v6393_v63 = vphi %v6277_v63, %v11007_v63   ;;  %v6389_v23 = vphi %v6273_v23, %v11006_v23   ;;  %v6385_v46 = vphi %v6269_v46, %v11005_v46   ;;  %v6381_v55 = vphi %v6265_v55, %v11004_v55   ;;  %v6377_v31 = vphi %v6261_v31, %v11003_v31   ;;  %v6373_v13 = vphi %v6257_v13, %v11002_v13   ;;  %v6369_v1 = vphi %v6253_v1, %v11001_v1   ;;  %v6365_v27 = vphi %v6249_v27, %v11000_v27   ;;  %v6361_v48 = vphi %v6245_v48, %v10999_v48   ;;  %v6357_v61 = vphi %v6241_v61, %v10998_v61   ;;  %v6353_v59 = vphi %v6237_v59, %v10997_v59   ;;  %v6349_v60 = vphi %v6233_v60, %v10996_v60   ;;  %v6345_v37 = vphi %v6229_v37, %v10995_v37   ;;  %v6341_v14 = vphi %v6225_v14, %v10994_v14   ;;  %v6337_v22 = vphi %v6221_v22, %v10993_v22   ;;  %v6333_v52 = vphi %v6217_v52, %v10992_v52   ;;  %v6329_v5 = vphi %v6213_v5, %v10991_v5   ;;  %v6325_v38 = vphi %v6209_v38, %v10990_v38   ;;  %v6321_v10 = vphi %v6205_v10, %v10989_v10   ;;  %v6317_v32 = vphi %v6201_v32, %v10988_v32   ;;  %v6313_v18 = vphi %v6197_v18, %v10987_v18  }
 0x29a   : >>> { %10880 = vst [vmem:[#allocation45_spill] sm:$0xff] %v6321_v10  ;;  %10881 = vst [vmem:[#allocation46_spill] sm:$0xff] %v6325_v38  ;;  %s2698_s11 = smul.u32 5, %s6425_s4  ;;  %s4678_s12 = sshll.u32 %s2696_s0, 5 }
 0x29b   : >>> { %10882 = vst [vmem:[#allocation47_spill] sm:$0xff] %v6329_v5  ;;  %10883 = vst [vmem:[#allocation48_spill] sm:$0xff] %v6333_v52  ;;  %s4679_s30 = sshll.u32 %s6309_s2, 10  ;;  %s2667_s4 = sadd.s32 1, %s6425_s4  }
 0x29c   : >>> { %10884 = vst [vmem:[#allocation49_spill] sm:$0xff] %v6337_v22  ;;  %10885 = vst [vmem:[#allocation50_spill] sm:$0xff] %v6341_v14  ;;  %s9622_s8 = sadd.s32 %s2698_s11, %s2697_s6  ;;  %s2703_s13 = sadd.s32 %s4679_s30, %s4678_s12 }
 0x29d   : >>> { %s2700_s9 = sld [smem:[#allocation13 + %s9622_s8]]  ;;  %s9625_s14 = scalar_lea.vmem [#allocation4], %s2703_s13 }
 0x29e   : >>> { %v2705_v54 = vld [vmem:[%s9625_s14] sm:$0xff]  ;;  %v2706_v49 = vld [vmem:[%s9625_s14 + $0x8] sm:$0xff]  ;;  %v2707_v30 = vld [vmem:[%s9625_s14 + $0x10] sm:$0xff]  ;;  %s2790_s15 = sadd.s32 1, %s9622_s8  ;;  %s2879_s17 = sadd.s32 2, %s9622_s8 }
 0x29f   : >>> { %v2708_v3 = vld [vmem:[%s9625_s14 + $0x18] sm:$0xf]  ;;  %v2709_v26 = vld [vmem:[%s9625_s14 + $0x20] sm:$0xff]  ;;  %v2710_v7 = vld [vmem:[%s9625_s14 + $0x28] sm:$0xff]  ;;  %s9656_s16 = sld [smem:[#allocation13 + %s2790_s15]]  ;;  %s2968_s18 = sadd.s32 3, %s9622_s8 }
 0x2a0   : >>> { %v2711_v58 = vld [vmem:[%s9625_s14 + $0x30] sm:$0xff]  ;;  %v2712_v21 = vld [vmem:[%s9625_s14 + $0x38] sm:$0xf]  ;;  %v2713_v34 = vld [vmem:[%s9625_s14 + $0x40] sm:$0xff]  ;;  %s9773_s19 = sld [smem:[#allocation13 + %s2879_s17]]  ;;  %s3057_s3 = sadd.s32 4, %s9622_s8 }
 0x2a1   : >>> { %v2714_v25 = vld [vmem:[%s9625_s14 + $0x48] sm:$0xff]  ;;  %v2715_v4 = vld [vmem:[%s9625_s14 + $0x50] sm:$0xff]  ;;  %v2716_v62 = vld [vmem:[%s9625_s14 + $0x58] sm:$0xf]  ;;  %s9775_s1 = sld [smem:[#allocation13 + %s2968_s18]]  ;;  %p10234_p3 = scmp.ge.s32.totalorder %s2667_s4, 5  }
 0x2a2   : >>> { %v2717_v41 = vld [vmem:[%s9625_s14 + $0x60] sm:$0xff]  ;;  %v2718_v44 = vld [vmem:[%s9625_s14 + $0x68] sm:$0xff]  ;;  %v2719_v40 = vld [vmem:[%s9625_s14 + $0x70] sm:$0xff]  ;;  %s10031_s20 = sld [smem:[#allocation13 + %s3057_s3]]  ;;  %s2633_s2 = sadd.s32 (%p10234_p3), 1, %s6309_s2  }
 0x2a3   : >>> { %v2733_v42 = vstv %s2700_s9  ;;  %v2720_v6 = vld [vmem:[%s9625_s14 + $0x78] sm:$0xf]  ;;  %v2721_v56 = vld [vmem:[%s9625_s14 + $0x80] sm:$0xff]  ;;  %v2722_v47 = vld [vmem:[%s9625_s14 + $0x88] sm:$0xff]  ;;  %p10327_p4 = scmp.ge.s32.totalorder (%p10234_p3), %s2633_s2, 8  }
 0x2a4   : >>> { %v2723_v53 = vld [vmem:[%s9625_s14 + $0x90] sm:$0xff]  ;;  %v2734_v20 = vmul.f32 %v2733_v42, %v2705_v54  ;;  %v2735_v39 = vmul.f32 %v2733_v42, %v2706_v49  ;;  %v2736_v45 = vmul.f32 %v2733_v42, %v2707_v30  ;;  %v2737_v33 = vmul.f32 %v2733_v42, %v2708_v3  ;;  %v2724_v57 = vld [vmem:[%s9625_s14 + $0x98] sm:$0xf]  ;;  %v2725_v0 = vld [vmem:[%s9625_s14 + $0xa0] sm:$0xff] }
 0x2a5   : >>> { %v2726_v29 = vld [vmem:[%s9625_s14 + $0xa8] sm:$0xff]  ;;  %v2738_v28 = vmul.f32 %v2733_v42, %v2709_v26  ;;  %v2739_v35 = vmul.f32 %v2733_v42, %v2710_v7  ;;  %v2740_v8 = vmul.f32 %v2733_v42, %v2711_v58  ;;  %v2741_v24 = vmul.f32 %v2733_v42, %v2712_v21  ;;  %v2727_v43 = vld [vmem:[%s9625_s14 + $0xb0] sm:$0xff]  ;;  %v2728_v11 = vld [vmem:[%s9625_s14 + $0xb8] sm:$0xf] }
 0x2a6   : >>> { %v2729_v17 = vld [vmem:[%s9625_s14 + $0xc0] sm:$0xff]  ;;  %v2742_v9 = vmul.f32 %v2733_v42, %v2713_v34  ;;  %v2743_v19 = vmul.f32 %v2733_v42, %v2714_v25  ;;  %v2744_v54 = vmul.f32 %v2733_v42, %v2715_v4  ;;  %v2745_v49 = vmul.f32 %v2733_v42, %v2716_v62  ;;  %v2730_v30 = vld [vmem:[%s9625_s14 + $0xc8] sm:$0xff]  ;;  %v2731_v3 = vld [vmem:[%s9625_s14 + $0xd0] sm:$0xff] }
 0x2a7   : >>> { %v2732_v18 = vld [vmem:[%s9625_s14 + $0xd8] sm:$0xf]  ;;  %v2746_v32 = vmul.f32 %v2733_v42, %v2717_v41  ;;  %v2747_v10 = vmul.f32 %v2733_v42, %v2718_v44  ;;  %v2748_v38 = vmul.f32 %v2733_v42, %v2719_v40  ;;  %v2749_v5 = vmul.f32 %v2733_v42, %v2720_v6 }
 0x2a8   : >>> { %v2750_v52 = vmul.f32 %v2733_v42, %v2721_v56  ;;  %v2751_v26 = vmul.f32 %v2733_v42, %v2722_v47  ;;  %v2752_v7 = vmul.f32 %v2733_v42, %v2723_v53  ;;  %v2753_v58 = vmul.f32 %v2733_v42, %v2724_v57  ;;  %v4693_v57 = vld [vmem:[%s9625_s14 + $0x2058] sm:$0xf] }
 0x2a9   : >>> { %v2754_v21 = vmul.f32 %v2733_v42, %v2725_v0  ;;  %v2755_v22 = vmul.f32 %v2733_v42, %v2726_v29  ;;  %v2756_v14 = vmul.f32 %v2733_v42, %v2727_v43  ;;  %v2757_v34 = vmul.f32 %v2733_v42, %v2728_v11  ;;  %v10892_v29 = vld [vmem:[#allocation47_spill] sm:$0xff]  ;;  %v10898_v43 = vld [vmem:[#allocation44_spill] sm:$0xff] }
 0x2aa   : >>> { %v2758_v25 = vmul.f32 %v2733_v42, %v2729_v17  ;;  %v2759_v4 = vmul.f32 %v2733_v42, %v2730_v30  ;;  %v2760_v62 = vmul.f32 %v2733_v42, %v2731_v3  ;;  %v2761_v41 = vmul.f32 %v2733_v42, %v2732_v18  ;;  %v4684_v42 = vld [vmem:[%s9625_s14 + $0x2010] sm:$0xff]  ;;  %v4695_v17 = vld [vmem:[%s9625_s14 + $0x2068] sm:$0xff]  ;;  %v4698_v30 = vld [vmem:[%s9625_s14 + $0x2080] sm:$0xff] }
 0x2ab   : >>> { %v9659_v44 = vadd.f32 %v6421_v50, %v2734_v20  ;;  %v9662_v40 = vadd.f32 %v6417_v15, %v2735_v39  ;;  %v9665_v6 = vadd.f32 %v6413_v51, %v2736_v45  ;;  %v9668_v56 = vadd.f32 %v6409_v16, %v2737_v33  ;;  %v4682_v50 = vld [vmem:[%s9625_s14 + $0x2000] sm:$0xff]  ;;  %v4687_v39 = vld [vmem:[%s9625_s14 + $0x2028] sm:$0xff] }
 0x2ac   : >>> { %v9671_v47 = vadd.f32 %v6405_v12, %v2738_v28  ;;  %v9674_v53 = vadd.f32 %v6401_v2, %v2739_v35  ;;  %v9677_v18 = vadd.f32 %v6397_v36, %v2740_v8  ;;  %v9680_v15 = vadd.f32 %v6393_v63, %v2741_v24  ;;  %v4683_v36 = vld [vmem:[%s9625_s14 + $0x2008] sm:$0xff]  ;;  %v4686_v20 = vld [vmem:[%s9625_s14 + $0x2020] sm:$0xff]  ;;  %v10894_v35 = vld [vmem:[#allocation46_spill] sm:$0xff] }
 0x2ad   : >>> { %v9683_v51 = vadd.f32 %v6389_v23, %v2742_v9  ;;  %v9686_v16 = vadd.f32 %v6385_v46, %v2743_v19  ;;  %v9689_v12 = vadd.f32 %v6381_v55, %v2744_v54  ;;  %v9692_v2 = vadd.f32 %v6377_v31, %v2745_v49  ;;  %v4685_v31 = vld [vmem:[%s9625_s14 + $0x2018] sm:$0xf]  ;;  %v4691_v33 = vld [vmem:[%s9625_s14 + $0x2048] sm:$0xff]  ;;  %v4696_v9 = vld [vmem:[%s9625_s14 + $0x2070] sm:$0xff] }
 0x2ae   : >>> { %v9698_v63 = vadd.f32 %v6373_v13, %v2746_v32  ;;  %v9701_v23 = vadd.f32 %v6369_v1, %v2747_v10  ;;  %v9704_v46 = vadd.f32 %v6365_v27, %v2748_v38  ;;  %v9707_v55 = vadd.f32 %v6361_v48, %v2749_v5  ;;  %v4688_v5 = vld [vmem:[%s9625_s14 + $0x2030] sm:$0xff]  ;;  %v4689_v48 = vld [vmem:[%s9625_s14 + $0x2038] sm:$0xf]  ;;  %v4690_v27 = vld [vmem:[%s9625_s14 + $0x2040] sm:$0xff] }
 0x2af   : >>> { %v9713_v45 = vadd.f32 %v6357_v61, %v2750_v52  ;;  %v9716_v32 = vadd.f32 %v6353_v59, %v2751_v26  ;;  %v9719_v10 = vadd.f32 %v6349_v60, %v2752_v7  ;;  %v9722_v38 = vadd.f32 %v6345_v37, %v2753_v58  ;;  %v10886_v1 = vld [vmem:[#allocation50_spill] sm:$0xff]  ;;  %v10888_v52 = vld [vmem:[#allocation49_spill] sm:$0xff]  ;;  %v10890_v61 = vld [vmem:[#allocation48_spill] sm:$0xff] }
 0x2b0   : >>> { %v9728_v13 = vadd.f32 %v10886_v1, %v2754_v21  ;;  %v9731_v59 = vadd.f32 %v10888_v52, %v2755_v22  ;;  %v9734_v60 = vadd.f32 %v10890_v61, %v2756_v14  ;;  %v4692_v37 = vld [vmem:[%s9625_s14 + $0x2050] sm:$0xff]  ;;  %v2822_v0 = vstv %s9656_s16  ;;  %v10896_v24 = vld [vmem:[#allocation45_spill] sm:$0xff]  ;;  %v4694_v14 = vld [vmem:[%s9625_s14 + $0x2060] sm:$0xff] }
 0x2b1   : >>> { %v9741_v28 = vadd.f32 %v10892_v29, %v2757_v34  ;;  %v9744_v8 = vadd.f32 %v10894_v35, %v2758_v25  ;;  %v9747_v22 = vadd.f32 %v10896_v24, %v2759_v4  ;;  %v9750_v11 = vadd.f32 %v10898_v43, %v2760_v62  ;;  %v10900_v19 = vld [vmem:[#allocation43_spill] sm:$0xff]  ;;  %v4699_v3 = vld [vmem:[%s9625_s14 + $0x2088] sm:$0xff]  ;;  %v4700_v21 = vld [vmem:[%s9625_s14 + $0x2090] sm:$0xff] }
 0x2b2   : >>> { %10887 = vst [vmem:[#allocation50_spill] sm:$0xff] %v9728_v13  ;;  %10889 = vst [vmem:[#allocation49_spill] sm:$0xff] %v9731_v59  ;;  %v9756_v54 = vadd.f32 %v10900_v19, %v2761_v41  ;;  %v4697_v49 = vld [vmem:[%s9625_s14 + $0x2078] sm:$0xf]  ;;  %v2823_v26 = vmul.f32 %v4682_v50, %v2822_v0  ;;  %v2824_v7 = vmul.f32 %v4683_v36, %v2822_v0  ;;  %v4702_v25 = vld [vmem:[%s9625_s14 + $0x20a0] sm:$0xff] }
 0x2b3   : >>> { %10891 = vst [vmem:[#allocation48_spill] sm:$0xff] %v9734_v60  ;;  %10893 = vst [vmem:[#allocation47_spill] sm:$0xff] %v9741_v28  ;;  %v2825_v58 = vmul.f32 %v4684_v42, %v2822_v0  ;;  %v4701_v34 = vld [vmem:[%s9625_s14 + $0x2098] sm:$0xf]  ;;  %v2826_v4 = vmul.f32 %v4685_v31, %v2822_v0  ;;  %v2827_v62 = vmul.f32 %v4686_v20, %v2822_v0  ;;  %v4703_v41 = vld [vmem:[%s9625_s14 + $0x20a8] sm:$0xff] }
 0x2b4   : >>> { %10895 = vst [vmem:[#allocation46_spill] sm:$0xff] %v9744_v8  ;;  %10897 = vst [vmem:[#allocation45_spill] sm:$0xff] %v9747_v22  ;;  %v2828_v1 = vmul.f32 %v4687_v39, %v2822_v0  ;;  %v2829_v52 = vmul.f32 %v4688_v5, %v2822_v0  ;;  %v4704_v61 = vld [vmem:[%s9625_s14 + $0x20b0] sm:$0xff]  ;;  %v4705_v29 = vld [vmem:[%s9625_s14 + $0x20b8] sm:$0xf]  ;;  %v2830_v35 = vmul.f32 %v4689_v48, %v2822_v0 }
 0x2b5   : >>> { %10899 = vst [vmem:[#allocation44_spill] sm:$0xff] %v9750_v11  ;;  %10901 = vst [vmem:[#allocation43_spill] sm:$0xff] %v9756_v54  ;;  %v2831_v50 = vmul.f32 %v4690_v27, %v2822_v0  ;;  %v2832_v36 = vmul.f32 %v4691_v33, %v2822_v0  ;;  %v2833_v24 = vmul.f32 %v4692_v37, %v2822_v0  ;;  %v4706_v42 = vld [vmem:[%s9625_s14 + $0x20c0] sm:$0xff]  ;;  %v4707_v43 = vld [vmem:[%s9625_s14 + $0x20c8] sm:$0xff] }
 0x2b6   : >>> { %v4708_v19 = vld [vmem:[%s9625_s14 + $0x20d0] sm:$0xff]  ;;  %v2834_v54 = vmul.f32 %v4693_v57, %v2822_v0  ;;  %v2835_v11 = vmul.f32 %v4694_v14, %v2822_v0  ;;  %v2836_v22 = vmul.f32 %v4695_v17, %v2822_v0  ;;  %v2837_v31 = vmul.f32 %v4696_v9, %v2822_v0  ;;  %v4709_v20 = vld [vmem:[%s9625_s14 + $0x20d8] sm:$0xf] }
 0x2b7   : >>> { %v2838_v39 = vmul.f32 %v4697_v49, %v2822_v0  ;;  %v2839_v5 = vmul.f32 %v4698_v30, %v2822_v0  ;;  %v2840_v8 = vmul.f32 %v4699_v3, %v2822_v0  ;;  %v2841_v28 = vmul.f32 %v4700_v21, %v2822_v0 }
 0x2b8   : >>> { %v2842_v60 = vmul.f32 %v4701_v34, %v2822_v0  ;;  %v2843_v59 = vmul.f32 %v4702_v25, %v2822_v0  ;;  %v2844_v48 = vmul.f32 %v4703_v41, %v2822_v0  ;;  %v2845_v27 = vmul.f32 %v4704_v61, %v2822_v0  ;;  %v4720_v34 = vld [vmem:[%s9625_s14 + $0x4040] sm:$0xff]  ;;  %v4721_v25 = vld [vmem:[%s9625_s14 + $0x4048] sm:$0xff]  ;;  %v4723_v41 = vld [vmem:[%s9625_s14 + $0x4058] sm:$0xf] }
 0x2b9   : >>> { %v2846_v33 = vmul.f32 %v4705_v29, %v2822_v0  ;;  %v2847_v37 = vmul.f32 %v4706_v42, %v2822_v0  ;;  %v2848_v13 = vmul.f32 %v4707_v43, %v2822_v0  ;;  %v2849_v57 = vmul.f32 %v4708_v19, %v2822_v0  ;;  %v10905_v21 = vld [vmem:[#allocation49_spill] sm:$0xff]  ;;  %v4724_v61 = vld [vmem:[%s9625_s14 + $0x4060] sm:$0xff]  ;;  %v4726_v43 = vld [vmem:[%s9625_s14 + $0x4070] sm:$0xff] }
 0x2ba   : >>> { %v2850_v14 = vmul.f32 %v4709_v20, %v2822_v0  ;;  %v9778_v17 = vadd.f32 %v2823_v26, %v9659_v44  ;;  %v9781_v9 = vadd.f32 %v2824_v7, %v9662_v40  ;;  %v9784_v49 = vadd.f32 %v2825_v58, %v9665_v6  ;;  %v4714_v7 = vld [vmem:[%s9625_s14 + $0x4010] sm:$0xff]  ;;  %v4725_v42 = vld [vmem:[%s9625_s14 + $0x4068] sm:$0xff]  ;;  %v4727_v19 = vld [vmem:[%s9625_s14 + $0x4078] sm:$0xf] }
 0x2bb   : >>> { %v9787_v30 = vadd.f32 %v2826_v4, %v9668_v56  ;;  %v9790_v3 = vadd.f32 %v2827_v62, %v9671_v47  ;;  %v9793_v0 = vadd.f32 %v2828_v1, %v9674_v53  ;;  %v9796_v44 = vadd.f32 %v2829_v52, %v9677_v18  ;;  %v4712_v53 = vld [vmem:[%s9625_s14 + $0x4000] sm:$0xff]  ;;  %v10909_v4 = vld [vmem:[#allocation47_spill] sm:$0xff]  ;;  %v10913_v62 = vld [vmem:[#allocation45_spill] sm:$0xff] }
 0x2bc   : >>> { %v9799_v40 = vadd.f32 %v2830_v35, %v9680_v15  ;;  %v9802_v6 = vadd.f32 %v2831_v50, %v9683_v51  ;;  %v9805_v56 = vadd.f32 %v2832_v36, %v9686_v16  ;;  %v9808_v47 = vadd.f32 %v2833_v24, %v9689_v12  ;;  %v4713_v16 = vld [vmem:[%s9625_s14 + $0x4008] sm:$0xff]  ;;  %v4715_v12 = vld [vmem:[%s9625_s14 + $0x4018] sm:$0xf]  ;;  %v4722_v52 = vld [vmem:[%s9625_s14 + $0x4050] sm:$0xff] }
 0x2bd   : >>> { %v9812_v26 = vadd.f32 %v2834_v54, %v9692_v2  ;;  %v9815_v18 = vadd.f32 %v2835_v11, %v9698_v63  ;;  %v9818_v15 = vadd.f32 %v2836_v22, %v9701_v23  ;;  %v9821_v51 = vadd.f32 %v2837_v31, %v9704_v46  ;;  %v4716_v46 = vld [vmem:[%s9625_s14 + $0x4020] sm:$0xff]  ;;  %v4717_v22 = vld [vmem:[%s9625_s14 + $0x4028] sm:$0xff]  ;;  %v4718_v11 = vld [vmem:[%s9625_s14 + $0x4030] sm:$0xff] }
 0x2be   : >>> { %v9827_v58 = vadd.f32 %v2838_v39, %v9707_v55  ;;  %v9830_v2 = vadd.f32 %v2839_v5, %v9713_v45  ;;  %v9833_v63 = vadd.f32 %v2840_v8, %v9716_v32  ;;  %v9836_v23 = vadd.f32 %v2841_v28, %v9719_v10  ;;  %v10903_v55 = vld [vmem:[#allocation50_spill] sm:$0xff]  ;;  %v10907_v8 = vld [vmem:[#allocation48_spill] sm:$0xff]  ;;  %v4719_v28 = vld [vmem:[%s9625_s14 + $0x4038] sm:$0xf] }
 0x2bf   : >>> { %v9842_v54 = vadd.f32 %v2842_v60, %v9722_v38  ;;  %v9845_v45 = vadd.f32 %v2843_v59, %v10903_v55  ;;  %v9848_v32 = vadd.f32 %v2844_v48, %v10905_v21  ;;  %v9851_v10 = vadd.f32 %v2845_v27, %v10907_v8  ;;  %v10911_v60 = vld [vmem:[#allocation46_spill] sm:$0xff]  ;;  %v10915_v35 = vld [vmem:[#allocation44_spill] sm:$0xff]  ;;  %v10917_v36 = vld [vmem:[#allocation43_spill] sm:$0xff] }
 0x2c0   : >>> { %v9857_v38 = vadd.f32 %v2846_v33, %v10909_v4  ;;  %v9860_v59 = vadd.f32 %v2847_v37, %v10911_v60  ;;  %v9863_v1 = vadd.f32 %v2848_v13, %v10913_v62  ;;  %v2911_v29 = vstv %s9773_s19  ;;  %v4728_v20 = vld [vmem:[%s9625_s14 + $0x4080] sm:$0xff]  ;;  %v4729_v39 = vld [vmem:[%s9625_s14 + $0x4088] sm:$0xff]  ;;  %v4730_v5 = vld [vmem:[%s9625_s14 + $0x4090] sm:$0xff] }
 0x2c1   : >>> { %10902 = vst [vmem:[#allocation51_spill] sm:$0xff] %v9842_v54  ;;  %10904 = vst [vmem:[#allocation50_spill] sm:$0xff] %v9845_v45  ;;  %v9870_v50 = vadd.f32 %v2849_v57, %v10915_v35  ;;  %v9873_v24 = vadd.f32 %v2850_v14, %v10917_v36  ;;  %v2912_v31 = vmul.f32 %v4712_v53, %v2911_v29  ;;  %v9879_v13 = vstv %s9775_s1  ;;  %v4731_v57 = vld [vmem:[%s9625_s14 + $0x4098] sm:$0xf]  ;;  %v4732_v14 = vld [vmem:[%s9625_s14 + $0x40a0] sm:$0xff] }
 0x2c2   : >>> { %10906 = vst [vmem:[#allocation49_spill] sm:$0xff] %v9848_v32  ;;  %10908 = vst [vmem:[#allocation48_spill] sm:$0xff] %v9851_v10  ;;  %v2913_v48 = vmul.f32 %v4713_v16, %v2911_v29  ;;  %v2914_v27 = vmul.f32 %v4714_v7, %v2911_v29  ;;  %v2915_v33 = vmul.f32 %v4715_v12, %v2911_v29  ;;  %v4733_v55 = vld [vmem:[%s9625_s14 + $0x40a8] sm:$0xff]  ;;  %v4734_v60 = vld [vmem:[%s9625_s14 + $0x40b0] sm:$0xff] }
 0x2c3   : >>> { %10910 = vst [vmem:[#allocation47_spill] sm:$0xff] %v9857_v38  ;;  %10912 = vst [vmem:[#allocation46_spill] sm:$0xff] %v9860_v59  ;;  %v2916_v37 = vmul.f32 %v4716_v46, %v2911_v29  ;;  %v2917_v21 = vmul.f32 %v4717_v22, %v2911_v29  ;;  %v2918_v53 = vmul.f32 %v4718_v11, %v2911_v29  ;;  %v4735_v62 = vld [vmem:[%s9625_s14 + $0x40b8] sm:$0xf]  ;;  %v4736_v35 = vld [vmem:[%s9625_s14 + $0x40c0] sm:$0xff] }
 0x2c4   : >>> { %10914 = vst [vmem:[#allocation45_spill] sm:$0xff] %v9863_v1  ;;  %10916 = vst [vmem:[#allocation44_spill] sm:$0xff] %v9870_v50  ;;  %v2919_v8 = vmul.f32 %v4719_v28, %v2911_v29  ;;  %v2920_v4 = vmul.f32 %v4720_v34, %v2911_v29  ;;  %v2921_v36 = vmul.f32 %v4721_v25, %v2911_v29  ;;  %v4737_v7 = vld [vmem:[%s9625_s14 + $0x40c8] sm:$0xff]  ;;  %v4738_v12 = vld [vmem:[%s9625_s14 + $0x40d0] sm:$0xff] }
 0x2c5   : >>> { %10918 = vst [vmem:[#allocation43_spill] sm:$0xff] %v9873_v24  ;;  %10919 = vst [vmem:[#allocation52_spill] sm:$0xff] %v9879_v13  ;;  %v2922_v13 = vmul.f32 %v4722_v52, %v2911_v29  ;;  %v2923_v24 = vmul.f32 %v4723_v41, %v2911_v29  ;;  %v2924_v16 = vmul.f32 %v4724_v61, %v2911_v29  ;;  %v4739_v50 = vld [vmem:[%s9625_s14 + $0x40d8] sm:$0xf] }
 0x2c6   : >>> { %v2925_v46 = vmul.f32 %v4725_v42, %v2911_v29  ;;  %v2926_v1 = vmul.f32 %v4726_v43, %v2911_v29  ;;  %v2927_v59 = vmul.f32 %v4727_v19, %v2911_v29  ;;  %v2928_v38 = vmul.f32 %v4728_v20, %v2911_v29 }
 0x2c7   : >>> { %v2929_v10 = vmul.f32 %v4729_v39, %v2911_v29  ;;  %v2930_v32 = vmul.f32 %v4730_v5, %v2911_v29  ;;  %v2931_v22 = vmul.f32 %v4731_v57, %v2911_v29  ;;  %v2932_v11 = vmul.f32 %v4732_v14, %v2911_v29  ;;  %v4752_v14 = vld [vmem:[%s9625_s14 + $0x6050] sm:$0xff] }
 0x2c8   : >>> { %v2933_v28 = vmul.f32 %v4733_v55, %v2911_v29  ;;  %v2934_v34 = vmul.f32 %v4734_v60, %v2911_v29  ;;  %v2935_v45 = vmul.f32 %v4735_v62, %v2911_v29  ;;  %v2936_v54 = vmul.f32 %v4736_v35, %v2911_v29  ;;  %v4753_v55 = vld [vmem:[%s9625_s14 + $0x6058] sm:$0xf] }
 0x2c9   : >>> { %v2937_v25 = vmul.f32 %v4737_v7, %v2911_v29  ;;  %v2938_v52 = vmul.f32 %v4738_v12, %v2911_v29  ;;  %v2939_v41 = vmul.f32 %v4739_v50, %v2911_v29  ;;  %v9894_v61 = vadd.f32 %v2912_v31, %v9778_v17  ;;  %v4744_v50 = vld [vmem:[%s9625_s14 + $0x6010] sm:$0xff]  ;;  %v4758_v12 = vld [vmem:[%s9625_s14 + $0x6080] sm:$0xff] }
 0x2ca   : >>> { %v9897_v42 = vadd.f32 %v2913_v48, %v9781_v9  ;;  %v9900_v43 = vadd.f32 %v2914_v27, %v9784_v49  ;;  %v9903_v19 = vadd.f32 %v2915_v33, %v9787_v30  ;;  %v9906_v20 = vadd.f32 %v2916_v37, %v9790_v3  ;;  %v4742_v30 = vld [vmem:[%s9625_s14 + $0x6000] sm:$0xff]  ;;  %v4751_v48 = vld [vmem:[%s9625_s14 + $0x6048] sm:$0xff]  ;;  %v10925_v37 = vld [vmem:[#allocation46_spill] sm:$0xff] }
 0x2cb   : >>> { %v9909_v39 = vadd.f32 %v2917_v21, %v9793_v0  ;;  %v9912_v17 = vadd.f32 %v2918_v53, %v9796_v44  ;;  %v9915_v9 = vadd.f32 %v2919_v8, %v9799_v40  ;;  %v9918_v49 = vadd.f32 %v2920_v4, %v9802_v6  ;;  %v4743_v40 = vld [vmem:[%s9625_s14 + $0x6008] sm:$0xff]  ;;  %v4745_v6 = vld [vmem:[%s9625_s14 + $0x6018] sm:$0xf]  ;;  %v4754_v21 = vld [vmem:[%s9625_s14 + $0x6060] sm:$0xff] }
 0x2cc   : >>> { %v9922_v29 = vadd.f32 %v2921_v36, %v9805_v56  ;;  %v9925_v3 = vadd.f32 %v2922_v13, %v9808_v47  ;;  %v9928_v0 = vadd.f32 %v2923_v24, %v9812_v26  ;;  %v9931_v44 = vadd.f32 %v2924_v16, %v9815_v18  ;;  %v4746_v18 = vld [vmem:[%s9625_s14 + $0x6020] sm:$0xff]  ;;  %v4747_v24 = vld [vmem:[%s9625_s14 + $0x6028] sm:$0xff]  ;;  %v4748_v13 = vld [vmem:[%s9625_s14 + $0x6030] sm:$0xff] }
 0x2cd   : >>> { %v9937_v31 = vadd.f32 %v2925_v46, %v9818_v15  ;;  %v9940_v56 = vadd.f32 %v2926_v1, %v9821_v51  ;;  %v9943_v47 = vadd.f32 %v2927_v59, %v9827_v58  ;;  %v9946_v26 = vadd.f32 %v2928_v38, %v9830_v2  ;;  %v10920_v51 = vld [vmem:[#allocation51_spill] sm:$0xff]  ;;  %v10921_v58 = vld [vmem:[#allocation50_spill] sm:$0xff]  ;;  %v4750_v38 = vld [vmem:[%s9625_s14 + $0x6040] sm:$0xff] }
 0x2ce   : >>> { %v9952_v5 = vadd.f32 %v2929_v10, %v9833_v63  ;;  %v9955_v15 = vadd.f32 %v2930_v32, %v9836_v23  ;;  %v9958_v1 = vadd.f32 %v2931_v22, %v10920_v51  ;;  %v9961_v59 = vadd.f32 %v2932_v11, %v10921_v58  ;;  %v4749_v2 = vld [vmem:[%s9625_s14 + $0x6038] sm:$0xf]  ;;  %v10922_v27 = vld [vmem:[#allocation49_spill] sm:$0xff]  ;;  %v10923_v10 = vld [vmem:[#allocation48_spill] sm:$0xff] }
 0x2cf   : >>> { %v9967_v63 = vadd.f32 %v2933_v28, %v10922_v27  ;;  %v9970_v23 = vadd.f32 %v2934_v34, %v10923_v10  ;;  %v10924_v32 = vld [vmem:[#allocation47_spill] sm:$0xff]  ;;  %v9976_v57 = vadd.f32 %v2936_v54, %v10925_v37  ;;  %v10926_v53 = vld [vmem:[#allocation45_spill] sm:$0xff]  ;;  %v10928_v4 = vld [vmem:[#allocation44_spill] sm:$0xff] }
 0x2d0   : >>> { %v9973_v33 = vadd.f32 %v2935_v45, %v10924_v32  ;;  %v9982_v8 = vadd.f32 %v2937_v25, %v10926_v53  ;;  %v9985_v60 = vadd.f32 %v2938_v52, %v10928_v4  ;;  %v10930_v62 = vld [vmem:[#allocation43_spill] sm:$0xff]  ;;  %v4755_v45 = vld [vmem:[%s9625_s14 + $0x6068] sm:$0xff]  ;;  %v4756_v36 = vld [vmem:[%s9625_s14 + $0x6070] sm:$0xff] }
 0x2d1   : >>> { %v9988_v35 = vadd.f32 %v2939_v41, %v10930_v62  ;;  %v4757_v16 = vld [vmem:[%s9625_s14 + $0x6078] sm:$0xf]  ;;  %v10932_v54 = vld [vmem:[#allocation52_spill] sm:$0xff]  ;;  %v4759_v46 = vld [vmem:[%s9625_s14 + $0x6088] sm:$0xff] }
 0x2d2   : >>> { %10927 = vst [vmem:[#allocation51_spill] sm:$0xff] %v9982_v8  ;;  %10929 = vst [vmem:[#allocation50_spill] sm:$0xff] %v9985_v60  ;;  %v3001_v7 = vmul.f32 %v4742_v30, %v10932_v54  ;;  %v4760_v22 = vld [vmem:[%s9625_s14 + $0x6090] sm:$0xff]  ;;  %v3002_v11 = vmul.f32 %v4743_v40, %v10932_v54  ;;  %v3003_v28 = vmul.f32 %v4744_v50, %v10932_v54  ;;  %v4761_v52 = vld [vmem:[%s9625_s14 + $0x6098] sm:$0xf] }
 0x2d3   : >>> { %10931 = vst [vmem:[#allocation49_spill] sm:$0xff] %v9988_v35  ;;  %v3004_v34 = vmul.f32 %v4745_v6, %v10932_v54  ;;  %v3005_v25 = vmul.f32 %v4746_v18, %v10932_v54  ;;  %v4762_v41 = vld [vmem:[%s9625_s14 + $0x60a0] sm:$0xff]  ;;  %v4763_v30 = vld [vmem:[%s9625_s14 + $0x60a8] sm:$0xff]  ;;  %v3006_v51 = vmul.f32 %v4747_v24, %v10932_v54  ;;  %v3007_v58 = vmul.f32 %v4748_v13, %v10932_v54  ;;  %v4764_v50 = vld [vmem:[%s9625_s14 + $0x60b0] sm:$0xff] }
 0x2d4   : >>> { %v3008_v27 = vmul.f32 %v4749_v2, %v10932_v54  ;;  %v3009_v40 = vmul.f32 %v4750_v38, %v10932_v54  ;;  %v4765_v10 = vld [vmem:[%s9625_s14 + $0x60b8] sm:$0xf]  ;;  %v4766_v6 = vld [vmem:[%s9625_s14 + $0x60c0] sm:$0xff]  ;;  %v3010_v32 = vmul.f32 %v4751_v48, %v10932_v54  ;;  %v3011_v18 = vmul.f32 %v4752_v14, %v10932_v54  ;;  %v4767_v4 = vld [vmem:[%s9625_s14 + $0x60c8] sm:$0xff] }
 0x2d5   : >>> { %v3012_v37 = vmul.f32 %v4753_v55, %v10932_v54  ;;  %v3013_v53 = vmul.f32 %v4754_v21, %v10932_v54  ;;  %v4768_v24 = vld [vmem:[%s9625_s14 + $0x60d0] sm:$0xff]  ;;  %v4769_v62 = vld [vmem:[%s9625_s14 + $0x60d8] sm:$0xf]  ;;  %v3014_v13 = vmul.f32 %v4755_v45, %v10932_v54  ;;  %v3015_v2 = vmul.f32 %v4756_v36, %v10932_v54 }
 0x2d6   : >>> { %v3016_v38 = vmul.f32 %v4757_v16, %v10932_v54  ;;  %v3017_v35 = vmul.f32 %v4758_v12, %v10932_v54  ;;  %v3018_v48 = vmul.f32 %v4759_v46, %v10932_v54  ;;  %v3019_v14 = vmul.f32 %v4760_v22, %v10932_v54 }
 0x2d7   : >>> { %v3020_v55 = vmul.f32 %v4761_v52, %v10932_v54  ;;  %v3021_v21 = vmul.f32 %v4762_v41, %v10932_v54  ;;  %v3022_v60 = vmul.f32 %v4763_v30, %v10932_v54  ;;  %v3023_v8 = vmul.f32 %v4764_v50, %v10932_v54 }
 0x2d8   : >>> { %v3024_v45 = vmul.f32 %v4765_v10, %v10932_v54  ;;  %v3025_v36 = vmul.f32 %v4766_v6, %v10932_v54  ;;  %v3026_v16 = vmul.f32 %v4767_v4, %v10932_v54  ;;  %v3027_v12 = vmul.f32 %v4768_v24, %v10932_v54  ;;  %v4789_v4 = vld [vmem:[%s9625_s14 + $0x8088] sm:$0xff]  ;;  %v4790_v24 = vld [vmem:[%s9625_s14 + $0x8090] sm:$0xff] }
 0x2d9   : >>> { %v3028_v46 = vmul.f32 %v4769_v62, %v10932_v54  ;;  %v10037_v22 = vadd.f32 %v3001_v7, %v9894_v61  ;;  %v10040_v52 = vadd.f32 %v3002_v11, %v9897_v42  ;;  %v10043_v41 = vadd.f32 %v3003_v28, %v9900_v43  ;;  %v4772_v54 = vld [vmem:[%s9625_s14 + $0x8000] sm:$0xff]  ;;  %v4774_v7 = vld [vmem:[%s9625_s14 + $0x8010] sm:$0xff]  ;;  %v4777_v28 = vld [vmem:[%s9625_s14 + $0x8028] sm:$0xff] }
 0x2da   : >>> { %v10046_v30 = vadd.f32 %v3004_v34, %v9903_v19  ;;  %v10049_v50 = vadd.f32 %v3005_v25, %v9906_v20  ;;  %v10052_v10 = vadd.f32 %v3006_v51, %v9909_v39  ;;  %v10055_v61 = vadd.f32 %v3007_v58, %v9912_v17  ;;  %v4778_v34 = vld [vmem:[%s9625_s14 + $0x8030] sm:$0xff]  ;;  %v4781_v51 = vld [vmem:[%s9625_s14 + $0x8048] sm:$0xff]  ;;  %v10941_v6 = vld [vmem:[#allocation51_spill] sm:$0xff] }
 0x2db   : >>> { %v10058_v42 = vadd.f32 %v3008_v27, %v9915_v9  ;;  %v10061_v43 = vadd.f32 %v3009_v40, %v9918_v49  ;;  %v10064_v19 = vadd.f32 %v3010_v32, %v9922_v29  ;;  %v10067_v20 = vadd.f32 %v3011_v18, %v9925_v3  ;;  %v4773_v9 = vld [vmem:[%s9625_s14 + $0x8008] sm:$0xff]  ;;  %v4775_v49 = vld [vmem:[%s9625_s14 + $0x8018] sm:$0xf]  ;;  %v4782_v58 = vld [vmem:[%s9625_s14 + $0x8050] sm:$0xff] }
 0x2dc   : >>> { %v10070_v39 = vadd.f32 %v3012_v37, %v9928_v0  ;;  %v10073_v17 = vadd.f32 %v3013_v53, %v9931_v44  ;;  %v10080_v11 = vadd.f32 %v3014_v13, %v9937_v31  ;;  %v10083_v29 = vadd.f32 %v3015_v2, %v9940_v56  ;;  %v4776_v44 = vld [vmem:[%s9625_s14 + $0x8020] sm:$0xff]  ;;  %v4783_v27 = vld [vmem:[%s9625_s14 + $0x8058] sm:$0xf]  ;;  %v4786_v18 = vld [vmem:[%s9625_s14 + $0x8070] sm:$0xff] }
 0x2dd   : >>> { %v10086_v3 = vadd.f32 %v3016_v38, %v9943_v47  ;;  %v10089_v0 = vadd.f32 %v3017_v35, %v9946_v26  ;;  %v10095_v25 = vadd.f32 %v3018_v48, %v9952_v5  ;;  %v10098_v31 = vadd.f32 %v3019_v14, %v9955_v15  ;;  %v4779_v26 = vld [vmem:[%s9625_s14 + $0x8038] sm:$0xf]  ;;  %v4780_v35 = vld [vmem:[%s9625_s14 + $0x8040] sm:$0xff] }
 0x2de   : >>> { %v10101_v56 = vadd.f32 %v3020_v55, %v9958_v1  ;;  %v10104_v47 = vadd.f32 %v3021_v21, %v9961_v59  ;;  %v10110_v5 = vadd.f32 %v3022_v60, %v9967_v63  ;;  %v10113_v15 = vadd.f32 %v3023_v8, %v9970_v23  ;;  %v4784_v40 = vld [vmem:[%s9625_s14 + $0x8060] sm:$0xff]  ;;  %v10943_v63 = vld [vmem:[#allocation50_spill] sm:$0xff]  ;;  %v10945_v23 = vld [vmem:[#allocation49_spill] sm:$0xff] }
 0x2df   : >>> { %10933 = vst [vmem:[#allocation48_spill] sm:$0xff] %v10095_v25  ;;  %10934 = vst [vmem:[#allocation47_spill] sm:$0xff] %v10098_v31  ;;  %v10116_v1 = vadd.f32 %v3024_v45, %v9973_v33  ;;  %v10119_v59 = vadd.f32 %v3025_v36, %v9976_v57  ;;  %v10125_v32 = vadd.f32 %v3026_v16, %v10941_v6  ;;  %v4785_v33 = vld [vmem:[%s9625_s14 + $0x8068] sm:$0xff]  ;;  %v4787_v37 = vld [vmem:[%s9625_s14 + $0x8078] sm:$0xf]  ;;  %v3089_v57 = vstv %s10031_s20 }
 0x2e0   : >>> { %10935 = vst [vmem:[#allocation46_spill] sm:$0xff] %v10101_v56  ;;  %10936 = vst [vmem:[#allocation45_spill] sm:$0xff] %v10104_v47  ;;  %v10128_v60 = vadd.f32 %v3027_v12, %v10943_v63  ;;  %v10131_v8 = vadd.f32 %v3028_v46, %v10945_v23  ;;  %v4788_v53 = vld [vmem:[%s9625_s14 + $0x8080] sm:$0xff]  ;;  %v3090_v62 = vmul.f32 %v4772_v54, %v3089_v57  ;;  %v4791_v48 = vld [vmem:[%s9625_s14 + $0x8098] sm:$0xf] }
 0x2e1   : >>> { %10937 = vst [vmem:[#allocation44_spill] sm:$0xff] %v10110_v5  ;;  %10938 = vst [vmem:[#allocation43_spill] sm:$0xff] %v10113_v15  ;;  %v3091_v13 = vmul.f32 %v4773_v9, %v3089_v57  ;;  %v3092_v2 = vmul.f32 %v4774_v7, %v3089_v57  ;;  %v3093_v38 = vmul.f32 %v4775_v49, %v3089_v57  ;;  %v4792_v14 = vld [vmem:[%s9625_s14 + $0x80a0] sm:$0xff]  ;;  %v4793_v55 = vld [vmem:[%s9625_s14 + $0x80a8] sm:$0xff] }
 0x2e2   : >>> { %10939 = vst [vmem:[#allocation52_spill] sm:$0xff] %v10116_v1  ;;  %10940 = vst [vmem:[#allocation53_spill] sm:$0xff] %v10119_v59  ;;  %v3094_v21 = vmul.f32 %v4776_v44, %v3089_v57  ;;  %v3095_v45 = vmul.f32 %v4777_v28, %v3089_v57  ;;  %v3096_v36 = vmul.f32 %v4778_v34, %v3089_v57  ;;  %v4794_v12 = vld [vmem:[%s9625_s14 + $0x80b0] sm:$0xff]  ;;  %v4795_v46 = vld [vmem:[%s9625_s14 + $0x80b8] sm:$0xf] }
 0x2e3   : >>> { %10942 = vst [vmem:[#allocation51_spill] sm:$0xff] %v10125_v32  ;;  %10944 = vst [vmem:[#allocation50_spill] sm:$0xff] %v10128_v60  ;;  %v3097_v16 = vmul.f32 %v4779_v26, %v3089_v57  ;;  %v4796_v6 = vld [vmem:[%s9625_s14 + $0x80c0] sm:$0xff]  ;;  %v3098_v63 = vmul.f32 %v4780_v35, %v3089_v57  ;;  %v3099_v23 = vmul.f32 %v4781_v51, %v3089_v57  ;;  %v4797_v9 = vld [vmem:[%s9625_s14 + $0x80c8] sm:$0xff] }
 0x2e4   : >>> { %10946 = vst [vmem:[#allocation49_spill] sm:$0xff] %v10131_v8  ;;  %v3100_v8 = vmul.f32 %v4782_v58, %v3089_v57  ;;  %v3101_v54 = vmul.f32 %v4783_v27, %v3089_v57  ;;  %v4798_v7 = vld [vmem:[%s9625_s14 + $0x80d0] sm:$0xff]  ;;  %v4799_v60 = vld [vmem:[%s9625_s14 + $0x80d8] sm:$0xf]  ;;  %v3102_v49 = vmul.f32 %v4784_v40, %v3089_v57  ;;  %v3103_v32 = vmul.f32 %v4785_v33, %v3089_v57 }
 0x2e5   : >>> { %v3104_v59 = vmul.f32 %v4786_v18, %v3089_v57  ;;  %v3105_v1 = vmul.f32 %v4787_v37, %v3089_v57  ;;  %v3106_v15 = vmul.f32 %v4788_v53, %v3089_v57  ;;  %v3107_v5 = vmul.f32 %v4789_v4, %v3089_v57 }
 0x2e6   : >>> { %v3108_v44 = vmul.f32 %v4790_v24, %v3089_v57  ;;  %v3109_v28 = vmul.f32 %v4791_v48, %v3089_v57  ;;  %v3110_v34 = vmul.f32 %v4792_v14, %v3089_v57  ;;  %v3111_v26 = vmul.f32 %v4793_v55, %v3089_v57 }
 0x2e7   : >>> { %v3112_v47 = vmul.f32 %v4794_v12, %v3089_v57  ;;  %v3113_v56 = vmul.f32 %v4795_v46, %v3089_v57  ;;  %v3114_v31 = vmul.f32 %v4796_v6, %v3089_v57  ;;  %v3115_v35 = vmul.f32 %v4797_v9, %v3089_v57 }
 0x2e8   : >>> { %v3116_v51 = vmul.f32 %v4798_v7, %v3089_v57  ;;  %v3117_v58 = vmul.f32 %v4799_v60, %v3089_v57  ;;  %v10150_v27 = vadd.f32 %v3090_v62, %v10037_v22   ;;  %v10153_v40 = vadd.f32 %v3091_v13, %v10040_v52  }
 0x2e9   : >>> { %v10156_v33 = vadd.f32 %v3092_v2, %v10043_v41   ;;  %v10159_v18 = vadd.f32 %v3093_v38, %v10046_v30   ;;  %v10162_v12 = vadd.f32 %v3094_v21, %v10049_v50   ;;  %v10165_v2 = vadd.f32 %v3095_v45, %v10052_v10  }
 0x2ea   : >>> { %10947 = vst [vmem:[#allocation54_spill] sm:$0xff] %v10150_v27  ;;  %10948 = vst [vmem:[#allocation55_spill] sm:$0xff] %v10153_v40  ;;  %v10168_v36 = vadd.f32 %v3096_v36, %v10055_v61   ;;  %v10171_v22 = vadd.f32 %v3097_v16, %v10058_v42   ;;  %v10174_v52 = vadd.f32 %v3098_v63, %v10061_v43  }
 0x2eb   : >>> { %10949 = vst [vmem:[#allocation56_spill] sm:$0xff] %v10156_v33  ;;  %v10950_v53 = vmov %v10159_v18  ;;  %v10951_v4 = vmov %v10162_v12  ;;  %v10952_v24 = vmov %v10165_v2  ;;  %v10177_v46 = vadd.f32 %v3099_v23, %v10064_v19  }
 0x2ec   : >>> { %v10953_v57 = vmov %v10168_v36  ;;  %v10954_v62 = vmov %v10171_v22  ;;  %v10955_v6 = vmov %v10174_v52  ;;  %v10180_v55 = vadd.f32 %v3100_v8, %v10067_v20  }
 0x2ed   : >>> { %v10956_v41 = vmov %v10177_v46  ;;  %v10183_v50 = vadd.f32 %v3101_v54, %v10070_v39   ;;  %v10186_v13 = vadd.f32 %v3102_v49, %v10073_v17   ;;  %v10189_v10 = vadd.f32 %v3103_v32, %v10080_v11   ;;  %v10966_v39 = vld [vmem:[#allocation47_spill] sm:$0xff]  ;;  %v10968_v17 = vld [vmem:[#allocation46_spill] sm:$0xff]  ;;  %v10970_v11 = vld [vmem:[#allocation45_spill] sm:$0xff] }
 0x2ee   : >>> { %v10957_v30 = vmov %v10180_v55  ;;  %v10192_v27 = vadd.f32 %v3104_v59, %v10083_v29   ;;  %v10195_v48 = vadd.f32 %v3105_v1, %v10086_v3   ;;  %v10198_v61 = vadd.f32 %v3106_v15, %v10089_v0   ;;  %v10972_v29 = vld [vmem:[#allocation44_spill] sm:$0xff]  ;;  %v10974_v3 = vld [vmem:[#allocation43_spill] sm:$0xff]  ;;  %v10982_v1 = vld [vmem:[#allocation50_spill] sm:$0xff] }
 0x2ef   : >>> { %v10958_v21 = vmov %v10183_v50  ;;  %v10959_v45 = vmov %v10186_v13  ;;  %v10960_v9 = vmov %v10189_v10  ;;  %v10964_v20 = vmov %v10095_v25  ;;  %v10976_v0 = vld [vmem:[#allocation52_spill] sm:$0xff]  ;;  %v10980_v15 = vld [vmem:[#allocation51_spill] sm:$0xff] }
 0x2f0   : >>> { %v10961_v42 = vmov %v10192_v27  ;;  %v10962_v43 = vmov %v10195_v48  ;;  %v10963_v19 = vmov %v10198_v61  ;;  %v10201_v59 = vadd.f32 %v3107_v5, %v10964_v20   ;;  %v10978_v61 = vld [vmem:[#allocation53_spill] sm:$0xff] }
 0x2f1   : >>> { %v10204_v60 = vadd.f32 %v3108_v44, %v10966_v39   ;;  %v10207_v37 = vadd.f32 %v3109_v28, %v10968_v17   ;;  %v10210_v14 = vadd.f32 %v3110_v34, %v10970_v11   ;;  %v10213_v22 = vadd.f32 %v3111_v26, %v10972_v29   ;;  %v11014_v50 = vld [vmem:[#allocation54_spill] sm:$0xff] }
 0x2f2   : >>> { %v10965_v8 = vmov %v10201_v59  ;;  %v10216_v52 = vadd.f32 %v3112_v47, %v10974_v3   ;;  %v10219_v5 = vadd.f32 %v3113_v56, %v10976_v0   ;;  %v10222_v38 = vadd.f32 %v3114_v31, %v10978_v61   ;;  %v10984_v59 = vld [vmem:[#allocation49_spill] sm:$0xff]  ;;  %v11043_v50 = vld [vmem:[#allocation54_spill] sm:$0xff] (%p10234_p3) }
 0x2f3   : >>> { %v10967_v54 = vmov %v10204_v60  ;;  %v10969_v7 = vmov %v10207_v37  ;;  %v10971_v49 = vmov %v10210_v14  ;;  %v10973_v25 = vmov %v10213_v22 }
 0x2f4   : >>> { %v10975_v40 = vmov %v10216_v52  ;;  %v10977_v33 = vmov %v10219_v5  ;;  %v10979_v20 = vmov %v10222_v38  ;;  %v10225_v10 = vadd.f32 %v3115_v35, %v10980_v15   ;;  %v11013_v15 = vld [vmem:[#allocation55_spill] sm:$0xff] }
 0x2f5   : >>> { %v10228_v32 = vadd.f32 %v3116_v51, %v10982_v1   ;;  %v10231_v18 = vadd.f32 %v3117_v58, %v10984_v59   ;;  %v10990_v38 = vmov %v10979_v20  ;;  %v10991_v5 = vmov %v10977_v33  ;;  %v11012_v51 = vld [vmem:[#allocation56_spill] sm:$0xff]  ;;  %v11042_v15 = vld [vmem:[#allocation55_spill] sm:$0xff] (%p10234_p3) }
 0x2f6   : >>> { %v10981_v44 = vmov %v10225_v10  ;;  %v10992_v52 = vmov %v10975_v40  ;;  %v10993_v22 = vmov %v10973_v25  ;;  %v10994_v14 = vmov %v10971_v49  ;;  %2666 = sbr.rel (!%p10234_p3) target bundleno = 665 (0x299), region = 236  ;;  %v11041_v51 = vld [vmem:[#allocation56_spill] sm:$0xff] (%p10234_p3) }
 0x2f7   : >>> { %v10983_v28 = vmov %v10228_v32  ;;  %v10985_v34 = vmov %v10231_v18  ;;  %v10989_v10 = vmov %v10981_v44  ;;  %v10995_v37 = vmov %v10969_v7 }
 0x2f8   : >>> { %v10987_v18 = vmov %v10985_v34  ;;  %v10988_v32 = vmov %v10983_v28  ;;  %v10996_v60 = vmov %v10967_v54  ;;  %v10997_v59 = vmov %v10965_v8 }
 0x2f9   : >>> { %v10998_v61 = vmov %v10963_v19  ;;  %v10999_v48 = vmov %v10962_v43  ;;  %v11000_v27 = vmov %v10961_v42  ;;  %v11001_v1 = vmov %v10960_v9 }
 0x2fa   : >>> { %v11002_v13 = vmov %v10959_v45  ;;  %v11003_v31 = vmov %v10958_v21  ;;  %v11004_v55 = vmov %v10957_v30  ;;  %v11005_v46 = vmov %v10956_v41 }
 0x2fb   : >>> { %v11006_v23 = vmov %v10955_v6  ;;  %v11007_v63 = vmov %v10954_v62  ;;  %v11008_v36 = vmov %v10953_v57  ;;  %v11009_v2 = vmov %v10952_v24 }
 0x2fc   : >>> { %v11010_v12 = vmov %v10951_v4  ;;  %v11011_v16 = vmov %v10950_v53  ;;  %v11016_v18 = vmov (%p10234_p3), %v10985_v34  ;;  %v11017_v32 = vmov (%p10234_p3), %v10983_v28 }
 0x2fd   : >> { %v11018_v10 = vmov %v10981_v44  ;;  %v11019_v38 = vmov %v10979_v20  ;;  %v11020_v5 = vmov %v10977_v33  ;;  %v11021_v52 = vmov %v10975_v40  ;;  %2632 = sbr.rel (!%p10327_p4) target bundleno = 664 (0x298), region = 247  ;;  %v11044_v47 = vld [vmem:[#allocation54_spill] sm:$0xff] (%p10327_p4)  ;;  %v11045_v35 = vld [vmem:[#allocation55_spill] sm:$0xff] (%p10327_p4)  ;;  %v11046_v39 = vld [vmem:[#allocation56_spill] sm:$0xff] (%p10327_p4) }
 0x2fe   : >> { %v11022_v22 = vmov %v10973_v25  ;;  %v11023_v14 = vmov %v10971_v49  ;;  %v11024_v37 = vmov %v10969_v7  ;;  %v11025_v60 = vmov %v10967_v54  ;;  %s4800_s23 = smul.u32 (%p10327_p4), 224, %s6193_s29  ;;  %s2626_s29 = sadd.s32 (%p10327_p4), 1, %s6193_s29  }
 0x2ff   : >> { %v11026_v59 = vmov %v10965_v8  ;;  %v11027_v61 = vmov %v10963_v19  ;;  %v11028_v48 = vmov %v10962_v43  ;;  %v11029_v27 = vmov %v10961_v42  ;;  %p2623_p5 = scmp.ge.s32.totalorder (%p10327_p4), %s2626_s29, 4  }
 0x300   : >> { %v11030_v1 = vmov %v10960_v9  ;;  %v11031_v13 = vmov %v10959_v45  ;;  %v11032_v31 = vmov %v10958_v21  ;;  %v11033_v55 = vmov %v10957_v30  ;;  %s10434_s25 = scalar_lea.vmem (%p10327_p4), %s10522_s7, %s4800_s23 }
 0x301   : >> { %v11034_v46 = vmov %v10956_v41  ;;  %v11035_v23 = vmov %v10955_v6  ;;  %v11036_v63 = vmov %v10954_v62  ;;  %v11037_v36 = vmov %v10953_v57 }
 0x302   : >> { %v11038_v2 = vmov %v10952_v24  ;;  %v11039_v12 = vmov %v10951_v4  ;;  %v11040_v16 = vmov %v10950_v53  ;;  %v10420_v56 = vstv (%p10327_p4), %s9374_s28 }
 0x303   : > { %v3147_v26 = vadd.f32 (%p10327_p4), %v10420_v56, %v11044_v47  ;;  %v3148_v58 = vadd.f32 (%p10327_p4), %v10420_v56, %v11045_v35  ;;  %v3149_v17 = vadd.f32 (%p10327_p4), %v10420_v56, %v11046_v39  ;;  %v3150_v50 = vadd.f32 (%p10327_p4), %v10420_v56, %v10950_v53 }
 0x304   : > { %v3151_v31 = vadd.f32 %v10420_v56, %v10951_v4  ;;  %v3152_v5 = vadd.f32 %v10420_v56, %v10952_v24  ;;  %v3153_v32 = vadd.f32 %v10420_v56, %v10953_v57  ;;  %v3154_v60 = vadd.f32 %v10420_v56, %v10954_v62 }
 0x305   : > { %v3175_v37 = vmax.f32 %v3147_v26, 0.0  ;;  %v3176_v13 = vmax.f32 %v3148_v58, 0.0  ;;  %v3177_v2 = vmax.f32 %v3149_v17, 0.0  ;;  %v3178_v38 = vmax.f32 %v3150_v50, 0.0 }
 0x306   : > { %v3179_v48 = vmax.f32 %v3151_v31, 0.0  ;;  %v3180_v14 = vmax.f32 %v3152_v5, 0.0  ;;  %v3181_v55 = vmax.f32 %v3153_v32, 0.0  ;;  %v3182_v36 = vmax.f32 %v3154_v60, 0.0 }
 0x307   : > { %3205 = vst [vmem:[%s10434_s25] sm:$0xff] %v3175_v37  ;;  %3206 = vst [vmem:[%s10434_s25 + $0x8] sm:$0xff] %v3176_v13  ;;  %v3155_v16 = vadd.f32 %v10420_v56, %v10955_v6  ;;  %v3156_v12 = vadd.f32 %v10420_v56, %v10956_v41  ;;  %v3157_v46 = vadd.f32 %v10420_v56, %v10957_v30 }
 0x308   : > { %3207 = vst [vmem:[%s10434_s25 + $0x10] sm:$0xff] %v3177_v2  ;;  %3208 = vst [vmem:[%s10434_s25 + $0x18] sm:$0xf] %v3178_v38  ;;  %v3158_v63 = vadd.f32 %v10420_v56, %v10958_v21  ;;  %v3159_v23 = vadd.f32 %v10420_v56, %v10959_v45  ;;  %v3160_v51 = vadd.f32 %v10420_v56, %v10960_v9 }
 0x309   : > { %3209 = vst [vmem:[%s10434_s25 + $0x20] sm:$0xff] %v3179_v48  ;;  %3210 = vst [vmem:[%s10434_s25 + $0x28] sm:$0xff] %v3180_v14  ;;  %v3161_v27 = vadd.f32 %v10420_v56, %v10961_v42  ;;  %v3162_v18 = vadd.f32 %v10420_v56, %v10962_v43  ;;  %v3183_v53 = vmax.f32 %v3155_v16, 0.0  ;;  %v3184_v4 = vmax.f32 %v3156_v12, 0.0 }
 0x30a   : > { %3211 = vst [vmem:[%s10434_s25 + $0x30] sm:$0xff] %v3181_v55  ;;  %3212 = vst [vmem:[%s10434_s25 + $0x38] sm:$0xf] %v3182_v36  ;;  %v3185_v24 = vmax.f32 %v3157_v46, 0.0  ;;  %v3186_v57 = vmax.f32 %v3158_v63, 0.0  ;;  %v3187_v22 = vmax.f32 %v3159_v23, 0.0  ;;  %v3163_v41 = vadd.f32 %v10420_v56, %v10963_v19 }
 0x30b   : > { %v3188_v62 = vmax.f32 %v3160_v51, 0.0  ;;  %v3189_v52 = vmax.f32 %v3161_v27, 0.0  ;;  %v3190_v6 = vmax.f32 %v3162_v18, 0.0  ;;  %3213 = vst [vmem:[%s10434_s25 + $0x40] sm:$0xff] %v3183_v53  ;;  %3214 = vst [vmem:[%s10434_s25 + $0x48] sm:$0xff] %v3184_v4  ;;  %v3164_v30 = vadd.f32 %v10420_v56, %v10965_v8 }
 0x30c   : > { %3215 = vst [vmem:[%s10434_s25 + $0x50] sm:$0xff] %v3185_v24  ;;  %3216 = vst [vmem:[%s10434_s25 + $0x58] sm:$0xf] %v3186_v57  ;;  %v3165_v21 = vadd.f32 %v10420_v56, %v10967_v54  ;;  %v3166_v45 = vadd.f32 %v10420_v56, %v10969_v7  ;;  %v3167_v10 = vadd.f32 %v10420_v56, %v10971_v49  ;;  %v3191_v19 = vmax.f32 %v3163_v41, 0.0 }
 0x30d   : > { %3217 = vst [vmem:[%s10434_s25 + $0x60] sm:$0xff] %v3187_v22  ;;  %3218 = vst [vmem:[%s10434_s25 + $0x68] sm:$0xff] %v3188_v62  ;;  %v3168_v9 = vadd.f32 %v10420_v56, %v10973_v25  ;;  %v3169_v42 = vadd.f32 %v10420_v56, %v10975_v40  ;;  %v3170_v43 = vadd.f32 %v10420_v56, %v10977_v33  ;;  %v3192_v8 = vmax.f32 %v3164_v30, 0.0 }
 0x30e   : > { %3219 = vst [vmem:[%s10434_s25 + $0x70] sm:$0xff] %v3189_v52  ;;  %3220 = vst [vmem:[%s10434_s25 + $0x78] sm:$0xf] %v3190_v6  ;;  %v3193_v54 = vmax.f32 %v3165_v21, 0.0  ;;  %v3194_v7 = vmax.f32 %v3166_v45, 0.0  ;;  %v3195_v11 = vmax.f32 %v3167_v10, 0.0  ;;  %v3171_v25 = vadd.f32 %v10420_v56, %v10979_v20 }
 0x30f   : > { %v3196_v29 = vmax.f32 %v3168_v9, 0.0  ;;  %v3197_v49 = vmax.f32 %v3169_v42, 0.0  ;;  %v3198_v3 = vmax.f32 %v3170_v43, 0.0  ;;  %3221 = vst [vmem:[%s10434_s25 + $0x80] sm:$0xff] %v3191_v19  ;;  %3222 = vst [vmem:[%s10434_s25 + $0x88] sm:$0xff] %v3192_v8  ;;  %v3172_v40 = vadd.f32 %v10420_v56, %v10981_v44  ;;  %2625 = sbr.rel (!%p2623_p5) target bundleno = 657 (0x291), region = 258 }
 0x310   : > { %3223 = vst [vmem:[%s10434_s25 + $0x90] sm:$0xff] %v3193_v54  ;;  %3224 = vst [vmem:[%s10434_s25 + $0x98] sm:$0xf] %v3194_v7  ;;  %v3173_v33 = vadd.f32 %v10420_v56, %v10983_v28  ;;  %v3174_v0 = vadd.f32 %v10420_v56, %v10985_v34  ;;  %v3199_v61 = vmax.f32 %v3171_v25, 0.0 }
 0x311   : > { %3225 = vst [vmem:[%s10434_s25 + $0xa0] sm:$0xff] %v3195_v11  ;;  %3226 = vst [vmem:[%s10434_s25 + $0xa8] sm:$0xff] %v3196_v29  ;;  %v3200_v15 = vmax.f32 %v3172_v40, 0.0 }
 0x312   : > { %3227 = vst [vmem:[%s10434_s25 + $0xb0] sm:$0xff] %v3197_v49  ;;  %3228 = vst [vmem:[%s10434_s25 + $0xb8] sm:$0xf] %v3198_v3  ;;  %v3201_v1 = vmax.f32 %v3173_v33, 0.0  ;;  %v3202_v59 = vmax.f32 %v3174_v0, 0.0 }
 0x313   : > { %3229 = vst [vmem:[%s10434_s25 + $0xc0] sm:$0xff] %v3199_v61  ;;  %3230 = vst [vmem:[%s10434_s25 + $0xc8] sm:$0xff] %v3200_v15 }
 0x314   : > { %3231 = vst [vmem:[%s10434_s25 + $0xd0] sm:$0xff] %v3201_v1  ;;  %3232 = vst [vmem:[%s10434_s25 + $0xd8] sm:$0xf] %v3202_v59 }
 0x316   :  { %3237 = vsyncpa [#allocation7], 1 }
 0x317   :  { %3238 = vsyncpa [#allocation9], 1 }
 0x318   :  { %3239 = vsyncpa [#allocation12], 1 }

</bundles_post_ra>
